<compile_context>
chip_gen: v5e
topology: v5e:2x2
jax: 0.10.0
libtpu: 0.0.40
codegen_flags: <defaults>
</compile_context>

<pallas_src>
import math
import functools

import jax
import jax.numpy as jnp
from jax.experimental import pallas as pl
from jax.experimental.pallas import tpu as pltpu

_LN_EPS = 1e-5            # PyTorch LayerNorm default
_NEG = -1e30              # large finite negative for additive masks (NaN-safe)


def _layernorm(y, g, b):
    mean = jnp.mean(y, axis=-1, keepdims=True)
    c = y - mean
    var = jnp.mean(c * c, axis=-1, keepdims=True)
    return c * jax.lax.rsqrt(var + _LN_EPS) * g + b


# --------------------- in-kernel building blocks (traced) --------------------

def _mha_ln(x_q, x_kv, bias, wq_ref, bq_ref, wk_ref, bk_ref, wv_ref, bv_ref,
            wo_ref, bo_ref, g_ref, b_ref):
    """Multi-head attention + residual + LayerNorm.

    x_q: (Tq, D) query stream (also the residual), f32 or bf16.
    x_kv: (Tk, D) key/value stream.
    bias: additive mask broadcastable against (Tq, Tk).
    wq/wk/wv: (H, D, Dh) refs, wo: (H, Dh, D) ref -- heads on the LEADING axis
    so per-head access is free ref indexing (no lane slicing).
    Returns (Tq, D) f32.
    """
    nhead, d_model, dh = wq_ref.shape
    cdt = wq_ref.dtype                      # compute (MXU operand) dtype, bf16
    scale = 1.0 / math.sqrt(dh)
    xq = x_q.astype(cdt)
    xkv = x_kv.astype(cdt)

    acc = jnp.zeros((xq.shape[0], d_model), jnp.float32)
    # TODO(synk): at production head counts convert this static unroll to
    # lax.fori_loop(..., unroll=True) + VMEM scratch to bound vreg live ranges.
    for h in range(nhead):
        qh = (jnp.dot(xq, wq_ref[h], preferred_element_type=jnp.float32)
              + bq_ref[h]) * scale                                    # (Tq, Dh)
        kh = jnp.dot(xkv, wk_ref[h], preferred_element_type=jnp.float32) + bk_ref[h]
        vh = jnp.dot(xkv, wv_ref[h], preferred_element_type=jnp.float32) + bv_ref[h]

        # q @ k^T without an explicit transpose (contract last dims).
        s = jax.lax.dot_general(qh.astype(cdt), kh.astype(cdt),
                                (((1,), (1,)), ((), ())),
                                preferred_element_type=jnp.float32)   # (Tq, Tk)
        s = s + bias
        m = jnp.max(s, axis=-1, keepdims=True)
        p = jnp.exp(s - m)
        denom = jnp.sum(p, axis=-1, keepdims=True)
        p = p * pl.reciprocal(denom, approx=True)

        oh = jnp.dot(p.astype(cdt), vh.astype(cdt),
                     preferred_element_type=jnp.float32)              # (Tq, Dh)
        # concat_h(o_h) @ Wo == sum_h o_h @ Wo[h]  -> accumulate per head.
        acc = acc + jnp.dot(oh.astype(cdt), wo_ref[h],
                            preferred_element_type=jnp.float32)

    y = acc + bo_ref[...] + x_q.astype(jnp.float32)     # out-proj bias + residual
    return _layernorm(y, g_ref[...], b_ref[...])


def _ffn_ln(y, w1_ref, fb1_ref, w2_ref, fb2_ref, g_ref, b_ref):
    """lin1 + ReLU + lin2 + residual + LayerNorm (y is the f32 residual)."""
    cdt = w1_ref.dtype
    h = jnp.dot(y.astype(cdt), w1_ref[...],
                preferred_element_type=jnp.float32) + fb1_ref[...]
    h = jnp.maximum(h, 0.0)
    z = jnp.dot(h.astype(cdt), w2_ref[...],
                preferred_element_type=jnp.float32) + fb2_ref[...]
    return _layernorm(z + y, g_ref[...], b_ref[...])


# ------------------------- fused encoder-layer kernel ------------------------

def _enc_layer_kernel(*refs, final_ln):
    if final_ln:
        (x_ref, kpm_ref, wq, bq, wk, bk, wv, bv, wo, bo, g1, b1,
         w1, fb1, w2, fb2, g2, b2, gf, bf, o_ref) = refs
    else:
        (x_ref, kpm_ref, wq, bq, wk, bk, wv, bv, wo, bo, g1, b1,
         w1, fb1, w2, fb2, g2, b2, o_ref) = refs
        gf = bf = None

    x = x_ref[0]                 # (S, D) bf16
    bias = kpm_ref[0]            # (1, S) additive key-padding mask (broadcasts)

    y = _mha_ln(x, x, bias, wq, bq, wk, bk, wv, bv, wo, bo, g1, b1)
    y = _ffn_ln(y, w1, fb1, w2, fb2, g2, b2)
    if final_ln:                 # final encoder LayerNorm folded into last layer
        y = _layernorm(y, gf[...], bf[...])
    o_ref[0] = y.astype(o_ref.dtype)


# ------------------------- fused decoder-layer kernel ------------------------

def _dec_layer_kernel(x_ref, mem_ref, cmask_ref, tkpm_ref, skpm_ref,
                      swq, sbq, swk, sbk, swv, sbv, swo, sbo, g1, b1,
                      cwq, cbq, cwk, cbk, cwv, cbv, cwo, cbo, g2, b2,
                      w1, fb1, w2, fb2, g3, b3, o_ref):
    x = x_ref[0]                               # (T, D) bf16
    mem = mem_ref[0]                           # (S, D) bf16
    self_bias = cmask_ref[...] + tkpm_ref[0]   # (T, T) causal + (1, T) padding
    cross_bias = skpm_ref[0]                   # (1, S) memory key padding

    y = _mha_ln(x, x, self_bias, swq, sbq, swk, sbk, swv, sbv, swo, sbo, g1, b1)
    y = _mha_ln(y, mem, cross_bias, cwq, cbq, cwk, cbk, cwv, cbv, cwo, cbo, g2, b2)
    y = _ffn_ln(y, w1, fb1, w2, fb2, g3, b3)
    o_ref[0] = y.astype(o_ref.dtype)


# -------------- fused decoder-norm + output projection + log_softmax ---------

def _out_head_kernel(x_ref, g_ref, b_ref, w_ref, ob_ref, o_ref):
    x = _layernorm(x_ref[...].astype(jnp.float32), g_ref[...], b_ref[...])
    y = jnp.dot(x.astype(w_ref.dtype), w_ref[...],
                preferred_element_type=jnp.float32) + ob_ref[...]
    m = jnp.max(y, axis=-1, keepdims=True)
    s = y - m
    lse = jnp.log(jnp.sum(jnp.exp(s), axis=-1, keepdims=True))
    o_ref[...] = s - lse


# ------------------------------ call wrappers ---------------------------------

def _const_spec(a):
    nd = a.ndim

    def imap(i):
        return (0,) * nd

    return pl.BlockSpec(a.shape, imap)


def _batch_spec(a):
    nd = a.ndim

    def imap(i):
        return (i,) + (0,) * (nd - 1)

    return pl.BlockSpec((1,) + a.shape[1:], imap)


def encoder_layer(x, kpm, p, final_norm=None):
    B, S, D = x.shape
    final_ln = final_norm is not None
    a = p["attn"]
    args = [x, kpm,
            a["wq"], a["bq"], a["wk"], a["bk"], a["wv"], a["bv"],
            a["wo"], a["bo"], p["g1"], p["b1"],
            p["w1"], p["fb1"], p["w2"], p["fb2"], p["g2"], p["b2"]]
    if final_ln:
        args += [final_norm["g"], final_norm["b"]]
    in_specs = [_batch_spec(x), _batch_spec(kpm)] + [_const_spec(t) for t in args[2:]]
    return pl.pallas_call(
        functools.partial(_enc_layer_kernel, final_ln=final_ln),
        grid=(B,),
        in_specs=in_specs,
        out_specs=pl.BlockSpec((1, S, D), lambda i: (i, 0, 0)),
        out_shape=jax.ShapeDtypeStruct((B, S, D), x.dtype),
        compiler_params=pltpu.CompilerParams(dimension_semantics=("parallel",)),
    )(*args)


def decoder_layer(x, mem, causal_mask, tkpm, skpm, p):
    B, T, D = x.shape
    ps, pc = p["self"], p["cross"]
    args = [x, mem, causal_mask, tkpm, skpm,
            ps["wq"], ps["bq"], ps["wk"], ps["bk"], ps["wv"], ps["bv"],
            ps["wo"], ps["bo"], p["g1"], p["b1"],
            pc["wq"], pc["bq"], pc["wk"], pc["bk"], pc["wv"], pc["bv"],
            pc["wo"], pc["bo"], p["g2"], p["b2"],
            p["w1"], p["fb1"], p["w2"], p["fb2"], p["g3"], p["b3"]]
    in_specs = ([_batch_spec(x), _batch_spec(mem), _const_spec(causal_mask),
                 _batch_spec(tkpm), _batch_spec(skpm)]
                + [_const_spec(t) for t in args[5:]])
    return pl.pallas_call(
        _dec_layer_kernel,
        grid=(B,),
        in_specs=in_specs,
        out_specs=pl.BlockSpec((1, T, D), lambda i: (i, 0, 0)),
        out_shape=jax.ShapeDtypeStruct((B, T, D), x.dtype),
        compiler_params=pltpu.CompilerParams(dimension_semantics=("parallel",)),
    )(*args)


def out_head(x, p_norm, w_pad, b_pad, vocab):
    B, T, D = x.shape
    Vp = w_pad.shape[1]
    x2 = x.reshape(B * T, D)     # fold batch into rows -> dense sublane tiles
    # TODO(synk): at production sizes tile over rows (grid over B*T) instead of
    # one whole block.
    out = pl.pallas_call(
        _out_head_kernel,
        out_shape=jax.ShapeDtypeStruct((B * T, Vp), jnp.float32),
    )(x2, p_norm["g"], p_norm["b"], w_pad, b_pad)
    return out[:, :vocab].reshape(B, T, vocab)


# ----------------------------- params / PE helpers ----------------------------

def make_pe(max_len, d_model):
    position = jnp.arange(max_len, dtype=jnp.float32)[:, None]
    div_term = jnp.exp(
        jnp.arange(0, d_model, 2, dtype=jnp.float32) * (-math.log(10000.0) / d_model)
    )
    pe = jnp.zeros((max_len, d_model), jnp.float32)
    pe = pe.at[:, 0::2].set(jnp.sin(position * div_term))
    pe = pe.at[:, 1::2].set(jnp.cos(position * div_term))
    return pe


def _xavier(key, shape):
    fan_in, fan_out = shape
    limit = math.sqrt(6.0 / (fan_in + fan_out))
    return jax.random.uniform(key, shape, jnp.float32, -limit, limit)


def init_params(key, d_model, nhead, num_layers, dff, pro_voc, smi_voc,
                pro_max, smi_max, weight_dtype=jnp.bfloat16):
    dh = d_model // nhead
    keys = iter(jax.random.split(key, 1024))
    nk = lambda: next(keys)

    def split_heads_in(w):                         # (D, D) -> (H, D, Dh)
        return w.reshape(d_model, nhead, dh).transpose(1, 0, 2)

    def mha_p():
        # Fused in-projection, matching nn.MultiheadAttention's single
        # in_proj_weight (xavier over the whole (D, 3D) tensor); then split per
        # head onto a leading head axis for the kernel.
        w_in = _xavier(nk(), (d_model, 3 * d_model))
        wq, wk, wv = jnp.split(w_in, 3, axis=1)
        wo = _xavier(nk(), (d_model, d_model))
        zb = jnp.zeros((nhead, 1, dh), jnp.float32)  # MHA biases init to zero
        return dict(
            wq=split_heads_in(wq).astype(weight_dtype),
            wk=split_heads_in(wk).astype(weight_dtype),
            wv=split_heads_in(wv).astype(weight_dtype),
            bq=zb, bk=zb, bv=zb,
            wo=wo.reshape(nhead, dh, d_model).astype(weight_dtype),
            bo=jnp.zeros((1, d_model), jnp.float32),
        )

    def ln_p():
        return dict(g=jnp.ones((1, d_model), jnp.float32),
                    b=jnp.zeros((1, d_model), jnp.float32))

    def lin_b(fan_in, size):                        # nn.Linear default bias init
        bound = 1.0 / math.sqrt(fan_in)
        return jax.random.uniform(nk(), (1, size), jnp.float32, -bound, bound)

    def enc_layer_p():
        n1, n2 = ln_p(), ln_p()
        return dict(
            attn=mha_p(),
            g1=n1["g"], b1=n1["b"],
            w1=_xavier(nk(), (d_model, dff)).astype(weight_dtype),
            fb1=lin_b(d_model, dff),
            w2=_xavier(nk(), (dff, d_model)).astype(weight_dtype),
            fb2=lin_b(dff, d_model),
            g2=n2["g"], b2=n2["b"],
        )

    def dec_layer_p():
        n1, n2, n3 = ln_p(), ln_p(), ln_p()
        return dict(
            self=mha_p(), cross=mha_p(),
            g1=n1["g"], b1=n1["b"], g2=n2["g"], b2=n2["b"],
            w1=_xavier(nk(), (d_model, dff)).astype(weight_dtype),
            fb1=lin_b(d_model, dff),
            w2=_xavier(nk(), (dff, d_model)).astype(weight_dtype),
            fb2=lin_b(dff, d_model),
            g3=n3["g"], b3=n3["b"],
        )

    # Output projection: pad vocab to a lane-dense multiple of 128 so the final
    # store is unmasked; pad weight cols = 0, pad bias = -1e30 so log_softmax
    # over the real columns is unaffected (pad cols are sliced off afterwards).
    vp = ((smi_voc + 127) // 128) * 128
    out_w = _xavier(nk(), (d_model, smi_voc))
    out_b = lin_b(d_model, smi_voc)
    out_w_pad = jnp.zeros((d_model, vp), jnp.float32).at[:, :smi_voc].set(out_w)
    out_b_pad = jnp.full((1, vp), _NEG, jnp.float32).at[:, :smi_voc].set(out_b)

    # _reset_parameters() xavier-inits every dim>1 param (embeddings included,
    # so padding_idx rows are NOT zero after init -- reproduced here).
    return dict(
        pro_emb=_xavier(nk(), (pro_voc, d_model)),
        smi_emb=_xavier(nk(), (smi_voc, d_model)),
        pro_pe=make_pe(pro_max, d_model),
        smi_pe=make_pe(smi_max, d_model),
        enc_layers=[enc_layer_p() for _ in range(num_layers)],
        dec_layers=[dec_layer_p() for _ in range(num_layers)],
        enc_norm=ln_p(), dec_norm=ln_p(),
        out_w_pad=out_w_pad.astype(weight_dtype),
        out_b_pad=out_b_pad,
    )


# --------------------------------- forward -----------------------------------

def mft_forward(params, src_ids, tgt_ids, smi_mask, pro_mask, tgt_mask):
    B, S = src_ids.shape
    T = tgt_ids.shape[1]
    neg = jnp.float32(_NEG)
    adt = jnp.bfloat16

    # tgt_mask.squeeze(0); clamp -inf to a large finite negative (NaN-safe).
    causal = jnp.maximum(tgt_mask[0].astype(jnp.float32), neg)       # (T, T)

    # embedding gather + positional encoding (glue, plain JAX); dropout: identity
    src = (params["pro_emb"][src_ids] + params["pro_pe"][None, :, :]).astype(adt)
    tgt = (params["smi_emb"][tgt_ids] + params["smi_pe"][None, :, :]).astype(adt)

    # additive key-padding vectors (B, 1, Tk) -- broadcast across heads and
    # query rows inside the kernels, never materialized as (B, Tq, Tk).
    src_kpm = jnp.where(pro_mask.astype(bool), 0.0, neg).astype(jnp.float32)[:, None, :]
    tgt_kpm = jnp.where(smi_mask.astype(bool), 0.0, neg).astype(jnp.float32)[:, None, :]

    # encoder (post-norm layers; final encoder LN fused into the last layer)
    mem = src
    nl = len(params["enc_layers"])
    for li, p in enumerate(params["enc_layers"]):
        mem = encoder_layer(mem, src_kpm, p,
                            final_norm=params["enc_norm"] if li == nl - 1 else None)

    # decoder (self + cross + FFN fused per layer)
    x = tgt
    for p in params["dec_layers"]:
        x = decoder_layer(x, mem, causal, tgt_kpm, src_kpm, p)

    # decoder final LayerNorm + output projection + log_softmax fused
    vocab = params["smi_emb"].shape[0]
    return out_head(x, params["dec_norm"], params["out_w_pad"],
                    params["out_b_pad"], vocab)


# ----------------------------------- main ------------------------------------

if __name__ == "__main__":
    D_MODEL, NHEAD, NLAYERS, DFF = 32, 4, 2, 64
    PRO_VOC, SMI_VOC = 12, 11
    B, S_SRC, S_TGT = 2, 10, 8   # proMaxLen=S_SRC, smiMaxLen=S_TGT (required by x + pe)

    params = init_params(jax.random.PRNGKey(0), D_MODEL, NHEAD, NLAYERS, DFF,
                         PRO_VOC, SMI_VOC, S_SRC, S_TGT)

    k1, k2 = jax.random.split(jax.random.PRNGKey(0))
    src_ids = jax.random.randint(k1, (B, S_SRC), 1, PRO_VOC)
    tgt_ids = jax.random.randint(k2, (B, S_TGT), 1, SMI_VOC)

    # 1 = valid token, 0 = padding (padding only at the tail)
    pro_mask = jnp.ones((B, S_SRC), jnp.int32).at[1, S_SRC - 2:].set(0)
    smi_mask = jnp.ones((B, S_TGT), jnp.int32).at[1, S_TGT - 1:].set(0)

    # causal mask a la nn.Transformer.generate_square_subsequent_mask, with a
    # leading batch dim of 1 (the module does tgt_mask.squeeze(0)).
    rows = jnp.arange(S_TGT)
    causal = jnp.where(rows[None, :] > rows[:, None], -jnp.inf, 0.0).astype(jnp.float32)
    tgt_mask = causal[None]  # (1, T, T)

    fwd = jax.jit(mft_forward)
    out = fwd(params, src_ids, tgt_ids, smi_mask, pro_mask, tgt_mask)
    out = jax.block_until_ready(out)

    assert out.shape == (B, S_TGT, SMI_VOC), out.shape
    assert bool(jnp.all(jnp.isfinite(out)))
    # log_softmax rows should sum (in prob space) to ~1
    assert bool(jnp.all(jnp.abs(jnp.sum(jnp.exp(out), axis=-1) - 1.0) < 1e-3))
    print("KERNEL_OK")
</pallas_src>

<mosaic_0001>
module attributes {stable_mosaic.version = 11 : i64} {
  func.func @_enc_layer_kernel(%arg0: i32, %arg1: memref<1x10x32xbf16, #tpu.memory_space<vmem>>, %arg2: memref<1x1x10xf32, #tpu.memory_space<vmem>>, %arg3: memref<4x32x8xbf16, #tpu.memory_space<vmem>>, %arg4: memref<4x1x8xf32, #tpu.memory_space<vmem>>, %arg5: memref<4x32x8xbf16, #tpu.memory_space<vmem>>, %arg6: memref<4x1x8xf32, #tpu.memory_space<vmem>>, %arg7: memref<4x32x8xbf16, #tpu.memory_space<vmem>>, %arg8: memref<4x1x8xf32, #tpu.memory_space<vmem>>, %arg9: memref<4x8x32xbf16, #tpu.memory_space<vmem>>, %arg10: memref<1x32xf32, #tpu.memory_space<vmem>>, %arg11: memref<1x32xf32, #tpu.memory_space<vmem>>, %arg12: memref<1x32xf32, #tpu.memory_space<vmem>>, %arg13: memref<32x64xbf16, #tpu.memory_space<vmem>>, %arg14: memref<1x64xf32, #tpu.memory_space<vmem>>, %arg15: memref<64x32xbf16, #tpu.memory_space<vmem>>, %arg16: memref<1x32xf32, #tpu.memory_space<vmem>>, %arg17: memref<1x32xf32, #tpu.memory_space<vmem>>, %arg18: memref<1x32xf32, #tpu.memory_space<vmem>>, %arg19: memref<1x32xf32, #tpu.memory_space<vmem>>, %arg20: memref<1x32xf32, #tpu.memory_space<vmem>>, %arg21: memref<1x10x32xbf16, #tpu.memory_space<vmem>>) attributes {dimension_semantics = [#tpu.dimension_semantics<parallel>], iteration_bounds = array<i64: 2>, scalar_prefetch = 0 : i64, scratch_operands = 0 : i64, tpu.core_type = #tpu.core_type<tc>, window_params = [{transform_indices = @transform_0, window_bounds = array<i64: 1, 10, 32>}, {transform_indices = @transform_1, window_bounds = array<i64: 1, 1, 10>}, {pipeline_mode = #tpu.pipeline_mode<synchronous>, transform_indices = @transform_2, window_bounds = array<i64: 4, 32, 8>}, {pipeline_mode = #tpu.pipeline_mode<synchronous>, transform_indices = @transform_3, window_bounds = array<i64: 4, 1, 8>}, {pipeline_mode = #tpu.pipeline_mode<synchronous>, transform_indices = @transform_4, window_bounds = array<i64: 4, 32, 8>}, {pipeline_mode = #tpu.pipeline_mode<synchronous>, transform_indices = @transform_5, window_bounds = array<i64: 4, 1, 8>}, {pipeline_mode = #tpu.pipeline_mode<synchronous>, transform_indices = @transform_6, window_bounds = array<i64: 4, 32, 8>}, {pipeline_mode = #tpu.pipeline_mode<synchronous>, transform_indices = @transform_7, window_bounds = array<i64: 4, 1, 8>}, {pipeline_mode = #tpu.pipeline_mode<synchronous>, transform_indices = @transform_8, window_bounds = array<i64: 4, 8, 32>}, {pipeline_mode = #tpu.pipeline_mode<synchronous>, transform_indices = @transform_9, window_bounds = array<i64: 1, 32>}, {pipeline_mode = #tpu.pipeline_mode<synchronous>, transform_indices = @transform_10, window_bounds = array<i64: 1, 32>}, {pipeline_mode = #tpu.pipeline_mode<synchronous>, transform_indices = @transform_11, window_bounds = array<i64: 1, 32>}, {pipeline_mode = #tpu.pipeline_mode<synchronous>, transform_indices = @transform_12, window_bounds = array<i64: 32, 64>}, {pipeline_mode = #tpu.pipeline_mode<synchronous>, transform_indices = @transform_13, window_bounds = array<i64: 1, 64>}, {pipeline_mode = #tpu.pipeline_mode<synchronous>, transform_indices = @transform_14, window_bounds = array<i64: 64, 32>}, {pipeline_mode = #tpu.pipeline_mode<synchronous>, transform_indices = @transform_15, window_bounds = array<i64: 1, 32>}, {pipeline_mode = #tpu.pipeline_mode<synchronous>, transform_indices = @transform_16, window_bounds = array<i64: 1, 32>}, {pipeline_mode = #tpu.pipeline_mode<synchronous>, transform_indices = @transform_17, window_bounds = array<i64: 1, 32>}, {pipeline_mode = #tpu.pipeline_mode<synchronous>, transform_indices = @transform_18, window_bounds = array<i64: 1, 32>}, {pipeline_mode = #tpu.pipeline_mode<synchronous>, transform_indices = @transform_19, window_bounds = array<i64: 1, 32>}, {transform_indices = @transform_20, window_bounds = array<i64: 1, 10, 32>}]} {
    %c0 = arith.constant 0 : index
    %c0_0 = arith.constant 0 : index
    %c0_1 = arith.constant 0 : index
    %0 = vector.load %arg1[%c0, %c0_0, %c0_1] : memref<1x10x32xbf16, #tpu.memory_space<vmem>>, vector<1x10x32xbf16>
    %1 = vector.shape_cast %0 : vector<1x10x32xbf16> to vector<10x32xbf16>
    %c0_2 = arith.constant 0 : index
    %c0_3 = arith.constant 0 : index
    %c0_4 = arith.constant 0 : index
    %2 = vector.load %arg2[%c0_2, %c0_3, %c0_4] : memref<1x1x10xf32, #tpu.memory_space<vmem>>, vector<1x1x10xf32>
    %3 = vector.shape_cast %2 : vector<1x1x10xf32> to vector<1x10xf32>
    %cst = arith.constant 0.000000e+00 : f32
    %4 = vector.broadcast %cst : f32 to vector<10x32xf32>
    %c0_5 = arith.constant 0 : index
    %c0_6 = arith.constant 0 : index
    %c0_7 = arith.constant 0 : index
    %5 = vector.load %arg3[%c0_5, %c0_6, %c0_7] : memref<4x32x8xbf16, #tpu.memory_space<vmem>>, vector<1x32x8xbf16>
    %6 = vector.shape_cast %5 : vector<1x32x8xbf16> to vector<32x8xbf16>
    %cst_8 = arith.constant dense<0.000000e+00> : vector<10x8xf32>
    %7 = tpu.matmul %1, %6, %cst_8 {dimension_numbers = #tpu.dot_dimension_numbers<[1], [0], [0], [1], [0, 0, 1, 1], [], []>} : vector<10x32xbf16>, vector<32x8xbf16>, vector<10x8xf32> -> vector<10x8xf32>
    %c0_9 = arith.constant 0 : index
    %c0_10 = arith.constant 0 : index
    %c0_11 = arith.constant 0 : index
    %8 = vector.load %arg4[%c0_9, %c0_10, %c0_11] : memref<4x1x8xf32, #tpu.memory_space<vmem>>, vector<1x1x8xf32>
    %9 = vector.shape_cast %8 : vector<1x1x8xf32> to vector<1x8xf32>
    %10 = vector.broadcast %9 : vector<1x8xf32> to vector<10x8xf32>
    %11 = arith.addf %7, %10 : vector<10x8xf32>
    %cst_12 = arith.constant 0.353553385 : f32
    %12 = vector.broadcast %cst_12 : f32 to vector<10x8xf32>
    %13 = arith.mulf %11, %12 : vector<10x8xf32>
    %c0_13 = arith.constant 0 : index
    %c0_14 = arith.constant 0 : index
    %c0_15 = arith.constant 0 : index
    %14 = vector.load %arg5[%c0_13, %c0_14, %c0_15] : memref<4x32x8xbf16, #tpu.memory_space<vmem>>, vector<1x32x8xbf16>
    %15 = vector.shape_cast %14 : vector<1x32x8xbf16> to vector<32x8xbf16>
    %cst_16 = arith.constant dense<0.000000e+00> : vector<10x8xf32>
    %16 = tpu.matmul %1, %15, %cst_16 {dimension_numbers = #tpu.dot_dimension_numbers<[1], [0], [0], [1], [0, 0, 1, 1], [], []>} : vector<10x32xbf16>, vector<32x8xbf16>, vector<10x8xf32> -> vector<10x8xf32>
    %c0_17 = arith.constant 0 : index
    %c0_18 = arith.constant 0 : index
    %c0_19 = arith.constant 0 : index
    %17 = vector.load %arg6[%c0_17, %c0_18, %c0_19] : memref<4x1x8xf32, #tpu.memory_space<vmem>>, vector<1x1x8xf32>
    %18 = vector.shape_cast %17 : vector<1x1x8xf32> to vector<1x8xf32>
    %19 = vector.broadcast %18 : vector<1x8xf32> to vector<10x8xf32>
    %20 = arith.addf %16, %19 : vector<10x8xf32>
    %c0_20 = arith.constant 0 : index
    %c0_21 = arith.constant 0 : index
    %c0_22 = arith.constant 0 : index
    %21 = vector.load %arg7[%c0_20, %c0_21, %c0_22] : memref<4x32x8xbf16, #tpu.memory_space<vmem>>, vector<1x32x8xbf16>
    %22 = vector.shape_cast %21 : vector<1x32x8xbf16> to vector<32x8xbf16>
    %cst_23 = arith.constant dense<0.000000e+00> : vector<10x8xf32>
    %23 = tpu.matmul %1, %22, %cst_23 {dimension_numbers = #tpu.dot_dimension_numbers<[1], [0], [0], [1], [0, 0, 1, 1], [], []>} : vector<10x32xbf16>, vector<32x8xbf16>, vector<10x8xf32> -> vector<10x8xf32>
    %c0_24 = arith.constant 0 : index
    %c0_25 = arith.constant 0 : index
    %c0_26 = arith.constant 0 : index
    %24 = vector.load %arg8[%c0_24, %c0_25, %c0_26] : memref<4x1x8xf32, #tpu.memory_space<vmem>>, vector<1x1x8xf32>
    %25 = vector.shape_cast %24 : vector<1x1x8xf32> to vector<1x8xf32>
    %26 = vector.broadcast %25 : vector<1x8xf32> to vector<10x8xf32>
    %27 = arith.addf %23, %26 : vector<10x8xf32>
    %28 = arith.truncf %13 : vector<10x8xf32> to vector<10x8xbf16>
    %29 = arith.truncf %20 : vector<10x8xf32> to vector<10x8xbf16>
    %cst_27 = arith.constant dense<0.000000e+00> : vector<10x10xf32>
    %30 = tpu.matmul %28, %29, %cst_27 {dimension_numbers = #tpu.dot_dimension_numbers<[1], [1], [0], [0], [0, 0, 1, 0], [], []>} : vector<10x8xbf16>, vector<10x8xbf16>, vector<10x10xf32> -> vector<10x10xf32>
    %31 = vector.broadcast %3 : vector<1x10xf32> to vector<10x10xf32>
    %32 = arith.addf %30, %31 : vector<10x10xf32>
    %cst_28 = arith.constant dense<0xFF800000> : vector<10xf32>
    %33 = vector.multi_reduction <maximumf>, %32, %cst_28 [1] : vector<10x10xf32> to vector<10xf32>
    %34 = vector.shape_cast %33 : vector<10xf32> to vector<10x1xf32>
    %35 = vector.broadcast %34 : vector<10x1xf32> to vector<10x10xf32>
    %36 = arith.subf %32, %35 : vector<10x10xf32>
    %37 = math.exp %36 : vector<10x10xf32>
    %cst_29 = arith.constant dense<0.000000e+00> : vector<10xf32>
    %38 = vector.multi_reduction <add>, %37, %cst_29 [1] : vector<10x10xf32> to vector<10xf32>
    %39 = vector.shape_cast %38 : vector<10xf32> to vector<10x1xf32>
    %40 = tpu.reciprocal %39 {approx = true} : vector<10x1xf32> -> vector<10x1xf32>
    %41 = vector.broadcast %40 : vector<10x1xf32> to vector<10x10xf32>
    %42 = arith.mulf %37, %41 : vector<10x10xf32>
    %43 = arith.truncf %42 : vector<10x10xf32> to vector<10x10xbf16>
    %44 = arith.truncf %27 : vector<10x8xf32> to vector<10x8xbf16>
    %cst_30 = arith.constant dense<0.000000e+00> : vector<10x8xf32>
    %45 = tpu.matmul %43, %44, %cst_30 {dimension_numbers = #tpu.dot_dimension_numbers<[1], [0], [0], [1], [0, 0, 1, 1], [], []>} : vector<10x10xbf16>, vector<10x8xbf16>, vector<10x8xf32> -> vector<10x8xf32>
    %46 = arith.truncf %45 : vector<10x8xf32> to vector<10x8xbf16>
    %c0_31 = arith.constant 0 : index
    %c0_32 = arith.constant 0 : index
    %c0_33 = arith.constant 0 : index
    %47 = vector.load %arg9[%c0_31, %c0_32, %c0_33] : memref<4x8x32xbf16, #tpu.memory_space<vmem>>, vector<1x8x32xbf16>
    %48 = vector.shape_cast %47 : vector<1x8x32xbf16> to vector<8x32xbf16>
    %cst_34 = arith.constant dense<0.000000e+00> : vector<10x32xf32>
    %49 = tpu.matmul %46, %48, %cst_34 {dimension_numbers = #tpu.dot_dimension_numbers<[1], [0], [0], [1], [0, 0, 1, 1], [], []>} : vector<10x8xbf16>, vector<8x32xbf16>, vector<10x32xf32> -> vector<10x32xf32>
    %50 = arith.addf %4, %49 : vector<10x32xf32>
    %c1 = arith.constant 1 : index
    %c0_35 = arith.constant 0 : index
    %c0_36 = arith.constant 0 : index
    %51 = vector.load %arg3[%c1, %c0_35, %c0_36] : memref<4x32x8xbf16, #tpu.memory_space<vmem>>, vector<1x32x8xbf16>
    %52 = vector.shape_cast %51 : vector<1x32x8xbf16> to vector<32x8xbf16>
    %cst_37 = arith.constant dense<0.000000e+00> : vector<10x8xf32>
    %53 = tpu.matmul %1, %52, %cst_37 {dimension_numbers = #tpu.dot_dimension_numbers<[1], [0], [0], [1], [0, 0, 1, 1], [], []>} : vector<10x32xbf16>, vector<32x8xbf16>, vector<10x8xf32> -> vector<10x8xf32>
    %c1_38 = arith.constant 1 : index
    %c0_39 = arith.constant 0 : index
    %c0_40 = arith.constant 0 : index
    %54 = vector.load %arg4[%c1_38, %c0_39, %c0_40] : memref<4x1x8xf32, #tpu.memory_space<vmem>>, vector<1x1x8xf32>
    %55 = vector.shape_cast %54 : vector<1x1x8xf32> to vector<1x8xf32>
    %56 = vector.broadcast %55 : vector<1x8xf32> to vector<10x8xf32>
    %57 = arith.addf %53, %56 : vector<10x8xf32>
    %cst_41 = arith.constant 0.353553385 : f32
    %58 = vector.broadcast %cst_41 : f32 to vector<10x8xf32>
    %59 = arith.mulf %57, %58 : vector<10x8xf32>
    %c1_42 = arith.constant 1 : index
    %c0_43 = arith.constant 0 : index
    %c0_44 = arith.constant 0 : index
    %60 = vector.load %arg5[%c1_42, %c0_43, %c0_44] : memref<4x32x8xbf16, #tpu.memory_space<vmem>>, vector<1x32x8xbf16>
    %61 = vector.shape_cast %60 : vector<1x32x8xbf16> to vector<32x8xbf16>
    %cst_45 = arith.constant dense<0.000000e+00> : vector<10x8xf32>
    %62 = tpu.matmul %1, %61, %cst_45 {dimension_numbers = #tpu.dot_dimension_numbers<[1], [0], [0], [1], [0, 0, 1, 1], [], []>} : vector<10x32xbf16>, vector<32x8xbf16>, vector<10x8xf32> -> vector<10x8xf32>
    %c1_46 = arith.constant 1 : index
    %c0_47 = arith.constant 0 : index
    %c0_48 = arith.constant 0 : index
    %63 = vector.load %arg6[%c1_46, %c0_47, %c0_48] : memref<4x1x8xf32, #tpu.memory_space<vmem>>, vector<1x1x8xf32>
    %64 = vector.shape_cast %63 : vector<1x1x8xf32> to vector<1x8xf32>
    %65 = vector.broadcast %64 : vector<1x8xf32> to vector<10x8xf32>
    %66 = arith.addf %62, %65 : vector<10x8xf32>
    %c1_49 = arith.constant 1 : index
    %c0_50 = arith.constant 0 : index
    %c0_51 = arith.constant 0 : index
    %67 = vector.load %arg7[%c1_49, %c0_50, %c0_51] : memref<4x32x8xbf16, #tpu.memory_space<vmem>>, vector<1x32x8xbf16>
    %68 = vector.shape_cast %67 : vector<1x32x8xbf16> to vector<32x8xbf16>
    %cst_52 = arith.constant dense<0.000000e+00> : vector<10x8xf32>
    %69 = tpu.matmul %1, %68, %cst_52 {dimension_numbers = #tpu.dot_dimension_numbers<[1], [0], [0], [1], [0, 0, 1, 1], [], []>} : vector<10x32xbf16>, vector<32x8xbf16>, vector<10x8xf32> -> vector<10x8xf32>
    %c1_53 = arith.constant 1 : index
    %c0_54 = arith.constant 0 : index
    %c0_55 = arith.constant 0 : index
    %70 = vector.load %arg8[%c1_53, %c0_54, %c0_55] : memref<4x1x8xf32, #tpu.memory_space<vmem>>, vector<1x1x8xf32>
    %71 = vector.shape_cast %70 : vector<1x1x8xf32> to vector<1x8xf32>
    %72 = vector.broadcast %71 : vector<1x8xf32> to vector<10x8xf32>
    %73 = arith.addf %69, %72 : vector<10x8xf32>
    %74 = arith.truncf %59 : vector<10x8xf32> to vector<10x8xbf16>
    %75 = arith.truncf %66 : vector<10x8xf32> to vector<10x8xbf16>
    %cst_56 = arith.constant dense<0.000000e+00> : vector<10x10xf32>
    %76 = tpu.matmul %74, %75, %cst_56 {dimension_numbers = #tpu.dot_dimension_numbers<[1], [1], [0], [0], [0, 0, 1, 0], [], []>} : vector<10x8xbf16>, vector<10x8xbf16>, vector<10x10xf32> -> vector<10x10xf32>
    %77 = vector.broadcast %3 : vector<1x10xf32> to vector<10x10xf32>
    %78 = arith.addf %76, %77 : vector<10x10xf32>
    %cst_57 = arith.constant dense<0xFF800000> : vector<10xf32>
    %79 = vector.multi_reduction <maximumf>, %78, %cst_57 [1] : vector<10x10xf32> to vector<10xf32>
    %80 = vector.shape_cast %79 : vector<10xf32> to vector<10x1xf32>
    %81 = vector.broadcast %80 : vector<10x1xf32> to vector<10x10xf32>
    %82 = arith.subf %78, %81 : vector<10x10xf32>
    %83 = math.exp %82 : vector<10x10xf32>
    %cst_58 = arith.constant dense<0.000000e+00> : vector<10xf32>
    %84 = vector.multi_reduction <add>, %83, %cst_58 [1] : vector<10x10xf32> to vector<10xf32>
    %85 = vector.shape_cast %84 : vector<10xf32> to vector<10x1xf32>
    %86 = tpu.reciprocal %85 {approx = true} : vector<10x1xf32> -> vector<10x1xf32>
    %87 = vector.broadcast %86 : vector<10x1xf32> to vector<10x10xf32>
    %88 = arith.mulf %83, %87 : vector<10x10xf32>
    %89 = arith.truncf %88 : vector<10x10xf32> to vector<10x10xbf16>
    %90 = arith.truncf %73 : vector<10x8xf32> to vector<10x8xbf16>
    %cst_59 = arith.constant dense<0.000000e+00> : vector<10x8xf32>
    %91 = tpu.matmul %89, %90, %cst_59 {dimension_numbers = #tpu.dot_dimension_numbers<[1], [0], [0], [1], [0, 0, 1, 1], [], []>} : vector<10x10xbf16>, vector<10x8xbf16>, vector<10x8xf32> -> vector<10x8xf32>
    %92 = arith.truncf %91 : vector<10x8xf32> to vector<10x8xbf16>
    %c1_60 = arith.constant 1 : index
    %c0_61 = arith.constant 0 : index
    %c0_62 = arith.constant 0 : index
    %93 = vector.load %arg9[%c1_60, %c0_61, %c0_62] : memref<4x8x32xbf16, #tpu.memory_space<vmem>>, vector<1x8x32xbf16>
    %94 = vector.shape_cast %93 : vector<1x8x32xbf16> to vector<8x32xbf16>
    %cst_63 = arith.constant dense<0.000000e+00> : vector<10x32xf32>
    %95 = tpu.matmul %92, %94, %cst_63 {dimension_numbers = #tpu.dot_dimension_numbers<[1], [0], [0], [1], [0, 0, 1, 1], [], []>} : vector<10x8xbf16>, vector<8x32xbf16>, vector<10x32xf32> -> vector<10x32xf32>
    %96 = arith.addf %50, %95 : vector<10x32xf32>
    %c2 = arith.constant 2 : index
    %c0_64 = arith.constant 0 : index
    %c0_65 = arith.constant 0 : index
    %97 = vector.load %arg3[%c2, %c0_64, %c0_65] : memref<4x32x8xbf16, #tpu.memory_space<vmem>>, vector<1x32x8xbf16>
    %98 = vector.shape_cast %97 : vector<1x32x8xbf16> to vector<32x8xbf16>
    %cst_66 = arith.constant dense<0.000000e+00> : vector<10x8xf32>
    %99 = tpu.matmul %1, %98, %cst_66 {dimension_numbers = #tpu.dot_dimension_numbers<[1], [0], [0], [1], [0, 0, 1, 1], [], []>} : vector<10x32xbf16>, vector<32x8xbf16>, vector<10x8xf32> -> vector<10x8xf32>
    %c2_67 = arith.constant 2 : index
    %c0_68 = arith.constant 0 : index
    %c0_69 = arith.constant 0 : index
    %100 = vector.load %arg4[%c2_67, %c0_68, %c0_69] : memref<4x1x8xf32, #tpu.memory_space<vmem>>, vector<1x1x8xf32>
    %101 = vector.shape_cast %100 : vector<1x1x8xf32> to vector<1x8xf32>
    %102 = vector.broadcast %101 : vector<1x8xf32> to vector<10x8xf32>
    %103 = arith.addf %99, %102 : vector<10x8xf32>
    %cst_70 = arith.constant 0.353553385 : f32
    %104 = vector.broadcast %cst_70 : f32 to vector<10x8xf32>
    %105 = arith.mulf %103, %104 : vector<10x8xf32>
    %c2_71 = arith.constant 2 : index
    %c0_72 = arith.constant 0 : index
    %c0_73 = arith.constant 0 : index
    %106 = vector.load %arg5[%c2_71, %c0_72, %c0_73] : memref<4x32x8xbf16, #tpu.memory_space<vmem>>, vector<1x32x8xbf16>
    %107 = vector.shape_cast %106 : vector<1x32x8xbf16> to vector<32x8xbf16>
    %cst_74 = arith.constant dense<0.000000e+00> : vector<10x8xf32>
    %108 = tpu.matmul %1, %107, %cst_74 {dimension_numbers = #tpu.dot_dimension_numbers<[1], [0], [0], [1], [0, 0, 1, 1], [], []>} : vector<10x32xbf16>, vector<32x8xbf16>, vector<10x8xf32> -> vector<10x8xf32>
    %c2_75 = arith.constant 2 : index
    %c0_76 = arith.constant 0 : index
    %c0_77 = arith.constant 0 : index
    %109 = vector.load %arg6[%c2_75, %c0_76, %c0_77] : memref<4x1x8xf32, #tpu.memory_space<vmem>>, vector<1x1x8xf32>
    %110 = vector.shape_cast %109 : vector<1x1x8xf32> to vector<1x8xf32>
    %111 = vector.broadcast %110 : vector<1x8xf32> to vector<10x8xf32>
    %112 = arith.addf %108, %111 : vector<10x8xf32>
    %c2_78 = arith.constant 2 : index
    %c0_79 = arith.constant 0 : index
    %c0_80 = arith.constant 0 : index
    %113 = vector.load %arg7[%c2_78, %c0_79, %c0_80] : memref<4x32x8xbf16, #tpu.memory_space<vmem>>, vector<1x32x8xbf16>
    %114 = vector.shape_cast %113 : vector<1x32x8xbf16> to vector<32x8xbf16>
    %cst_81 = arith.constant dense<0.000000e+00> : vector<10x8xf32>
    %115 = tpu.matmul %1, %114, %cst_81 {dimension_numbers = #tpu.dot_dimension_numbers<[1], [0], [0], [1], [0, 0, 1, 1], [], []>} : vector<10x32xbf16>, vector<32x8xbf16>, vector<10x8xf32> -> vector<10x8xf32>
    %c2_82 = arith.constant 2 : index
    %c0_83 = arith.constant 0 : index
    %c0_84 = arith.constant 0 : index
    %116 = vector.load %arg8[%c2_82, %c0_83, %c0_84] : memref<4x1x8xf32, #tpu.memory_space<vmem>>, vector<1x1x8xf32>
    %117 = vector.shape_cast %116 : vector<1x1x8xf32> to vector<1x8xf32>
    %118 = vector.broadcast %117 : vector<1x8xf32> to vector<10x8xf32>
    %119 = arith.addf %115, %118 : vector<10x8xf32>
    %120 = arith.truncf %105 : vector<10x8xf32> to vector<10x8xbf16>
    %121 = arith.truncf %112 : vector<10x8xf32> to vector<10x8xbf16>
    %cst_85 = arith.constant dense<0.000000e+00> : vector<10x10xf32>
    %122 = tpu.matmul %120, %121, %cst_85 {dimension_numbers = #tpu.dot_dimension_numbers<[1], [1], [0], [0], [0, 0, 1, 0], [], []>} : vector<10x8xbf16>, vector<10x8xbf16>, vector<10x10xf32> -> vector<10x10xf32>
    %123 = vector.broadcast %3 : vector<1x10xf32> to vector<10x10xf32>
    %124 = arith.addf %122, %123 : vector<10x10xf32>
    %cst_86 = arith.constant dense<0xFF800000> : vector<10xf32>
    %125 = vector.multi_reduction <maximumf>, %124, %cst_86 [1] : vector<10x10xf32> to vector<10xf32>
    %126 = vector.shape_cast %125 : vector<10xf32> to vector<10x1xf32>
    %127 = vector.broadcast %126 : vector<10x1xf32> to vector<10x10xf32>
    %128 = arith.subf %124, %127 : vector<10x10xf32>
    %129 = math.exp %128 : vector<10x10xf32>
    %cst_87 = arith.constant dense<0.000000e+00> : vector<10xf32>
    %130 = vector.multi_reduction <add>, %129, %cst_87 [1] : vector<10x10xf32> to vector<10xf32>
    %131 = vector.shape_cast %130 : vector<10xf32> to vector<10x1xf32>
    %132 = tpu.reciprocal %131 {approx = true} : vector<10x1xf32> -> vector<10x1xf32>
    %133 = vector.broadcast %132 : vector<10x1xf32> to vector<10x10xf32>
    %134 = arith.mulf %129, %133 : vector<10x10xf32>
    %135 = arith.truncf %134 : vector<10x10xf32> to vector<10x10xbf16>
    %136 = arith.truncf %119 : vector<10x8xf32> to vector<10x8xbf16>
    %cst_88 = arith.constant dense<0.000000e+00> : vector<10x8xf32>
    %137 = tpu.matmul %135, %136, %cst_88 {dimension_numbers = #tpu.dot_dimension_numbers<[1], [0], [0], [1], [0, 0, 1, 1], [], []>} : vector<10x10xbf16>, vector<10x8xbf16>, vector<10x8xf32> -> vector<10x8xf32>
    %138 = arith.truncf %137 : vector<10x8xf32> to vector<10x8xbf16>
    %c2_89 = arith.constant 2 : index
    %c0_90 = arith.constant 0 : index
    %c0_91 = arith.constant 0 : index
    %139 = vector.load %arg9[%c2_89, %c0_90, %c0_91] : memref<4x8x32xbf16, #tpu.memory_space<vmem>>, vector<1x8x32xbf16>
    %140 = vector.shape_cast %139 : vector<1x8x32xbf16> to vector<8x32xbf16>
    %cst_92 = arith.constant dense<0.000000e+00> : vector<10x32xf32>
    %141 = tpu.matmul %138, %140, %cst_92 {dimension_numbers = #tpu.dot_dimension_numbers<[1], [0], [0], [1], [0, 0, 1, 1], [], []>} : vector<10x8xbf16>, vector<8x32xbf16>, vector<10x32xf32> -> vector<10x32xf32>
    %142 = arith.addf %96, %141 : vector<10x32xf32>
    %c3 = arith.constant 3 : index
    %c0_93 = arith.constant 0 : index
    %c0_94 = arith.constant 0 : index
    %143 = vector.load %arg3[%c3, %c0_93, %c0_94] : memref<4x32x8xbf16, #tpu.memory_space<vmem>>, vector<1x32x8xbf16>
    %144 = vector.shape_cast %143 : vector<1x32x8xbf16> to vector<32x8xbf16>
    %cst_95 = arith.constant dense<0.000000e+00> : vector<10x8xf32>
    %145 = tpu.matmul %1, %144, %cst_95 {dimension_numbers = #tpu.dot_dimension_numbers<[1], [0], [0], [1], [0, 0, 1, 1], [], []>} : vector<10x32xbf16>, vector<32x8xbf16>, vector<10x8xf32> -> vector<10x8xf32>
    %c3_96 = arith.constant 3 : index
    %c0_97 = arith.constant 0 : index
    %c0_98 = arith.constant 0 : index
    %146 = vector.load %arg4[%c3_96, %c0_97, %c0_98] : memref<4x1x8xf32, #tpu.memory_space<vmem>>, vector<1x1x8xf32>
    %147 = vector.shape_cast %146 : vector<1x1x8xf32> to vector<1x8xf32>
    %148 = vector.broadcast %147 : vector<1x8xf32> to vector<10x8xf32>
    %149 = arith.addf %145, %148 : vector<10x8xf32>
    %cst_99 = arith.constant 0.353553385 : f32
    %150 = vector.broadcast %cst_99 : f32 to vector<10x8xf32>
    %151 = arith.mulf %149, %150 : vector<10x8xf32>
    %c3_100 = arith.constant 3 : index
    %c0_101 = arith.constant 0 : index
    %c0_102 = arith.constant 0 : index
    %152 = vector.load %arg5[%c3_100, %c0_101, %c0_102] : memref<4x32x8xbf16, #tpu.memory_space<vmem>>, vector<1x32x8xbf16>
    %153 = vector.shape_cast %152 : vector<1x32x8xbf16> to vector<32x8xbf16>
    %cst_103 = arith.constant dense<0.000000e+00> : vector<10x8xf32>
    %154 = tpu.matmul %1, %153, %cst_103 {dimension_numbers = #tpu.dot_dimension_numbers<[1], [0], [0], [1], [0, 0, 1, 1], [], []>} : vector<10x32xbf16>, vector<32x8xbf16>, vector<10x8xf32> -> vector<10x8xf32>
    %c3_104 = arith.constant 3 : index
    %c0_105 = arith.constant 0 : index
    %c0_106 = arith.constant 0 : index
    %155 = vector.load %arg6[%c3_104, %c0_105, %c0_106] : memref<4x1x8xf32, #tpu.memory_space<vmem>>, vector<1x1x8xf32>
    %156 = vector.shape_cast %155 : vector<1x1x8xf32> to vector<1x8xf32>
    %157 = vector.broadcast %156 : vector<1x8xf32> to vector<10x8xf32>
    %158 = arith.addf %154, %157 : vector<10x8xf32>
    %c3_107 = arith.constant 3 : index
    %c0_108 = arith.constant 0 : index
    %c0_109 = arith.constant 0 : index
    %159 = vector.load %arg7[%c3_107, %c0_108, %c0_109] : memref<4x32x8xbf16, #tpu.memory_space<vmem>>, vector<1x32x8xbf16>
    %160 = vector.shape_cast %159 : vector<1x32x8xbf16> to vector<32x8xbf16>
    %cst_110 = arith.constant dense<0.000000e+00> : vector<10x8xf32>
    %161 = tpu.matmul %1, %160, %cst_110 {dimension_numbers = #tpu.dot_dimension_numbers<[1], [0], [0], [1], [0, 0, 1, 1], [], []>} : vector<10x32xbf16>, vector<32x8xbf16>, vector<10x8xf32> -> vector<10x8xf32>
    %c3_111 = arith.constant 3 : index
    %c0_112 = arith.constant 0 : index
    %c0_113 = arith.constant 0 : index
    %162 = vector.load %arg8[%c3_111, %c0_112, %c0_113] : memref<4x1x8xf32, #tpu.memory_space<vmem>>, vector<1x1x8xf32>
    %163 = vector.shape_cast %162 : vector<1x1x8xf32> to vector<1x8xf32>
    %164 = vector.broadcast %163 : vector<1x8xf32> to vector<10x8xf32>
    %165 = arith.addf %161, %164 : vector<10x8xf32>
    %166 = arith.truncf %151 : vector<10x8xf32> to vector<10x8xbf16>
    %167 = arith.truncf %158 : vector<10x8xf32> to vector<10x8xbf16>
    %cst_114 = arith.constant dense<0.000000e+00> : vector<10x10xf32>
    %168 = tpu.matmul %166, %167, %cst_114 {dimension_numbers = #tpu.dot_dimension_numbers<[1], [1], [0], [0], [0, 0, 1, 0], [], []>} : vector<10x8xbf16>, vector<10x8xbf16>, vector<10x10xf32> -> vector<10x10xf32>
    %169 = vector.broadcast %3 : vector<1x10xf32> to vector<10x10xf32>
    %170 = arith.addf %168, %169 : vector<10x10xf32>
    %cst_115 = arith.constant dense<0xFF800000> : vector<10xf32>
    %171 = vector.multi_reduction <maximumf>, %170, %cst_115 [1] : vector<10x10xf32> to vector<10xf32>
    %172 = vector.shape_cast %171 : vector<10xf32> to vector<10x1xf32>
    %173 = vector.broadcast %172 : vector<10x1xf32> to vector<10x10xf32>
    %174 = arith.subf %170, %173 : vector<10x10xf32>
    %175 = math.exp %174 : vector<10x10xf32>
    %cst_116 = arith.constant dense<0.000000e+00> : vector<10xf32>
    %176 = vector.multi_reduction <add>, %175, %cst_116 [1] : vector<10x10xf32> to vector<10xf32>
    %177 = vector.shape_cast %176 : vector<10xf32> to vector<10x1xf32>
    %178 = tpu.reciprocal %177 {approx = true} : vector<10x1xf32> -> vector<10x1xf32>
    %179 = vector.broadcast %178 : vector<10x1xf32> to vector<10x10xf32>
    %180 = arith.mulf %175, %179 : vector<10x10xf32>
    %181 = arith.truncf %180 : vector<10x10xf32> to vector<10x10xbf16>
    %182 = arith.truncf %165 : vector<10x8xf32> to vector<10x8xbf16>
    %cst_117 = arith.constant dense<0.000000e+00> : vector<10x8xf32>
    %183 = tpu.matmul %181, %182, %cst_117 {dimension_numbers = #tpu.dot_dimension_numbers<[1], [0], [0], [1], [0, 0, 1, 1], [], []>} : vector<10x10xbf16>, vector<10x8xbf16>, vector<10x8xf32> -> vector<10x8xf32>
    %184 = arith.truncf %183 : vector<10x8xf32> to vector<10x8xbf16>
    %c3_118 = arith.constant 3 : index
    %c0_119 = arith.constant 0 : index
    %c0_120 = arith.constant 0 : index
    %185 = vector.load %arg9[%c3_118, %c0_119, %c0_120] : memref<4x8x32xbf16, #tpu.memory_space<vmem>>, vector<1x8x32xbf16>
    %186 = vector.shape_cast %185 : vector<1x8x32xbf16> to vector<8x32xbf16>
    %cst_121 = arith.constant dense<0.000000e+00> : vector<10x32xf32>
    %187 = tpu.matmul %184, %186, %cst_121 {dimension_numbers = #tpu.dot_dimension_numbers<[1], [0], [0], [1], [0, 0, 1, 1], [], []>} : vector<10x8xbf16>, vector<8x32xbf16>, vector<10x32xf32> -> vector<10x32xf32>
    %188 = arith.addf %142, %187 : vector<10x32xf32>
    %c0_122 = arith.constant 0 : index
    %c0_123 = arith.constant 0 : index
    %189 = vector.load %arg10[%c0_122, %c0_123] : memref<1x32xf32, #tpu.memory_space<vmem>>, vector<1x32xf32>
    %190 = vector.broadcast %189 : vector<1x32xf32> to vector<10x32xf32>
    %191 = arith.addf %188, %190 : vector<10x32xf32>
    %192 = arith.extf %1 : vector<10x32xbf16> to vector<10x32xf32>
    %193 = arith.addf %191, %192 : vector<10x32xf32>
    %c0_124 = arith.constant 0 : index
    %c0_125 = arith.constant 0 : index
    %194 = vector.load %arg11[%c0_124, %c0_125] : memref<1x32xf32, #tpu.memory_space<vmem>>, vector<1x32xf32>
    %c0_126 = arith.constant 0 : index
    %c0_127 = arith.constant 0 : index
    %195 = vector.load %arg12[%c0_126, %c0_127] : memref<1x32xf32, #tpu.memory_space<vmem>>, vector<1x32xf32>
    %cst_128 = arith.constant dense<0.000000e+00> : vector<10xf32>
    %196 = vector.multi_reduction <add>, %193, %cst_128 [1] : vector<10x32xf32> to vector<10xf32>
    %197 = vector.shape_cast %196 : vector<10xf32> to vector<10x1xf32>
    %cst_129 = arith.constant 3.200000e+01 : f32
    %198 = vector.broadcast %cst_129 : f32 to vector<10x1xf32>
    %199 = arith.divf %197, %198 : vector<10x1xf32>
    %200 = vector.broadcast %199 : vector<10x1xf32> to vector<10x32xf32>
    %201 = arith.subf %193, %200 : vector<10x32xf32>
    %202 = arith.mulf %201, %201 : vector<10x32xf32>
    %cst_130 = arith.constant dense<0.000000e+00> : vector<10xf32>
    %203 = vector.multi_reduction <add>, %202, %cst_130 [1] : vector<10x32xf32> to vector<10xf32>
    %204 = vector.shape_cast %203 : vector<10xf32> to vector<10x1xf32>
    %cst_131 = arith.constant 3.200000e+01 : f32
    %205 = vector.broadcast %cst_131 : f32 to vector<10x1xf32>
    %206 = arith.divf %204, %205 : vector<10x1xf32>
    %cst_132 = arith.constant 9.99999974E-6 : f32
    %207 = vector.broadcast %cst_132 : f32 to vector<10x1xf32>
    %208 = arith.addf %206, %207 : vector<10x1xf32>
    %209 = math.rsqrt %208 : vector<10x1xf32>
    %210 = vector.broadcast %209 : vector<10x1xf32> to vector<10x32xf32>
    %211 = arith.mulf %201, %210 : vector<10x32xf32>
    %212 = vector.broadcast %194 : vector<1x32xf32> to vector<10x32xf32>
    %213 = arith.mulf %211, %212 : vector<10x32xf32>
    %214 = vector.broadcast %195 : vector<1x32xf32> to vector<10x32xf32>
    %215 = arith.addf %213, %214 : vector<10x32xf32>
    %216 = arith.truncf %215 : vector<10x32xf32> to vector<10x32xbf16>
    %c0_133 = arith.constant 0 : index
    %c0_134 = arith.constant 0 : index
    %217 = vector.load %arg13[%c0_133, %c0_134] : memref<32x64xbf16, #tpu.memory_space<vmem>>, vector<32x64xbf16>
    %cst_135 = arith.constant dense<0.000000e+00> : vector<10x64xf32>
    %218 = tpu.matmul %216, %217, %cst_135 {dimension_numbers = #tpu.dot_dimension_numbers<[1], [0], [0], [1], [0, 0, 1, 1], [], []>} : vector<10x32xbf16>, vector<32x64xbf16>, vector<10x64xf32> -> vector<10x64xf32>
    %c0_136 = arith.constant 0 : index
    %c0_137 = arith.constant 0 : index
    %219 = vector.load %arg14[%c0_136, %c0_137] : memref<1x64xf32, #tpu.memory_space<vmem>>, vector<1x64xf32>
    %220 = vector.broadcast %219 : vector<1x64xf32> to vector<10x64xf32>
    %221 = arith.addf %218, %220 : vector<10x64xf32>
    %cst_138 = arith.constant 0.000000e+00 : f32
    %222 = vector.broadcast %cst_138 : f32 to vector<10x64xf32>
    %223 = arith.maximumf %221, %222 : vector<10x64xf32>
    %224 = arith.truncf %223 : vector<10x64xf32> to vector<10x64xbf16>
    %c0_139 = arith.constant 0 : index
    %c0_140 = arith.constant 0 : index
    %225 = vector.load %arg15[%c0_139, %c0_140] : memref<64x32xbf16, #tpu.memory_space<vmem>>, vector<64x32xbf16>
    %cst_141 = arith.constant dense<0.000000e+00> : vector<10x32xf32>
    %226 = tpu.matmul %224, %225, %cst_141 {dimension_numbers = #tpu.dot_dimension_numbers<[1], [0], [0], [1], [0, 0, 1, 1], [], []>} : vector<10x64xbf16>, vector<64x32xbf16>, vector<10x32xf32> -> vector<10x32xf32>
    %c0_142 = arith.constant 0 : index
    %c0_143 = arith.constant 0 : index
    %227 = vector.load %arg16[%c0_142, %c0_143] : memref<1x32xf32, #tpu.memory_space<vmem>>, vector<1x32xf32>
    %228 = vector.broadcast %227 : vector<1x32xf32> to vector<10x32xf32>
    %229 = arith.addf %226, %228 : vector<10x32xf32>
    %230 = arith.addf %229, %215 : vector<10x32xf32>
    %c0_144 = arith.constant 0 : index
    %c0_145 = arith.constant 0 : index
    %231 = vector.load %arg17[%c0_144, %c0_145] : memref<1x32xf32, #tpu.memory_space<vmem>>, vector<1x32xf32>
    %c0_146 = arith.constant 0 : index
    %c0_147 = arith.constant 0 : index
    %232 = vector.load %arg18[%c0_146, %c0_147] : memref<1x32xf32, #tpu.memory_space<vmem>>, vector<1x32xf32>
    %cst_148 = arith.constant dense<0.000000e+00> : vector<10xf32>
    %233 = vector.multi_reduction <add>, %230, %cst_148 [1] : vector<10x32xf32> to vector<10xf32>
    %234 = vector.shape_cast %233 : vector<10xf32> to vector<10x1xf32>
    %cst_149 = arith.constant 3.200000e+01 : f32
    %235 = vector.broadcast %cst_149 : f32 to vector<10x1xf32>
    %236 = arith.divf %234, %235 : vector<10x1xf32>
    %237 = vector.broadcast %236 : vector<10x1xf32> to vector<10x32xf32>
    %238 = arith.subf %230, %237 : vector<10x32xf32>
    %239 = arith.mulf %238, %238 : vector<10x32xf32>
    %cst_150 = arith.constant dense<0.000000e+00> : vector<10xf32>
    %240 = vector.multi_reduction <add>, %239, %cst_150 [1] : vector<10x32xf32> to vector<10xf32>
    %241 = vector.shape_cast %240 : vector<10xf32> to vector<10x1xf32>
    %cst_151 = arith.constant 3.200000e+01 : f32
    %242 = vector.broadcast %cst_151 : f32 to vector<10x1xf32>
    %243 = arith.divf %241, %242 : vector<10x1xf32>
    %cst_152 = arith.constant 9.99999974E-6 : f32
    %244 = vector.broadcast %cst_152 : f32 to vector<10x1xf32>
    %245 = arith.addf %243, %244 : vector<10x1xf32>
    %246 = math.rsqrt %245 : vector<10x1xf32>
    %247 = vector.broadcast %246 : vector<10x1xf32> to vector<10x32xf32>
    %248 = arith.mulf %238, %247 : vector<10x32xf32>
    %249 = vector.broadcast %231 : vector<1x32xf32> to vector<10x32xf32>
    %250 = arith.mulf %248, %249 : vector<10x32xf32>
    %251 = vector.broadcast %232 : vector<1x32xf32> to vector<10x32xf32>
    %252 = arith.addf %250, %251 : vector<10x32xf32>
    %c0_153 = arith.constant 0 : index
    %c0_154 = arith.constant 0 : index
    %253 = vector.load %arg19[%c0_153, %c0_154] : memref<1x32xf32, #tpu.memory_space<vmem>>, vector<1x32xf32>
    %c0_155 = arith.constant 0 : index
    %c0_156 = arith.constant 0 : index
    %254 = vector.load %arg20[%c0_155, %c0_156] : memref<1x32xf32, #tpu.memory_space<vmem>>, vector<1x32xf32>
    %cst_157 = arith.constant dense<0.000000e+00> : vector<10xf32>
    %255 = vector.multi_reduction <add>, %252, %cst_157 [1] : vector<10x32xf32> to vector<10xf32>
    %256 = vector.shape_cast %255 : vector<10xf32> to vector<10x1xf32>
    %cst_158 = arith.constant 3.200000e+01 : f32
    %257 = vector.broadcast %cst_158 : f32 to vector<10x1xf32>
    %258 = arith.divf %256, %257 : vector<10x1xf32>
    %259 = vector.broadcast %258 : vector<10x1xf32> to vector<10x32xf32>
    %260 = arith.subf %252, %259 : vector<10x32xf32>
    %261 = arith.mulf %260, %260 : vector<10x32xf32>
    %cst_159 = arith.constant dense<0.000000e+00> : vector<10xf32>
    %262 = vector.multi_reduction <add>, %261, %cst_159 [1] : vector<10x32xf32> to vector<10xf32>
    %263 = vector.shape_cast %262 : vector<10xf32> to vector<10x1xf32>
    %cst_160 = arith.constant 3.200000e+01 : f32
    %264 = vector.broadcast %cst_160 : f32 to vector<10x1xf32>
    %265 = arith.divf %263, %264 : vector<10x1xf32>
    %cst_161 = arith.constant 9.99999974E-6 : f32
    %266 = vector.broadcast %cst_161 : f32 to vector<10x1xf32>
    %267 = arith.addf %265, %266 : vector<10x1xf32>
    %268 = math.rsqrt %267 : vector<10x1xf32>
    %269 = vector.broadcast %268 : vector<10x1xf32> to vector<10x32xf32>
    %270 = arith.mulf %260, %269 : vector<10x32xf32>
    %271 = vector.broadcast %253 : vector<1x32xf32> to vector<10x32xf32>
    %272 = arith.mulf %270, %271 : vector<10x32xf32>
    %273 = vector.broadcast %254 : vector<1x32xf32> to vector<10x32xf32>
    %274 = arith.addf %272, %273 : vector<10x32xf32>
    %275 = arith.truncf %274 : vector<10x32xf32> to vector<10x32xbf16>
    %c0_162 = arith.constant 0 : index
    %c0_163 = arith.constant 0 : index
    %c0_164 = arith.constant 0 : index
    %276 = vector.load %arg21[%c0_162, %c0_163, %c0_164] : memref<1x10x32xbf16, #tpu.memory_space<vmem>>, vector<1x10x32xbf16>
    %277 = vector.shape_cast %276 : vector<1x10x32xbf16> to vector<10x32xbf16>
    %278 = vector.shape_cast %275 : vector<10x32xbf16> to vector<1x10x32xbf16>
    tpu.vector_store %arg21[%c0_162, %c0_163, %c0_164], %278 {strides = array<i32>} : memref<1x10x32xbf16, #tpu.memory_space<vmem>>, vector<1x10x32xbf16>,
    return
  }
  func.func @transform_0(%arg0: i32) -> (i32, i32, i32) {
    %c0_i32 = arith.constant 0 : i32
    %c0_i32_0 = arith.constant 0 : i32
    %c0_i32_1 = arith.constant 0 : i32
    return %arg0, %c0_i32, %c0_i32_0 : i32, i32, i32
  }
  func.func @transform_1(%arg0: i32) -> (i32, i32, i32) {
    %c0_i32 = arith.constant 0 : i32
    %c0_i32_0 = arith.constant 0 : i32
    %c0_i32_1 = arith.constant 0 : i32
    return %arg0, %c0_i32, %c0_i32_0 : i32, i32, i32
  }
  func.func @transform_2(%arg0: i32) -> (i32, i32, i32) {
    %c0_i32 = arith.constant 0 : i32
    %c0_i32_0 = arith.constant 0 : i32
    %c0_i32_1 = arith.constant 0 : i32
    %c0_i32_2 = arith.constant 0 : i32
    return %c0_i32, %c0_i32_0, %c0_i32_1 : i32, i32, i32
  }
  func.func @transform_3(%arg0: i32) -> (i32, i32, i32) {
    %c0_i32 = arith.constant 0 : i32
    %c0_i32_0 = arith.constant 0 : i32
    %c0_i32_1 = arith.constant 0 : i32
    %c0_i32_2 = arith.constant 0 : i32
    return %c0_i32, %c0_i32_0, %c0_i32_1 : i32, i32, i32
  }
  func.func @transform_4(%arg0: i32) -> (i32, i32, i32) {
    %c0_i32 = arith.constant 0 : i32
    %c0_i32_0 = arith.constant 0 : i32
    %c0_i32_1 = arith.constant 0 : i32
    %c0_i32_2 = arith.constant 0 : i32
    return %c0_i32, %c0_i32_0, %c0_i32_1 : i32, i32, i32
  }
  func.func @transform_5(%arg0: i32) -> (i32, i32, i32) {
    %c0_i32 = arith.constant 0 : i32
    %c0_i32_0 = arith.constant 0 : i32
    %c0_i32_1 = arith.constant 0 : i32
    %c0_i32_2 = arith.constant 0 : i32
    return %c0_i32, %c0_i32_0, %c0_i32_1 : i32, i32, i32
  }
  func.func @transform_6(%arg0: i32) -> (i32, i32, i32) {
    %c0_i32 = arith.constant 0 : i32
    %c0_i32_0 = arith.constant 0 : i32
    %c0_i32_1 = arith.constant 0 : i32
    %c0_i32_2 = arith.constant 0 : i32
    return %c0_i32, %c0_i32_0, %c0_i32_1 : i32, i32, i32
  }
  func.func @transform_7(%arg0: i32) -> (i32, i32, i32) {
    %c0_i32 = arith.constant 0 : i32
    %c0_i32_0 = arith.constant 0 : i32
    %c0_i32_1 = arith.constant 0 : i32
    %c0_i32_2 = arith.constant 0 : i32
    return %c0_i32, %c0_i32_0, %c0_i32_1 : i32, i32, i32
  }
  func.func @transform_8(%arg0: i32) -> (i32, i32, i32) {
    %c0_i32 = arith.constant 0 : i32
    %c0_i32_0 = arith.constant 0 : i32
    %c0_i32_1 = arith.constant 0 : i32
    %c0_i32_2 = arith.constant 0 : i32
    return %c0_i32, %c0_i32_0, %c0_i32_1 : i32, i32, i32
  }
  func.func @transform_9(%arg0: i32) -> (i32, i32) {
    %c0_i32 = arith.constant 0 : i32
    %c0_i32_0 = arith.constant 0 : i32
    %c0_i32_1 = arith.constant 0 : i32
    return %c0_i32, %c0_i32_0 : i32, i32
  }
  func.func @transform_10(%arg0: i32) -> (i32, i32) {
    %c0_i32 = arith.constant 0 : i32
    %c0_i32_0 = arith.constant 0 : i32
    %c0_i32_1 = arith.constant 0 : i32
    return %c0_i32, %c0_i32_0 : i32, i32
  }
  func.func @transform_11(%arg0: i32) -> (i32, i32) {
    %c0_i32 = arith.constant 0 : i32
    %c0_i32_0 = arith.constant 0 : i32
    %c0_i32_1 = arith.constant 0 : i32
    return %c0_i32, %c0_i32_0 : i32, i32
  }
  func.func @transform_12(%arg0: i32) -> (i32, i32) {
    %c0_i32 = arith.constant 0 : i32
    %c0_i32_0 = arith.constant 0 : i32
    %c0_i32_1 = arith.constant 0 : i32
    return %c0_i32, %c0_i32_0 : i32, i32
  }
  func.func @transform_13(%arg0: i32) -> (i32, i32) {
    %c0_i32 = arith.constant 0 : i32
    %c0_i32_0 = arith.constant 0 : i32
    %c0_i32_1 = arith.constant 0 : i32
    return %c0_i32, %c0_i32_0 : i32, i32
  }
  func.func @transform_14(%arg0: i32) -> (i32, i32) {
    %c0_i32 = arith.constant 0 : i32
    %c0_i32_0 = arith.constant 0 : i32
    %c0_i32_1 = arith.constant 0 : i32
    return %c0_i32, %c0_i32_0 : i32, i32
  }
  func.func @transform_15(%arg0: i32) -> (i32, i32) {
    %c0_i32 = arith.constant 0 : i32
    %c0_i32_0 = arith.constant 0 : i32
    %c0_i32_1 = arith.constant 0 : i32
    return %c0_i32, %c0_i32_0 : i32, i32
  }
  func.func @transform_16(%arg0: i32) -> (i32, i32) {
    %c0_i32 = arith.constant 0 : i32
    %c0_i32_0 = arith.constant 0 : i32
    %c0_i32_1 = arith.constant 0 : i32
    return %c0_i32, %c0_i32_0 : i32, i32
  }
  func.func @transform_17(%arg0: i32) -> (i32, i32) {
    %c0_i32 = arith.constant 0 : i32
    %c0_i32_0 = arith.constant 0 : i32
    %c0_i32_1 = arith.constant 0 : i32
    return %c0_i32, %c0_i32_0 : i32, i32
  }
  func.func @transform_18(%arg0: i32) -> (i32, i32) {
    %c0_i32 = arith.constant 0 : i32
    %c0_i32_0 = arith.constant 0 : i32
    %c0_i32_1 = arith.constant 0 : i32
    return %c0_i32, %c0_i32_0 : i32, i32
  }
  func.func @transform_19(%arg0: i32) -> (i32, i32) {
    %c0_i32 = arith.constant 0 : i32
    %c0_i32_0 = arith.constant 0 : i32
    %c0_i32_1 = arith.constant 0 : i32
    return %c0_i32, %c0_i32_0 : i32, i32
  }
  func.func @transform_20(%arg0: i32) -> (i32, i32, i32) {
    %c0_i32 = arith.constant 0 : i32
    %c0_i32_0 = arith.constant 0 : i32
    %c0_i32_1 = arith.constant 0 : i32
    return %arg0, %c0_i32, %c0_i32_0 : i32, i32, i32
  }
}

module attributes {stable_mosaic.version = 11 : i64} {
  func.func @_enc_layer_kernel(%arg0: i32, %arg1: memref<1x10x32xbf16, #tpu.memory_space<vmem>>, %arg2: memref<1x1x10xf32, #tpu.memory_space<vmem>>, %arg3: memref<4x32x8xbf16, #tpu.memory_space<vmem>>, %arg4: memref<4x1x8xf32, #tpu.memory_space<vmem>>, %arg5: memref<4x32x8xbf16, #tpu.memory_space<vmem>>, %arg6: memref<4x1x8xf32, #tpu.memory_space<vmem>>, %arg7: memref<4x32x8xbf16, #tpu.memory_space<vmem>>, %arg8: memref<4x1x8xf32, #tpu.memory_space<vmem>>, %arg9: memref<4x8x32xbf16, #tpu.memory_space<vmem>>, %arg10: memref<1x32xf32, #tpu.memory_space<vmem>>, %arg11: memref<1x32xf32, #tpu.memory_space<vmem>>, %arg12: memref<1x32xf32, #tpu.memory_space<vmem>>, %arg13: memref<32x64xbf16, #tpu.memory_space<vmem>>, %arg14: memref<1x64xf32, #tpu.memory_space<vmem>>, %arg15: memref<64x32xbf16, #tpu.memory_space<vmem>>, %arg16: memref<1x32xf32, #tpu.memory_space<vmem>>, %arg17: memref<1x32xf32, #tpu.memory_space<vmem>>, %arg18: memref<1x32xf32, #tpu.memory_space<vmem>>, %arg19: memref<1x10x32xbf16, #tpu.memory_space<vmem>>) attributes {dimension_semantics = [#tpu.dimension_semantics<parallel>], iteration_bounds = array<i64: 2>, scalar_prefetch = 0 : i64, scratch_operands = 0 : i64, tpu.core_type = #tpu.core_type<tc>, window_params = [{transform_indices = @transform_0, window_bounds = array<i64: 1, 10, 32>}, {transform_indices = @transform_1, window_bounds = array<i64: 1, 1, 10>}, {pipeline_mode = #tpu.pipeline_mode<synchronous>, transform_indices = @transform_2, window_bounds = array<i64: 4, 32, 8>}, {pipeline_mode = #tpu.pipeline_mode<synchronous>, transform_indices = @transform_3, window_bounds = array<i64: 4, 1, 8>}, {pipeline_mode = #tpu.pipeline_mode<synchronous>, transform_indices = @transform_4, window_bounds = array<i64: 4, 32, 8>}, {pipeline_mode = #tpu.pipeline_mode<synchronous>, transform_indices = @transform_5, window_bounds = array<i64: 4, 1, 8>}, {pipeline_mode = #tpu.pipeline_mode<synchronous>, transform_indices = @transform_6, window_bounds = array<i64: 4, 32, 8>}, {pipeline_mode = #tpu.pipeline_mode<synchronous>, transform_indices = @transform_7, window_bounds = array<i64: 4, 1, 8>}, {pipeline_mode = #tpu.pipeline_mode<synchronous>, transform_indices = @transform_8, window_bounds = array<i64: 4, 8, 32>}, {pipeline_mode = #tpu.pipeline_mode<synchronous>, transform_indices = @transform_9, window_bounds = array<i64: 1, 32>}, {pipeline_mode = #tpu.pipeline_mode<synchronous>, transform_indices = @transform_10, window_bounds = array<i64: 1, 32>}, {pipeline_mode = #tpu.pipeline_mode<synchronous>, transform_indices = @transform_11, window_bounds = array<i64: 1, 32>}, {pipeline_mode = #tpu.pipeline_mode<synchronous>, transform_indices = @transform_12, window_bounds = array<i64: 32, 64>}, {pipeline_mode = #tpu.pipeline_mode<synchronous>, transform_indices = @transform_13, window_bounds = array<i64: 1, 64>}, {pipeline_mode = #tpu.pipeline_mode<synchronous>, transform_indices = @transform_14, window_bounds = array<i64: 64, 32>}, {pipeline_mode = #tpu.pipeline_mode<synchronous>, transform_indices = @transform_15, window_bounds = array<i64: 1, 32>}, {pipeline_mode = #tpu.pipeline_mode<synchronous>, transform_indices = @transform_16, window_bounds = array<i64: 1, 32>}, {pipeline_mode = #tpu.pipeline_mode<synchronous>, transform_indices = @transform_17, window_bounds = array<i64: 1, 32>}, {transform_indices = @transform_18, window_bounds = array<i64: 1, 10, 32>}]} {
    %c0 = arith.constant 0 : index
    %c0_0 = arith.constant 0 : index
    %c0_1 = arith.constant 0 : index
    %0 = vector.load %arg1[%c0, %c0_0, %c0_1] : memref<1x10x32xbf16, #tpu.memory_space<vmem>>, vector<1x10x32xbf16>
    %1 = vector.shape_cast %0 : vector<1x10x32xbf16> to vector<10x32xbf16>
    %c0_2 = arith.constant 0 : index
    %c0_3 = arith.constant 0 : index
    %c0_4 = arith.constant 0 : index
    %2 = vector.load %arg2[%c0_2, %c0_3, %c0_4] : memref<1x1x10xf32, #tpu.memory_space<vmem>>, vector<1x1x10xf32>
    %3 = vector.shape_cast %2 : vector<1x1x10xf32> to vector<1x10xf32>
    %cst = arith.constant 0.000000e+00 : f32
    %4 = vector.broadcast %cst : f32 to vector<10x32xf32>
    %c0_5 = arith.constant 0 : index
    %c0_6 = arith.constant 0 : index
    %c0_7 = arith.constant 0 : index
    %5 = vector.load %arg3[%c0_5, %c0_6, %c0_7] : memref<4x32x8xbf16, #tpu.memory_space<vmem>>, vector<1x32x8xbf16>
    %6 = vector.shape_cast %5 : vector<1x32x8xbf16> to vector<32x8xbf16>
    %cst_8 = arith.constant dense<0.000000e+00> : vector<10x8xf32>
    %7 = tpu.matmul %1, %6, %cst_8 {dimension_numbers = #tpu.dot_dimension_numbers<[1], [0], [0], [1], [0, 0, 1, 1], [], []>} : vector<10x32xbf16>, vector<32x8xbf16>, vector<10x8xf32> -> vector<10x8xf32>
    %c0_9 = arith.constant 0 : index
    %c0_10 = arith.constant 0 : index
    %c0_11 = arith.constant 0 : index
    %8 = vector.load %arg4[%c0_9, %c0_10, %c0_11] : memref<4x1x8xf32, #tpu.memory_space<vmem>>, vector<1x1x8xf32>
    %9 = vector.shape_cast %8 : vector<1x1x8xf32> to vector<1x8xf32>
    %10 = vector.broadcast %9 : vector<1x8xf32> to vector<10x8xf32>
    %11 = arith.addf %7, %10 : vector<10x8xf32>
    %cst_12 = arith.constant 0.353553385 : f32
    %12 = vector.broadcast %cst_12 : f32 to vector<10x8xf32>
    %13 = arith.mulf %11, %12 : vector<10x8xf32>
    %c0_13 = arith.constant 0 : index
    %c0_14 = arith.constant 0 : index
    %c0_15 = arith.constant 0 : index
    %14 = vector.load %arg5[%c0_13, %c0_14, %c0_15] : memref<4x32x8xbf16, #tpu.memory_space<vmem>>, vector<1x32x8xbf16>
    %15 = vector.shape_cast %14 : vector<1x32x8xbf16> to vector<32x8xbf16>
    %cst_16 = arith.constant dense<0.000000e+00> : vector<10x8xf32>
    %16 = tpu.matmul %1, %15, %cst_16 {dimension_numbers = #tpu.dot_dimension_numbers<[1], [0], [0], [1], [0, 0, 1, 1], [], []>} : vector<10x32xbf16>, vector<32x8xbf16>, vector<10x8xf32> -> vector<10x8xf32>
    %c0_17 = arith.constant 0 : index
    %c0_18 = arith.constant 0 : index
    %c0_19 = arith.constant 0 : index
    %17 = vector.load %arg6[%c0_17, %c0_18, %c0_19] : memref<4x1x8xf32, #tpu.memory_space<vmem>>, vector<1x1x8xf32>
    %18 = vector.shape_cast %17 : vector<1x1x8xf32> to vector<1x8xf32>
    %19 = vector.broadcast %18 : vector<1x8xf32> to vector<10x8xf32>
    %20 = arith.addf %16, %19 : vector<10x8xf32>
    %c0_20 = arith.constant 0 : index
    %c0_21 = arith.constant 0 : index
    %c0_22 = arith.constant 0 : index
    %21 = vector.load %arg7[%c0_20, %c0_21, %c0_22] : memref<4x32x8xbf16, #tpu.memory_space<vmem>>, vector<1x32x8xbf16>
    %22 = vector.shape_cast %21 : vector<1x32x8xbf16> to vector<32x8xbf16>
    %cst_23 = arith.constant dense<0.000000e+00> : vector<10x8xf32>
    %23 = tpu.matmul %1, %22, %cst_23 {dimension_numbers = #tpu.dot_dimension_numbers<[1], [0], [0], [1], [0, 0, 1, 1], [], []>} : vector<10x32xbf16>, vector<32x8xbf16>, vector<10x8xf32> -> vector<10x8xf32>
    %c0_24 = arith.constant 0 : index
    %c0_25 = arith.constant 0 : index
    %c0_26 = arith.constant 0 : index
    %24 = vector.load %arg8[%c0_24, %c0_25, %c0_26] : memref<4x1x8xf32, #tpu.memory_space<vmem>>, vector<1x1x8xf32>
    %25 = vector.shape_cast %24 : vector<1x1x8xf32> to vector<1x8xf32>
    %26 = vector.broadcast %25 : vector<1x8xf32> to vector<10x8xf32>
    %27 = arith.addf %23, %26 : vector<10x8xf32>
    %28 = arith.truncf %13 : vector<10x8xf32> to vector<10x8xbf16>
    %29 = arith.truncf %20 : vector<10x8xf32> to vector<10x8xbf16>
    %cst_27 = arith.constant dense<0.000000e+00> : vector<10x10xf32>
    %30 = tpu.matmul %28, %29, %cst_27 {dimension_numbers = #tpu.dot_dimension_numbers<[1], [1], [0], [0], [0, 0, 1, 0], [], []>} : vector<10x8xbf16>, vector<10x8xbf16>, vector<10x10xf32> -> vector<10x10xf32>
    %31 = vector.broadcast %3 : vector<1x10xf32> to vector<10x10xf32>
    %32 = arith.addf %30, %31 : vector<10x10xf32>
    %cst_28 = arith.constant dense<0xFF800000> : vector<10xf32>
    %33 = vector.multi_reduction <maximumf>, %32, %cst_28 [1] : vector<10x10xf32> to vector<10xf32>
    %34 = vector.shape_cast %33 : vector<10xf32> to vector<10x1xf32>
    %35 = vector.broadcast %34 : vector<10x1xf32> to vector<10x10xf32>
    %36 = arith.subf %32, %35 : vector<10x10xf32>
    %37 = math.exp %36 : vector<10x10xf32>
    %cst_29 = arith.constant dense<0.000000e+00> : vector<10xf32>
    %38 = vector.multi_reduction <add>, %37, %cst_29 [1] : vector<10x10xf32> to vector<10xf32>
    %39 = vector.shape_cast %38 : vector<10xf32> to vector<10x1xf32>
    %40 = tpu.reciprocal %39 {approx = true} : vector<10x1xf32> -> vector<10x1xf32>
    %41 = vector.broadcast %40 : vector<10x1xf32> to vector<10x10xf32>
    %42 = arith.mulf %37, %41 : vector<10x10xf32>
    %43 = arith.truncf %42 : vector<10x10xf32> to vector<10x10xbf16>
    %44 = arith.truncf %27 : vector<10x8xf32> to vector<10x8xbf16>
    %cst_30 = arith.constant dense<0.000000e+00> : vector<10x8xf32>
    %45 = tpu.matmul %43, %44, %cst_30 {dimension_numbers = #tpu.dot_dimension_numbers<[1], [0], [0], [1], [0, 0, 1, 1], [], []>} : vector<10x10xbf16>, vector<10x8xbf16>, vector<10x8xf32> -> vector<10x8xf32>
    %46 = arith.truncf %45 : vector<10x8xf32> to vector<10x8xbf16>
    %c0_31 = arith.constant 0 : index
    %c0_32 = arith.constant 0 : index
    %c0_33 = arith.constant 0 : index
    %47 = vector.load %arg9[%c0_31, %c0_32, %c0_33] : memref<4x8x32xbf16, #tpu.memory_space<vmem>>, vector<1x8x32xbf16>
    %48 = vector.shape_cast %47 : vector<1x8x32xbf16> to vector<8x32xbf16>
    %cst_34 = arith.constant dense<0.000000e+00> : vector<10x32xf32>
    %49 = tpu.matmul %46, %48, %cst_34 {dimension_numbers = #tpu.dot_dimension_numbers<[1], [0], [0], [1], [0, 0, 1, 1], [], []>} : vector<10x8xbf16>, vector<8x32xbf16>, vector<10x32xf32> -> vector<10x32xf32>
    %50 = arith.addf %4, %49 : vector<10x32xf32>
    %c1 = arith.constant 1 : index
    %c0_35 = arith.constant 0 : index
    %c0_36 = arith.constant 0 : index
    %51 = vector.load %arg3[%c1, %c0_35, %c0_36] : memref<4x32x8xbf16, #tpu.memory_space<vmem>>, vector<1x32x8xbf16>
    %52 = vector.shape_cast %51 : vector<1x32x8xbf16> to vector<32x8xbf16>
    %cst_37 = arith.constant dense<0.000000e+00> : vector<10x8xf32>
    %53 = tpu.matmul %1, %52, %cst_37 {dimension_numbers = #tpu.dot_dimension_numbers<[1], [0], [0], [1], [0, 0, 1, 1], [], []>} : vector<10x32xbf16>, vector<32x8xbf16>, vector<10x8xf32> -> vector<10x8xf32>
    %c1_38 = arith.constant 1 : index
    %c0_39 = arith.constant 0 : index
    %c0_40 = arith.constant 0 : index
    %54 = vector.load %arg4[%c1_38, %c0_39, %c0_40] : memref<4x1x8xf32, #tpu.memory_space<vmem>>, vector<1x1x8xf32>
    %55 = vector.shape_cast %54 : vector<1x1x8xf32> to vector<1x8xf32>
    %56 = vector.broadcast %55 : vector<1x8xf32> to vector<10x8xf32>
    %57 = arith.addf %53, %56 : vector<10x8xf32>
    %cst_41 = arith.constant 0.353553385 : f32
    %58 = vector.broadcast %cst_41 : f32 to vector<10x8xf32>
    %59 = arith.mulf %57, %58 : vector<10x8xf32>
    %c1_42 = arith.constant 1 : index
    %c0_43 = arith.constant 0 : index
    %c0_44 = arith.constant 0 : index
    %60 = vector.load %arg5[%c1_42, %c0_43, %c0_44] : memref<4x32x8xbf16, #tpu.memory_space<vmem>>, vector<1x32x8xbf16>
    %61 = vector.shape_cast %60 : vector<1x32x8xbf16> to vector<32x8xbf16>
    %cst_45 = arith.constant dense<0.000000e+00> : vector<10x8xf32>
    %62 = tpu.matmul %1, %61, %cst_45 {dimension_numbers = #tpu.dot_dimension_numbers<[1], [0], [0], [1], [0, 0, 1, 1], [], []>} : vector<10x32xbf16>, vector<32x8xbf16>, vector<10x8xf32> -> vector<10x8xf32>
    %c1_46 = arith.constant 1 : index
    %c0_47 = arith.constant 0 : index
    %c0_48 = arith.constant 0 : index
    %63 = vector.load %arg6[%c1_46, %c0_47, %c0_48] : memref<4x1x8xf32, #tpu.memory_space<vmem>>, vector<1x1x8xf32>
    %64 = vector.shape_cast %63 : vector<1x1x8xf32> to vector<1x8xf32>
    %65 = vector.broadcast %64 : vector<1x8xf32> to vector<10x8xf32>
    %66 = arith.addf %62, %65 : vector<10x8xf32>
    %c1_49 = arith.constant 1 : index
    %c0_50 = arith.constant 0 : index
    %c0_51 = arith.constant 0 : index
    %67 = vector.load %arg7[%c1_49, %c0_50, %c0_51] : memref<4x32x8xbf16, #tpu.memory_space<vmem>>, vector<1x32x8xbf16>
    %68 = vector.shape_cast %67 : vector<1x32x8xbf16> to vector<32x8xbf16>
    %cst_52 = arith.constant dense<0.000000e+00> : vector<10x8xf32>
    %69 = tpu.matmul %1, %68, %cst_52 {dimension_numbers = #tpu.dot_dimension_numbers<[1], [0], [0], [1], [0, 0, 1, 1], [], []>} : vector<10x32xbf16>, vector<32x8xbf16>, vector<10x8xf32> -> vector<10x8xf32>
    %c1_53 = arith.constant 1 : index
    %c0_54 = arith.constant 0 : index
    %c0_55 = arith.constant 0 : index
    %70 = vector.load %arg8[%c1_53, %c0_54, %c0_55] : memref<4x1x8xf32, #tpu.memory_space<vmem>>, vector<1x1x8xf32>
    %71 = vector.shape_cast %70 : vector<1x1x8xf32> to vector<1x8xf32>
    %72 = vector.broadcast %71 : vector<1x8xf32> to vector<10x8xf32>
    %73 = arith.addf %69, %72 : vector<10x8xf32>
    %74 = arith.truncf %59 : vector<10x8xf32> to vector<10x8xbf16>
    %75 = arith.truncf %66 : vector<10x8xf32> to vector<10x8xbf16>
    %cst_56 = arith.constant dense<0.000000e+00> : vector<10x10xf32>
    %76 = tpu.matmul %74, %75, %cst_56 {dimension_numbers = #tpu.dot_dimension_numbers<[1], [1], [0], [0], [0, 0, 1, 0], [], []>} : vector<10x8xbf16>, vector<10x8xbf16>, vector<10x10xf32> -> vector<10x10xf32>
    %77 = vector.broadcast %3 : vector<1x10xf32> to vector<10x10xf32>
    %78 = arith.addf %76, %77 : vector<10x10xf32>
    %cst_57 = arith.constant dense<0xFF800000> : vector<10xf32>
    %79 = vector.multi_reduction <maximumf>, %78, %cst_57 [1] : vector<10x10xf32> to vector<10xf32>
    %80 = vector.shape_cast %79 : vector<10xf32> to vector<10x1xf32>
    %81 = vector.broadcast %80 : vector<10x1xf32> to vector<10x10xf32>
    %82 = arith.subf %78, %81 : vector<10x10xf32>
    %83 = math.exp %82 : vector<10x10xf32>
    %cst_58 = arith.constant dense<0.000000e+00> : vector<10xf32>
    %84 = vector.multi_reduction <add>, %83, %cst_58 [1] : vector<10x10xf32> to vector<10xf32>
    %85 = vector.shape_cast %84 : vector<10xf32> to vector<10x1xf32>
    %86 = tpu.reciprocal %85 {approx = true} : vector<10x1xf32> -> vector<10x1xf32>
    %87 = vector.broadcast %86 : vector<10x1xf32> to vector<10x10xf32>
    %88 = arith.mulf %83, %87 : vector<10x10xf32>
    %89 = arith.truncf %88 : vector<10x10xf32> to vector<10x10xbf16>
    %90 = arith.truncf %73 : vector<10x8xf32> to vector<10x8xbf16>
    %cst_59 = arith.constant dense<0.000000e+00> : vector<10x8xf32>
    %91 = tpu.matmul %89, %90, %cst_59 {dimension_numbers = #tpu.dot_dimension_numbers<[1], [0], [0], [1], [0, 0, 1, 1], [], []>} : vector<10x10xbf16>, vector<10x8xbf16>, vector<10x8xf32> -> vector<10x8xf32>
    %92 = arith.truncf %91 : vector<10x8xf32> to vector<10x8xbf16>
    %c1_60 = arith.constant 1 : index
    %c0_61 = arith.constant 0 : index
    %c0_62 = arith.constant 0 : index
    %93 = vector.load %arg9[%c1_60, %c0_61, %c0_62] : memref<4x8x32xbf16, #tpu.memory_space<vmem>>, vector<1x8x32xbf16>
    %94 = vector.shape_cast %93 : vector<1x8x32xbf16> to vector<8x32xbf16>
    %cst_63 = arith.constant dense<0.000000e+00> : vector<10x32xf32>
    %95 = tpu.matmul %92, %94, %cst_63 {dimension_numbers = #tpu.dot_dimension_numbers<[1], [0], [0], [1], [0, 0, 1, 1], [], []>} : vector<10x8xbf16>, vector<8x32xbf16>, vector<10x32xf32> -> vector<10x32xf32>
    %96 = arith.addf %50, %95 : vector<10x32xf32>
    %c2 = arith.constant 2 : index
    %c0_64 = arith.constant 0 : index
    %c0_65 = arith.constant 0 : index
    %97 = vector.load %arg3[%c2, %c0_64, %c0_65] : memref<4x32x8xbf16, #tpu.memory_space<vmem>>, vector<1x32x8xbf16>
    %98 = vector.shape_cast %97 : vector<1x32x8xbf16> to vector<32x8xbf16>
    %cst_66 = arith.constant dense<0.000000e+00> : vector<10x8xf32>
    %99 = tpu.matmul %1, %98, %cst_66 {dimension_numbers = #tpu.dot_dimension_numbers<[1], [0], [0], [1], [0, 0, 1, 1], [], []>} : vector<10x32xbf16>, vector<32x8xbf16>, vector<10x8xf32> -> vector<10x8xf32>
    %c2_67 = arith.constant 2 : index
    %c0_68 = arith.constant 0 : index
    %c0_69 = arith.constant 0 : index
    %100 = vector.load %arg4[%c2_67, %c0_68, %c0_69] : memref<4x1x8xf32, #tpu.memory_space<vmem>>, vector<1x1x8xf32>
    %101 = vector.shape_cast %100 : vector<1x1x8xf32> to vector<1x8xf32>
    %102 = vector.broadcast %101 : vector<1x8xf32> to vector<10x8xf32>
    %103 = arith.addf %99, %102 : vector<10x8xf32>
    %cst_70 = arith.constant 0.353553385 : f32
    %104 = vector.broadcast %cst_70 : f32 to vector<10x8xf32>
    %105 = arith.mulf %103, %104 : vector<10x8xf32>
    %c2_71 = arith.constant 2 : index
    %c0_72 = arith.constant 0 : index
    %c0_73 = arith.constant 0 : index
    %106 = vector.load %arg5[%c2_71, %c0_72, %c0_73] : memref<4x32x8xbf16, #tpu.memory_space<vmem>>, vector<1x32x8xbf16>
    %107 = vector.shape_cast %106 : vector<1x32x8xbf16> to vector<32x8xbf16>
    %cst_74 = arith.constant dense<0.000000e+00> : vector<10x8xf32>
    %108 = tpu.matmul %1, %107, %cst_74 {dimension_numbers = #tpu.dot_dimension_numbers<[1], [0], [0], [1], [0, 0, 1, 1], [], []>} : vector<10x32xbf16>, vector<32x8xbf16>, vector<10x8xf32> -> vector<10x8xf32>
    %c2_75 = arith.constant 2 : index
    %c0_76 = arith.constant 0 : index
    %c0_77 = arith.constant 0 : index
    %109 = vector.load %arg6[%c2_75, %c0_76, %c0_77] : memref<4x1x8xf32, #tpu.memory_space<vmem>>, vector<1x1x8xf32>
    %110 = vector.shape_cast %109 : vector<1x1x8xf32> to vector<1x8xf32>
    %111 = vector.broadcast %110 : vector<1x8xf32> to vector<10x8xf32>
    %112 = arith.addf %108, %111 : vector<10x8xf32>
    %c2_78 = arith.constant 2 : index
    %c0_79 = arith.constant 0 : index
    %c0_80 = arith.constant 0 : index
    %113 = vector.load %arg7[%c2_78, %c0_79, %c0_80] : memref<4x32x8xbf16, #tpu.memory_space<vmem>>, vector<1x32x8xbf16>
    %114 = vector.shape_cast %113 : vector<1x32x8xbf16> to vector<32x8xbf16>
    %cst_81 = arith.constant dense<0.000000e+00> : vector<10x8xf32>
    %115 = tpu.matmul %1, %114, %cst_81 {dimension_numbers = #tpu.dot_dimension_numbers<[1], [0], [0], [1], [0, 0, 1, 1], [], []>} : vector<10x32xbf16>, vector<32x8xbf16>, vector<10x8xf32> -> vector<10x8xf32>
    %c2_82 = arith.constant 2 : index
    %c0_83 = arith.constant 0 : index
    %c0_84 = arith.constant 0 : index
    %116 = vector.load %arg8[%c2_82, %c0_83, %c0_84] : memref<4x1x8xf32, #tpu.memory_space<vmem>>, vector<1x1x8xf32>
    %117 = vector.shape_cast %116 : vector<1x1x8xf32> to vector<1x8xf32>
    %118 = vector.broadcast %117 : vector<1x8xf32> to vector<10x8xf32>
    %119 = arith.addf %115, %118 : vector<10x8xf32>
    %120 = arith.truncf %105 : vector<10x8xf32> to vector<10x8xbf16>
    %121 = arith.truncf %112 : vector<10x8xf32> to vector<10x8xbf16>
    %cst_85 = arith.constant dense<0.000000e+00> : vector<10x10xf32>
    %122 = tpu.matmul %120, %121, %cst_85 {dimension_numbers = #tpu.dot_dimension_numbers<[1], [1], [0], [0], [0, 0, 1, 0], [], []>} : vector<10x8xbf16>, vector<10x8xbf16>, vector<10x10xf32> -> vector<10x10xf32>
    %123 = vector.broadcast %3 : vector<1x10xf32> to vector<10x10xf32>
    %124 = arith.addf %122, %123 : vector<10x10xf32>
    %cst_86 = arith.constant dense<0xFF800000> : vector<10xf32>
    %125 = vector.multi_reduction <maximumf>, %124, %cst_86 [1] : vector<10x10xf32> to vector<10xf32>
    %126 = vector.shape_cast %125 : vector<10xf32> to vector<10x1xf32>
    %127 = vector.broadcast %126 : vector<10x1xf32> to vector<10x10xf32>
    %128 = arith.subf %124, %127 : vector<10x10xf32>
    %129 = math.exp %128 : vector<10x10xf32>
    %cst_87 = arith.constant dense<0.000000e+00> : vector<10xf32>
    %130 = vector.multi_reduction <add>, %129, %cst_87 [1] : vector<10x10xf32> to vector<10xf32>
    %131 = vector.shape_cast %130 : vector<10xf32> to vector<10x1xf32>
    %132 = tpu.reciprocal %131 {approx = true} : vector<10x1xf32> -> vector<10x1xf32>
    %133 = vector.broadcast %132 : vector<10x1xf32> to vector<10x10xf32>
    %134 = arith.mulf %129, %133 : vector<10x10xf32>
    %135 = arith.truncf %134 : vector<10x10xf32> to vector<10x10xbf16>
    %136 = arith.truncf %119 : vector<10x8xf32> to vector<10x8xbf16>
    %cst_88 = arith.constant dense<0.000000e+00> : vector<10x8xf32>
    %137 = tpu.matmul %135, %136, %cst_88 {dimension_numbers = #tpu.dot_dimension_numbers<[1], [0], [0], [1], [0, 0, 1, 1], [], []>} : vector<10x10xbf16>, vector<10x8xbf16>, vector<10x8xf32> -> vector<10x8xf32>
    %138 = arith.truncf %137 : vector<10x8xf32> to vector<10x8xbf16>
    %c2_89 = arith.constant 2 : index
    %c0_90 = arith.constant 0 : index
    %c0_91 = arith.constant 0 : index
    %139 = vector.load %arg9[%c2_89, %c0_90, %c0_91] : memref<4x8x32xbf16, #tpu.memory_space<vmem>>, vector<1x8x32xbf16>
    %140 = vector.shape_cast %139 : vector<1x8x32xbf16> to vector<8x32xbf16>
    %cst_92 = arith.constant dense<0.000000e+00> : vector<10x32xf32>
    %141 = tpu.matmul %138, %140, %cst_92 {dimension_numbers = #tpu.dot_dimension_numbers<[1], [0], [0], [1], [0, 0, 1, 1], [], []>} : vector<10x8xbf16>, vector<8x32xbf16>, vector<10x32xf32> -> vector<10x32xf32>
    %142 = arith.addf %96, %141 : vector<10x32xf32>
    %c3 = arith.constant 3 : index
    %c0_93 = arith.constant 0 : index
    %c0_94 = arith.constant 0 : index
    %143 = vector.load %arg3[%c3, %c0_93, %c0_94] : memref<4x32x8xbf16, #tpu.memory_space<vmem>>, vector<1x32x8xbf16>
    %144 = vector.shape_cast %143 : vector<1x32x8xbf16> to vector<32x8xbf16>
    %cst_95 = arith.constant dense<0.000000e+00> : vector<10x8xf32>
    %145 = tpu.matmul %1, %144, %cst_95 {dimension_numbers = #tpu.dot_dimension_numbers<[1], [0], [0], [1], [0, 0, 1, 1], [], []>} : vector<10x32xbf16>, vector<32x8xbf16>, vector<10x8xf32> -> vector<10x8xf32>
    %c3_96 = arith.constant 3 : index
    %c0_97 = arith.constant 0 : index
    %c0_98 = arith.constant 0 : index
    %146 = vector.load %arg4[%c3_96, %c0_97, %c0_98] : memref<4x1x8xf32, #tpu.memory_space<vmem>>, vector<1x1x8xf32>
    %147 = vector.shape_cast %146 : vector<1x1x8xf32> to vector<1x8xf32>
    %148 = vector.broadcast %147 : vector<1x8xf32> to vector<10x8xf32>
    %149 = arith.addf %145, %148 : vector<10x8xf32>
    %cst_99 = arith.constant 0.353553385 : f32
    %150 = vector.broadcast %cst_99 : f32 to vector<10x8xf32>
    %151 = arith.mulf %149, %150 : vector<10x8xf32>
    %c3_100 = arith.constant 3 : index
    %c0_101 = arith.constant 0 : index
    %c0_102 = arith.constant 0 : index
    %152 = vector.load %arg5[%c3_100, %c0_101, %c0_102] : memref<4x32x8xbf16, #tpu.memory_space<vmem>>, vector<1x32x8xbf16>
    %153 = vector.shape_cast %152 : vector<1x32x8xbf16> to vector<32x8xbf16>
    %cst_103 = arith.constant dense<0.000000e+00> : vector<10x8xf32>
    %154 = tpu.matmul %1, %153, %cst_103 {dimension_numbers = #tpu.dot_dimension_numbers<[1], [0], [0], [1], [0, 0, 1, 1], [], []>} : vector<10x32xbf16>, vector<32x8xbf16>, vector<10x8xf32> -> vector<10x8xf32>
    %c3_104 = arith.constant 3 : index
    %c0_105 = arith.constant 0 : index
    %c0_106 = arith.constant 0 : index
    %155 = vector.load %arg6[%c3_104, %c0_105, %c0_106] : memref<4x1x8xf32, #tpu.memory_space<vmem>>, vector<1x1x8xf32>
    %156 = vector.shape_cast %155 : vector<1x1x8xf32> to vector<1x8xf32>
    %157 = vector.broadcast %156 : vector<1x8xf32> to vector<10x8xf32>
    %158 = arith.addf %154, %157 : vector<10x8xf32>
    %c3_107 = arith.constant 3 : index
    %c0_108 = arith.constant 0 : index
    %c0_109 = arith.constant 0 : index
    %159 = vector.load %arg7[%c3_107, %c0_108, %c0_109] : memref<4x32x8xbf16, #tpu.memory_space<vmem>>, vector<1x32x8xbf16>
    %160 = vector.shape_cast %159 : vector<1x32x8xbf16> to vector<32x8xbf16>
    %cst_110 = arith.constant dense<0.000000e+00> : vector<10x8xf32>
    %161 = tpu.matmul %1, %160, %cst_110 {dimension_numbers = #tpu.dot_dimension_numbers<[1], [0], [0], [1], [0, 0, 1, 1], [], []>} : vector<10x32xbf16>, vector<32x8xbf16>, vector<10x8xf32> -> vector<10x8xf32>
    %c3_111 = arith.constant 3 : index
    %c0_112 = arith.constant 0 : index
    %c0_113 = arith.constant 0 : index
    %162 = vector.load %arg8[%c3_111, %c0_112, %c0_113] : memref<4x1x8xf32, #tpu.memory_space<vmem>>, vector<1x1x8xf32>
    %163 = vector.shape_cast %162 : vector<1x1x8xf32> to vector<1x8xf32>
    %164 = vector.broadcast %163 : vector<1x8xf32> to vector<10x8xf32>
    %165 = arith.addf %161, %164 : vector<10x8xf32>
    %166 = arith.truncf %151 : vector<10x8xf32> to vector<10x8xbf16>
    %167 = arith.truncf %158 : vector<10x8xf32> to vector<10x8xbf16>
    %cst_114 = arith.constant dense<0.000000e+00> : vector<10x10xf32>
    %168 = tpu.matmul %166, %167, %cst_114 {dimension_numbers = #tpu.dot_dimension_numbers<[1], [1], [0], [0], [0, 0, 1, 0], [], []>} : vector<10x8xbf16>, vector<10x8xbf16>, vector<10x10xf32> -> vector<10x10xf32>
    %169 = vector.broadcast %3 : vector<1x10xf32> to vector<10x10xf32>
    %170 = arith.addf %168, %169 : vector<10x10xf32>
    %cst_115 = arith.constant dense<0xFF800000> : vector<10xf32>
    %171 = vector.multi_reduction <maximumf>, %170, %cst_115 [1] : vector<10x10xf32> to vector<10xf32>
    %172 = vector.shape_cast %171 : vector<10xf32> to vector<10x1xf32>
    %173 = vector.broadcast %172 : vector<10x1xf32> to vector<10x10xf32>
    %174 = arith.subf %170, %173 : vector<10x10xf32>
    %175 = math.exp %174 : vector<10x10xf32>
    %cst_116 = arith.constant dense<0.000000e+00> : vector<10xf32>
    %176 = vector.multi_reduction <add>, %175, %cst_116 [1] : vector<10x10xf32> to vector<10xf32>
    %177 = vector.shape_cast %176 : vector<10xf32> to vector<10x1xf32>
    %178 = tpu.reciprocal %177 {approx = true} : vector<10x1xf32> -> vector<10x1xf32>
    %179 = vector.broadcast %178 : vector<10x1xf32> to vector<10x10xf32>
    %180 = arith.mulf %175, %179 : vector<10x10xf32>
    %181 = arith.truncf %180 : vector<10x10xf32> to vector<10x10xbf16>
    %182 = arith.truncf %165 : vector<10x8xf32> to vector<10x8xbf16>
    %cst_117 = arith.constant dense<0.000000e+00> : vector<10x8xf32>
    %183 = tpu.matmul %181, %182, %cst_117 {dimension_numbers = #tpu.dot_dimension_numbers<[1], [0], [0], [1], [0, 0, 1, 1], [], []>} : vector<10x10xbf16>, vector<10x8xbf16>, vector<10x8xf32> -> vector<10x8xf32>
    %184 = arith.truncf %183 : vector<10x8xf32> to vector<10x8xbf16>
    %c3_118 = arith.constant 3 : index
    %c0_119 = arith.constant 0 : index
    %c0_120 = arith.constant 0 : index
    %185 = vector.load %arg9[%c3_118, %c0_119, %c0_120] : memref<4x8x32xbf16, #tpu.memory_space<vmem>>, vector<1x8x32xbf16>
    %186 = vector.shape_cast %185 : vector<1x8x32xbf16> to vector<8x32xbf16>
    %cst_121 = arith.constant dense<0.000000e+00> : vector<10x32xf32>
    %187 = tpu.matmul %184, %186, %cst_121 {dimension_numbers = #tpu.dot_dimension_numbers<[1], [0], [0], [1], [0, 0, 1, 1], [], []>} : vector<10x8xbf16>, vector<8x32xbf16>, vector<10x32xf32> -> vector<10x32xf32>
    %188 = arith.addf %142, %187 : vector<10x32xf32>
    %c0_122 = arith.constant 0 : index
    %c0_123 = arith.constant 0 : index
    %189 = vector.load %arg10[%c0_122, %c0_123] : memref<1x32xf32, #tpu.memory_space<vmem>>, vector<1x32xf32>
    %190 = vector.broadcast %189 : vector<1x32xf32> to vector<10x32xf32>
    %191 = arith.addf %188, %190 : vector<10x32xf32>
    %192 = arith.extf %1 : vector<10x32xbf16> to vector<10x32xf32>
    %193 = arith.addf %191, %192 : vector<10x32xf32>
    %c0_124 = arith.constant 0 : index
    %c0_125 = arith.constant 0 : index
    %194 = vector.load %arg11[%c0_124, %c0_125] : memref<1x32xf32, #tpu.memory_space<vmem>>, vector<1x32xf32>
    %c0_126 = arith.constant 0 : index
    %c0_127 = arith.constant 0 : index
    %195 = vector.load %arg12[%c0_126, %c0_127] : memref<1x32xf32, #tpu.memory_space<vmem>>, vector<1x32xf32>
    %cst_128 = arith.constant dense<0.000000e+00> : vector<10xf32>
    %196 = vector.multi_reduction <add>, %193, %cst_128 [1] : vector<10x32xf32> to vector<10xf32>
    %197 = vector.shape_cast %196 : vector<10xf32> to vector<10x1xf32>
    %cst_129 = arith.constant 3.200000e+01 : f32
    %198 = vector.broadcast %cst_129 : f32 to vector<10x1xf32>
    %199 = arith.divf %197, %198 : vector<10x1xf32>
    %200 = vector.broadcast %199 : vector<10x1xf32> to vector<10x32xf32>
    %201 = arith.subf %193, %200 : vector<10x32xf32>
    %202 = arith.mulf %201, %201 : vector<10x32xf32>
    %cst_130 = arith.constant dense<0.000000e+00> : vector<10xf32>
    %203 = vector.multi_reduction <add>, %202, %cst_130 [1] : vector<10x32xf32> to vector<10xf32>
    %204 = vector.shape_cast %203 : vector<10xf32> to vector<10x1xf32>
    %cst_131 = arith.constant 3.200000e+01 : f32
    %205 = vector.broadcast %cst_131 : f32 to vector<10x1xf32>
    %206 = arith.divf %204, %205 : vector<10x1xf32>
    %cst_132 = arith.constant 9.99999974E-6 : f32
    %207 = vector.broadcast %cst_132 : f32 to vector<10x1xf32>
    %208 = arith.addf %206, %207 : vector<10x1xf32>
    %209 = math.rsqrt %208 : vector<10x1xf32>
    %210 = vector.broadcast %209 : vector<10x1xf32> to vector<10x32xf32>
    %211 = arith.mulf %201, %210 : vector<10x32xf32>
    %212 = vector.broadcast %194 : vector<1x32xf32> to vector<10x32xf32>
    %213 = arith.mulf %211, %212 : vector<10x32xf32>
    %214 = vector.broadcast %195 : vector<1x32xf32> to vector<10x32xf32>
    %215 = arith.addf %213, %214 : vector<10x32xf32>
    %216 = arith.truncf %215 : vector<10x32xf32> to vector<10x32xbf16>
    %c0_133 = arith.constant 0 : index
    %c0_134 = arith.constant 0 : index
    %217 = vector.load %arg13[%c0_133, %c0_134] : memref<32x64xbf16, #tpu.memory_space<vmem>>, vector<32x64xbf16>
    %cst_135 = arith.constant dense<0.000000e+00> : vector<10x64xf32>
    %218 = tpu.matmul %216, %217, %cst_135 {dimension_numbers = #tpu.dot_dimension_numbers<[1], [0], [0], [1], [0, 0, 1, 1], [], []>} : vector<10x32xbf16>, vector<32x64xbf16>, vector<10x64xf32> -> vector<10x64xf32>
    %c0_136 = arith.constant 0 : index
    %c0_137 = arith.constant 0 : index
    %219 = vector.load %arg14[%c0_136, %c0_137] : memref<1x64xf32, #tpu.memory_space<vmem>>, vector<1x64xf32>
    %220 = vector.broadcast %219 : vector<1x64xf32> to vector<10x64xf32>
    %221 = arith.addf %218, %220 : vector<10x64xf32>
    %cst_138 = arith.constant 0.000000e+00 : f32
    %222 = vector.broadcast %cst_138 : f32 to vector<10x64xf32>
    %223 = arith.maximumf %221, %222 : vector<10x64xf32>
    %224 = arith.truncf %223 : vector<10x64xf32> to vector<10x64xbf16>
    %c0_139 = arith.constant 0 : index
    %c0_140 = arith.constant 0 : index
    %225 = vector.load %arg15[%c0_139, %c0_140] : memref<64x32xbf16, #tpu.memory_space<vmem>>, vector<64x32xbf16>
    %cst_141 = arith.constant dense<0.000000e+00> : vector<10x32xf32>
    %226 = tpu.matmul %224, %225, %cst_141 {dimension_numbers = #tpu.dot_dimension_numbers<[1], [0], [0], [1], [0, 0, 1, 1], [], []>} : vector<10x64xbf16>, vector<64x32xbf16>, vector<10x32xf32> -> vector<10x32xf32>
    %c0_142 = arith.constant 0 : index
    %c0_143 = arith.constant 0 : index
    %227 = vector.load %arg16[%c0_142, %c0_143] : memref<1x32xf32, #tpu.memory_space<vmem>>, vector<1x32xf32>
    %228 = vector.broadcast %227 : vector<1x32xf32> to vector<10x32xf32>
    %229 = arith.addf %226, %228 : vector<10x32xf32>
    %230 = arith.addf %229, %215 : vector<10x32xf32>
    %c0_144 = arith.constant 0 : index
    %c0_145 = arith.constant 0 : index
    %231 = vector.load %arg17[%c0_144, %c0_145] : memref<1x32xf32, #tpu.memory_space<vmem>>, vector<1x32xf32>
    %c0_146 = arith.constant 0 : index
    %c0_147 = arith.constant 0 : index
    %232 = vector.load %arg18[%c0_146, %c0_147] : memref<1x32xf32, #tpu.memory_space<vmem>>, vector<1x32xf32>
    %cst_148 = arith.constant dense<0.000000e+00> : vector<10xf32>
    %233 = vector.multi_reduction <add>, %230, %cst_148 [1] : vector<10x32xf32> to vector<10xf32>
    %234 = vector.shape_cast %233 : vector<10xf32> to vector<10x1xf32>
    %cst_149 = arith.constant 3.200000e+01 : f32
    %235 = vector.broadcast %cst_149 : f32 to vector<10x1xf32>
    %236 = arith.divf %234, %235 : vector<10x1xf32>
    %237 = vector.broadcast %236 : vector<10x1xf32> to vector<10x32xf32>
    %238 = arith.subf %230, %237 : vector<10x32xf32>
    %239 = arith.mulf %238, %238 : vector<10x32xf32>
    %cst_150 = arith.constant dense<0.000000e+00> : vector<10xf32>
    %240 = vector.multi_reduction <add>, %239, %cst_150 [1] : vector<10x32xf32> to vector<10xf32>
    %241 = vector.shape_cast %240 : vector<10xf32> to vector<10x1xf32>
    %cst_151 = arith.constant 3.200000e+01 : f32
    %242 = vector.broadcast %cst_151 : f32 to vector<10x1xf32>
    %243 = arith.divf %241, %242 : vector<10x1xf32>
    %cst_152 = arith.constant 9.99999974E-6 : f32
    %244 = vector.broadcast %cst_152 : f32 to vector<10x1xf32>
    %245 = arith.addf %243, %244 : vector<10x1xf32>
    %246 = math.rsqrt %245 : vector<10x1xf32>
    %247 = vector.broadcast %246 : vector<10x1xf32> to vector<10x32xf32>
    %248 = arith.mulf %238, %247 : vector<10x32xf32>
    %249 = vector.broadcast %231 : vector<1x32xf32> to vector<10x32xf32>
    %250 = arith.mulf %248, %249 : vector<10x32xf32>
    %251 = vector.broadcast %232 : vector<1x32xf32> to vector<10x32xf32>
    %252 = arith.addf %250, %251 : vector<10x32xf32>
    %253 = arith.truncf %252 : vector<10x32xf32> to vector<10x32xbf16>
    %c0_153 = arith.constant 0 : index
    %c0_154 = arith.constant 0 : index
    %c0_155 = arith.constant 0 : index
    %254 = vector.load %arg19[%c0_153, %c0_154, %c0_155] : memref<1x10x32xbf16, #tpu.memory_space<vmem>>, vector<1x10x32xbf16>
    %255 = vector.shape_cast %254 : vector<1x10x32xbf16> to vector<10x32xbf16>
    %256 = vector.shape_cast %253 : vector<10x32xbf16> to vector<1x10x32xbf16>
    tpu.vector_store %arg19[%c0_153, %c0_154, %c0_155], %256 {strides = array<i32>} : memref<1x10x32xbf16, #tpu.memory_space<vmem>>, vector<1x10x32xbf16>,
    return
  }
  func.func @transform_0(%arg0: i32) -> (i32, i32, i32) {
    %c0_i32 = arith.constant 0 : i32
    %c0_i32_0 = arith.constant 0 : i32
    %c0_i32_1 = arith.constant 0 : i32
    return %arg0, %c0_i32, %c0_i32_0 : i32, i32, i32
  }
  func.func @transform_1(%arg0: i32) -> (i32, i32, i32) {
    %c0_i32 = arith.constant 0 : i32
    %c0_i32_0 = arith.constant 0 : i32
    %c0_i32_1 = arith.constant 0 : i32
    return %arg0, %c0_i32, %c0_i32_0 : i32, i32, i32
  }
  func.func @transform_2(%arg0: i32) -> (i32, i32, i32) {
    %c0_i32 = arith.constant 0 : i32
    %c0_i32_0 = arith.constant 0 : i32
    %c0_i32_1 = arith.constant 0 : i32
    %c0_i32_2 = arith.constant 0 : i32
    return %c0_i32, %c0_i32_0, %c0_i32_1 : i32, i32, i32
  }
  func.func @transform_3(%arg0: i32) -> (i32, i32, i32) {
    %c0_i32 = arith.constant 0 : i32
    %c0_i32_0 = arith.constant 0 : i32
    %c0_i32_1 = arith.constant 0 : i32
    %c0_i32_2 = arith.constant 0 : i32
    return %c0_i32, %c0_i32_0, %c0_i32_1 : i32, i32, i32
  }
  func.func @transform_4(%arg0: i32) -> (i32, i32, i32) {
    %c0_i32 = arith.constant 0 : i32
    %c0_i32_0 = arith.constant 0 : i32
    %c0_i32_1 = arith.constant 0 : i32
    %c0_i32_2 = arith.constant 0 : i32
    return %c0_i32, %c0_i32_0, %c0_i32_1 : i32, i32, i32
  }
  func.func @transform_5(%arg0: i32) -> (i32, i32, i32) {
    %c0_i32 = arith.constant 0 : i32
    %c0_i32_0 = arith.constant 0 : i32
    %c0_i32_1 = arith.constant 0 : i32
    %c0_i32_2 = arith.constant 0 : i32
    return %c0_i32, %c0_i32_0, %c0_i32_1 : i32, i32, i32
  }
  func.func @transform_6(%arg0: i32) -> (i32, i32, i32) {
    %c0_i32 = arith.constant 0 : i32
    %c0_i32_0 = arith.constant 0 : i32
    %c0_i32_1 = arith.constant 0 : i32
    %c0_i32_2 = arith.constant 0 : i32
    return %c0_i32, %c0_i32_0, %c0_i32_1 : i32, i32, i32
  }
  func.func @transform_7(%arg0: i32) -> (i32, i32, i32) {
    %c0_i32 = arith.constant 0 : i32
    %c0_i32_0 = arith.constant 0 : i32
    %c0_i32_1 = arith.constant 0 : i32
    %c0_i32_2 = arith.constant 0 : i32
    return %c0_i32, %c0_i32_0, %c0_i32_1 : i32, i32, i32
  }
  func.func @transform_8(%arg0: i32) -> (i32, i32, i32) {
    %c0_i32 = arith.constant 0 : i32
    %c0_i32_0 = arith.constant 0 : i32
    %c0_i32_1 = arith.constant 0 : i32
    %c0_i32_2 = arith.constant 0 : i32
    return %c0_i32, %c0_i32_0, %c0_i32_1 : i32, i32, i32
  }
  func.func @transform_9(%arg0: i32) -> (i32, i32) {
    %c0_i32 = arith.constant 0 : i32
    %c0_i32_0 = arith.constant 0 : i32
    %c0_i32_1 = arith.constant 0 : i32
    return %c0_i32, %c0_i32_0 : i32, i32
  }
  func.func @transform_10(%arg0: i32) -> (i32, i32) {
    %c0_i32 = arith.constant 0 : i32
    %c0_i32_0 = arith.constant 0 : i32
    %c0_i32_1 = arith.constant 0 : i32
    return %c0_i32, %c0_i32_0 : i32, i32
  }
  func.func @transform_11(%arg0: i32) -> (i32, i32) {
    %c0_i32 = arith.constant 0 : i32
    %c0_i32_0 = arith.constant 0 : i32
    %c0_i32_1 = arith.constant 0 : i32
    return %c0_i32, %c0_i32_0 : i32, i32
  }
  func.func @transform_12(%arg0: i32) -> (i32, i32) {
    %c0_i32 = arith.constant 0 : i32
    %c0_i32_0 = arith.constant 0 : i32
    %c0_i32_1 = arith.constant 0 : i32
    return %c0_i32, %c0_i32_0 : i32, i32
  }
  func.func @transform_13(%arg0: i32) -> (i32, i32) {
    %c0_i32 = arith.constant 0 : i32
    %c0_i32_0 = arith.constant 0 : i32
    %c0_i32_1 = arith.constant 0 : i32
    return %c0_i32, %c0_i32_0 : i32, i32
  }
  func.func @transform_14(%arg0: i32) -> (i32, i32) {
    %c0_i32 = arith.constant 0 : i32
    %c0_i32_0 = arith.constant 0 : i32
    %c0_i32_1 = arith.constant 0 : i32
    return %c0_i32, %c0_i32_0 : i32, i32
  }
  func.func @transform_15(%arg0: i32) -> (i32, i32) {
    %c0_i32 = arith.constant 0 : i32
    %c0_i32_0 = arith.constant 0 : i32
    %c0_i32_1 = arith.constant 0 : i32
    return %c0_i32, %c0_i32_0 : i32, i32
  }
  func.func @transform_16(%arg0: i32) -> (i32, i32) {
    %c0_i32 = arith.constant 0 : i32
    %c0_i32_0 = arith.constant 0 : i32
    %c0_i32_1 = arith.constant 0 : i32
    return %c0_i32, %c0_i32_0 : i32, i32
  }
  func.func @transform_17(%arg0: i32) -> (i32, i32) {
    %c0_i32 = arith.constant 0 : i32
    %c0_i32_0 = arith.constant 0 : i32
    %c0_i32_1 = arith.constant 0 : i32
    return %c0_i32, %c0_i32_0 : i32, i32
  }
  func.func @transform_18(%arg0: i32) -> (i32, i32, i32) {
    %c0_i32 = arith.constant 0 : i32
    %c0_i32_0 = arith.constant 0 : i32
    %c0_i32_1 = arith.constant 0 : i32
    return %arg0, %c0_i32, %c0_i32_0 : i32, i32, i32
  }
}

module attributes {stable_mosaic.version = 11 : i64} {
  func.func @_out_head_kernel(%arg0: memref<16x32xbf16, #tpu.memory_space<vmem>>, %arg1: memref<1x32xf32, #tpu.memory_space<vmem>>, %arg2: memref<1x32xf32, #tpu.memory_space<vmem>>, %arg3: memref<32x128xbf16, #tpu.memory_space<vmem>>, %arg4: memref<1x128xf32, #tpu.memory_space<vmem>>, %arg5: memref<16x128xf32, #tpu.memory_space<vmem>>) attributes {dimension_semantics = [], scalar_prefetch = 0 : i64, scratch_operands = 0 : i64, tpu.core_type = #tpu.core_type<tc>} {
    %c0 = arith.constant 0 : index
    %c0_0 = arith.constant 0 : index
    %0 = vector.load %arg0[%c0, %c0_0] : memref<16x32xbf16, #tpu.memory_space<vmem>>, vector<16x32xbf16>
    %1 = arith.extf %0 : vector<16x32xbf16> to vector<16x32xf32>
    %c0_1 = arith.constant 0 : index
    %c0_2 = arith.constant 0 : index
    %2 = vector.load %arg1[%c0_1, %c0_2] : memref<1x32xf32, #tpu.memory_space<vmem>>, vector<1x32xf32>
    %c0_3 = arith.constant 0 : index
    %c0_4 = arith.constant 0 : index
    %3 = vector.load %arg2[%c0_3, %c0_4] : memref<1x32xf32, #tpu.memory_space<vmem>>, vector<1x32xf32>
    %cst = arith.constant dense<0.000000e+00> : vector<16xf32>
    %4 = vector.multi_reduction <add>, %1, %cst [1] : vector<16x32xf32> to vector<16xf32>
    %5 = vector.shape_cast %4 : vector<16xf32> to vector<16x1xf32>
    %cst_5 = arith.constant 3.200000e+01 : f32
    %6 = vector.broadcast %cst_5 : f32 to vector<16x1xf32>
    %7 = arith.divf %5, %6 : vector<16x1xf32>
    %8 = vector.broadcast %7 : vector<16x1xf32> to vector<16x32xf32>
    %9 = arith.subf %1, %8 : vector<16x32xf32>
    %10 = arith.mulf %9, %9 : vector<16x32xf32>
    %cst_6 = arith.constant dense<0.000000e+00> : vector<16xf32>
    %11 = vector.multi_reduction <add>, %10, %cst_6 [1] : vector<16x32xf32> to vector<16xf32>
    %12 = vector.shape_cast %11 : vector<16xf32> to vector<16x1xf32>
    %cst_7 = arith.constant 3.200000e+01 : f32
    %13 = vector.broadcast %cst_7 : f32 to vector<16x1xf32>
    %14 = arith.divf %12, %13 : vector<16x1xf32>
    %cst_8 = arith.constant 9.99999974E-6 : f32
    %15 = vector.broadcast %cst_8 : f32 to vector<16x1xf32>
    %16 = arith.addf %14, %15 : vector<16x1xf32>
    %17 = math.rsqrt %16 : vector<16x1xf32>
    %18 = vector.broadcast %17 : vector<16x1xf32> to vector<16x32xf32>
    %19 = arith.mulf %9, %18 : vector<16x32xf32>
    %20 = vector.broadcast %2 : vector<1x32xf32> to vector<16x32xf32>
    %21 = arith.mulf %19, %20 : vector<16x32xf32>
    %22 = vector.broadcast %3 : vector<1x32xf32> to vector<16x32xf32>
    %23 = arith.addf %21, %22 : vector<16x32xf32>
    %24 = arith.truncf %23 : vector<16x32xf32> to vector<16x32xbf16>
    %c0_9 = arith.constant 0 : index
    %c0_10 = arith.constant 0 : index
    %25 = vector.load %arg3[%c0_9, %c0_10] : memref<32x128xbf16, #tpu.memory_space<vmem>>, vector<32x128xbf16>
    %cst_11 = arith.constant dense<0.000000e+00> : vector<16x128xf32>
    %26 = tpu.matmul %24, %25, %cst_11 {dimension_numbers = #tpu.dot_dimension_numbers<[1], [0], [0], [1], [0, 0, 1, 1], [], []>} : vector<16x32xbf16>, vector<32x128xbf16>, vector<16x128xf32> -> vector<16x128xf32>
    %c0_12 = arith.constant 0 : index
    %c0_13 = arith.constant 0 : index
    %27 = vector.load %arg4[%c0_12, %c0_13] : memref<1x128xf32, #tpu.memory_space<vmem>>, vector<1x128xf32>
    %28 = vector.broadcast %27 : vector<1x128xf32> to vector<16x128xf32>
    %29 = arith.addf %26, %28 : vector<16x128xf32>
    %cst_14 = arith.constant dense<0xFF800000> : vector<16xf32>
    %30 = vector.multi_reduction <maximumf>, %29, %cst_14 [1] : vector<16x128xf32> to vector<16xf32>
    %31 = vector.shape_cast %30 : vector<16xf32> to vector<16x1xf32>
    %32 = vector.broadcast %31 : vector<16x1xf32> to vector<16x128xf32>
    %33 = arith.subf %29, %32 : vector<16x128xf32>
    %34 = math.exp %33 : vector<16x128xf32>
    %cst_15 = arith.constant dense<0.000000e+00> : vector<16xf32>
    %35 = vector.multi_reduction <add>, %34, %cst_15 [1] : vector<16x128xf32> to vector<16xf32>
    %36 = vector.shape_cast %35 : vector<16xf32> to vector<16x1xf32>
    %37 = math.log %36 : vector<16x1xf32>
    %38 = vector.broadcast %37 : vector<16x1xf32> to vector<16x128xf32>
    %39 = arith.subf %33, %38 : vector<16x128xf32>
    %c0_16 = arith.constant 0 : index
    %c0_17 = arith.constant 0 : index
    %40 = vector.load %arg5[%c0_16, %c0_17] : memref<16x128xf32, #tpu.memory_space<vmem>>, vector<16x128xf32>
    tpu.vector_store %arg5[%c0_16, %c0_17], %39 {strides = array<i32>} : memref<16x128xf32, #tpu.memory_space<vmem>>, vector<16x128xf32>,
    return
  }
}

module attributes {stable_mosaic.version = 11 : i64} {
  func.func @_dec_layer_kernel(%arg0: i32, %arg1: memref<1x8x32xbf16, #tpu.memory_space<vmem>>, %arg2: memref<1x10x32xbf16, #tpu.memory_space<vmem>>, %arg3: memref<8x8xf32, #tpu.memory_space<vmem>>, %arg4: memref<1x1x8xf32, #tpu.memory_space<vmem>>, %arg5: memref<1x1x10xf32, #tpu.memory_space<vmem>>, %arg6: memref<4x32x8xbf16, #tpu.memory_space<vmem>>, %arg7: memref<4x1x8xf32, #tpu.memory_space<vmem>>, %arg8: memref<4x32x8xbf16, #tpu.memory_space<vmem>>, %arg9: memref<4x1x8xf32, #tpu.memory_space<vmem>>, %arg10: memref<4x32x8xbf16, #tpu.memory_space<vmem>>, %arg11: memref<4x1x8xf32, #tpu.memory_space<vmem>>, %arg12: memref<4x8x32xbf16, #tpu.memory_space<vmem>>, %arg13: memref<1x32xf32, #tpu.memory_space<vmem>>, %arg14: memref<1x32xf32, #tpu.memory_space<vmem>>, %arg15: memref<1x32xf32, #tpu.memory_space<vmem>>, %arg16: memref<4x32x8xbf16, #tpu.memory_space<vmem>>, %arg17: memref<4x1x8xf32, #tpu.memory_space<vmem>>, %arg18: memref<4x32x8xbf16, #tpu.memory_space<vmem>>, %arg19: memref<4x1x8xf32, #tpu.memory_space<vmem>>, %arg20: memref<4x32x8xbf16, #tpu.memory_space<vmem>>, %arg21: memref<4x1x8xf32, #tpu.memory_space<vmem>>, %arg22: memref<4x8x32xbf16, #tpu.memory_space<vmem>>, %arg23: memref<1x32xf32, #tpu.memory_space<vmem>>, %arg24: memref<1x32xf32, #tpu.memory_space<vmem>>, %arg25: memref<1x32xf32, #tpu.memory_space<vmem>>, %arg26: memref<32x64xbf16, #tpu.memory_space<vmem>>, %arg27: memref<1x64xf32, #tpu.memory_space<vmem>>, %arg28: memref<64x32xbf16, #tpu.memory_space<vmem>>, %arg29: memref<1x32xf32, #tpu.memory_space<vmem>>, %arg30: memref<1x32xf32, #tpu.memory_space<vmem>>, %arg31: memref<1x32xf32, #tpu.memory_space<vmem>>, %arg32: memref<1x8x32xbf16, #tpu.memory_space<vmem>>) attributes {dimension_semantics = [#tpu.dimension_semantics<parallel>], iteration_bounds = array<i64: 2>, scalar_prefetch = 0 : i64, scratch_operands = 0 : i64, tpu.core_type = #tpu.core_type<tc>, window_params = [{transform_indices = @transform_0, window_bounds = array<i64: 1, 8, 32>}, {transform_indices = @transform_1, window_bounds = array<i64: 1, 10, 32>}, {pipeline_mode = #tpu.pipeline_mode<synchronous>, transform_indices = @transform_2, window_bounds = array<i64: 8, 8>}, {transform_indices = @transform_3, window_bounds = array<i64: 1, 1, 8>}, {transform_indices = @transform_4, window_bounds = array<i64: 1, 1, 10>}, {pipeline_mode = #tpu.pipeline_mode<synchronous>, transform_indices = @transform_5, window_bounds = array<i64: 4, 32, 8>}, {pipeline_mode = #tpu.pipeline_mode<synchronous>, transform_indices = @transform_6, window_bounds = array<i64: 4, 1, 8>}, {pipeline_mode = #tpu.pipeline_mode<synchronous>, transform_indices = @transform_7, window_bounds = array<i64: 4, 32, 8>}, {pipeline_mode = #tpu.pipeline_mode<synchronous>, transform_indices = @transform_8, window_bounds = array<i64: 4, 1, 8>}, {pipeline_mode = #tpu.pipeline_mode<synchronous>, transform_indices = @transform_9, window_bounds = array<i64: 4, 32, 8>}, {pipeline_mode = #tpu.pipeline_mode<synchronous>, transform_indices = @transform_10, window_bounds = array<i64: 4, 1, 8>}, {pipeline_mode = #tpu.pipeline_mode<synchronous>, transform_indices = @transform_11, window_bounds = array<i64: 4, 8, 32>}, {pipeline_mode = #tpu.pipeline_mode<synchronous>, transform_indices = @transform_12, window_bounds = array<i64: 1, 32>}, {pipeline_mode = #tpu.pipeline_mode<synchronous>, transform_indices = @transform_13, window_bounds = array<i64: 1, 32>}, {pipeline_mode = #tpu.pipeline_mode<synchronous>, transform_indices = @transform_14, window_bounds = array<i64: 1, 32>}, {pipeline_mode = #tpu.pipeline_mode<synchronous>, transform_indices = @transform_15, window_bounds = array<i64: 4, 32, 8>}, {pipeline_mode = #tpu.pipeline_mode<synchronous>, transform_indices = @transform_16, window_bounds = array<i64: 4, 1, 8>}, {pipeline_mode = #tpu.pipeline_mode<synchronous>, transform_indices = @transform_17, window_bounds = array<i64: 4, 32, 8>}, {pipeline_mode = #tpu.pipeline_mode<synchronous>, transform_indices = @transform_18, window_bounds = array<i64: 4, 1, 8>}, {pipeline_mode = #tpu.pipeline_mode<synchronous>, transform_indices = @transform_19, window_bounds = array<i64: 4, 32, 8>}, {pipeline_mode = #tpu.pipeline_mode<synchronous>, transform_indices = @transform_20, window_bounds = array<i64: 4, 1, 8>}, {pipeline_mode = #tpu.pipeline_mode<synchronous>, transform_indices = @transform_21, window_bounds = array<i64: 4, 8, 32>}, {pipeline_mode = #tpu.pipeline_mode<synchronous>, transform_indices = @transform_22, window_bounds = array<i64: 1, 32>}, {pipeline_mode = #tpu.pipeline_mode<synchronous>, transform_indices = @transform_23, window_bounds = array<i64: 1, 32>}, {pipeline_mode = #tpu.pipeline_mode<synchronous>, transform_indices = @transform_24, window_bounds = array<i64: 1, 32>}, {pipeline_mode = #tpu.pipeline_mode<synchronous>, transform_indices = @transform_25, window_bounds = array<i64: 32, 64>}, {pipeline_mode = #tpu.pipeline_mode<synchronous>, transform_indices = @transform_26, window_bounds = array<i64: 1, 64>}, {pipeline_mode = #tpu.pipeline_mode<synchronous>, transform_indices = @transform_27, window_bounds = array<i64: 64, 32>}, {pipeline_mode = #tpu.pipeline_mode<synchronous>, transform_indices = @transform_28, window_bounds = array<i64: 1, 32>}, {pipeline_mode = #tpu.pipeline_mode<synchronous>, transform_indices = @transform_29, window_bounds = array<i64: 1, 32>}, {pipeline_mode = #tpu.pipeline_mode<synchronous>, transform_indices = @transform_30, window_bounds = array<i64: 1, 32>}, {transform_indices = @transform_31, window_bounds = array<i64: 1, 8, 32>}]} {
    %c0 = arith.constant 0 : index
    %c0_0 = arith.constant 0 : index
    %c0_1 = arith.constant 0 : index
    %0 = vector.load %arg1[%c0, %c0_0, %c0_1] : memref<1x8x32xbf16, #tpu.memory_space<vmem>>, vector<1x8x32xbf16>
    %1 = vector.shape_cast %0 : vector<1x8x32xbf16> to vector<8x32xbf16>
    %c0_2 = arith.constant 0 : index
    %c0_3 = arith.constant 0 : index
    %c0_4 = arith.constant 0 : index
    %2 = vector.load %arg2[%c0_2, %c0_3, %c0_4] : memref<1x10x32xbf16, #tpu.memory_space<vmem>>, vector<1x10x32xbf16>
    %3 = vector.shape_cast %2 : vector<1x10x32xbf16> to vector<10x32xbf16>
    %c0_5 = arith.constant 0 : index
    %c0_6 = arith.constant 0 : index
    %4 = vector.load %arg3[%c0_5, %c0_6] : memref<8x8xf32, #tpu.memory_space<vmem>>, vector<8x8xf32>
    %c0_7 = arith.constant 0 : index
    %c0_8 = arith.constant 0 : index
    %c0_9 = arith.constant 0 : index
    %5 = vector.load %arg4[%c0_7, %c0_8, %c0_9] : memref<1x1x8xf32, #tpu.memory_space<vmem>>, vector<1x1x8xf32>
    %6 = vector.shape_cast %5 : vector<1x1x8xf32> to vector<1x8xf32>
    %7 = vector.broadcast %6 : vector<1x8xf32> to vector<8x8xf32>
    %8 = arith.addf %4, %7 : vector<8x8xf32>
    %c0_10 = arith.constant 0 : index
    %c0_11 = arith.constant 0 : index
    %c0_12 = arith.constant 0 : index
    %9 = vector.load %arg5[%c0_10, %c0_11, %c0_12] : memref<1x1x10xf32, #tpu.memory_space<vmem>>, vector<1x1x10xf32>
    %10 = vector.shape_cast %9 : vector<1x1x10xf32> to vector<1x10xf32>
    %cst = arith.constant 0.000000e+00 : f32
    %11 = vector.broadcast %cst : f32 to vector<8x32xf32>
    %c0_13 = arith.constant 0 : index
    %c0_14 = arith.constant 0 : index
    %c0_15 = arith.constant 0 : index
    %12 = vector.load %arg6[%c0_13, %c0_14, %c0_15] : memref<4x32x8xbf16, #tpu.memory_space<vmem>>, vector<1x32x8xbf16>
    %13 = vector.shape_cast %12 : vector<1x32x8xbf16> to vector<32x8xbf16>
    %cst_16 = arith.constant dense<0.000000e+00> : vector<8x8xf32>
    %14 = tpu.matmul %1, %13, %cst_16 {dimension_numbers = #tpu.dot_dimension_numbers<[1], [0], [0], [1], [0, 0, 1, 1], [], []>} : vector<8x32xbf16>, vector<32x8xbf16>, vector<8x8xf32> -> vector<8x8xf32>
    %c0_17 = arith.constant 0 : index
    %c0_18 = arith.constant 0 : index
    %c0_19 = arith.constant 0 : index
    %15 = vector.load %arg7[%c0_17, %c0_18, %c0_19] : memref<4x1x8xf32, #tpu.memory_space<vmem>>, vector<1x1x8xf32>
    %16 = vector.shape_cast %15 : vector<1x1x8xf32> to vector<1x8xf32>
    %17 = vector.broadcast %16 : vector<1x8xf32> to vector<8x8xf32>
    %18 = arith.addf %14, %17 : vector<8x8xf32>
    %cst_20 = arith.constant 0.353553385 : f32
    %19 = vector.broadcast %cst_20 : f32 to vector<8x8xf32>
    %20 = arith.mulf %18, %19 : vector<8x8xf32>
    %c0_21 = arith.constant 0 : index
    %c0_22 = arith.constant 0 : index
    %c0_23 = arith.constant 0 : index
    %21 = vector.load %arg8[%c0_21, %c0_22, %c0_23] : memref<4x32x8xbf16, #tpu.memory_space<vmem>>, vector<1x32x8xbf16>
    %22 = vector.shape_cast %21 : vector<1x32x8xbf16> to vector<32x8xbf16>
    %cst_24 = arith.constant dense<0.000000e+00> : vector<8x8xf32>
    %23 = tpu.matmul %1, %22, %cst_24 {dimension_numbers = #tpu.dot_dimension_numbers<[1], [0], [0], [1], [0, 0, 1, 1], [], []>} : vector<8x32xbf16>, vector<32x8xbf16>, vector<8x8xf32> -> vector<8x8xf32>
    %c0_25 = arith.constant 0 : index
    %c0_26 = arith.constant 0 : index
    %c0_27 = arith.constant 0 : index
    %24 = vector.load %arg9[%c0_25, %c0_26, %c0_27] : memref<4x1x8xf32, #tpu.memory_space<vmem>>, vector<1x1x8xf32>
    %25 = vector.shape_cast %24 : vector<1x1x8xf32> to vector<1x8xf32>
    %26 = vector.broadcast %25 : vector<1x8xf32> to vector<8x8xf32>
    %27 = arith.addf %23, %26 : vector<8x8xf32>
    %c0_28 = arith.constant 0 : index
    %c0_29 = arith.constant 0 : index
    %c0_30 = arith.constant 0 : index
    %28 = vector.load %arg10[%c0_28, %c0_29, %c0_30] : memref<4x32x8xbf16, #tpu.memory_space<vmem>>, vector<1x32x8xbf16>
    %29 = vector.shape_cast %28 : vector<1x32x8xbf16> to vector<32x8xbf16>
    %cst_31 = arith.constant dense<0.000000e+00> : vector<8x8xf32>
    %30 = tpu.matmul %1, %29, %cst_31 {dimension_numbers = #tpu.dot_dimension_numbers<[1], [0], [0], [1], [0, 0, 1, 1], [], []>} : vector<8x32xbf16>, vector<32x8xbf16>, vector<8x8xf32> -> vector<8x8xf32>
    %c0_32 = arith.constant 0 : index
    %c0_33 = arith.constant 0 : index
    %c0_34 = arith.constant 0 : index
    %31 = vector.load %arg11[%c0_32, %c0_33, %c0_34] : memref<4x1x8xf32, #tpu.memory_space<vmem>>, vector<1x1x8xf32>
    %32 = vector.shape_cast %31 : vector<1x1x8xf32> to vector<1x8xf32>
    %33 = vector.broadcast %32 : vector<1x8xf32> to vector<8x8xf32>
    %34 = arith.addf %30, %33 : vector<8x8xf32>
    %35 = arith.truncf %20 : vector<8x8xf32> to vector<8x8xbf16>
    %36 = arith.truncf %27 : vector<8x8xf32> to vector<8x8xbf16>
    %cst_35 = arith.constant dense<0.000000e+00> : vector<8x8xf32>
    %37 = tpu.matmul %35, %36, %cst_35 {dimension_numbers = #tpu.dot_dimension_numbers<[1], [1], [0], [0], [0, 0, 1, 0], [], []>} : vector<8x8xbf16>, vector<8x8xbf16>, vector<8x8xf32> -> vector<8x8xf32>
    %38 = arith.addf %37, %8 : vector<8x8xf32>
    %cst_36 = arith.constant dense<0xFF800000> : vector<8xf32>
    %39 = vector.multi_reduction <maximumf>, %38, %cst_36 [1] : vector<8x8xf32> to vector<8xf32>
    %40 = vector.shape_cast %39 : vector<8xf32> to vector<8x1xf32>
    %41 = vector.broadcast %40 : vector<8x1xf32> to vector<8x8xf32>
    %42 = arith.subf %38, %41 : vector<8x8xf32>
    %43 = math.exp %42 : vector<8x8xf32>
    %cst_37 = arith.constant dense<0.000000e+00> : vector<8xf32>
    %44 = vector.multi_reduction <add>, %43, %cst_37 [1] : vector<8x8xf32> to vector<8xf32>
    %45 = vector.shape_cast %44 : vector<8xf32> to vector<8x1xf32>
    %46 = tpu.reciprocal %45 {approx = true} : vector<8x1xf32> -> vector<8x1xf32>
    %47 = vector.broadcast %46 : vector<8x1xf32> to vector<8x8xf32>
    %48 = arith.mulf %43, %47 : vector<8x8xf32>
    %49 = arith.truncf %48 : vector<8x8xf32> to vector<8x8xbf16>
    %50 = arith.truncf %34 : vector<8x8xf32> to vector<8x8xbf16>
    %cst_38 = arith.constant dense<0.000000e+00> : vector<8x8xf32>
    %51 = tpu.matmul %49, %50, %cst_38 {dimension_numbers = #tpu.dot_dimension_numbers<[1], [0], [0], [1], [0, 0, 1, 1], [], []>} : vector<8x8xbf16>, vector<8x8xbf16>, vector<8x8xf32> -> vector<8x8xf32>
    %52 = arith.truncf %51 : vector<8x8xf32> to vector<8x8xbf16>
    %c0_39 = arith.constant 0 : index
    %c0_40 = arith.constant 0 : index
    %c0_41 = arith.constant 0 : index
    %53 = vector.load %arg12[%c0_39, %c0_40, %c0_41] : memref<4x8x32xbf16, #tpu.memory_space<vmem>>, vector<1x8x32xbf16>
    %54 = vector.shape_cast %53 : vector<1x8x32xbf16> to vector<8x32xbf16>
    %cst_42 = arith.constant dense<0.000000e+00> : vector<8x32xf32>
    %55 = tpu.matmul %52, %54, %cst_42 {dimension_numbers = #tpu.dot_dimension_numbers<[1], [0], [0], [1], [0, 0, 1, 1], [], []>} : vector<8x8xbf16>, vector<8x32xbf16>, vector<8x32xf32> -> vector<8x32xf32>
    %56 = arith.addf %11, %55 : vector<8x32xf32>
    %c1 = arith.constant 1 : index
    %c0_43 = arith.constant 0 : index
    %c0_44 = arith.constant 0 : index
    %57 = vector.load %arg6[%c1, %c0_43, %c0_44] : memref<4x32x8xbf16, #tpu.memory_space<vmem>>, vector<1x32x8xbf16>
    %58 = vector.shape_cast %57 : vector<1x32x8xbf16> to vector<32x8xbf16>
    %cst_45 = arith.constant dense<0.000000e+00> : vector<8x8xf32>
    %59 = tpu.matmul %1, %58, %cst_45 {dimension_numbers = #tpu.dot_dimension_numbers<[1], [0], [0], [1], [0, 0, 1, 1], [], []>} : vector<8x32xbf16>, vector<32x8xbf16>, vector<8x8xf32> -> vector<8x8xf32>
    %c1_46 = arith.constant 1 : index
    %c0_47 = arith.constant 0 : index
    %c0_48 = arith.constant 0 : index
    %60 = vector.load %arg7[%c1_46, %c0_47, %c0_48] : memref<4x1x8xf32, #tpu.memory_space<vmem>>, vector<1x1x8xf32>
    %61 = vector.shape_cast %60 : vector<1x1x8xf32> to vector<1x8xf32>
    %62 = vector.broadcast %61 : vector<1x8xf32> to vector<8x8xf32>
    %63 = arith.addf %59, %62 : vector<8x8xf32>
    %cst_49 = arith.constant 0.353553385 : f32
    %64 = vector.broadcast %cst_49 : f32 to vector<8x8xf32>
    %65 = arith.mulf %63, %64 : vector<8x8xf32>
    %c1_50 = arith.constant 1 : index
    %c0_51 = arith.constant 0 : index
    %c0_52 = arith.constant 0 : index
    %66 = vector.load %arg8[%c1_50, %c0_51, %c0_52] : memref<4x32x8xbf16, #tpu.memory_space<vmem>>, vector<1x32x8xbf16>
    %67 = vector.shape_cast %66 : vector<1x32x8xbf16> to vector<32x8xbf16>
    %cst_53 = arith.constant dense<0.000000e+00> : vector<8x8xf32>
    %68 = tpu.matmul %1, %67, %cst_53 {dimension_numbers = #tpu.dot_dimension_numbers<[1], [0], [0], [1], [0, 0, 1, 1], [], []>} : vector<8x32xbf16>, vector<32x8xbf16>, vector<8x8xf32> -> vector<8x8xf32>
    %c1_54 = arith.constant 1 : index
    %c0_55 = arith.constant 0 : index
    %c0_56 = arith.constant 0 : index
    %69 = vector.load %arg9[%c1_54, %c0_55, %c0_56] : memref<4x1x8xf32, #tpu.memory_space<vmem>>, vector<1x1x8xf32>
    %70 = vector.shape_cast %69 : vector<1x1x8xf32> to vector<1x8xf32>
    %71 = vector.broadcast %70 : vector<1x8xf32> to vector<8x8xf32>
    %72 = arith.addf %68, %71 : vector<8x8xf32>
    %c1_57 = arith.constant 1 : index
    %c0_58 = arith.constant 0 : index
    %c0_59 = arith.constant 0 : index
    %73 = vector.load %arg10[%c1_57, %c0_58, %c0_59] : memref<4x32x8xbf16, #tpu.memory_space<vmem>>, vector<1x32x8xbf16>
    %74 = vector.shape_cast %73 : vector<1x32x8xbf16> to vector<32x8xbf16>
    %cst_60 = arith.constant dense<0.000000e+00> : vector<8x8xf32>
    %75 = tpu.matmul %1, %74, %cst_60 {dimension_numbers = #tpu.dot_dimension_numbers<[1], [0], [0], [1], [0, 0, 1, 1], [], []>} : vector<8x32xbf16>, vector<32x8xbf16>, vector<8x8xf32> -> vector<8x8xf32>
    %c1_61 = arith.constant 1 : index
    %c0_62 = arith.constant 0 : index
    %c0_63 = arith.constant 0 : index
    %76 = vector.load %arg11[%c1_61, %c0_62, %c0_63] : memref<4x1x8xf32, #tpu.memory_space<vmem>>, vector<1x1x8xf32>
    %77 = vector.shape_cast %76 : vector<1x1x8xf32> to vector<1x8xf32>
    %78 = vector.broadcast %77 : vector<1x8xf32> to vector<8x8xf32>
    %79 = arith.addf %75, %78 : vector<8x8xf32>
    %80 = arith.truncf %65 : vector<8x8xf32> to vector<8x8xbf16>
    %81 = arith.truncf %72 : vector<8x8xf32> to vector<8x8xbf16>
    %cst_64 = arith.constant dense<0.000000e+00> : vector<8x8xf32>
    %82 = tpu.matmul %80, %81, %cst_64 {dimension_numbers = #tpu.dot_dimension_numbers<[1], [1], [0], [0], [0, 0, 1, 0], [], []>} : vector<8x8xbf16>, vector<8x8xbf16>, vector<8x8xf32> -> vector<8x8xf32>
    %83 = arith.addf %82, %8 : vector<8x8xf32>
    %cst_65 = arith.constant dense<0xFF800000> : vector<8xf32>
    %84 = vector.multi_reduction <maximumf>, %83, %cst_65 [1] : vector<8x8xf32> to vector<8xf32>
    %85 = vector.shape_cast %84 : vector<8xf32> to vector<8x1xf32>
    %86 = vector.broadcast %85 : vector<8x1xf32> to vector<8x8xf32>
    %87 = arith.subf %83, %86 : vector<8x8xf32>
    %88 = math.exp %87 : vector<8x8xf32>
    %cst_66 = arith.constant dense<0.000000e+00> : vector<8xf32>
    %89 = vector.multi_reduction <add>, %88, %cst_66 [1] : vector<8x8xf32> to vector<8xf32>
    %90 = vector.shape_cast %89 : vector<8xf32> to vector<8x1xf32>
    %91 = tpu.reciprocal %90 {approx = true} : vector<8x1xf32> -> vector<8x1xf32>
    %92 = vector.broadcast %91 : vector<8x1xf32> to vector<8x8xf32>
    %93 = arith.mulf %88, %92 : vector<8x8xf32>
    %94 = arith.truncf %93 : vector<8x8xf32> to vector<8x8xbf16>
    %95 = arith.truncf %79 : vector<8x8xf32> to vector<8x8xbf16>
    %cst_67 = arith.constant dense<0.000000e+00> : vector<8x8xf32>
    %96 = tpu.matmul %94, %95, %cst_67 {dimension_numbers = #tpu.dot_dimension_numbers<[1], [0], [0], [1], [0, 0, 1, 1], [], []>} : vector<8x8xbf16>, vector<8x8xbf16>, vector<8x8xf32> -> vector<8x8xf32>
    %97 = arith.truncf %96 : vector<8x8xf32> to vector<8x8xbf16>
    %c1_68 = arith.constant 1 : index
    %c0_69 = arith.constant 0 : index
    %c0_70 = arith.constant 0 : index
    %98 = vector.load %arg12[%c1_68, %c0_69, %c0_70] : memref<4x8x32xbf16, #tpu.memory_space<vmem>>, vector<1x8x32xbf16>
    %99 = vector.shape_cast %98 : vector<1x8x32xbf16> to vector<8x32xbf16>
    %cst_71 = arith.constant dense<0.000000e+00> : vector<8x32xf32>
    %100 = tpu.matmul %97, %99, %cst_71 {dimension_numbers = #tpu.dot_dimension_numbers<[1], [0], [0], [1], [0, 0, 1, 1], [], []>} : vector<8x8xbf16>, vector<8x32xbf16>, vector<8x32xf32> -> vector<8x32xf32>
    %101 = arith.addf %56, %100 : vector<8x32xf32>
    %c2 = arith.constant 2 : index
    %c0_72 = arith.constant 0 : index
    %c0_73 = arith.constant 0 : index
    %102 = vector.load %arg6[%c2, %c0_72, %c0_73] : memref<4x32x8xbf16, #tpu.memory_space<vmem>>, vector<1x32x8xbf16>
    %103 = vector.shape_cast %102 : vector<1x32x8xbf16> to vector<32x8xbf16>
    %cst_74 = arith.constant dense<0.000000e+00> : vector<8x8xf32>
    %104 = tpu.matmul %1, %103, %cst_74 {dimension_numbers = #tpu.dot_dimension_numbers<[1], [0], [0], [1], [0, 0, 1, 1], [], []>} : vector<8x32xbf16>, vector<32x8xbf16>, vector<8x8xf32> -> vector<8x8xf32>
    %c2_75 = arith.constant 2 : index
    %c0_76 = arith.constant 0 : index
    %c0_77 = arith.constant 0 : index
    %105 = vector.load %arg7[%c2_75, %c0_76, %c0_77] : memref<4x1x8xf32, #tpu.memory_space<vmem>>, vector<1x1x8xf32>
    %106 = vector.shape_cast %105 : vector<1x1x8xf32> to vector<1x8xf32>
    %107 = vector.broadcast %106 : vector<1x8xf32> to vector<8x8xf32>
    %108 = arith.addf %104, %107 : vector<8x8xf32>
    %cst_78 = arith.constant 0.353553385 : f32
    %109 = vector.broadcast %cst_78 : f32 to vector<8x8xf32>
    %110 = arith.mulf %108, %109 : vector<8x8xf32>
    %c2_79 = arith.constant 2 : index
    %c0_80 = arith.constant 0 : index
    %c0_81 = arith.constant 0 : index
    %111 = vector.load %arg8[%c2_79, %c0_80, %c0_81] : memref<4x32x8xbf16, #tpu.memory_space<vmem>>, vector<1x32x8xbf16>
    %112 = vector.shape_cast %111 : vector<1x32x8xbf16> to vector<32x8xbf16>
    %cst_82 = arith.constant dense<0.000000e+00> : vector<8x8xf32>
    %113 = tpu.matmul %1, %112, %cst_82 {dimension_numbers = #tpu.dot_dimension_numbers<[1], [0], [0], [1], [0, 0, 1, 1], [], []>} : vector<8x32xbf16>, vector<32x8xbf16>, vector<8x8xf32> -> vector<8x8xf32>
    %c2_83 = arith.constant 2 : index
    %c0_84 = arith.constant 0 : index
    %c0_85 = arith.constant 0 : index
    %114 = vector.load %arg9[%c2_83, %c0_84, %c0_85] : memref<4x1x8xf32, #tpu.memory_space<vmem>>, vector<1x1x8xf32>
    %115 = vector.shape_cast %114 : vector<1x1x8xf32> to vector<1x8xf32>
    %116 = vector.broadcast %115 : vector<1x8xf32> to vector<8x8xf32>
    %117 = arith.addf %113, %116 : vector<8x8xf32>
    %c2_86 = arith.constant 2 : index
    %c0_87 = arith.constant 0 : index
    %c0_88 = arith.constant 0 : index
    %118 = vector.load %arg10[%c2_86, %c0_87, %c0_88] : memref<4x32x8xbf16, #tpu.memory_space<vmem>>, vector<1x32x8xbf16>
    %119 = vector.shape_cast %118 : vector<1x32x8xbf16> to vector<32x8xbf16>
    %cst_89 = arith.constant dense<0.000000e+00> : vector<8x8xf32>
    %120 = tpu.matmul %1, %119, %cst_89 {dimension_numbers = #tpu.dot_dimension_numbers<[1], [0], [0], [1], [0, 0, 1, 1], [], []>} : vector<8x32xbf16>, vector<32x8xbf16>, vector<8x8xf32> -> vector<8x8xf32>
    %c2_90 = arith.constant 2 : index
    %c0_91 = arith.constant 0 : index
    %c0_92 = arith.constant 0 : index
    %121 = vector.load %arg11[%c2_90, %c0_91, %c0_92] : memref<4x1x8xf32, #tpu.memory_space<vmem>>, vector<1x1x8xf32>
    %122 = vector.shape_cast %121 : vector<1x1x8xf32> to vector<1x8xf32>
    %123 = vector.broadcast %122 : vector<1x8xf32> to vector<8x8xf32>
    %124 = arith.addf %120, %123 : vector<8x8xf32>
    %125 = arith.truncf %110 : vector<8x8xf32> to vector<8x8xbf16>
    %126 = arith.truncf %117 : vector<8x8xf32> to vector<8x8xbf16>
    %cst_93 = arith.constant dense<0.000000e+00> : vector<8x8xf32>
    %127 = tpu.matmul %125, %126, %cst_93 {dimension_numbers = #tpu.dot_dimension_numbers<[1], [1], [0], [0], [0, 0, 1, 0], [], []>} : vector<8x8xbf16>, vector<8x8xbf16>, vector<8x8xf32> -> vector<8x8xf32>
    %128 = arith.addf %127, %8 : vector<8x8xf32>
    %cst_94 = arith.constant dense<0xFF800000> : vector<8xf32>
    %129 = vector.multi_reduction <maximumf>, %128, %cst_94 [1] : vector<8x8xf32> to vector<8xf32>
    %130 = vector.shape_cast %129 : vector<8xf32> to vector<8x1xf32>
    %131 = vector.broadcast %130 : vector<8x1xf32> to vector<8x8xf32>
    %132 = arith.subf %128, %131 : vector<8x8xf32>
    %133 = math.exp %132 : vector<8x8xf32>
    %cst_95 = arith.constant dense<0.000000e+00> : vector<8xf32>
    %134 = vector.multi_reduction <add>, %133, %cst_95 [1] : vector<8x8xf32> to vector<8xf32>
    %135 = vector.shape_cast %134 : vector<8xf32> to vector<8x1xf32>
    %136 = tpu.reciprocal %135 {approx = true} : vector<8x1xf32> -> vector<8x1xf32>
    %137 = vector.broadcast %136 : vector<8x1xf32> to vector<8x8xf32>
    %138 = arith.mulf %133, %137 : vector<8x8xf32>
    %139 = arith.truncf %138 : vector<8x8xf32> to vector<8x8xbf16>
    %140 = arith.truncf %124 : vector<8x8xf32> to vector<8x8xbf16>
    %cst_96 = arith.constant dense<0.000000e+00> : vector<8x8xf32>
    %141 = tpu.matmul %139, %140, %cst_96 {dimension_numbers = #tpu.dot_dimension_numbers<[1], [0], [0], [1], [0, 0, 1, 1], [], []>} : vector<8x8xbf16>, vector<8x8xbf16>, vector<8x8xf32> -> vector<8x8xf32>
    %142 = arith.truncf %141 : vector<8x8xf32> to vector<8x8xbf16>
    %c2_97 = arith.constant 2 : index
    %c0_98 = arith.constant 0 : index
    %c0_99 = arith.constant 0 : index
    %143 = vector.load %arg12[%c2_97, %c0_98, %c0_99] : memref<4x8x32xbf16, #tpu.memory_space<vmem>>, vector<1x8x32xbf16>
    %144 = vector.shape_cast %143 : vector<1x8x32xbf16> to vector<8x32xbf16>
    %cst_100 = arith.constant dense<0.000000e+00> : vector<8x32xf32>
    %145 = tpu.matmul %142, %144, %cst_100 {dimension_numbers = #tpu.dot_dimension_numbers<[1], [0], [0], [1], [0, 0, 1, 1], [], []>} : vector<8x8xbf16>, vector<8x32xbf16>, vector<8x32xf32> -> vector<8x32xf32>
    %146 = arith.addf %101, %145 : vector<8x32xf32>
    %c3 = arith.constant 3 : index
    %c0_101 = arith.constant 0 : index
    %c0_102 = arith.constant 0 : index
    %147 = vector.load %arg6[%c3, %c0_101, %c0_102] : memref<4x32x8xbf16, #tpu.memory_space<vmem>>, vector<1x32x8xbf16>
    %148 = vector.shape_cast %147 : vector<1x32x8xbf16> to vector<32x8xbf16>
    %cst_103 = arith.constant dense<0.000000e+00> : vector<8x8xf32>
    %149 = tpu.matmul %1, %148, %cst_103 {dimension_numbers = #tpu.dot_dimension_numbers<[1], [0], [0], [1], [0, 0, 1, 1], [], []>} : vector<8x32xbf16>, vector<32x8xbf16>, vector<8x8xf32> -> vector<8x8xf32>
    %c3_104 = arith.constant 3 : index
    %c0_105 = arith.constant 0 : index
    %c0_106 = arith.constant 0 : index
    %150 = vector.load %arg7[%c3_104, %c0_105, %c0_106] : memref<4x1x8xf32, #tpu.memory_space<vmem>>, vector<1x1x8xf32>
    %151 = vector.shape_cast %150 : vector<1x1x8xf32> to vector<1x8xf32>
    %152 = vector.broadcast %151 : vector<1x8xf32> to vector<8x8xf32>
    %153 = arith.addf %149, %152 : vector<8x8xf32>
    %cst_107 = arith.constant 0.353553385 : f32
    %154 = vector.broadcast %cst_107 : f32 to vector<8x8xf32>
    %155 = arith.mulf %153, %154 : vector<8x8xf32>
    %c3_108 = arith.constant 3 : index
    %c0_109 = arith.constant 0 : index
    %c0_110 = arith.constant 0 : index
    %156 = vector.load %arg8[%c3_108, %c0_109, %c0_110] : memref<4x32x8xbf16, #tpu.memory_space<vmem>>, vector<1x32x8xbf16>
    %157 = vector.shape_cast %156 : vector<1x32x8xbf16> to vector<32x8xbf16>
    %cst_111 = arith.constant dense<0.000000e+00> : vector<8x8xf32>
    %158 = tpu.matmul %1, %157, %cst_111 {dimension_numbers = #tpu.dot_dimension_numbers<[1], [0], [0], [1], [0, 0, 1, 1], [], []>} : vector<8x32xbf16>, vector<32x8xbf16>, vector<8x8xf32> -> vector<8x8xf32>
    %c3_112 = arith.constant 3 : index
    %c0_113 = arith.constant 0 : index
    %c0_114 = arith.constant 0 : index
    %159 = vector.load %arg9[%c3_112, %c0_113, %c0_114] : memref<4x1x8xf32, #tpu.memory_space<vmem>>, vector<1x1x8xf32>
    %160 = vector.shape_cast %159 : vector<1x1x8xf32> to vector<1x8xf32>
    %161 = vector.broadcast %160 : vector<1x8xf32> to vector<8x8xf32>
    %162 = arith.addf %158, %161 : vector<8x8xf32>
    %c3_115 = arith.constant 3 : index
    %c0_116 = arith.constant 0 : index
    %c0_117 = arith.constant 0 : index
    %163 = vector.load %arg10[%c3_115, %c0_116, %c0_117] : memref<4x32x8xbf16, #tpu.memory_space<vmem>>, vector<1x32x8xbf16>
    %164 = vector.shape_cast %163 : vector<1x32x8xbf16> to vector<32x8xbf16>
    %cst_118 = arith.constant dense<0.000000e+00> : vector<8x8xf32>
    %165 = tpu.matmul %1, %164, %cst_118 {dimension_numbers = #tpu.dot_dimension_numbers<[1], [0], [0], [1], [0, 0, 1, 1], [], []>} : vector<8x32xbf16>, vector<32x8xbf16>, vector<8x8xf32> -> vector<8x8xf32>
    %c3_119 = arith.constant 3 : index
    %c0_120 = arith.constant 0 : index
    %c0_121 = arith.constant 0 : index
    %166 = vector.load %arg11[%c3_119, %c0_120, %c0_121] : memref<4x1x8xf32, #tpu.memory_space<vmem>>, vector<1x1x8xf32>
    %167 = vector.shape_cast %166 : vector<1x1x8xf32> to vector<1x8xf32>
    %168 = vector.broadcast %167 : vector<1x8xf32> to vector<8x8xf32>
    %169 = arith.addf %165, %168 : vector<8x8xf32>
    %170 = arith.truncf %155 : vector<8x8xf32> to vector<8x8xbf16>
    %171 = arith.truncf %162 : vector<8x8xf32> to vector<8x8xbf16>
    %cst_122 = arith.constant dense<0.000000e+00> : vector<8x8xf32>
    %172 = tpu.matmul %170, %171, %cst_122 {dimension_numbers = #tpu.dot_dimension_numbers<[1], [1], [0], [0], [0, 0, 1, 0], [], []>} : vector<8x8xbf16>, vector<8x8xbf16>, vector<8x8xf32> -> vector<8x8xf32>
    %173 = arith.addf %172, %8 : vector<8x8xf32>
    %cst_123 = arith.constant dense<0xFF800000> : vector<8xf32>
    %174 = vector.multi_reduction <maximumf>, %173, %cst_123 [1] : vector<8x8xf32> to vector<8xf32>
    %175 = vector.shape_cast %174 : vector<8xf32> to vector<8x1xf32>
    %176 = vector.broadcast %175 : vector<8x1xf32> to vector<8x8xf32>
    %177 = arith.subf %173, %176 : vector<8x8xf32>
    %178 = math.exp %177 : vector<8x8xf32>
    %cst_124 = arith.constant dense<0.000000e+00> : vector<8xf32>
    %179 = vector.multi_reduction <add>, %178, %cst_124 [1] : vector<8x8xf32> to vector<8xf32>
    %180 = vector.shape_cast %179 : vector<8xf32> to vector<8x1xf32>
    %181 = tpu.reciprocal %180 {approx = true} : vector<8x1xf32> -> vector<8x1xf32>
    %182 = vector.broadcast %181 : vector<8x1xf32> to vector<8x8xf32>
    %183 = arith.mulf %178, %182 : vector<8x8xf32>
    %184 = arith.truncf %183 : vector<8x8xf32> to vector<8x8xbf16>
    %185 = arith.truncf %169 : vector<8x8xf32> to vector<8x8xbf16>
    %cst_125 = arith.constant dense<0.000000e+00> : vector<8x8xf32>
    %186 = tpu.matmul %184, %185, %cst_125 {dimension_numbers = #tpu.dot_dimension_numbers<[1], [0], [0], [1], [0, 0, 1, 1], [], []>} : vector<8x8xbf16>, vector<8x8xbf16>, vector<8x8xf32> -> vector<8x8xf32>
    %187 = arith.truncf %186 : vector<8x8xf32> to vector<8x8xbf16>
    %c3_126 = arith.constant 3 : index
    %c0_127 = arith.constant 0 : index
    %c0_128 = arith.constant 0 : index
    %188 = vector.load %arg12[%c3_126, %c0_127, %c0_128] : memref<4x8x32xbf16, #tpu.memory_space<vmem>>, vector<1x8x32xbf16>
    %189 = vector.shape_cast %188 : vector<1x8x32xbf16> to vector<8x32xbf16>
    %cst_129 = arith.constant dense<0.000000e+00> : vector<8x32xf32>
    %190 = tpu.matmul %187, %189, %cst_129 {dimension_numbers = #tpu.dot_dimension_numbers<[1], [0], [0], [1], [0, 0, 1, 1], [], []>} : vector<8x8xbf16>, vector<8x32xbf16>, vector<8x32xf32> -> vector<8x32xf32>
    %191 = arith.addf %146, %190 : vector<8x32xf32>
    %c0_130 = arith.constant 0 : index
    %c0_131 = arith.constant 0 : index
    %192 = vector.load %arg13[%c0_130, %c0_131] : memref<1x32xf32, #tpu.memory_space<vmem>>, vector<1x32xf32>
    %193 = vector.broadcast %192 : vector<1x32xf32> to vector<8x32xf32>
    %194 = arith.addf %191, %193 : vector<8x32xf32>
    %195 = arith.extf %1 : vector<8x32xbf16> to vector<8x32xf32>
    %196 = arith.addf %194, %195 : vector<8x32xf32>
    %c0_132 = arith.constant 0 : index
    %c0_133 = arith.constant 0 : index
    %197 = vector.load %arg14[%c0_132, %c0_133] : memref<1x32xf32, #tpu.memory_space<vmem>>, vector<1x32xf32>
    %c0_134 = arith.constant 0 : index
    %c0_135 = arith.constant 0 : index
    %198 = vector.load %arg15[%c0_134, %c0_135] : memref<1x32xf32, #tpu.memory_space<vmem>>, vector<1x32xf32>
    %cst_136 = arith.constant dense<0.000000e+00> : vector<8xf32>
    %199 = vector.multi_reduction <add>, %196, %cst_136 [1] : vector<8x32xf32> to vector<8xf32>
    %200 = vector.shape_cast %199 : vector<8xf32> to vector<8x1xf32>
    %cst_137 = arith.constant 3.200000e+01 : f32
    %201 = vector.broadcast %cst_137 : f32 to vector<8x1xf32>
    %202 = arith.divf %200, %201 : vector<8x1xf32>
    %203 = vector.broadcast %202 : vector<8x1xf32> to vector<8x32xf32>
    %204 = arith.subf %196, %203 : vector<8x32xf32>
    %205 = arith.mulf %204, %204 : vector<8x32xf32>
    %cst_138 = arith.constant dense<0.000000e+00> : vector<8xf32>
    %206 = vector.multi_reduction <add>, %205, %cst_138 [1] : vector<8x32xf32> to vector<8xf32>
    %207 = vector.shape_cast %206 : vector<8xf32> to vector<8x1xf32>
    %cst_139 = arith.constant 3.200000e+01 : f32
    %208 = vector.broadcast %cst_139 : f32 to vector<8x1xf32>
    %209 = arith.divf %207, %208 : vector<8x1xf32>
    %cst_140 = arith.constant 9.99999974E-6 : f32
    %210 = vector.broadcast %cst_140 : f32 to vector<8x1xf32>
    %211 = arith.addf %209, %210 : vector<8x1xf32>
    %212 = math.rsqrt %211 : vector<8x1xf32>
    %213 = vector.broadcast %212 : vector<8x1xf32> to vector<8x32xf32>
    %214 = arith.mulf %204, %213 : vector<8x32xf32>
    %215 = vector.broadcast %197 : vector<1x32xf32> to vector<8x32xf32>
    %216 = arith.mulf %214, %215 : vector<8x32xf32>
    %217 = vector.broadcast %198 : vector<1x32xf32> to vector<8x32xf32>
    %218 = arith.addf %216, %217 : vector<8x32xf32>
    %219 = arith.truncf %218 : vector<8x32xf32> to vector<8x32xbf16>
    %cst_141 = arith.constant 0.000000e+00 : f32
    %220 = vector.broadcast %cst_141 : f32 to vector<8x32xf32>
    %c0_142 = arith.constant 0 : index
    %c0_143 = arith.constant 0 : index
    %c0_144 = arith.constant 0 : index
    %221 = vector.load %arg16[%c0_142, %c0_143, %c0_144] : memref<4x32x8xbf16, #tpu.memory_space<vmem>>, vector<1x32x8xbf16>
    %222 = vector.shape_cast %221 : vector<1x32x8xbf16> to vector<32x8xbf16>
    %cst_145 = arith.constant dense<0.000000e+00> : vector<8x8xf32>
    %223 = tpu.matmul %219, %222, %cst_145 {dimension_numbers = #tpu.dot_dimension_numbers<[1], [0], [0], [1], [0, 0, 1, 1], [], []>} : vector<8x32xbf16>, vector<32x8xbf16>, vector<8x8xf32> -> vector<8x8xf32>
    %c0_146 = arith.constant 0 : index
    %c0_147 = arith.constant 0 : index
    %c0_148 = arith.constant 0 : index
    %224 = vector.load %arg17[%c0_146, %c0_147, %c0_148] : memref<4x1x8xf32, #tpu.memory_space<vmem>>, vector<1x1x8xf32>
    %225 = vector.shape_cast %224 : vector<1x1x8xf32> to vector<1x8xf32>
    %226 = vector.broadcast %225 : vector<1x8xf32> to vector<8x8xf32>
    %227 = arith.addf %223, %226 : vector<8x8xf32>
    %cst_149 = arith.constant 0.353553385 : f32
    %228 = vector.broadcast %cst_149 : f32 to vector<8x8xf32>
    %229 = arith.mulf %227, %228 : vector<8x8xf32>
    %c0_150 = arith.constant 0 : index
    %c0_151 = arith.constant 0 : index
    %c0_152 = arith.constant 0 : index
    %230 = vector.load %arg18[%c0_150, %c0_151, %c0_152] : memref<4x32x8xbf16, #tpu.memory_space<vmem>>, vector<1x32x8xbf16>
    %231 = vector.shape_cast %230 : vector<1x32x8xbf16> to vector<32x8xbf16>
    %cst_153 = arith.constant dense<0.000000e+00> : vector<10x8xf32>
    %232 = tpu.matmul %3, %231, %cst_153 {dimension_numbers = #tpu.dot_dimension_numbers<[1], [0], [0], [1], [0, 0, 1, 1], [], []>} : vector<10x32xbf16>, vector<32x8xbf16>, vector<10x8xf32> -> vector<10x8xf32>
    %c0_154 = arith.constant 0 : index
    %c0_155 = arith.constant 0 : index
    %c0_156 = arith.constant 0 : index
    %233 = vector.load %arg19[%c0_154, %c0_155, %c0_156] : memref<4x1x8xf32, #tpu.memory_space<vmem>>, vector<1x1x8xf32>
    %234 = vector.shape_cast %233 : vector<1x1x8xf32> to vector<1x8xf32>
    %235 = vector.broadcast %234 : vector<1x8xf32> to vector<10x8xf32>
    %236 = arith.addf %232, %235 : vector<10x8xf32>
    %c0_157 = arith.constant 0 : index
    %c0_158 = arith.constant 0 : index
    %c0_159 = arith.constant 0 : index
    %237 = vector.load %arg20[%c0_157, %c0_158, %c0_159] : memref<4x32x8xbf16, #tpu.memory_space<vmem>>, vector<1x32x8xbf16>
    %238 = vector.shape_cast %237 : vector<1x32x8xbf16> to vector<32x8xbf16>
    %cst_160 = arith.constant dense<0.000000e+00> : vector<10x8xf32>
    %239 = tpu.matmul %3, %238, %cst_160 {dimension_numbers = #tpu.dot_dimension_numbers<[1], [0], [0], [1], [0, 0, 1, 1], [], []>} : vector<10x32xbf16>, vector<32x8xbf16>, vector<10x8xf32> -> vector<10x8xf32>
    %c0_161 = arith.constant 0 : index
    %c0_162 = arith.constant 0 : index
    %c0_163 = arith.constant 0 : index
    %240 = vector.load %arg21[%c0_161, %c0_162, %c0_163] : memref<4x1x8xf32, #tpu.memory_space<vmem>>, vector<1x1x8xf32>
    %241 = vector.shape_cast %240 : vector<1x1x8xf32> to vector<1x8xf32>
    %242 = vector.broadcast %241 : vector<1x8xf32> to vector<10x8xf32>
    %243 = arith.addf %239, %242 : vector<10x8xf32>
    %244 = arith.truncf %229 : vector<8x8xf32> to vector<8x8xbf16>
    %245 = arith.truncf %236 : vector<10x8xf32> to vector<10x8xbf16>
    %cst_164 = arith.constant dense<0.000000e+00> : vector<8x10xf32>
    %246 = tpu.matmul %244, %245, %cst_164 {dimension_numbers = #tpu.dot_dimension_numbers<[1], [1], [0], [0], [0, 0, 1, 0], [], []>} : vector<8x8xbf16>, vector<10x8xbf16>, vector<8x10xf32> -> vector<8x10xf32>
    %247 = vector.broadcast %10 : vector<1x10xf32> to vector<8x10xf32>
    %248 = arith.addf %246, %247 : vector<8x10xf32>
    %cst_165 = arith.constant dense<0xFF800000> : vector<8xf32>
    %249 = vector.multi_reduction <maximumf>, %248, %cst_165 [1] : vector<8x10xf32> to vector<8xf32>
    %250 = vector.shape_cast %249 : vector<8xf32> to vector<8x1xf32>
    %251 = vector.broadcast %250 : vector<8x1xf32> to vector<8x10xf32>
    %252 = arith.subf %248, %251 : vector<8x10xf32>
    %253 = math.exp %252 : vector<8x10xf32>
    %cst_166 = arith.constant dense<0.000000e+00> : vector<8xf32>
    %254 = vector.multi_reduction <add>, %253, %cst_166 [1] : vector<8x10xf32> to vector<8xf32>
    %255 = vector.shape_cast %254 : vector<8xf32> to vector<8x1xf32>
    %256 = tpu.reciprocal %255 {approx = true} : vector<8x1xf32> -> vector<8x1xf32>
    %257 = vector.broadcast %256 : vector<8x1xf32> to vector<8x10xf32>
    %258 = arith.mulf %253, %257 : vector<8x10xf32>
    %259 = arith.truncf %258 : vector<8x10xf32> to vector<8x10xbf16>
    %260 = arith.truncf %243 : vector<10x8xf32> to vector<10x8xbf16>
    %cst_167 = arith.constant dense<0.000000e+00> : vector<8x8xf32>
    %261 = tpu.matmul %259, %260, %cst_167 {dimension_numbers = #tpu.dot_dimension_numbers<[1], [0], [0], [1], [0, 0, 1, 1], [], []>} : vector<8x10xbf16>, vector<10x8xbf16>, vector<8x8xf32> -> vector<8x8xf32>
    %262 = arith.truncf %261 : vector<8x8xf32> to vector<8x8xbf16>
    %c0_168 = arith.constant 0 : index
    %c0_169 = arith.constant 0 : index
    %c0_170 = arith.constant 0 : index
    %263 = vector.load %arg22[%c0_168, %c0_169, %c0_170] : memref<4x8x32xbf16, #tpu.memory_space<vmem>>, vector<1x8x32xbf16>
    %264 = vector.shape_cast %263 : vector<1x8x32xbf16> to vector<8x32xbf16>
    %cst_171 = arith.constant dense<0.000000e+00> : vector<8x32xf32>
    %265 = tpu.matmul %262, %264, %cst_171 {dimension_numbers = #tpu.dot_dimension_numbers<[1], [0], [0], [1], [0, 0, 1, 1], [], []>} : vector<8x8xbf16>, vector<8x32xbf16>, vector<8x32xf32> -> vector<8x32xf32>
    %266 = arith.addf %220, %265 : vector<8x32xf32>
    %c1_172 = arith.constant 1 : index
    %c0_173 = arith.constant 0 : index
    %c0_174 = arith.constant 0 : index
    %267 = vector.load %arg16[%c1_172, %c0_173, %c0_174] : memref<4x32x8xbf16, #tpu.memory_space<vmem>>, vector<1x32x8xbf16>
    %268 = vector.shape_cast %267 : vector<1x32x8xbf16> to vector<32x8xbf16>
    %cst_175 = arith.constant dense<0.000000e+00> : vector<8x8xf32>
    %269 = tpu.matmul %219, %268, %cst_175 {dimension_numbers = #tpu.dot_dimension_numbers<[1], [0], [0], [1], [0, 0, 1, 1], [], []>} : vector<8x32xbf16>, vector<32x8xbf16>, vector<8x8xf32> -> vector<8x8xf32>
    %c1_176 = arith.constant 1 : index
    %c0_177 = arith.constant 0 : index
    %c0_178 = arith.constant 0 : index
    %270 = vector.load %arg17[%c1_176, %c0_177, %c0_178] : memref<4x1x8xf32, #tpu.memory_space<vmem>>, vector<1x1x8xf32>
    %271 = vector.shape_cast %270 : vector<1x1x8xf32> to vector<1x8xf32>
    %272 = vector.broadcast %271 : vector<1x8xf32> to vector<8x8xf32>
    %273 = arith.addf %269, %272 : vector<8x8xf32>
    %cst_179 = arith.constant 0.353553385 : f32
    %274 = vector.broadcast %cst_179 : f32 to vector<8x8xf32>
    %275 = arith.mulf %273, %274 : vector<8x8xf32>
    %c1_180 = arith.constant 1 : index
    %c0_181 = arith.constant 0 : index
    %c0_182 = arith.constant 0 : index
    %276 = vector.load %arg18[%c1_180, %c0_181, %c0_182] : memref<4x32x8xbf16, #tpu.memory_space<vmem>>, vector<1x32x8xbf16>
    %277 = vector.shape_cast %276 : vector<1x32x8xbf16> to vector<32x8xbf16>
    %cst_183 = arith.constant dense<0.000000e+00> : vector<10x8xf32>
    %278 = tpu.matmul %3, %277, %cst_183 {dimension_numbers = #tpu.dot_dimension_numbers<[1], [0], [0], [1], [0, 0, 1, 1], [], []>} : vector<10x32xbf16>, vector<32x8xbf16>, vector<10x8xf32> -> vector<10x8xf32>
    %c1_184 = arith.constant 1 : index
    %c0_185 = arith.constant 0 : index
    %c0_186 = arith.constant 0 : index
    %279 = vector.load %arg19[%c1_184, %c0_185, %c0_186] : memref<4x1x8xf32, #tpu.memory_space<vmem>>, vector<1x1x8xf32>
    %280 = vector.shape_cast %279 : vector<1x1x8xf32> to vector<1x8xf32>
    %281 = vector.broadcast %280 : vector<1x8xf32> to vector<10x8xf32>
    %282 = arith.addf %278, %281 : vector<10x8xf32>
    %c1_187 = arith.constant 1 : index
    %c0_188 = arith.constant 0 : index
    %c0_189 = arith.constant 0 : index
    %283 = vector.load %arg20[%c1_187, %c0_188, %c0_189] : memref<4x32x8xbf16, #tpu.memory_space<vmem>>, vector<1x32x8xbf16>
    %284 = vector.shape_cast %283 : vector<1x32x8xbf16> to vector<32x8xbf16>
    %cst_190 = arith.constant dense<0.000000e+00> : vector<10x8xf32>
    %285 = tpu.matmul %3, %284, %cst_190 {dimension_numbers = #tpu.dot_dimension_numbers<[1], [0], [0], [1], [0, 0, 1, 1], [], []>} : vector<10x32xbf16>, vector<32x8xbf16>, vector<10x8xf32> -> vector<10x8xf32>
    %c1_191 = arith.constant 1 : index
    %c0_192 = arith.constant 0 : index
    %c0_193 = arith.constant 0 : index
    %286 = vector.load %arg21[%c1_191, %c0_192, %c0_193] : memref<4x1x8xf32, #tpu.memory_space<vmem>>, vector<1x1x8xf32>
    %287 = vector.shape_cast %286 : vector<1x1x8xf32> to vector<1x8xf32>
    %288 = vector.broadcast %287 : vector<1x8xf32> to vector<10x8xf32>
    %289 = arith.addf %285, %288 : vector<10x8xf32>
    %290 = arith.truncf %275 : vector<8x8xf32> to vector<8x8xbf16>
    %291 = arith.truncf %282 : vector<10x8xf32> to vector<10x8xbf16>
    %cst_194 = arith.constant dense<0.000000e+00> : vector<8x10xf32>
    %292 = tpu.matmul %290, %291, %cst_194 {dimension_numbers = #tpu.dot_dimension_numbers<[1], [1], [0], [0], [0, 0, 1, 0], [], []>} : vector<8x8xbf16>, vector<10x8xbf16>, vector<8x10xf32> -> vector<8x10xf32>
    %293 = vector.broadcast %10 : vector<1x10xf32> to vector<8x10xf32>
    %294 = arith.addf %292, %293 : vector<8x10xf32>
    %cst_195 = arith.constant dense<0xFF800000> : vector<8xf32>
    %295 = vector.multi_reduction <maximumf>, %294, %cst_195 [1] : vector<8x10xf32> to vector<8xf32>
    %296 = vector.shape_cast %295 : vector<8xf32> to vector<8x1xf32>
    %297 = vector.broadcast %296 : vector<8x1xf32> to vector<8x10xf32>
    %298 = arith.subf %294, %297 : vector<8x10xf32>
    %299 = math.exp %298 : vector<8x10xf32>
    %cst_196 = arith.constant dense<0.000000e+00> : vector<8xf32>
    %300 = vector.multi_reduction <add>, %299, %cst_196 [1] : vector<8x10xf32> to vector<8xf32>
    %301 = vector.shape_cast %300 : vector<8xf32> to vector<8x1xf32>
    %302 = tpu.reciprocal %301 {approx = true} : vector<8x1xf32> -> vector<8x1xf32>
    %303 = vector.broadcast %302 : vector<8x1xf32> to vector<8x10xf32>
    %304 = arith.mulf %299, %303 : vector<8x10xf32>
    %305 = arith.truncf %304 : vector<8x10xf32> to vector<8x10xbf16>
    %306 = arith.truncf %289 : vector<10x8xf32> to vector<10x8xbf16>
    %cst_197 = arith.constant dense<0.000000e+00> : vector<8x8xf32>
    %307 = tpu.matmul %305, %306, %cst_197 {dimension_numbers = #tpu.dot_dimension_numbers<[1], [0], [0], [1], [0, 0, 1, 1], [], []>} : vector<8x10xbf16>, vector<10x8xbf16>, vector<8x8xf32> -> vector<8x8xf32>
    %308 = arith.truncf %307 : vector<8x8xf32> to vector<8x8xbf16>
    %c1_198 = arith.constant 1 : index
    %c0_199 = arith.constant 0 : index
    %c0_200 = arith.constant 0 : index
    %309 = vector.load %arg22[%c1_198, %c0_199, %c0_200] : memref<4x8x32xbf16, #tpu.memory_space<vmem>>, vector<1x8x32xbf16>
    %310 = vector.shape_cast %309 : vector<1x8x32xbf16> to vector<8x32xbf16>
    %cst_201 = arith.constant dense<0.000000e+00> : vector<8x32xf32>
    %311 = tpu.matmul %308, %310, %cst_201 {dimension_numbers = #tpu.dot_dimension_numbers<[1], [0], [0], [1], [0, 0, 1, 1], [], []>} : vector<8x8xbf16>, vector<8x32xbf16>, vector<8x32xf32> -> vector<8x32xf32>
    %312 = arith.addf %266, %311 : vector<8x32xf32>
    %c2_202 = arith.constant 2 : index
    %c0_203 = arith.constant 0 : index
    %c0_204 = arith.constant 0 : index
    %313 = vector.load %arg16[%c2_202, %c0_203, %c0_204] : memref<4x32x8xbf16, #tpu.memory_space<vmem>>, vector<1x32x8xbf16>
    %314 = vector.shape_cast %313 : vector<1x32x8xbf16> to vector<32x8xbf16>
    %cst_205 = arith.constant dense<0.000000e+00> : vector<8x8xf32>
    %315 = tpu.matmul %219, %314, %cst_205 {dimension_numbers = #tpu.dot_dimension_numbers<[1], [0], [0], [1], [0, 0, 1, 1], [], []>} : vector<8x32xbf16>, vector<32x8xbf16>, vector<8x8xf32> -> vector<8x8xf32>
    %c2_206 = arith.constant 2 : index
    %c0_207 = arith.constant 0 : index
    %c0_208 = arith.constant 0 : index
    %316 = vector.load %arg17[%c2_206, %c0_207, %c0_208] : memref<4x1x8xf32, #tpu.memory_space<vmem>>, vector<1x1x8xf32>
    %317 = vector.shape_cast %316 : vector<1x1x8xf32> to vector<1x8xf32>
    %318 = vector.broadcast %317 : vector<1x8xf32> to vector<8x8xf32>
    %319 = arith.addf %315, %318 : vector<8x8xf32>
    %cst_209 = arith.constant 0.353553385 : f32
    %320 = vector.broadcast %cst_209 : f32 to vector<8x8xf32>
    %321 = arith.mulf %319, %320 : vector<8x8xf32>
    %c2_210 = arith.constant 2 : index
    %c0_211 = arith.constant 0 : index
    %c0_212 = arith.constant 0 : index
    %322 = vector.load %arg18[%c2_210, %c0_211, %c0_212] : memref<4x32x8xbf16, #tpu.memory_space<vmem>>, vector<1x32x8xbf16>
    %323 = vector.shape_cast %322 : vector<1x32x8xbf16> to vector<32x8xbf16>
    %cst_213 = arith.constant dense<0.000000e+00> : vector<10x8xf32>
    %324 = tpu.matmul %3, %323, %cst_213 {dimension_numbers = #tpu.dot_dimension_numbers<[1], [0], [0], [1], [0, 0, 1, 1], [], []>} : vector<10x32xbf16>, vector<32x8xbf16>, vector<10x8xf32> -> vector<10x8xf32>
    %c2_214 = arith.constant 2 : index
    %c0_215 = arith.constant 0 : index
    %c0_216 = arith.constant 0 : index
    %325 = vector.load %arg19[%c2_214, %c0_215, %c0_216] : memref<4x1x8xf32, #tpu.memory_space<vmem>>, vector<1x1x8xf32>
    %326 = vector.shape_cast %325 : vector<1x1x8xf32> to vector<1x8xf32>
    %327 = vector.broadcast %326 : vector<1x8xf32> to vector<10x8xf32>
    %328 = arith.addf %324, %327 : vector<10x8xf32>
    %c2_217 = arith.constant 2 : index
    %c0_218 = arith.constant 0 : index
    %c0_219 = arith.constant 0 : index
    %329 = vector.load %arg20[%c2_217, %c0_218, %c0_219] : memref<4x32x8xbf16, #tpu.memory_space<vmem>>, vector<1x32x8xbf16>
    %330 = vector.shape_cast %329 : vector<1x32x8xbf16> to vector<32x8xbf16>
    %cst_220 = arith.constant dense<0.000000e+00> : vector<10x8xf32>
    %331 = tpu.matmul %3, %330, %cst_220 {dimension_numbers = #tpu.dot_dimension_numbers<[1], [0], [0], [1], [0, 0, 1, 1], [], []>} : vector<10x32xbf16>, vector<32x8xbf16>, vector<10x8xf32> -> vector<10x8xf32>
    %c2_221 = arith.constant 2 : index
    %c0_222 = arith.constant 0 : index
    %c0_223 = arith.constant 0 : index
    %332 = vector.load %arg21[%c2_221, %c0_222, %c0_223] : memref<4x1x8xf32, #tpu.memory_space<vmem>>, vector<1x1x8xf32>
    %333 = vector.shape_cast %332 : vector<1x1x8xf32> to vector<1x8xf32>
    %334 = vector.broadcast %333 : vector<1x8xf32> to vector<10x8xf32>
    %335 = arith.addf %331, %334 : vector<10x8xf32>
    %336 = arith.truncf %321 : vector<8x8xf32> to vector<8x8xbf16>
    %337 = arith.truncf %328 : vector<10x8xf32> to vector<10x8xbf16>
    %cst_224 = arith.constant dense<0.000000e+00> : vector<8x10xf32>
    %338 = tpu.matmul %336, %337, %cst_224 {dimension_numbers = #tpu.dot_dimension_numbers<[1], [1], [0], [0], [0, 0, 1, 0], [], []>} : vector<8x8xbf16>, vector<10x8xbf16>, vector<8x10xf32> -> vector<8x10xf32>
    %339 = vector.broadcast %10 : vector<1x10xf32> to vector<8x10xf32>
    %340 = arith.addf %338, %339 : vector<8x10xf32>
    %cst_225 = arith.constant dense<0xFF800000> : vector<8xf32>
    %341 = vector.multi_reduction <maximumf>, %340, %cst_225 [1] : vector<8x10xf32> to vector<8xf32>
    %342 = vector.shape_cast %341 : vector<8xf32> to vector<8x1xf32>
    %343 = vector.broadcast %342 : vector<8x1xf32> to vector<8x10xf32>
    %344 = arith.subf %340, %343 : vector<8x10xf32>
    %345 = math.exp %344 : vector<8x10xf32>
    %cst_226 = arith.constant dense<0.000000e+00> : vector<8xf32>
    %346 = vector.multi_reduction <add>, %345, %cst_226 [1] : vector<8x10xf32> to vector<8xf32>
    %347 = vector.shape_cast %346 : vector<8xf32> to vector<8x1xf32>
    %348 = tpu.reciprocal %347 {approx = true} : vector<8x1xf32> -> vector<8x1xf32>
    %349 = vector.broadcast %348 : vector<8x1xf32> to vector<8x10xf32>
    %350 = arith.mulf %345, %349 : vector<8x10xf32>
    %351 = arith.truncf %350 : vector<8x10xf32> to vector<8x10xbf16>
    %352 = arith.truncf %335 : vector<10x8xf32> to vector<10x8xbf16>
    %cst_227 = arith.constant dense<0.000000e+00> : vector<8x8xf32>
    %353 = tpu.matmul %351, %352, %cst_227 {dimension_numbers = #tpu.dot_dimension_numbers<[1], [0], [0], [1], [0, 0, 1, 1], [], []>} : vector<8x10xbf16>, vector<10x8xbf16>, vector<8x8xf32> -> vector<8x8xf32>
    %354 = arith.truncf %353 : vector<8x8xf32> to vector<8x8xbf16>
    %c2_228 = arith.constant 2 : index
    %c0_229 = arith.constant 0 : index
    %c0_230 = arith.constant 0 : index
    %355 = vector.load %arg22[%c2_228, %c0_229, %c0_230] : memref<4x8x32xbf16, #tpu.memory_space<vmem>>, vector<1x8x32xbf16>
    %356 = vector.shape_cast %355 : vector<1x8x32xbf16> to vector<8x32xbf16>
    %cst_231 = arith.constant dense<0.000000e+00> : vector<8x32xf32>
    %357 = tpu.matmul %354, %356, %cst_231 {dimension_numbers = #tpu.dot_dimension_numbers<[1], [0], [0], [1], [0, 0, 1, 1], [], []>} : vector<8x8xbf16>, vector<8x32xbf16>, vector<8x32xf32> -> vector<8x32xf32>
    %358 = arith.addf %312, %357 : vector<8x32xf32>
    %c3_232 = arith.constant 3 : index
    %c0_233 = arith.constant 0 : index
    %c0_234 = arith.constant 0 : index
    %359 = vector.load %arg16[%c3_232, %c0_233, %c0_234] : memref<4x32x8xbf16, #tpu.memory_space<vmem>>, vector<1x32x8xbf16>
    %360 = vector.shape_cast %359 : vector<1x32x8xbf16> to vector<32x8xbf16>
    %cst_235 = arith.constant dense<0.000000e+00> : vector<8x8xf32>
    %361 = tpu.matmul %219, %360, %cst_235 {dimension_numbers = #tpu.dot_dimension_numbers<[1], [0], [0], [1], [0, 0, 1, 1], [], []>} : vector<8x32xbf16>, vector<32x8xbf16>, vector<8x8xf32> -> vector<8x8xf32>
    %c3_236 = arith.constant 3 : index
    %c0_237 = arith.constant 0 : index
    %c0_238 = arith.constant 0 : index
    %362 = vector.load %arg17[%c3_236, %c0_237, %c0_238] : memref<4x1x8xf32, #tpu.memory_space<vmem>>, vector<1x1x8xf32>
    %363 = vector.shape_cast %362 : vector<1x1x8xf32> to vector<1x8xf32>
    %364 = vector.broadcast %363 : vector<1x8xf32> to vector<8x8xf32>
    %365 = arith.addf %361, %364 : vector<8x8xf32>
    %cst_239 = arith.constant 0.353553385 : f32
    %366 = vector.broadcast %cst_239 : f32 to vector<8x8xf32>
    %367 = arith.mulf %365, %366 : vector<8x8xf32>
    %c3_240 = arith.constant 3 : index
    %c0_241 = arith.constant 0 : index
    %c0_242 = arith.constant 0 : index
    %368 = vector.load %arg18[%c3_240, %c0_241, %c0_242] : memref<4x32x8xbf16, #tpu.memory_space<vmem>>, vector<1x32x8xbf16>
    %369 = vector.shape_cast %368 : vector<1x32x8xbf16> to vector<32x8xbf16>
    %cst_243 = arith.constant dense<0.000000e+00> : vector<10x8xf32>
    %370 = tpu.matmul %3, %369, %cst_243 {dimension_numbers = #tpu.dot_dimension_numbers<[1], [0], [0], [1], [0, 0, 1, 1], [], []>} : vector<10x32xbf16>, vector<32x8xbf16>, vector<10x8xf32> -> vector<10x8xf32>
    %c3_244 = arith.constant 3 : index
    %c0_245 = arith.constant 0 : index
    %c0_246 = arith.constant 0 : index
    %371 = vector.load %arg19[%c3_244, %c0_245, %c0_246] : memref<4x1x8xf32, #tpu.memory_space<vmem>>, vector<1x1x8xf32>
    %372 = vector.shape_cast %371 : vector<1x1x8xf32> to vector<1x8xf32>
    %373 = vector.broadcast %372 : vector<1x8xf32> to vector<10x8xf32>
    %374 = arith.addf %370, %373 : vector<10x8xf32>
    %c3_247 = arith.constant 3 : index
    %c0_248 = arith.constant 0 : index
    %c0_249 = arith.constant 0 : index
    %375 = vector.load %arg20[%c3_247, %c0_248, %c0_249] : memref<4x32x8xbf16, #tpu.memory_space<vmem>>, vector<1x32x8xbf16>
    %376 = vector.shape_cast %375 : vector<1x32x8xbf16> to vector<32x8xbf16>
    %cst_250 = arith.constant dense<0.000000e+00> : vector<10x8xf32>
    %377 = tpu.matmul %3, %376, %cst_250 {dimension_numbers = #tpu.dot_dimension_numbers<[1], [0], [0], [1], [0, 0, 1, 1], [], []>} : vector<10x32xbf16>, vector<32x8xbf16>, vector<10x8xf32> -> vector<10x8xf32>
    %c3_251 = arith.constant 3 : index
    %c0_252 = arith.constant 0 : index
    %c0_253 = arith.constant 0 : index
    %378 = vector.load %arg21[%c3_251, %c0_252, %c0_253] : memref<4x1x8xf32, #tpu.memory_space<vmem>>, vector<1x1x8xf32>
    %379 = vector.shape_cast %378 : vector<1x1x8xf32> to vector<1x8xf32>
    %380 = vector.broadcast %379 : vector<1x8xf32> to vector<10x8xf32>
    %381 = arith.addf %377, %380 : vector<10x8xf32>
    %382 = arith.truncf %367 : vector<8x8xf32> to vector<8x8xbf16>
    %383 = arith.truncf %374 : vector<10x8xf32> to vector<10x8xbf16>
    %cst_254 = arith.constant dense<0.000000e+00> : vector<8x10xf32>
    %384 = tpu.matmul %382, %383, %cst_254 {dimension_numbers = #tpu.dot_dimension_numbers<[1], [1], [0], [0], [0, 0, 1, 0], [], []>} : vector<8x8xbf16>, vector<10x8xbf16>, vector<8x10xf32> -> vector<8x10xf32>
    %385 = vector.broadcast %10 : vector<1x10xf32> to vector<8x10xf32>
    %386 = arith.addf %384, %385 : vector<8x10xf32>
    %cst_255 = arith.constant dense<0xFF800000> : vector<8xf32>
    %387 = vector.multi_reduction <maximumf>, %386, %cst_255 [1] : vector<8x10xf32> to vector<8xf32>
    %388 = vector.shape_cast %387 : vector<8xf32> to vector<8x1xf32>
    %389 = vector.broadcast %388 : vector<8x1xf32> to vector<8x10xf32>
    %390 = arith.subf %386, %389 : vector<8x10xf32>
    %391 = math.exp %390 : vector<8x10xf32>
    %cst_256 = arith.constant dense<0.000000e+00> : vector<8xf32>
    %392 = vector.multi_reduction <add>, %391, %cst_256 [1] : vector<8x10xf32> to vector<8xf32>
    %393 = vector.shape_cast %392 : vector<8xf32> to vector<8x1xf32>
    %394 = tpu.reciprocal %393 {approx = true} : vector<8x1xf32> -> vector<8x1xf32>
    %395 = vector.broadcast %394 : vector<8x1xf32> to vector<8x10xf32>
    %396 = arith.mulf %391, %395 : vector<8x10xf32>
    %397 = arith.truncf %396 : vector<8x10xf32> to vector<8x10xbf16>
    %398 = arith.truncf %381 : vector<10x8xf32> to vector<10x8xbf16>
    %cst_257 = arith.constant dense<0.000000e+00> : vector<8x8xf32>
    %399 = tpu.matmul %397, %398, %cst_257 {dimension_numbers = #tpu.dot_dimension_numbers<[1], [0], [0], [1], [0, 0, 1, 1], [], []>} : vector<8x10xbf16>, vector<10x8xbf16>, vector<8x8xf32> -> vector<8x8xf32>
    %400 = arith.truncf %399 : vector<8x8xf32> to vector<8x8xbf16>
    %c3_258 = arith.constant 3 : index
    %c0_259 = arith.constant 0 : index
    %c0_260 = arith.constant 0 : index
    %401 = vector.load %arg22[%c3_258, %c0_259, %c0_260] : memref<4x8x32xbf16, #tpu.memory_space<vmem>>, vector<1x8x32xbf16>
    %402 = vector.shape_cast %401 : vector<1x8x32xbf16> to vector<8x32xbf16>
    %cst_261 = arith.constant dense<0.000000e+00> : vector<8x32xf32>
    %403 = tpu.matmul %400, %402, %cst_261 {dimension_numbers = #tpu.dot_dimension_numbers<[1], [0], [0], [1], [0, 0, 1, 1], [], []>} : vector<8x8xbf16>, vector<8x32xbf16>, vector<8x32xf32> -> vector<8x32xf32>
    %404 = arith.addf %358, %403 : vector<8x32xf32>
    %c0_262 = arith.constant 0 : index
    %c0_263 = arith.constant 0 : index
    %405 = vector.load %arg23[%c0_262, %c0_263] : memref<1x32xf32, #tpu.memory_space<vmem>>, vector<1x32xf32>
    %406 = vector.broadcast %405 : vector<1x32xf32> to vector<8x32xf32>
    %407 = arith.addf %404, %406 : vector<8x32xf32>
    %408 = arith.addf %407, %218 : vector<8x32xf32>
    %c0_264 = arith.constant 0 : index
    %c0_265 = arith.constant 0 : index
    %409 = vector.load %arg24[%c0_264, %c0_265] : memref<1x32xf32, #tpu.memory_space<vmem>>, vector<1x32xf32>
    %c0_266 = arith.constant 0 : index
    %c0_267 = arith.constant 0 : index
    %410 = vector.load %arg25[%c0_266, %c0_267] : memref<1x32xf32, #tpu.memory_space<vmem>>, vector<1x32xf32>
    %cst_268 = arith.constant dense<0.000000e+00> : vector<8xf32>
    %411 = vector.multi_reduction <add>, %408, %cst_268 [1] : vector<8x32xf32> to vector<8xf32>
    %412 = vector.shape_cast %411 : vector<8xf32> to vector<8x1xf32>
    %cst_269 = arith.constant 3.200000e+01 : f32
    %413 = vector.broadcast %cst_269 : f32 to vector<8x1xf32>
    %414 = arith.divf %412, %413 : vector<8x1xf32>
    %415 = vector.broadcast %414 : vector<8x1xf32> to vector<8x32xf32>
    %416 = arith.subf %408, %415 : vector<8x32xf32>
    %417 = arith.mulf %416, %416 : vector<8x32xf32>
    %cst_270 = arith.constant dense<0.000000e+00> : vector<8xf32>
    %418 = vector.multi_reduction <add>, %417, %cst_270 [1] : vector<8x32xf32> to vector<8xf32>
    %419 = vector.shape_cast %418 : vector<8xf32> to vector<8x1xf32>
    %cst_271 = arith.constant 3.200000e+01 : f32
    %420 = vector.broadcast %cst_271 : f32 to vector<8x1xf32>
    %421 = arith.divf %419, %420 : vector<8x1xf32>
    %cst_272 = arith.constant 9.99999974E-6 : f32
    %422 = vector.broadcast %cst_272 : f32 to vector<8x1xf32>
    %423 = arith.addf %421, %422 : vector<8x1xf32>
    %424 = math.rsqrt %423 : vector<8x1xf32>
    %425 = vector.broadcast %424 : vector<8x1xf32> to vector<8x32xf32>
    %426 = arith.mulf %416, %425 : vector<8x32xf32>
    %427 = vector.broadcast %409 : vector<1x32xf32> to vector<8x32xf32>
    %428 = arith.mulf %426, %427 : vector<8x32xf32>
    %429 = vector.broadcast %410 : vector<1x32xf32> to vector<8x32xf32>
    %430 = arith.addf %428, %429 : vector<8x32xf32>
    %431 = arith.truncf %430 : vector<8x32xf32> to vector<8x32xbf16>
    %c0_273 = arith.constant 0 : index
    %c0_274 = arith.constant 0 : index
    %432 = vector.load %arg26[%c0_273, %c0_274] : memref<32x64xbf16, #tpu.memory_space<vmem>>, vector<32x64xbf16>
    %cst_275 = arith.constant dense<0.000000e+00> : vector<8x64xf32>
    %433 = tpu.matmul %431, %432, %cst_275 {dimension_numbers = #tpu.dot_dimension_numbers<[1], [0], [0], [1], [0, 0, 1, 1], [], []>} : vector<8x32xbf16>, vector<32x64xbf16>, vector<8x64xf32> -> vector<8x64xf32>
    %c0_276 = arith.constant 0 : index
    %c0_277 = arith.constant 0 : index
    %434 = vector.load %arg27[%c0_276, %c0_277] : memref<1x64xf32, #tpu.memory_space<vmem>>, vector<1x64xf32>
    %435 = vector.broadcast %434 : vector<1x64xf32> to vector<8x64xf32>
    %436 = arith.addf %433, %435 : vector<8x64xf32>
    %cst_278 = arith.constant 0.000000e+00 : f32
    %437 = vector.broadcast %cst_278 : f32 to vector<8x64xf32>
    %438 = arith.maximumf %436, %437 : vector<8x64xf32>
    %439 = arith.truncf %438 : vector<8x64xf32> to vector<8x64xbf16>
    %c0_279 = arith.constant 0 : index
    %c0_280 = arith.constant 0 : index
    %440 = vector.load %arg28[%c0_279, %c0_280] : memref<64x32xbf16, #tpu.memory_space<vmem>>, vector<64x32xbf16>
    %cst_281 = arith.constant dense<0.000000e+00> : vector<8x32xf32>
    %441 = tpu.matmul %439, %440, %cst_281 {dimension_numbers = #tpu.dot_dimension_numbers<[1], [0], [0], [1], [0, 0, 1, 1], [], []>} : vector<8x64xbf16>, vector<64x32xbf16>, vector<8x32xf32> -> vector<8x32xf32>
    %c0_282 = arith.constant 0 : index
    %c0_283 = arith.constant 0 : index
    %442 = vector.load %arg29[%c0_282, %c0_283] : memref<1x32xf32, #tpu.memory_space<vmem>>, vector<1x32xf32>
    %443 = vector.broadcast %442 : vector<1x32xf32> to vector<8x32xf32>
    %444 = arith.addf %441, %443 : vector<8x32xf32>
    %445 = arith.addf %444, %430 : vector<8x32xf32>
    %c0_284 = arith.constant 0 : index
    %c0_285 = arith.constant 0 : index
    %446 = vector.load %arg30[%c0_284, %c0_285] : memref<1x32xf32, #tpu.memory_space<vmem>>, vector<1x32xf32>
    %c0_286 = arith.constant 0 : index
    %c0_287 = arith.constant 0 : index
    %447 = vector.load %arg31[%c0_286, %c0_287] : memref<1x32xf32, #tpu.memory_space<vmem>>, vector<1x32xf32>
    %cst_288 = arith.constant dense<0.000000e+00> : vector<8xf32>
    %448 = vector.multi_reduction <add>, %445, %cst_288 [1] : vector<8x32xf32> to vector<8xf32>
    %449 = vector.shape_cast %448 : vector<8xf32> to vector<8x1xf32>
    %cst_289 = arith.constant 3.200000e+01 : f32
    %450 = vector.broadcast %cst_289 : f32 to vector<8x1xf32>
    %451 = arith.divf %449, %450 : vector<8x1xf32>
    %452 = vector.broadcast %451 : vector<8x1xf32> to vector<8x32xf32>
    %453 = arith.subf %445, %452 : vector<8x32xf32>
    %454 = arith.mulf %453, %453 : vector<8x32xf32>
    %cst_290 = arith.constant dense<0.000000e+00> : vector<8xf32>
    %455 = vector.multi_reduction <add>, %454, %cst_290 [1] : vector<8x32xf32> to vector<8xf32>
    %456 = vector.shape_cast %455 : vector<8xf32> to vector<8x1xf32>
    %cst_291 = arith.constant 3.200000e+01 : f32
    %457 = vector.broadcast %cst_291 : f32 to vector<8x1xf32>
    %458 = arith.divf %456, %457 : vector<8x1xf32>
    %cst_292 = arith.constant 9.99999974E-6 : f32
    %459 = vector.broadcast %cst_292 : f32 to vector<8x1xf32>
    %460 = arith.addf %458, %459 : vector<8x1xf32>
    %461 = math.rsqrt %460 : vector<8x1xf32>
    %462 = vector.broadcast %461 : vector<8x1xf32> to vector<8x32xf32>
    %463 = arith.mulf %453, %462 : vector<8x32xf32>
    %464 = vector.broadcast %446 : vector<1x32xf32> to vector<8x32xf32>
    %465 = arith.mulf %463, %464 : vector<8x32xf32>
    %466 = vector.broadcast %447 : vector<1x32xf32> to vector<8x32xf32>
    %467 = arith.addf %465, %466 : vector<8x32xf32>
    %468 = arith.truncf %467 : vector<8x32xf32> to vector<8x32xbf16>
    %c0_293 = arith.constant 0 : index
    %c0_294 = arith.constant 0 : index
    %c0_295 = arith.constant 0 : index
    %469 = vector.load %arg32[%c0_293, %c0_294, %c0_295] : memref<1x8x32xbf16, #tpu.memory_space<vmem>>, vector<1x8x32xbf16>
    %470 = vector.shape_cast %469 : vector<1x8x32xbf16> to vector<8x32xbf16>
    %471 = vector.shape_cast %468 : vector<8x32xbf16> to vector<1x8x32xbf16>
    tpu.vector_store %arg32[%c0_293, %c0_294, %c0_295], %471 {strides = array<i32>} : memref<1x8x32xbf16, #tpu.memory_space<vmem>>, vector<1x8x32xbf16>,
    return
  }
  func.func @transform_0(%arg0: i32) -> (i32, i32, i32) {
    %c0_i32 = arith.constant 0 : i32
    %c0_i32_0 = arith.constant 0 : i32
    %c0_i32_1 = arith.constant 0 : i32
    return %arg0, %c0_i32, %c0_i32_0 : i32, i32, i32
  }
  func.func @transform_1(%arg0: i32) -> (i32, i32, i32) {
    %c0_i32 = arith.constant 0 : i32
    %c0_i32_0 = arith.constant 0 : i32
    %c0_i32_1 = arith.constant 0 : i32
    return %arg0, %c0_i32, %c0_i32_0 : i32, i32, i32
  }
  func.func @transform_2(%arg0: i32) -> (i32, i32) {
    %c0_i32 = arith.constant 0 : i32
    %c0_i32_0 = arith.constant 0 : i32
    %c0_i32_1 = arith.constant 0 : i32
    return %c0_i32, %c0_i32_0 : i32, i32
  }
  func.func @transform_3(%arg0: i32) -> (i32, i32, i32) {
    %c0_i32 = arith.constant 0 : i32
    %c0_i32_0 = arith.constant 0 : i32
    %c0_i32_1 = arith.constant 0 : i32
    return %arg0, %c0_i32, %c0_i32_0 : i32, i32, i32
  }
  func.func @transform_4(%arg0: i32) -> (i32, i32, i32) {
    %c0_i32 = arith.constant 0 : i32
    %c0_i32_0 = arith.constant 0 : i32
    %c0_i32_1 = arith.constant 0 : i32
    return %arg0, %c0_i32, %c0_i32_0 : i32, i32, i32
  }
  func.func @transform_5(%arg0: i32) -> (i32, i32, i32) {
    %c0_i32 = arith.constant 0 : i32
    %c0_i32_0 = arith.constant 0 : i32
    %c0_i32_1 = arith.constant 0 : i32
    %c0_i32_2 = arith.constant 0 : i32
    return %c0_i32, %c0_i32_0, %c0_i32_1 : i32, i32, i32
  }
  func.func @transform_6(%arg0: i32) -> (i32, i32, i32) {
    %c0_i32 = arith.constant 0 : i32
    %c0_i32_0 = arith.constant 0 : i32
    %c0_i32_1 = arith.constant 0 : i32
    %c0_i32_2 = arith.constant 0 : i32
    return %c0_i32, %c0_i32_0, %c0_i32_1 : i32, i32, i32
  }
  func.func @transform_7(%arg0: i32) -> (i32, i32, i32) {
    %c0_i32 = arith.constant 0 : i32
    %c0_i32_0 = arith.constant 0 : i32
    %c0_i32_1 = arith.constant 0 : i32
    %c0_i32_2 = arith.constant 0 : i32
    return %c0_i32, %c0_i32_0, %c0_i32_1 : i32, i32, i32
  }
  func.func @transform_8(%arg0: i32) -> (i32, i32, i32) {
    %c0_i32 = arith.constant 0 : i32
    %c0_i32_0 = arith.constant 0 : i32
    %c0_i32_1 = arith.constant 0 : i32
    %c0_i32_2 = arith.constant 0 : i32
    return %c0_i32, %c0_i32_0, %c0_i32_1 : i32, i32, i32
  }
  func.func @transform_9(%arg0: i32) -> (i32, i32, i32) {
    %c0_i32 = arith.constant 0 : i32
    %c0_i32_0 = arith.constant 0 : i32
    %c0_i32_1 = arith.constant 0 : i32
    %c0_i32_2 = arith.constant 0 : i32
    return %c0_i32, %c0_i32_0, %c0_i32_1 : i32, i32, i32
  }
  func.func @transform_10(%arg0: i32) -> (i32, i32, i32) {
    %c0_i32 = arith.constant 0 : i32
    %c0_i32_0 = arith.constant 0 : i32
    %c0_i32_1 = arith.constant 0 : i32
    %c0_i32_2 = arith.constant 0 : i32
    return %c0_i32, %c0_i32_0, %c0_i32_1 : i32, i32, i32
  }
  func.func @transform_11(%arg0: i32) -> (i32, i32, i32) {
    %c0_i32 = arith.constant 0 : i32
    %c0_i32_0 = arith.constant 0 : i32
    %c0_i32_1 = arith.constant 0 : i32
    %c0_i32_2 = arith.constant 0 : i32
    return %c0_i32, %c0_i32_0, %c0_i32_1 : i32, i32, i32
  }
  func.func @transform_12(%arg0: i32) -> (i32, i32) {
    %c0_i32 = arith.constant 0 : i32
    %c0_i32_0 = arith.constant 0 : i32
    %c0_i32_1 = arith.constant 0 : i32
    return %c0_i32, %c0_i32_0 : i32, i32
  }
  func.func @transform_13(%arg0: i32) -> (i32, i32) {
    %c0_i32 = arith.constant 0 : i32
    %c0_i32_0 = arith.constant 0 : i32
    %c0_i32_1 = arith.constant 0 : i32
    return %c0_i32, %c0_i32_0 : i32, i32
  }
  func.func @transform_14(%arg0: i32) -> (i32, i32) {
    %c0_i32 = arith.constant 0 : i32
    %c0_i32_0 = arith.constant 0 : i32
    %c0_i32_1 = arith.constant 0 : i32
    return %c0_i32, %c0_i32_0 : i32, i32
  }
  func.func @transform_15(%arg0: i32) -> (i32, i32, i32) {
    %c0_i32 = arith.constant 0 : i32
    %c0_i32_0 = arith.constant 0 : i32
    %c0_i32_1 = arith.constant 0 : i32
    %c0_i32_2 = arith.constant 0 : i32
    return %c0_i32, %c0_i32_0, %c0_i32_1 : i32, i32, i32
  }
  func.func @transform_16(%arg0: i32) -> (i32, i32, i32) {
    %c0_i32 = arith.constant 0 : i32
    %c0_i32_0 = arith.constant 0 : i32
    %c0_i32_1 = arith.constant 0 : i32
    %c0_i32_2 = arith.constant 0 : i32
    return %c0_i32, %c0_i32_0, %c0_i32_1 : i32, i32, i32
  }
  func.func @transform_17(%arg0: i32) -> (i32, i32, i32) {
    %c0_i32 = arith.constant 0 : i32
    %c0_i32_0 = arith.constant 0 : i32
    %c0_i32_1 = arith.constant 0 : i32
    %c0_i32_2 = arith.constant 0 : i32
    return %c0_i32, %c0_i32_0, %c0_i32_1 : i32, i32, i32
  }
  func.func @transform_18(%arg0: i32) -> (i32, i32, i32) {
    %c0_i32 = arith.constant 0 : i32
    %c0_i32_0 = arith.constant 0 : i32
    %c0_i32_1 = arith.constant 0 : i32
    %c0_i32_2 = arith.constant 0 : i32
    return %c0_i32, %c0_i32_0, %c0_i32_1 : i32, i32, i32
  }
  func.func @transform_19(%arg0: i32) -> (i32, i32, i32) {
    %c0_i32 = arith.constant 0 : i32
    %c0_i32_0 = arith.constant 0 : i32
    %c0_i32_1 = arith.constant 0 : i32
    %c0_i32_2 = arith.constant 0 : i32
    return %c0_i32, %c0_i32_0, %c0_i32_1 : i32, i32, i32
  }
  func.func @transform_20(%arg0: i32) -> (i32, i32, i32) {
    %c0_i32 = arith.constant 0 : i32
    %c0_i32_0 = arith.constant 0 : i32
    %c0_i32_1 = arith.constant 0 : i32
    %c0_i32_2 = arith.constant 0 : i32
    return %c0_i32, %c0_i32_0, %c0_i32_1 : i32, i32, i32
  }
  func.func @transform_21(%arg0: i32) -> (i32, i32, i32) {
    %c0_i32 = arith.constant 0 : i32
    %c0_i32_0 = arith.constant 0 : i32
    %c0_i32_1 = arith.constant 0 : i32
    %c0_i32_2 = arith.constant 0 : i32
    return %c0_i32, %c0_i32_0, %c0_i32_1 : i32, i32, i32
  }
  func.func @transform_22(%arg0: i32) -> (i32, i32) {
    %c0_i32 = arith.constant 0 : i32
    %c0_i32_0 = arith.constant 0 : i32
    %c0_i32_1 = arith.constant 0 : i32
    return %c0_i32, %c0_i32_0 : i32, i32
  }
  func.func @transform_23(%arg0: i32) -> (i32, i32) {
    %c0_i32 = arith.constant 0 : i32
    %c0_i32_0 = arith.constant 0 : i32
    %c0_i32_1 = arith.constant 0 : i32
    return %c0_i32, %c0_i32_0 : i32, i32
  }
  func.func @transform_24(%arg0: i32) -> (i32, i32) {
    %c0_i32 = arith.constant 0 : i32
    %c0_i32_0 = arith.constant 0 : i32
    %c0_i32_1 = arith.constant 0 : i32
    return %c0_i32, %c0_i32_0 : i32, i32
  }
  func.func @transform_25(%arg0: i32) -> (i32, i32) {
    %c0_i32 = arith.constant 0 : i32
    %c0_i32_0 = arith.constant 0 : i32
    %c0_i32_1 = arith.constant 0 : i32
    return %c0_i32, %c0_i32_0 : i32, i32
  }
  func.func @transform_26(%arg0: i32) -> (i32, i32) {
    %c0_i32 = arith.constant 0 : i32
    %c0_i32_0 = arith.constant 0 : i32
    %c0_i32_1 = arith.constant 0 : i32
    return %c0_i32, %c0_i32_0 : i32, i32
  }
  func.func @transform_27(%arg0: i32) -> (i32, i32) {
    %c0_i32 = arith.constant 0 : i32
    %c0_i32_0 = arith.constant 0 : i32
    %c0_i32_1 = arith.constant 0 : i32
    return %c0_i32, %c0_i32_0 : i32, i32
  }
  func.func @transform_28(%arg0: i32) -> (i32, i32) {
    %c0_i32 = arith.constant 0 : i32
    %c0_i32_0 = arith.constant 0 : i32
    %c0_i32_1 = arith.constant 0 : i32
    return %c0_i32, %c0_i32_0 : i32, i32
  }
  func.func @transform_29(%arg0: i32) -> (i32, i32) {
    %c0_i32 = arith.constant 0 : i32
    %c0_i32_0 = arith.constant 0 : i32
    %c0_i32_1 = arith.constant 0 : i32
    return %c0_i32, %c0_i32_0 : i32, i32
  }
  func.func @transform_30(%arg0: i32) -> (i32, i32) {
    %c0_i32 = arith.constant 0 : i32
    %c0_i32_0 = arith.constant 0 : i32
    %c0_i32_1 = arith.constant 0 : i32
    return %c0_i32, %c0_i32_0 : i32, i32
  }
  func.func @transform_31(%arg0: i32) -> (i32, i32, i32) {
    %c0_i32 = arith.constant 0 : i32
    %c0_i32_0 = arith.constant 0 : i32
    %c0_i32_1 = arith.constant 0 : i32
    return %arg0, %c0_i32, %c0_i32_0 : i32, i32, i32
  }
}

</mosaic_0001>

<bundles_post_ra>
// kernel: mft_forward.9
= control target key start
LH: loop header
LB: loop body
LE: loop exit
PB: predicated region body
PF: predicated region fallthrough
CT: control target
= control target key end

     0   :  { %vm27_vm0 = vcmask 261120   ;;  %v186_v5 = vmov 32.0   ;;  %s246_s0 = inlined_call_operand.vmem [shape: bf16[16,32], index: 0, kind: input, shape index: {}]   ;;  %s247_s1 = inlined_call_operand.vmem [shape: f32[1,32], index: 1, kind: input, shape index: {}]   ;;  %s248_s2 = inlined_call_operand.vmem [shape: f32[1,32], index: 2, kind: input, shape index: {}]   ;;  %s249_s4 = inlined_call_operand.vmem [shape: f32[1,128], index: 4, kind: input, shape index: {}]   ;;  %s250_s3 = inlined_call_operand.vmem [shape: bf16[32,128], index: 3, kind: input, shape index: {}]   ;;  %s251_s5 = inlined_call_operand.vmem [shape: f32[16,128], index: 5, kind: output, shape index: {}]  }
   0x1   :  { %v165_v0 = vld [vmem:[%s246_s0] sm:$0xff]   ;;  %172 = vrcp.f32 %v186_v5  ;;  %v163_v22 = vld [vmem:[%s250_s3 + $0x8] sm:$0xff] }
   0x2   :  { %v166_v1 = vunpack.c.l.bf16 %v165_v0  ;;  %v167_v3 = vunpack.c.h.bf16 %v165_v0  ;;  %119 = vmatpush.bf16.msra.mxu0 %v163_v22  ;;  %v162_v24 = vld [vmem:[%s250_s3] sm:$0xff] }
   0x3   :  { %v169_v43 = vld [vmem:[%s247_s1] ss:$0 sm:$0xff] }
   0x4   :  { %v28_v2 = vsel %vm27_vm0, %v166_v1, 0.0  ;;  %v31_v4 = vsel %vm27_vm0, %v167_v3, 0.0  ;;  %v170_v48 = vld [vmem:[%s248_s2] ss:$0 sm:$0xff] }
   0x5   :  { %29 = vadd.xlane.f32.xlu0 %v28_v2  ;;  %v171_v53 = vld [vmem:[%s249_s4] ss:$0 sm:$0xff] }
   0x6   :  { %120 = vmatpush.bf16.msra.mxu0 %v162_v24 }
   0x7   :  { %v173_v6 = vpop.eup %172 }
   0x8   :  { %v35_v7 = vmul.f32 32.0, %v173_v6  ;;  %vm39_vm1 = vweird.f32 %v173_v6 }
   0xa   :  { %v36_v8 = vsub.f32 1.0, %v35_v7 }
   0xc   :  { %v37_v9 = vmul.f32 %v173_v6, %v36_v8 }
   0xd   :  { %32 = vadd.xlane.f32.xlu0 %v31_v4 }
   0xe   :  { %v38_v10 = vadd.f32 %v173_v6, %v37_v9 }
  0x10   :  { %v40_v11 = vsel %vm39_vm1, %v173_v6, %v38_v10 }
  0x78   :  { %v30_v12 = vpop.xlane.xlu0 %29 }
  0x79   :  { %v41_v13 = vmul.f32 %v40_v11, %v30_v12 }
  0x7b   :  { %v43_v14 = vsub.f32 %v166_v1, %v41_v13 }
  0x7d   :  { %v45_v15 = vmul.f32 %v43_v14, %v43_v14 }
  0x7f   :  { %v47_v16 = vsel %vm27_vm0, %v45_v15, 0.0 }
  0x80   :  { %48 = vadd.xlane.f32.xlu1 %v47_v16  ;;  %v33_v17 = vpop.xlane.xlu0 %32 }
  0x81   :  { %v42_v18 = vmul.f32 %v40_v11, %v33_v17 }
  0x83   :  { %v44_v19 = vsub.f32 %v167_v3, %v42_v18 }
  0x85   :  { %v46_v20 = vmul.f32 %v44_v19, %v44_v19 }
  0x87   :  { %v50_v21 = vsel %vm27_vm0, %v46_v20, 0.0 }
  0x88   :  { %51 = vadd.xlane.f32.xlu1 %v50_v21 }
  0xf3   :  { %v49_v23 = vpop.xlane.xlu1 %48 }
  0xf4   :  { %v53_v25 = vmul.f32 %v49_v23, %v40_v11 }
  0xf6   :  { %v55_v26 = vadd.f32 1e-05, %v53_v25 }
  0xf8   :  { %174 = vrsqrt.f32 %v55_v26  ;;  %vm63_vm3 = vweird.f32 %v55_v26 }
  0xfb   :  { %v52_v27 = vpop.xlane.xlu1 %51 }
  0xfc   :  { %v54_v28 = vmul.f32 %v52_v27, %v40_v11 }
  0xfe   :  { %v175_v29 = vpop.eup %174  ;;  %v56_v30 = vadd.f32 1e-05, %v54_v28 }
  0xff   :  { %v58_v31 = vmul.f32 %v175_v29, %v55_v26  ;;  %vm64_vm2 = vweird.f32 %v175_v29 }
 0x100   :  { %176 = vrsqrt.f32 %v56_v30  ;;  %vm65_vm4 = vmor %vm63_vm3, %vm64_vm2  ;;  %vm73_vm6 = vweird.f32 %v56_v30 }
 0x101   :  { %v59_v32 = vmul.f32 %v175_v29, %v58_v31 }
 0x103   :  { %v60_v33 = vmul.f32 0.5, %v59_v32 }
 0x105   :  { %v61_v34 = vsub.f32 1.5, %v60_v33 }
 0x106   :  { %v177_v35 = vpop.eup %176 }
 0x107   :  { %v62_v36 = vmul.f32 %v175_v29, %v61_v34  ;;  %v68_v37 = vmul.f32 %v177_v35, %v56_v30  ;;  %vm74_vm5 = vweird.f32 %v177_v35 }
 0x108   :  { %vm75_vm7 = vmor %vm73_vm6, %vm74_vm5 }
 0x109   :  { %v69_v38 = vmul.f32 %v177_v35, %v68_v37  ;;  %v66_v39 = vsel %vm65_vm4, %v175_v29, %v62_v36 }
 0x10a   :  { %v77_v42 = vmul.f32 %v66_v39, %v43_v14 }
 0x10b   :  { %v70_v40 = vmul.f32 0.5, %v69_v38 }
 0x10c   :  { %v82_v47 = vmul.f32 %v169_v43, %v77_v42 }
 0x10d   :  { %v71_v41 = vsub.f32 1.5, %v70_v40 }
 0x10e   :  { %v87_v50 = vadd.f32 %v170_v48, %v82_v47 }
 0x10f   :  { %v72_v44 = vmul.f32 %v177_v35, %v71_v41 }
 0x111   :  { %v76_v45 = vsel %vm75_vm7, %v177_v35, %v72_v44 }
 0x112   :  { %v78_v46 = vmul.f32 %v76_v45, %v44_v19 }
 0x114   :  { %v83_v49 = vmul.f32 %v169_v43, %v78_v46 }
 0x116   :  { %v88_v51 = vadd.f32 %v170_v48, %v83_v49 }
 0x118   :  { %v89_v52 = vpack.c.bf16 %v88_v51, %v87_v50 }
 0x11a   :  { %161 = vmatmul.msk.bf16.vlgmr.msra.gmra.mxu0 %vm27_vm0, %v89_v52 }
 0x197   :  { %v122_v54 = vpop.f32.mrf.mxu0 }
 0x198   :  { %v123_v55 = vadd.f32 %v171_v53, %v122_v54 }
 0x19a   :  { %127 = vmax.xlane.f32.xlu2 %v123_v55 }
 0x19f   :  { %v124_v56 = vpop.f32.mrf.mxu0 }
 0x1a0   :  { %v125_v57 = vadd.f32 %v171_v53, %v124_v56 }
 0x1a2   :  { %129 = vmax.xlane.f32.xlu2 %v125_v57 }
 0x20d   :  { %v128_v58 = vpop.xlane.xlu2 %127 }
 0x20e   :  { %v131_v59 = vsub.f32 %v123_v55, %v128_v58 }
 0x210   :  { %v133_v60 = vmul.f32 1.442695, %v131_v59 }
 0x212   :  { %178 = vpow2.f32 %v133_v60 }
 0x215   :  { %v130_v61 = vpop.xlane.xlu2 %129 }
 0x216   :  { %v132_v62 = vsub.f32 %v125_v57, %v130_v61 }
 0x218   :  { %v179_v63 = vpop.eup %178  ;;  %v135_v0 = vmul.f32 1.442695, %v132_v62 }
 0x219   :  { %137 = vadd.xlane.f32.xlu0 %v179_v63 }
 0x21a   :  { %180 = vpow2.f32 %v135_v0 }
 0x220   :  { %v181_v1 = vpop.eup %180 }
 0x221   :  { %139 = vadd.xlane.f32.xlu1 %v181_v1 }
 0x28c   :  { %v138_v2 = vpop.xlane.xlu0 %137 }
 0x28d   :  { %182 = vlog2.f32 %v138_v2 }
 0x293   :  { %v183_v3 = vpop.eup %182 }
 0x294   :  { %v142_v4 = vmul.f32 0.6931472, %v183_v3  ;;  %v140_v5 = vpop.xlane.xlu1 %139 }
 0x295   :  { %184 = vlog2.f32 %v140_v5 }
 0x296   :  { %v145_v6 = vsub.f32 %v131_v59, %v142_v4 }
 0x298   :  { %147 = vst [vmem:[%s251_s5] sm:$0xff] %v145_v6 }
 0x29b   :  { %v185_v7 = vpop.eup %184 }
 0x29c   :  { %v144_v8 = vmul.f32 0.6931472, %v185_v7 }
 0x29e   :  { %v146_v9 = vsub.f32 %v132_v62, %v144_v8 }
 0x2a0   :  { %148 = vst [vmem:[%s251_s5 + $0x8] sm:$0xff] %v146_v9 }

// kernel: mft_forward.5
= control target key start
LH: loop header
LB: loop body
LE: loop exit
PB: predicated region body
PF: predicated region fallthrough
CT: control target
= control target key end

     0   :  { %s2118_s27 = smov 0   ;;  %s2412_s0 = inlined_call_operand.vmem [shape: bf16[2,10,32], index: 0, kind: input, shape index: {}]   ;;  %s2413_s1 = inlined_call_operand.vmem [shape: f32[2,1,10], index: 1, kind: input, shape index: {}]   ;;  %s2414_s2 = inlined_call_operand.vmem [shape: bf16[4,32,8], index: 2, kind: input, shape index: {}]   ;;  %s2415_s3 = inlined_call_operand.vmem [shape: f32[4,1,8], index: 3, kind: input, shape index: {}]   ;;  %s2416_s4 = inlined_call_operand.vmem [shape: bf16[4,32,8], index: 4, kind: input, shape index: {}]   ;;  %s2417_s5 = inlined_call_operand.vmem [shape: f32[4,1,8], index: 5, kind: input, shape index: {}]   ;;  %s2418_s6 = inlined_call_operand.vmem [shape: bf16[4,32,8], index: 6, kind: input, shape index: {}]   ;;  %s2419_s7 = inlined_call_operand.vmem [shape: f32[4,1,8], index: 7, kind: input, shape index: {}]   ;;  %s2420_s8 = inlined_call_operand.vmem [shape: bf16[4,8,32], index: 8, kind: input, shape index: {}]   ;;  %s2421_s9 = inlined_call_operand.vmem [shape: f32[1,32], index: 9, kind: input, shape index: {}]   ;;  %s2422_s10 = inlined_call_operand.vmem [shape: f32[1,32], index: 10, kind: input, shape index: {}]   ;;  %s2423_s11 = inlined_call_operand.vmem [shape: f32[1,32], index: 11, kind: input, shape index: {}]   ;;  %s2424_s12 = inlined_call_operand.vmem [shape: bf16[32,64], index: 12, kind: input, shape index: {}]   ;;  %s2425_s13 = inlined_call_operand.vmem [shape: f32[1,64], index: 13, kind: input, shape index: {}]   ;;  %s2426_s14 = inlined_call_operand.vmem [shape: bf16[64,32], index: 14, kind: input, shape index: {}]   ;;  %s2427_s15 = inlined_call_operand.vmem [shape: f32[1,32], index: 15, kind: input, shape index: {}]   ;;  %s2428_s16 = inlined_call_operand.vmem [shape: f32[1,32], index: 16, kind: input, shape index: {}]   ;;  %s2429_s17 = inlined_call_operand.vmem [shape: f32[1,32], index: 17, kind: input, shape index: {}]   ;;  %s2430_s18 = inlined_call_operand.vmem [shape: bf16[2,10,32], index: 18, kind: output, shape index: {}]  }
   0x1   :  { %2432 = sst [smem:[#allocation2_spill]] %s2412_s0 }
   0x2   :  { %2433 = sst [smem:[#allocation3_spill]] %s2413_s1 }
   0x3   :  { %2434 = sst [smem:[#allocation4_spill]] %s2414_s2 }
   0x4 LB: > { %s1701_s28 = sadd.s32 4294967295, %s2020_s27   ;;  %p1705_p0 = scmp.ge.s32.totalorder %s2020_s27, 1  ;;  %s2020_s27 = sphi %s2118_s27, %s28_s27  }
   0x5   : > { %p520_p1 = scmp.lt.s32.totalorder %s2020_s27, 3 }
   0x7   : > { %p521_p2 = pnand %p1705_p0, %p520_p1 }
   0x8   : > { %s2435_s0 = sld [smem:[#allocation4_spill]] (!%p521_p2)  ;;  %p577_p3 = scmp.lt.s32.totalorder (!%p521_p2), %s1701_s28, 1 }
   0x9   : > { %524 = sbr.rel (%p521_p2) target bundleno = 3186 (0xc72), region = 92  ;;  %s2436_s26 = sld [smem:[#allocation2_spill]] (!%p521_p2) }
   0xa   : > { %s2437_s1 = sld [smem:[#allocation3_spill]] (!%p521_p2) }
   0xe   : > { %v1914_v0 = vld [vmem:[%s2435_s0 + $0x8] sm:$0xff]  ;;  %v1913_v2 = vld [vmem:[%s2435_s0] sm:$0xff]  ;;  %s2439_s28 = smov (!%p577_p3, %s1701_s28), 1  ;;  %vm619_vm0 = vcmask 261120   ;;  %vm712_vm1 = vcmask 64512   ;;  %v1922_v24 = vld [vmem:[%s2416_s4 + $0x18] sm:$0xff] }
   0xf   : > { %v1916_v1 = vld [vmem:[%s2416_s4 + $0x8] sm:$0xff]  ;;  %629 = vmatpush.bf16.msra.mxu0 %v1914_v0  ;;  %v1915_v3 = vld [vmem:[%s2416_s4] sm:$0xff]  ;;  %s1910_s23 = sshll.u32 %s2439_s28, 3  ;;  %vm733_vm2 = vcmask 80896   ;;  %vm737_vm3 = vcmask 74752   ;;  %v1921_v32 = vld [vmem:[%s2416_s4 + $0x10] sm:$0xff] }
  0x10   : > { %665 = vmatpush.bf16.msra.mxu1 %v1916_v1  ;;  %s2146_s29 = scalar_lea.vmem %s2436_s26, %s1910_s23  ;;  %s584_s20 = scalar_lea.vmem %s2437_s1, %s2439_s28  ;;  %v1953_v9 = vld [vmem:[%s2417_s5] ss:$0 sm:$0xff]  ;;  %v1918_v22 = vld [vmem:[%s2418_s6 + $0x8] sm:$0xff]  ;;  %v1920_v33 = vld [vmem:[%s2435_s0 + $0x18] sm:$0xff]  ;;  %vm762_vm4 = vcmask 1044480   ;;  %vm964_vm5 = vcmask 1043456  }
  0x11   : > { %v1712_v4 = vld [vmem:[%s2146_s29] sm:$0xf]  ;;  %v1912_v5 = vld [vmem:[%s2146_s29] sm:$0x10]  ;;  %699 = vmatpush.bf16.msra.mxu2 %v1918_v22  ;;  %v1919_v34 = vld [vmem:[%s2435_s0 + $0x10] sm:$0xff]  ;;  %vm1419_vm6 = vcmask 254976   ;;  %s589_s19 = scalar_lea.vmem %s2430_s18, %s1910_s23 }
  0x12   : > { %v2150_v6 = vor.u32 %v1912_v5, %v1712_v4  ;;  %v1952_v12 = vld [vmem:[%s2415_s3] ss:$0 sm:$0xff]  ;;  %v1956_v53 = vld [vmem:[%s2417_s5 + $0x1] ss:$0 sm:$0xff]  ;;  %v1924_v60 = vld [vmem:[%s2418_s6 + $0x18] sm:$0xff]  ;;  %vm1555_vm14 = vcmask 523264  }
  0x13   : > { %630 = vmatpush.bf16.msra.mxu0 %v1913_v2  ;;  %v1917_v23 = vld [vmem:[%s2418_s6] sm:$0xff]  ;;  %v1923_v61 = vld [vmem:[%s2418_s6 + $0x10] sm:$0xff] }
  0x14   : > { %666 = vmatpush.bf16.msra.mxu1 %v1915_v3  ;;  %v2179_v25 = vld [vmem:[%s584_s20] ss:$0 sm:$0xff]  ;;  %v1957_v5 = vld [vmem:[%s2415_s3 + $0x1] ss:$0 sm:$0xff] }
  0x15   : > { %700 = vmatpush.bf16.msra.mxu2 %v1917_v23  ;;  %v1955_v46 = vld [vmem:[%s2419_s7] ss:$0 sm:$0xff] }
  0x16   : > { %1722 = vmatmul.msk.bf16.vlgmr.msra.gmra.mxu0 %vm619_vm0, %v2150_v6 }
  0x17   : > { %1731 = vmatmul.msk.bf16.vlgmr.msra.gmra.mxu1 %vm619_vm0, %v2150_v6 }
  0x18   : > { %1740 = vmatmul.msk.bf16.vlgmr.msra.gmra.mxu2 %vm619_vm0, %v2150_v6  ;;  %810 = vmatpush.bf16.msrb.mxu1 %v1920_v33 }
  0x19   : > { %848 = vmatpush.bf16.msrb.mxu2 %v1922_v24 }
  0x1c   : > { %811 = vmatpush.bf16.msrb.mxu1 %v1919_v34 }
  0x1d   : > { %849 = vmatpush.bf16.msrb.mxu2 %v1921_v32 }
  0x27   : > { %1756 = vmatmul.msk.bf16.vlgmr.msrb.gmra.mxu1 %vm619_vm0, %v2150_v6 }
  0x28   : > { %1770 = vmatmul.msk.bf16.vlgmr.msrb.gmra.mxu2 %vm619_vm0, %v2150_v6 }
  0x93   : > { %v632_v7 = vpop.f32.mrf.mxu0 }
  0x94   : > { %v668_v8 = vpop.f32.mrf.mxu1  ;;  %v633_v17 = vadd.f32 %v1952_v12, %v632_v7 }
  0x95   : > { %v669_v13 = vadd.f32 %v1953_v9, %v668_v8 }
  0x96   : > { %v637_v20 = vmul.f32 0.35355338, %v633_v17 }
  0x9b   : > { %v634_v10 = vpop.f32.mrf.mxu0  ;;  %v702_v45 = vpop.f32.mrf.mxu2 }
  0x9c   : > { %v670_v11 = vpop.f32.mrf.mxu1  ;;  %v635_v15 = vadd.f32 %v1952_v12, %v634_v10  ;;  %v703_v48 = vadd.f32 %v1955_v46, %v702_v45  ;;  %v1925_v45 = vld [vmem:[%s2435_s0 + $0x20] sm:$0xff] }
  0x9d   : > { %v671_v14 = vadd.f32 %v1953_v9, %v670_v11 }
  0x9e   : > { %v638_v19 = vmul.f32 0.35355338, %v635_v15 }
  0x9f   : > { %v708_v16 = vpack.c.bf16 %v671_v14, %v669_v13  ;;  %v781_v13 = vld [vmem:[%s2420_s8] sm:$0xf] }
  0xa0   : > { %v707_v21 = vpack.c.bf16 %v638_v19, %v637_v20  ;;  %v986_v14 = vsel %vm964_vm5, %v781_v13, 0 }
  0xa1   : > { %v717_v18 = vsel %vm712_vm1, %v708_v16, 0 }
  0xa2   : > { %726 = vmatpush.bf16.xpose.msra.mxu3 %v717_v18 }
  0xa3   : > { %v704_v47 = vpop.f32.mrf.mxu2 }
  0xa4   : > { %v705_v49 = vadd.f32 %v1955_v46, %v704_v47  ;;  %v813_v0 = vpop.f32.mrf.mxu1 }
  0xa5   : > { %v814_v8 = vadd.f32 %v1957_v5, %v813_v0 }
  0xa6   : > { %v758_v50 = vpack.c.bf16 %v705_v49, %v703_v48 }
  0xa7   : > { %v818_v10 = vmul.f32 0.35355338, %v814_v8 }
  0xa8   : > { %v764_v51 = vsel %vm762_vm4, %v758_v50, 0 }
  0xa9   : > { %1741 = vmatmul.msk.bf16.vlgmr.msra.gmra.mxu3 %vm712_vm1, %v707_v21  ;;  %773 = vmatpush.bf16.msrb.mxu0 %v764_v51 }
  0xaa   : > { %884 = vmatpush.bf16.msrb.mxu3 %v1924_v60  ;;  %v1959_v60 = vld [vmem:[%s2417_s5 + $0x2] ss:$0 sm:$0xff] }
  0xab   : > { %v851_v52 = vpop.f32.mrf.mxu2 }
  0xac   : > { %v852_v54 = vadd.f32 %v1956_v53, %v851_v52  ;;  %v815_v7 = vpop.f32.mrf.mxu1 }
  0xad   : > { %v816_v9 = vadd.f32 %v1957_v5, %v815_v7 }
  0xae   : > { %885 = vmatpush.bf16.msrb.mxu3 %v1923_v61  ;;  %v1960_v61 = vld [vmem:[%s2415_s3 + $0x2] ss:$0 sm:$0xff] }
  0xaf   : > { %v819_v11 = vmul.f32 0.35355338, %v816_v9 }
  0xb1   : > { %v892_v12 = vpack.c.bf16 %v819_v11, %v818_v10  ;;  %v1930_v10 = vld [vmem:[%s2418_s6 + $0x28] sm:$0xff] }
  0xb2   : > { %995 = vmatpush.bf16.msra.mxu3 %v986_v14 }
  0xb3   : > { %v853_v55 = vpop.f32.mrf.mxu2 }
  0xb4   : > { %v854_v56 = vadd.f32 %v1956_v53, %v853_v55  ;;  %v1787_v53 = vld [vmem:[%s2420_s8 + $0x4] sm:$0xf] }
  0xb6   : > { %v893_v57 = vpack.c.bf16 %v854_v56, %v852_v54  ;;  %v966_v54 = vsel %vm964_vm5, %v1787_v53, 0  ;;  %v1962_v53 = vld [vmem:[%s2417_s5 + $0x3] ss:$0 sm:$0xff] }
  0xb7   : > { %975 = vmatpush.bf16.msra.mxu2 %v966_v54 }
  0xb8   : > { %v898_v58 = vsel %vm712_vm1, %v893_v57, 0 }
  0xb9   : > { %907 = vmatpush.bf16.xpose.msra.mxu0 %v898_v58  ;;  %1784 = vmatmul.msk.bf16.vlgmr.msrb.gmra.mxu3 %vm619_vm0, %v2150_v6 }
  0xbb   : > { %1104 = vmatpush.bf16.msrb.mxu2 %v1930_v10 }
 0x12c   : > { %v728_v26 = vpop.f32.mrf.mxu3 }
 0x12d   : > { %v729_v27 = vadd.f32 %v2179_v25, %v728_v26 }
 0x12f   : > { %v734_v28 = vsel %vm733_vm2, %v729_v27, -inf }
 0x130   : > { %735 = vmax.xlane.f32.xlu0 %v734_v28 }
 0x134   : > { %v730_v29 = vpop.f32.mrf.mxu3 }
 0x135   : > { %v731_v30 = vadd.f32 %v2179_v25, %v730_v29 }
 0x137   : > { %v738_v31 = vsel %vm737_vm3, %v731_v30, -inf }
 0x138   : > { %739 = vmax.xlane.f32.xlu0 %v738_v31 }
 0x1a3   : > { %v736_v35 = vpop.xlane.xlu0 %735 }
 0x1a4   : > { %v741_v36 = vsub.f32 %v729_v27, %v736_v35  ;;  %v887_v35 = vpop.f32.mrf.mxu3 }
 0x1a6   : > { %v743_v37 = vmul.f32 1.442695, %v741_v36  ;;  %v1958_v36 = vld [vmem:[%s2419_s7 + $0x1] ss:$0 sm:$0xff] }
 0x1a8   : > { %1972 = vpow2.f32 %v743_v37 }
 0x1ab   : > { %v740_v38 = vpop.xlane.xlu0 %739 }
 0x1ac   : > { %v742_v39 = vsub.f32 %v731_v30, %v740_v38  ;;  %v889_v37 = vpop.f32.mrf.mxu3  ;;  %v888_v38 = vadd.f32 %v1958_v36, %v887_v35 }
 0x1ae   : > { %v1973_v40 = vpop.eup %1972  ;;  %v745_v41 = vmul.f32 1.442695, %v742_v39  ;;  %v890_v39 = vadd.f32 %v1958_v36, %v889_v37 }
 0x1af   : > { %v747_v42 = vsel %vm733_vm2, %v1973_v40, 0.0 }
 0x1b0   : > { %1974 = vpow2.f32 %v745_v41  ;;  %748 = vadd.xlane.f32.xlu1 %v747_v42  ;;  %v1928_v42 = vld [vmem:[%s2416_s4 + $0x28] sm:$0xff] }
 0x1b6   : > { %v1975_v43 = vpop.eup %1974 }
 0x1b7   : > { %v750_v44 = vsel %vm737_vm3, %v1975_v43, 0.0 }
 0x1b8   : > { %751 = vadd.xlane.f32.xlu1 %v750_v44  ;;  %v1927_v44 = vld [vmem:[%s2416_s4 + $0x20] sm:$0xff] }
 0x223   : > { %v749_v59 = vpop.xlane.xlu1 %748 }
 0x224   : > { %1976 = vrcp.f32 %v749_v59 }
 0x22a   : > { %v1977_v63 = vpop.eup %1976 }
 0x22b   : > { %v752_v62 = vpop.xlane.xlu1 %751  ;;  %v755_v2 = vmul.f32 %v1977_v63, %v1973_v40  ;;  %v937_v40 = vpack.c.bf16 %v890_v39, %v888_v38  ;;  %v1934_v38 = vld [vmem:[%s2416_s4 + $0x38] sm:$0xff] }
 0x22c   : > { %1978 = vrcp.f32 %v752_v62 }
 0x22d   : > { %v942_v41 = vsel %vm762_vm4, %v937_v40, 0  ;;  %v1933_v40 = vld [vmem:[%s2416_s4 + $0x30] sm:$0xff] }
 0x22e   : > { %951 = vmatpush.bf16.msra.mxu1 %v942_v41 }
 0x232   : > { %v1979_v1 = vpop.eup %1978  ;;  %1068 = vmatpush.bf16.msrb.mxu1 %v1928_v42  ;;  %v1932_v42 = vld [vmem:[%s2435_s0 + $0x38] sm:$0xff] }
 0x233   : > { %v756_v3 = vmul.f32 %v1979_v1, %v1975_v43  ;;  %v1926_v43 = vld [vmem:[%s2435_s0 + $0x28] sm:$0xff] }
 0x235   : > { %v757_v4 = vpack.c.bf16 %v756_v3, %v755_v2 }
 0x236   : > { %1069 = vmatpush.bf16.msrb.mxu1 %v1927_v44 }
 0x237   : > { %1742 = vmatmul.msk.bf16.vlgmr.msrb.gmra.mxu0 %vm733_vm2, %v757_v4 }
 0x238   : > { %1030 = vmatpush.bf16.msrb.mxu0 %v1926_v43  ;;  %v1931_v43 = vld [vmem:[%s2435_s0 + $0x30] sm:$0xff] }
 0x23c   : > { %1031 = vmatpush.bf16.msrb.mxu0 %v1925_v45 }
 0x247   : > { %1785 = vmatmul.msk.bf16.vlgmr.msra.gmra.mxu0 %vm712_vm1, %v892_v12  ;;  %v1929_v12 = vld [vmem:[%s2418_s6 + $0x20] sm:$0xff] }
 0x248   : > { %1105 = vmatpush.bf16.msrb.mxu2 %v1929_v12 }
 0x257   : > { %1803 = vmatmul.msk.bf16.vlgmr.msrb.gmra.mxu0 %vm619_vm0, %v2150_v6 }
 0x2b4   : > { %v775_v15 = vpop.f32.mrf.mxu0 }
 0x2bc   : > { %v777_v16 = vpop.f32.mrf.mxu0 }
 0x2bd   : > { %v780_v17 = vpack.c.bf16 %v777_v16, %v775_v15 }
 0x2bf   : > { %1789 = vmatmul.msk.bf16.vlgmr.msra.gmra.mxu3 %vm712_vm1, %v780_v17 }
 0x2c4   : > { %v909_v18 = vpop.f32.mrf.mxu0 }
 0x2c5   : > { %v910_v19 = vadd.f32 %v2179_v25, %v909_v18 }
 0x2c7   : > { %v914_v20 = vsel %vm733_vm2, %v910_v19, -inf }
 0x2c8   : > { %915 = vmax.xlane.f32.xlu2 %v914_v20 }
 0x2cc   : > { %v911_v21 = vpop.f32.mrf.mxu0 }
 0x2cd   : > { %v912_v22 = vadd.f32 %v2179_v25, %v911_v21 }
 0x2cf   : > { %v917_v23 = vsel %vm737_vm3, %v912_v22, -inf }
 0x2d0   : > { %918 = vmax.xlane.f32.xlu2 %v917_v23 }
 0x2d4   : > { %v1033_v58 = vpop.f32.mrf.mxu0 }
 0x2d5   : > { %v1034_v2 = vadd.f32 %v1960_v61, %v1033_v58 }
 0x2d7   : > { %v1038_v7 = vmul.f32 0.35355338, %v1034_v2 }
 0x2dc   : > { %v1035_v63 = vpop.f32.mrf.mxu0 }
 0x2dd   : > { %v1036_v4 = vadd.f32 %v1960_v61, %v1035_v63 }
 0x2df   : > { %v1039_v8 = vmul.f32 0.35355338, %v1036_v4 }
 0x2e1   : > { %v1112_v9 = vpack.c.bf16 %v1039_v8, %v1038_v7  ;;  %v1936_v8 = vld [vmem:[%s2418_s6 + $0x38] sm:$0xff] }
 0x33b   : > { %v916_v24 = vpop.xlane.xlu2 %915 }
 0x33c   : > { %v920_v26 = vsub.f32 %v910_v19, %v916_v24 }
 0x33e   : > { %v922_v27 = vmul.f32 1.442695, %v920_v26 }
 0x340   : > { %1980 = vpow2.f32 %v922_v27 }
 0x342   : > { %v2269_v11 = vpop.f32.mrf.mxu3 }
 0x343   : > { %v919_v28 = vpop.xlane.xlu2 %918 }
 0x344   : > { %v921_v29 = vsub.f32 %v912_v22, %v919_v28 }
 0x346   : > { %v1981_v30 = vpop.eup %1980  ;;  %v924_v31 = vmul.f32 1.442695, %v921_v29 }
 0x347   : > { %v926_v32 = vsel %vm733_vm2, %v1981_v30, 0.0 }
 0x348   : > { %1982 = vpow2.f32 %v924_v31  ;;  %927 = vadd.xlane.f32.xlu0 %v926_v32 }
 0x34a   : > { %v2276_v13 = vpop.f32.mrf.mxu3 }
 0x34e   : > { %v1983_v33 = vpop.eup %1982 }
 0x34f   : > { %v929_v34 = vsel %vm737_vm3, %v1983_v33, 0.0 }
 0x350   : > { %930 = vadd.xlane.f32.xlu1 %v929_v34  ;;  %v1961_v34 = vld [vmem:[%s2419_s7 + $0x2] ss:$0 sm:$0xff] }
 0x3bb   : > { %v928_v46 = vpop.xlane.xlu0 %927 }
 0x3bc   : > { %1984 = vrcp.f32 %v928_v46 }
 0x3c2   : > { %v1985_v48 = vpop.eup %1984 }
 0x3c3   : > { %v931_v47 = vpop.xlane.xlu1 %930  ;;  %v934_v50 = vmul.f32 %v1985_v48, %v1981_v30 }
 0x3c4   : > { %1986 = vrcp.f32 %v931_v47 }
 0x3ca   : > { %v1987_v49 = vpop.eup %1986 }
 0x3cb   : > { %v935_v51 = vmul.f32 %v1987_v49, %v1983_v33 }
 0x3cd   : > { %v936_v52 = vpack.c.bf16 %v935_v51, %v934_v50 }
 0x3cf   : > { %1786 = vmatmul.msk.bf16.vlgmr.msra.gmra.mxu1 %vm733_vm2, %v936_v52  ;;  %v1834_v52 = vld [vmem:[%s2420_s8 + $0x8] sm:$0xf] }
 0x3d0   : > { %v1185_v54 = vsel %vm964_vm5, %v1834_v52, 0 }
 0x3d1   : > { %1194 = vmatpush.bf16.msra.mxu1 %v1185_v54 }
 0x3df   : > { %1817 = vmatmul.msk.bf16.vlgmr.msrb.gmra.mxu1 %vm619_vm0, %v2150_v6 }
 0x44c   : > { %v953_v55 = vpop.f32.mrf.mxu1 }
 0x454   : > { %v955_v56 = vpop.f32.mrf.mxu1 }
 0x455   : > { %v958_v57 = vpack.c.bf16 %v955_v56, %v953_v55 }
 0x457   : > { %1788 = vmatmul.msk.bf16.vlgmr.msra.gmra.mxu2 %vm712_vm1, %v958_v57 }
 0x458   : > { %1231 = vmatpush.bf16.msra.mxu2 %v1932_v42 }
 0x45c   : > { %v1071_v59 = vpop.f32.mrf.mxu1  ;;  %1232 = vmatpush.bf16.msra.mxu2 %v1931_v43 }
 0x45d   : > { %v1072_v0 = vadd.f32 %v1959_v60, %v1071_v59 }
 0x464   : > { %v1073_v62 = vpop.f32.mrf.mxu1 }
 0x465   : > { %v1074_v1 = vadd.f32 %v1959_v60, %v1073_v62 }
 0x467   : > { %v1113_v3 = vpack.c.bf16 %v1074_v1, %v1072_v0  ;;  %1831 = vmatmul.msk.bf16.vlgmr.msrb.gmra.mxu2 %vm619_vm0, %v2150_v6  ;;  %v1963_v0 = vld [vmem:[%s2415_s3 + $0x3] ss:$0 sm:$0xff] }
 0x469   : > { %v1118_v5 = vsel %vm712_vm1, %v1113_v3, 0 }
 0x46a   : > { %1127 = vmatpush.bf16.xpose.msrb.mxu3 %v1118_v5 }
 0x471   : > { %1832 = vmatmul.msk.bf16.vlgmr.msrb.gmra.mxu3 %vm712_vm1, %v1112_v9  ;;  %v1935_v9 = vld [vmem:[%s2418_s6 + $0x30] sm:$0xff] }
 0x472   : > { %1269 = vmatpush.bf16.msra.mxu3 %v1934_v38 }
 0x476   : > { %1270 = vmatpush.bf16.msra.mxu3 %v1933_v40 }
 0x477   : > { %1849 = vmatmul.msk.bf16.vlgmr.msra.gmra.mxu2 %vm619_vm0, %v2150_v6 }
 0x481   : > { %1863 = vmatmul.msk.bf16.vlgmr.msra.gmra.mxu3 %vm619_vm0, %v2150_v6 }
 0x4da   : > { %v977_v31 = vpop.f32.mrf.mxu2 }
 0x4db   : > { %v998_v10 = vadd.f32 %v2269_v11, %v977_v31 }
 0x4e2   : > { %v979_v32 = vpop.f32.mrf.mxu2 }
 0x4ea   : > { %v1107_v33 = vpop.f32.mrf.mxu2 }
 0x4eb   : > { %v1108_v36 = vadd.f32 %v1961_v34, %v1107_v33 }
 0x4f2   : > { %v1109_v35 = vpop.f32.mrf.mxu2 }
 0x4f3   : > { %v1110_v37 = vadd.f32 %v1961_v34, %v1109_v35 }
 0x4f4   : > { %v1129_v14 = vpop.f32.mrf.mxu3 }
 0x4f5   : > { %v1130_v15 = vadd.f32 %v2179_v25, %v1129_v14  ;;  %v1157_v39 = vpack.c.bf16 %v1110_v37, %v1108_v36 }
 0x4f7   : > { %v1134_v16 = vsel %vm733_vm2, %v1130_v15, -inf  ;;  %v1162_v41 = vsel %vm762_vm4, %v1157_v39, 0 }
 0x4f8   : > { %1135 = vmax.xlane.f32.xlu2 %v1134_v16  ;;  %1171 = vmatpush.bf16.msra.mxu0 %v1162_v41 }
 0x4fa   : > { %v1234_v61 = vpop.f32.mrf.mxu2 }
 0x4fb   : > { %v1235_v2 = vadd.f32 %v1963_v0, %v1234_v61 }
 0x4fc   : > { %v1131_v17 = vpop.f32.mrf.mxu3  ;;  %1305 = vmatpush.bf16.msrb.mxu0 %v1936_v8 }
 0x4fd   : > { %v1132_v18 = vadd.f32 %v2179_v25, %v1131_v17  ;;  %v1239_v4 = vmul.f32 0.35355338, %v1235_v2 }
 0x4ff   : > { %v1137_v19 = vsel %vm737_vm3, %v1132_v18, -inf }
 0x500   : > { %1138 = vmax.xlane.f32.xlu0 %v1137_v19  ;;  %1306 = vmatpush.bf16.msrb.mxu0 %v1935_v9 }
 0x502   : > { %v1236_v1 = vpop.f32.mrf.mxu2 }
 0x503   : > { %v1237_v3 = vadd.f32 %v1963_v0, %v1236_v1  ;;  %v2022_v1 = vmov 32.0  }
 0x504   : > { %v1272_v51 = vpop.f32.mrf.mxu3 }
 0x505   : > { %v1273_v55 = vadd.f32 %v1962_v53, %v1272_v51  ;;  %v1240_v5 = vmul.f32 0.35355338, %v1237_v3  ;;  %v1965_v51 = vld [vmem:[%s2421_s9] ss:$0 sm:$0xff] }
 0x507   : > { %v1313_v7 = vpack.c.bf16 %v1240_v5, %v1239_v4 }
 0x50c   : > { %v1274_v56 = vpop.f32.mrf.mxu3 }
 0x50d   : > { %v1275_v57 = vadd.f32 %v1962_v53, %v1274_v56 }
 0x50f   : > { %v1314_v58 = vpack.c.bf16 %v1275_v57, %v1273_v55  ;;  %v592_v57 = vld [vmem:[%s2146_s29 + $0x4] sm:$0x1] }
 0x510   : > { %v1411_v61 = vunpack.c.l.bf16 %v592_v57 }
 0x511   : > { %v1319_v59 = vsel %vm712_vm1, %v1314_v58, 0 }
 0x512   : > { %1328 = vmatpush.bf16.xpose.msrb.mxu1 %v1319_v59 }
 0x56b   : > { %v1136_v20 = vpop.xlane.xlu2 %1135 }
 0x56c   : > { %v1140_v21 = vsub.f32 %v1130_v15, %v1136_v20  ;;  %v1000_v15 = vadd.f32 %v2276_v13, %v979_v32  ;;  %v1964_v32 = vld [vmem:[%s2419_s7 + $0x3] ss:$0 sm:$0xff] }
 0x56e   : > { %v1142_v22 = vmul.f32 1.442695, %v1140_v21 }
 0x570   : > { %1988 = vpow2.f32 %v1142_v22 }
 0x573   : > { %v1139_v23 = vpop.xlane.xlu0 %1138 }
 0x574   : > { %v1141_v24 = vsub.f32 %v1132_v18, %v1139_v23 }
 0x576   : > { %v1989_v26 = vpop.eup %1988  ;;  %v1144_v27 = vmul.f32 1.442695, %v1141_v24 }
 0x577   : > { %v1146_v28 = vsel %vm733_vm2, %v1989_v26, 0.0 }
 0x578   : > { %1990 = vpow2.f32 %v1144_v27  ;;  %1147 = vadd.xlane.f32.xlu1 %v1146_v28 }
 0x57e   : > { %v1991_v29 = vpop.eup %1990 }
 0x57f   : > { %v1149_v30 = vsel %vm737_vm3, %v1991_v29, 0.0 }
 0x580   : > { %1150 = vadd.xlane.f32.xlu2 %v1149_v30 }
 0x5eb   : > { %v1148_v44 = vpop.xlane.xlu1 %1147 }
 0x5ec   : > { %1992 = vrcp.f32 %v1148_v44 }
 0x5f2   : > { %v1993_v46 = vpop.eup %1992 }
 0x5f3   : > { %v1151_v45 = vpop.xlane.xlu2 %1150  ;;  %v1154_v48 = vmul.f32 %v1993_v46, %v1989_v26 }
 0x5f4   : > { %1994 = vrcp.f32 %v1151_v45  ;;  %v1880_v45 = vld [vmem:[%s2420_s8 + $0xc] sm:$0xf] }
 0x5f5   : > { %v1386_v46 = vsel %vm964_vm5, %v1880_v45, 0 }
 0x5f6   : > { %1395 = vmatpush.bf16.msrb.mxu3 %v1386_v46 }
 0x5fa   : > { %v1995_v47 = vpop.eup %1994 }
 0x5fb   : > { %v1155_v49 = vmul.f32 %v1995_v47, %v1991_v29 }
 0x5fd   : > { %v1156_v50 = vpack.c.bf16 %v1155_v49, %v1154_v48 }
 0x5ff   : > { %1833 = vmatmul.msk.bf16.vlgmr.msra.gmra.mxu0 %vm733_vm2, %v1156_v50  ;;  %v591_v50 = vld [vmem:[%s2146_s29] sm:$0xf] }
 0x600   : > { %v1410_v54 = vunpack.c.l.bf16 %v591_v50  ;;  %v1941_v50 = vld [vmem:[%s2426_s14 + $0x10] sm:$0xff] }
 0x60f   : > { %1877 = vmatmul.msk.bf16.vlgmr.msrb.gmra.mxu0 %vm619_vm0, %v2150_v6 }
 0x67c   : > { %v1173_v60 = vpop.f32.mrf.mxu0 }
 0x684   : > { %v1175_v62 = vpop.f32.mrf.mxu0 }
 0x685   : > { %v1178_v63 = vpack.c.bf16 %v1175_v62, %v1173_v60 }
 0x687   : > { %1835 = vmatmul.msk.bf16.vlgmr.msra.gmra.mxu1 %vm712_vm1, %v1178_v63 }
 0x697   : > { %1878 = vmatmul.msk.bf16.vlgmr.msrb.gmra.mxu1 %vm712_vm1, %v1313_v7 }
 0x704   : > { %v1196_v12 = vpop.f32.mrf.mxu1 }
 0x705   : > { %v1201_v14 = vadd.f32 %v1196_v12, %v998_v10 }
 0x70c   : > { %v1198_v16 = vpop.f32.mrf.mxu1 }
 0x70d   : > { %v1202_v17 = vadd.f32 %v1198_v16, %v1000_v15 }
 0x714   : > { %v1330_v18 = vpop.f32.mrf.mxu1 }
 0x715   : > { %v1331_v19 = vadd.f32 %v2179_v25, %v1330_v18 }
 0x717   : > { %v1335_v20 = vsel %vm733_vm2, %v1331_v19, -inf }
 0x718   : > { %1336 = vmax.xlane.f32.xlu0 %v1335_v20 }
 0x71c   : > { %v1332_v21 = vpop.f32.mrf.mxu1 }
 0x71d   : > { %v1333_v22 = vadd.f32 %v2179_v25, %v1332_v21  ;;  %v1308_v25 = vpop.f32.mrf.mxu0  ;;  %v1938_v21 = vld [vmem:[%s2424_s12 + $0x8] sm:$0xff] }
 0x71e   : > { %v1309_v34 = vadd.f32 %v1964_v32, %v1308_v25  ;;  %1508 = vmatpush.bf16.msra.mxu0 %v1938_v21 }
 0x71f   : > { %v1338_v11 = vsel %vm737_vm3, %v1333_v22, -inf }
 0x720   : > { %1339 = vmax.xlane.f32.xlu1 %v1338_v11 }
 0x725   : > { %v1310_v33 = vpop.f32.mrf.mxu0 }
 0x726   : > { %v1311_v35 = vadd.f32 %v1964_v32, %v1310_v33 }
 0x728   : > { %v1358_v36 = vpack.c.bf16 %v1311_v35, %v1309_v34 }
 0x72a   : > { %v1363_v37 = vsel %vm762_vm4, %v1358_v36, 0 }
 0x72b   : > { %1372 = vmatpush.bf16.msrb.mxu2 %v1363_v37 }
 0x78b   : > { %v1337_v23 = vpop.xlane.xlu0 %1336 }
 0x78c   : > { %v1341_v24 = vsub.f32 %v1331_v19, %v1337_v23  ;;  %v1937_v23 = vld [vmem:[%s2424_s12] sm:$0xff] }
 0x78d   : > { %1509 = vmatpush.bf16.msra.mxu0 %v1937_v23 }
 0x78e   : > { %v1343_v26 = vmul.f32 1.442695, %v1341_v24 }
 0x790   : > { %1996 = vpow2.f32 %v1343_v26 }
 0x793   : > { %v1340_v6 = vpop.xlane.xlu1 %1339 }
 0x794   : > { %v1342_v13 = vsub.f32 %v1333_v22, %v1340_v6 }
 0x796   : > { %v1997_v27 = vpop.eup %1996  ;;  %v1345_v28 = vmul.f32 1.442695, %v1342_v13 }
 0x797   : > { %v1347_v29 = vsel %vm733_vm2, %v1997_v27, 0.0 }
 0x798   : > { %1998 = vpow2.f32 %v1345_v28  ;;  %1348 = vadd.xlane.f32.xlu2 %v1347_v29 }
 0x79e   : > { %v1999_v30 = vpop.eup %1998 }
 0x79f   : > { %v1350_v31 = vsel %vm737_vm3, %v1999_v30, 0.0  ;;  %vm1633_vm3 = vcmask 257024  }
 0x7a0   : > { %1351 = vadd.xlane.f32.xlu0 %v1350_v31 }
 0x80b   : > { %v1349_v38 = vpop.xlane.xlu2 %1348 }
 0x80c   : > { %2000 = vrcp.f32 %v1349_v38  ;;  %v1966_v38 = vld [vmem:[%s2422_s10] ss:$0 sm:$0xff] }
 0x812   : > { %v2001_v40 = vpop.eup %2000 }
 0x813   : > { %v1352_v39 = vpop.xlane.xlu0 %1351  ;;  %v1355_v42 = vmul.f32 %v2001_v40, %v1997_v27 }
 0x814   : > { %2002 = vrcp.f32 %v1352_v39 }
 0x815   : > { %2004 = vrcp.f32 %v2022_v1 }
 0x81a   : > { %v2003_v41 = vpop.eup %2002 }
 0x81b   : > { %v1356_v43 = vmul.f32 %v2003_v41, %v1999_v30  ;;  %v2005_v2 = vpop.eup %2004 }
 0x81c   : > { %v1424_v3 = vmul.f32 32.0, %v2005_v2  ;;  %vm1428_vm7 = vweird.f32 %v2005_v2 }
 0x81d   : > { %v1357_v44 = vpack.c.bf16 %v1356_v43, %v1355_v42  ;;  %v1967_v42 = vld [vmem:[%s2423_s11] ss:$0 sm:$0xff] }
 0x81e   : > { %v1425_v4 = vsub.f32 1.0, %v1424_v3 }
 0x81f   : > { %1879 = vmatmul.msk.bf16.vlgmr.msrb.gmra.mxu2 %vm733_vm2, %v1357_v44 }
 0x820   : > { %v1426_v5 = vmul.f32 %v2005_v2, %v1425_v4 }
 0x822   : > { %v1427_v7 = vadd.f32 %v2005_v2, %v1426_v5 }
 0x824   : > { %v2351_v8 = vsel %vm1428_vm7, %v2005_v2, %v1427_v7 }
 0x8a2   : > { %v1374_v47 = vpop.f32.mrf.mxu2 }
 0x8aa   : > { %v1376_v48 = vpop.f32.mrf.mxu2 }
 0x8ab   : > { %v1379_v49 = vpack.c.bf16 %v1376_v48, %v1374_v47 }
 0x8ad   : > { %1881 = vmatmul.msk.bf16.vlgmr.msrb.gmra.mxu3 %vm712_vm1, %v1379_v49  ;;  %v1942_v49 = vld [vmem:[%s2426_s14 + $0x18] sm:$0xff] }
 0x8ae   : > { %1563 = vmatpush.bf16.msra.mxu1 %v1942_v49 }
 0x8b2   : > { %1564 = vmatpush.bf16.msra.mxu1 %v1941_v50 }
 0x930   : > { %v1397_v52 = vpop.f32.mrf.mxu3 }
 0x931   : > { %v1402_v53 = vadd.f32 %v1397_v52, %v1201_v14  ;;  %v1939_v52 = vld [vmem:[%s2426_s14] sm:$0xff] }
 0x933   : > { %v1408_v55 = vadd.f32 %v1965_v51, %v1402_v53 }
 0x935   : > { %v1412_v56 = vadd.f32 %v1410_v54, %v1408_v55  ;;  %v1968_v54 = vld [vmem:[%s2425_s13] ss:$0 sm:$0xff] }
 0x937   : > { %v1416_v58 = vsel %vm619_vm0, %v1412_v56, 0.0 }
 0x938   : > { %v1399_v59 = vpop.f32.mrf.mxu3  ;;  %1417 = vadd.xlane.f32.xlu1 %v1416_v58 }
 0x939   : > { %v1403_v60 = vadd.f32 %v1399_v59, %v1202_v17 }
 0x93b   : > { %v1409_v62 = vadd.f32 %v1965_v51, %v1403_v60  ;;  %v1940_v51 = vld [vmem:[%s2426_s14 + $0x8] sm:$0xff] }
 0x93c   : > { %1565 = vmatpush.bf16.msra.mxu1 %v1940_v51 }
 0x93d   : > { %v1413_v63 = vadd.f32 %v1411_v61, %v1409_v62  ;;  %v1969_v61 = vld [vmem:[%s2427_s15] ss:$0 sm:$0xff] }
 0x93f   : > { %v1420_v0 = vsel %vm1419_vm6, %v1413_v63, 0.0 }
 0x940   : > { %1421 = vadd.xlane.f32.xlu2 %v1420_v0  ;;  %1566 = vmatpush.bf16.msra.mxu1 %v1939_v52 }
 0x9ab   : > { %v1418_v9 = vpop.xlane.xlu1 %1417 }
 0x9ac   : > { %v1430_v10 = vmul.f32 %v2351_v8, %v1418_v9 }
 0x9ae   : > { %v1432_v12 = vsub.f32 %v1412_v56, %v1430_v10 }
 0x9b0   : > { %v1434_v14 = vmul.f32 %v1432_v12, %v1432_v12 }
 0x9b2   : > { %v1436_v15 = vsel %vm619_vm0, %v1434_v14, 0.0 }
 0x9b3   : > { %v1422_v16 = vpop.xlane.xlu2 %1421  ;;  %1437 = vadd.xlane.f32.xlu0 %v1436_v15 }
 0x9b4   : > { %v1431_v17 = vmul.f32 %v2351_v8, %v1422_v16 }
 0x9b6   : > { %v1433_v18 = vsub.f32 %v1413_v63, %v1431_v17 }
 0x9b8   : > { %v1435_v19 = vmul.f32 %v1433_v18, %v1433_v18 }
 0x9ba   : > { %v1439_v20 = vsel %vm1419_vm6, %v1435_v19, 0.0 }
 0x9bb   : > { %1440 = vadd.xlane.f32.xlu1 %v1439_v20 }
 0xa26   : > { %v1438_v22 = vpop.xlane.xlu0 %1437 }
 0xa27   : > { %v1442_v11 = vmul.f32 %v1438_v22, %v2351_v8 }
 0xa29   : > { %v1444_v24 = vadd.f32 1e-05, %v1442_v11 }
 0xa2b   : > { %2006 = vrsqrt.f32 %v1444_v24  ;;  %vm1452_vm9 = vweird.f32 %v1444_v24 }
 0xa2e   : > { %v1441_v26 = vpop.xlane.xlu1 %1440 }
 0xa2f   : > { %v1443_v6 = vmul.f32 %v1441_v26, %v2351_v8 }
 0xa31   : > { %v2007_v13 = vpop.eup %2006  ;;  %v1445_v27 = vadd.f32 1e-05, %v1443_v6 }
 0xa32   : > { %v1447_v28 = vmul.f32 %v2007_v13, %v1444_v24  ;;  %vm1453_vm8 = vweird.f32 %v2007_v13 }
 0xa33   : > { %2008 = vrsqrt.f32 %v1445_v27  ;;  %vm1454_vm10 = vmor %vm1452_vm9, %vm1453_vm8  ;;  %vm1462_vm12 = vweird.f32 %v1445_v27 }
 0xa34   : > { %v1448_v29 = vmul.f32 %v2007_v13, %v1447_v28 }
 0xa36   : > { %v1449_v30 = vmul.f32 0.5, %v1448_v29 }
 0xa38   : > { %v1450_v31 = vsub.f32 1.5, %v1449_v30 }
 0xa39   : > { %v2009_v25 = vpop.eup %2008 }
 0xa3a   : > { %v1451_v32 = vmul.f32 %v2007_v13, %v1450_v31  ;;  %v1457_v33 = vmul.f32 %v2009_v25, %v1445_v27  ;;  %vm1463_vm11 = vweird.f32 %v2009_v25 }
 0xa3b   : > { %vm1464_vm13 = vmor %vm1462_vm12, %vm1463_vm11 }
 0xa3c   : > { %v1458_v34 = vmul.f32 %v2009_v25, %v1457_v33  ;;  %v1455_v35 = vsel %vm1454_vm10, %v2007_v13, %v1451_v32  ;;  %v1971_v33 = vld [vmem:[%s2429_s17] ss:$0 sm:$0xff] }
 0xa3d   : > { %v1466_v39 = vmul.f32 %v1455_v35, %v1432_v12 }
 0xa3e   : > { %v1459_v36 = vmul.f32 0.5, %v1458_v34 }
 0xa3f   : > { %v1471_v43 = vmul.f32 %v1966_v38, %v1466_v39 }
 0xa40   : > { %v1460_v37 = vsub.f32 1.5, %v1459_v36 }
 0xa41   : > { %v1476_v46 = vadd.f32 %v1967_v42, %v1471_v43 }
 0xa42   : > { %v1461_v40 = vmul.f32 %v2009_v25, %v1460_v37 }
 0xa44   : > { %v1465_v41 = vsel %vm1464_vm13, %v2009_v25, %v1461_v40  ;;  %v1970_v25 = vld [vmem:[%s2428_s16] ss:$0 sm:$0xff] }
 0xa45   : > { %v1467_v44 = vmul.f32 %v1465_v41, %v1433_v18 }
 0xa47   : > { %v1472_v45 = vmul.f32 %v1966_v38, %v1467_v44 }
 0xa49   : > { %v1477_v47 = vadd.f32 %v1967_v42, %v1472_v45 }
 0xa4b   : > { %v1478_v48 = vpack.c.bf16 %v1477_v47, %v1476_v46 }
 0xa4d   : > { %1890 = vmatmul.msk.bf16.vlgmr.msra.gmra.mxu0 %vm619_vm0, %v1478_v48 }
 0xaca   : > { %v1511_v53 = vpop.f32.mrf.mxu0 }
 0xacb   : > { %v1512_v55 = vadd.f32 %v1968_v54, %v1511_v53 }
 0xacd   : > { %v1516_v58 = vmax.f32 %v1512_v55, 0.0 }
 0xad2   : > { %v1513_v56 = vpop.f32.mrf.mxu0 }
 0xad3   : > { %v1514_v57 = vadd.f32 %v1968_v54, %v1513_v56 }
 0xad5   : > { %v1517_v59 = vmax.f32 %v1514_v57, 0.0 }
 0xad7   : > { %v1518_v60 = vpack.c.bf16 %v1517_v59, %v1516_v58 }
 0xad9   : > { %1907 = vmatmul.msk.bf16.vlgmr.msra.gmra.mxu1 %vm1555_vm14, %v1518_v60 }
 0xb56   : > { %v1568_v62 = vpop.f32.mrf.mxu1 }
 0xb57   : > { %v1569_v63 = vadd.f32 %v1969_v61, %v1568_v62 }
 0xb59   : > { %v1573_v0 = vadd.f32 %v1569_v63, %v1476_v46 }
 0xb5b   : > { %v1577_v1 = vsel %vm619_vm0, %v1573_v0, 0.0 }
 0xb5c   : > { %1578 = vadd.xlane.f32.xlu2 %v1577_v1 }
 0xb5e   : > { %v1570_v2 = vpop.f32.mrf.mxu1 }
 0xb5f   : > { %v1571_v3 = vadd.f32 %v1969_v61, %v1570_v2 }
 0xb61   : > { %v1574_v4 = vadd.f32 %v1571_v3, %v1477_v47 }
 0xb63   : > { %v1580_v5 = vsel %vm1419_vm6, %v1574_v4, 0.0 }
 0xb64   : > { %1581 = vadd.xlane.f32.xlu0 %v1580_v5 }
 0xbcf   : > { %v1579_v7 = vpop.xlane.xlu2 %1578 }
 0xbd0   : > { %v1583_v9 = vmul.f32 %v1579_v7, %v2351_v8 }
 0xbd2   : > { %v1585_v10 = vsub.f32 %v1573_v0, %v1583_v9 }
 0xbd4   : > { %v1587_v12 = vmul.f32 %v1585_v10, %v1585_v10 }
 0xbd6   : > { %v1589_v14 = vsel %vm619_vm0, %v1587_v12, 0.0 }
 0xbd7   : > { %v1582_v15 = vpop.xlane.xlu0 %1581  ;;  %1590 = vadd.xlane.f32.xlu1 %v1589_v14 }
 0xbd8   : > { %v1584_v16 = vmul.f32 %v1582_v15, %v2351_v8 }
 0xbda   : > { %v1586_v17 = vsub.f32 %v1574_v4, %v1584_v16 }
 0xbdc   : > { %v1588_v18 = vmul.f32 %v1586_v17, %v1586_v17 }
 0xbde   : > { %v1592_v19 = vsel %vm1419_vm6, %v1588_v18, 0.0  ;;  %vm1635_vm6 = vcmask 253952  }
 0xbdf   : > { %1593 = vadd.xlane.f32.xlu2 %v1592_v19 }
 0xc4a   : > { %v1591_v20 = vpop.xlane.xlu1 %1590 }
 0xc4b   : > { %v1595_v21 = vmul.f32 %v1591_v20, %v2351_v8 }
 0xc4d   : > { %v1597_v22 = vadd.f32 1e-05, %v1595_v21 }
 0xc4f   : > { %2010 = vrsqrt.f32 %v1597_v22  ;;  %vm1605_vm0 = vweird.f32 %v1597_v22 }
 0xc52   : > { %v1594_v11 = vpop.xlane.xlu2 %1593 }
 0xc53   : > { %v1596_v23 = vmul.f32 %v1594_v11, %v2351_v8 }
 0xc55   : > { %v2011_v24 = vpop.eup %2010  ;;  %v1598_v26 = vadd.f32 1e-05, %v1596_v23 }
 0xc56   : > { %v1600_v6 = vmul.f32 %v2011_v24, %v1597_v22  ;;  %vm1606_vm15 = vweird.f32 %v2011_v24 }
 0xc57   : > { %2012 = vrsqrt.f32 %v1598_v26  ;;  %vm1607_vm1 = vmor %vm1605_vm0, %vm1606_vm15  ;;  %vm1615_vm4 = vweird.f32 %v1598_v26 }
 0xc58   : > { %v1601_v13 = vmul.f32 %v2011_v24, %v1600_v6 }
 0xc5a   : > { %v1602_v27 = vmul.f32 0.5, %v1601_v13 }
 0xc5c   : > { %v1603_v28 = vsub.f32 1.5, %v1602_v27 }
 0xc5d   : > { %v2013_v29 = vpop.eup %2012 }
 0xc5e   : > { %v1604_v30 = vmul.f32 %v2011_v24, %v1603_v28  ;;  %v1610_v31 = vmul.f32 %v2013_v29, %v1598_v26  ;;  %vm1616_vm2 = vweird.f32 %v2013_v29 }
 0xc5f   : > { %vm1617_vm5 = vmor %vm1615_vm4, %vm1616_vm2 }
 0xc60   : > { %v1608_v32 = vsel %vm1607_vm1, %v2011_v24, %v1604_v30  ;;  %v1611_v8 = vmul.f32 %v2013_v29, %v1610_v31 }
 0xc61   : > { %v1619_v34 = vmul.f32 %v1608_v32, %v1585_v10 }
 0xc62   : > { %v1612_v35 = vmul.f32 0.5, %v1611_v8 }
 0xc63   : > { %v1624_v36 = vmul.f32 %v1970_v25, %v1619_v34 }
 0xc64   : > { %v1613_v37 = vsub.f32 1.5, %v1612_v35 }
 0xc65   : > { %v1629_v38 = vadd.f32 %v1971_v33, %v1624_v36 }
 0xc66   : > { %v1614_v39 = vmul.f32 %v2013_v29, %v1613_v37 }
 0xc67   : > { %v1631_v40 = vpack.c.bf16 %v1629_v38, %v1629_v38 }
 0xc68   : > { %v1618_v41 = vsel %vm1617_vm5, %v2013_v29, %v1614_v39 }
 0xc69   : > { %1634 = vst.msk [vmem:[%s589_s19] sm:$0xf] %vm1633_vm3, %v1631_v40  ;;  %v1620_v42 = vmul.f32 %v1618_v41, %v1586_v17 }
 0xc6b   : > { %v1625_v43 = vmul.f32 %v1970_v25, %v1620_v42 }
 0xc6d   : > { %v1630_v44 = vadd.f32 %v1971_v33, %v1625_v43 }
 0xc6f   : > { %v1632_v45 = vpack.c.bf16 %v1630_v44, %v1630_v44 }
 0xc71   : > { %1636 = vst.msk [vmem:[%s589_s19 + $0x4] sm:$0x1] %vm1635_vm6, %v1632_v45 }
 0xc72 PF: > { %s28_s27 = sadd.s32 1, %s2020_s27  }
 0xc73   : > { %p25_p4 = scmp.ge.s32.totalorder %s28_s27, 4  }
 0xc75   :  { %27 = sbr.rel (!%p25_p4) target bundleno = 4 (0x4), region = 146 }

// kernel: mft_forward.6
= control target key start
LH: loop header
LB: loop body
LE: loop exit
PB: predicated region body
PF: predicated region fallthrough
CT: control target
= control target key end

     0   :  { %s2552_s0 = inlined_call_operand.vmem [shape: bf16[2,10,32], index: 0, kind: input, shape index: {}]   ;;  %s2553_s1 = inlined_call_operand.vmem [shape: f32[2,1,10], index: 1, kind: input, shape index: {}]   ;;  %s2554_s2 = inlined_call_operand.vmem [shape: bf16[4,32,8], index: 2, kind: input, shape index: {}]   ;;  %s2555_s3 = inlined_call_operand.vmem [shape: f32[4,1,8], index: 3, kind: input, shape index: {}]   ;;  %s2556_s4 = inlined_call_operand.vmem [shape: bf16[4,32,8], index: 4, kind: input, shape index: {}]   ;;  %s2557_s5 = inlined_call_operand.vmem [shape: f32[4,1,8], index: 5, kind: input, shape index: {}]   ;;  %s2558_s6 = inlined_call_operand.vmem [shape: bf16[4,32,8], index: 6, kind: input, shape index: {}]   ;;  %s2559_s7 = inlined_call_operand.vmem [shape: f32[4,1,8], index: 7, kind: input, shape index: {}]   ;;  %s2560_s8 = inlined_call_operand.vmem [shape: bf16[4,8,32], index: 8, kind: input, shape index: {}]   ;;  %s2561_s9 = inlined_call_operand.vmem [shape: f32[1,32], index: 9, kind: input, shape index: {}]   ;;  %s2562_s10 = inlined_call_operand.vmem [shape: f32[1,32], index: 10, kind: input, shape index: {}]   ;;  %s2563_s11 = inlined_call_operand.vmem [shape: f32[1,32], index: 11, kind: input, shape index: {}]   ;;  %s2564_s12 = inlined_call_operand.vmem [shape: bf16[32,64], index: 12, kind: input, shape index: {}]   ;;  %s2565_s13 = inlined_call_operand.vmem [shape: f32[1,64], index: 13, kind: input, shape index: {}]   ;;  %s2566_s14 = inlined_call_operand.vmem [shape: bf16[64,32], index: 14, kind: input, shape index: {}]   ;;  %s2567_s15 = inlined_call_operand.vmem [shape: f32[1,32], index: 15, kind: input, shape index: {}]   ;;  %s2568_s16 = inlined_call_operand.vmem [shape: f32[1,32], index: 16, kind: input, shape index: {}]   ;;  %s2569_s17 = inlined_call_operand.vmem [shape: f32[1,32], index: 17, kind: input, shape index: {}]   ;;  %s2570_s18 = inlined_call_operand.vmem [shape: f32[1,32], index: 18, kind: input, shape index: {}]   ;;  %s2571_s19 = inlined_call_operand.vmem [shape: f32[1,32], index: 19, kind: input, shape index: {}]   ;;  %s2572_s20 = inlined_call_operand.vmem [shape: bf16[2,10,32], index: 20, kind: output, shape index: {}]  }
   0x1   :  { %2576 = sst [smem:[#allocation2_spill]] %s2552_s0 }
   0x2   :  { %2577 = sst [smem:[#allocation3_spill]] %s2553_s1  ;;  %s2244_s1 = smov 0  }
   0x3   :  { %2578 = sst [smem:[#allocation4_spill]] %s2554_s2 }
   0x4   :  { %2579 = sst [smem:[#allocation5_spill]] %s2555_s3 }
   0x5   :  { %2580 = sst [smem:[#allocation6_spill]] %s2556_s4 }
   0x6 LB: > { %s1811_s22 = sadd.s32 4294967295, %s2136_s1   ;;  %p1815_p0 = scmp.ge.s32.totalorder %s2136_s1, 1  ;;  %s2136_s1 = sphi %s2244_s1, %s30_s1  }
   0x7   : > { %p570_p1 = scmp.lt.s32.totalorder %s2136_s1, 3 }
   0x9   : > { %p571_p2 = pnand %p1815_p0, %p570_p1 }
   0xa   : > { %s2581_s2 = sld [smem:[#allocation4_spill]] (!%p571_p2)  ;;  %p631_p3 = scmp.lt.s32.totalorder (!%p571_p2), %s1811_s22, 1 }
   0xb   : > { %574 = sbr.rel (%p571_p2) target bundleno = 3456 (0xd80), region = 100  ;;  %s2582_s26 = sld [smem:[#allocation6_spill]] (!%p571_p2) }
   0xc   : > { %s2583_s23 = sld [smem:[#allocation2_spill]] (!%p571_p2) }
   0xd   : > { %s2584_s27 = sld [smem:[#allocation3_spill]] (!%p571_p2) }
  0x10   : > { %v2024_v0 = vld [vmem:[%s2581_s2 + $0x8] sm:$0xff]  ;;  %v2023_v2 = vld [vmem:[%s2581_s2] sm:$0xff]  ;;  %s2587_s22 = smov (!%p631_p3, %s1811_s22), 1  ;;  %vm673_vm0 = vcmask 261120   ;;  %vm766_vm1 = vcmask 64512   ;;  %vm787_vm2 = vcmask 80896  }
  0x11   : > { %v2026_v1 = vld [vmem:[%s2582_s26 + $0x8] sm:$0xff]  ;;  %683 = vmatpush.bf16.msra.mxu0 %v2024_v0  ;;  %v2025_v3 = vld [vmem:[%s2582_s26] sm:$0xff]  ;;  %s2020_s30 = sshll.u32 %s2587_s22, 3  ;;  %v2032_v24 = vld [vmem:[%s2582_s26 + $0x18] sm:$0xff]  ;;  %vm791_vm3 = vcmask 74752   ;;  %vm816_vm4 = vcmask 1044480  }
  0x12   : > { %719 = vmatpush.bf16.msra.mxu1 %v2026_v1  ;;  %s2272_s24 = scalar_lea.vmem %s2583_s23, %s2020_s30  ;;  %v2063_v9 = vld [vmem:[%s2557_s5] ss:$0 sm:$0xff]  ;;  %s2585_s23 = sld [smem:[#allocation5_spill]]  ;;  %v2028_v22 = vld [vmem:[%s2558_s6 + $0x8] sm:$0xff]  ;;  %v2031_v32 = vld [vmem:[%s2582_s26 + $0x10] sm:$0xff]  ;;  %vm1018_vm5 = vcmask 1043456  }
  0x13   : > { %v1822_v4 = vld [vmem:[%s2272_s24] sm:$0xf]  ;;  %v2022_v5 = vld [vmem:[%s2272_s24] sm:$0x10]  ;;  %s638_s28 = scalar_lea.vmem %s2584_s27, %s2587_s22  ;;  %753 = vmatpush.bf16.msra.mxu2 %v2028_v22  ;;  %v2030_v33 = vld [vmem:[%s2581_s2 + $0x18] sm:$0xff]  ;;  %vm1473_vm6 = vcmask 254976  }
  0x14   : > { %v2276_v6 = vor.u32 %v2022_v5, %v1822_v4  ;;  %v2027_v23 = vld [vmem:[%s2558_s6] sm:$0xff]  ;;  %v2029_v34 = vld [vmem:[%s2581_s2 + $0x10] sm:$0xff]  ;;  %v2034_v60 = vld [vmem:[%s2558_s6 + $0x18] sm:$0xff]  ;;  %vm1609_vm14 = vcmask 523264  }
  0x15   : > { %684 = vmatpush.bf16.msra.mxu0 %v2023_v2  ;;  %v2305_v25 = vld [vmem:[%s638_s28] ss:$0 sm:$0xff]  ;;  %v2066_v53 = vld [vmem:[%s2557_s5 + $0x1] ss:$0 sm:$0xff]  ;;  %v2033_v61 = vld [vmem:[%s2558_s6 + $0x10] sm:$0xff]  ;;  %s643_s28 = scalar_lea.vmem %s2572_s20, %s2020_s30 }
  0x16   : > { %720 = vmatpush.bf16.msra.mxu1 %v2025_v3  ;;  %v2065_v46 = vld [vmem:[%s2559_s7] ss:$0 sm:$0xff] }
  0x17   : > { %754 = vmatpush.bf16.msra.mxu2 %v2027_v23 }
  0x18   : > { %1832 = vmatmul.msk.bf16.vlgmr.msra.gmra.mxu0 %vm673_vm0, %v2276_v6  ;;  %v2062_v12 = vld [vmem:[%s2585_s23] ss:$0 sm:$0xff]  ;;  %v2067_v5 = vld [vmem:[%s2585_s23 + $0x1] ss:$0 sm:$0xff] }
  0x19   : > { %1841 = vmatmul.msk.bf16.vlgmr.msra.gmra.mxu1 %vm673_vm0, %v2276_v6 }
  0x1a   : > { %1850 = vmatmul.msk.bf16.vlgmr.msra.gmra.mxu2 %vm673_vm0, %v2276_v6  ;;  %864 = vmatpush.bf16.msrb.mxu1 %v2030_v33 }
  0x1b   : > { %902 = vmatpush.bf16.msrb.mxu2 %v2032_v24 }
  0x1e   : > { %865 = vmatpush.bf16.msrb.mxu1 %v2029_v34 }
  0x1f   : > { %903 = vmatpush.bf16.msrb.mxu2 %v2031_v32 }
  0x29   : > { %1866 = vmatmul.msk.bf16.vlgmr.msrb.gmra.mxu1 %vm673_vm0, %v2276_v6 }
  0x2a   : > { %1880 = vmatmul.msk.bf16.vlgmr.msrb.gmra.mxu2 %vm673_vm0, %v2276_v6 }
  0x95   : > { %v686_v7 = vpop.f32.mrf.mxu0 }
  0x96   : > { %v722_v8 = vpop.f32.mrf.mxu1  ;;  %v687_v17 = vadd.f32 %v2062_v12, %v686_v7 }
  0x97   : > { %v723_v13 = vadd.f32 %v2063_v9, %v722_v8 }
  0x98   : > { %v691_v20 = vmul.f32 0.35355338, %v687_v17 }
  0x9d   : > { %v688_v10 = vpop.f32.mrf.mxu0  ;;  %v756_v45 = vpop.f32.mrf.mxu2 }
  0x9e   : > { %v724_v11 = vpop.f32.mrf.mxu1  ;;  %v689_v15 = vadd.f32 %v2062_v12, %v688_v10  ;;  %v757_v48 = vadd.f32 %v2065_v46, %v756_v45  ;;  %v2035_v45 = vld [vmem:[%s2581_s2 + $0x20] sm:$0xff] }
  0x9f   : > { %v725_v14 = vadd.f32 %v2063_v9, %v724_v11 }
  0xa0   : > { %v692_v19 = vmul.f32 0.35355338, %v689_v15 }
  0xa1   : > { %v762_v16 = vpack.c.bf16 %v725_v14, %v723_v13  ;;  %v835_v13 = vld [vmem:[%s2560_s8] sm:$0xf] }
  0xa2   : > { %v761_v21 = vpack.c.bf16 %v692_v19, %v691_v20  ;;  %v1040_v14 = vsel %vm1018_vm5, %v835_v13, 0 }
  0xa3   : > { %v771_v18 = vsel %vm766_vm1, %v762_v16, 0 }
  0xa4   : > { %780 = vmatpush.bf16.xpose.msra.mxu3 %v771_v18 }
  0xa5   : > { %v758_v47 = vpop.f32.mrf.mxu2 }
  0xa6   : > { %v759_v49 = vadd.f32 %v2065_v46, %v758_v47  ;;  %v867_v0 = vpop.f32.mrf.mxu1 }
  0xa7   : > { %v868_v8 = vadd.f32 %v2067_v5, %v867_v0 }
  0xa8   : > { %v812_v50 = vpack.c.bf16 %v759_v49, %v757_v48 }
  0xa9   : > { %v872_v10 = vmul.f32 0.35355338, %v868_v8 }
  0xaa   : > { %v818_v51 = vsel %vm816_vm4, %v812_v50, 0 }
  0xab   : > { %1851 = vmatmul.msk.bf16.vlgmr.msra.gmra.mxu3 %vm766_vm1, %v761_v21  ;;  %827 = vmatpush.bf16.msrb.mxu0 %v818_v51 }
  0xac   : > { %938 = vmatpush.bf16.msrb.mxu3 %v2034_v60  ;;  %v2069_v60 = vld [vmem:[%s2557_s5 + $0x2] ss:$0 sm:$0xff] }
  0xad   : > { %v905_v52 = vpop.f32.mrf.mxu2 }
  0xae   : > { %v906_v54 = vadd.f32 %v2066_v53, %v905_v52  ;;  %v869_v7 = vpop.f32.mrf.mxu1 }
  0xaf   : > { %v870_v9 = vadd.f32 %v2067_v5, %v869_v7 }
  0xb0   : > { %939 = vmatpush.bf16.msrb.mxu3 %v2033_v61  ;;  %v2070_v61 = vld [vmem:[%s2585_s23 + $0x2] ss:$0 sm:$0xff] }
  0xb1   : > { %v873_v11 = vmul.f32 0.35355338, %v870_v9 }
  0xb3   : > { %v946_v12 = vpack.c.bf16 %v873_v11, %v872_v10  ;;  %v2040_v10 = vld [vmem:[%s2558_s6 + $0x28] sm:$0xff] }
  0xb4   : > { %1049 = vmatpush.bf16.msra.mxu3 %v1040_v14 }
  0xb5   : > { %v907_v55 = vpop.f32.mrf.mxu2 }
  0xb6   : > { %v908_v56 = vadd.f32 %v2066_v53, %v907_v55  ;;  %v1897_v53 = vld [vmem:[%s2560_s8 + $0x4] sm:$0xf] }
  0xb8   : > { %v947_v57 = vpack.c.bf16 %v908_v56, %v906_v54  ;;  %v1020_v54 = vsel %vm1018_vm5, %v1897_v53, 0  ;;  %v2072_v53 = vld [vmem:[%s2557_s5 + $0x3] ss:$0 sm:$0xff] }
  0xb9   : > { %1029 = vmatpush.bf16.msra.mxu2 %v1020_v54 }
  0xba   : > { %v952_v58 = vsel %vm766_vm1, %v947_v57, 0 }
  0xbb   : > { %961 = vmatpush.bf16.xpose.msra.mxu0 %v952_v58  ;;  %1894 = vmatmul.msk.bf16.vlgmr.msrb.gmra.mxu3 %vm673_vm0, %v2276_v6 }
  0xbd   : > { %1158 = vmatpush.bf16.msrb.mxu2 %v2040_v10 }
 0x12e   : > { %v782_v26 = vpop.f32.mrf.mxu3 }
 0x12f   : > { %v783_v27 = vadd.f32 %v2305_v25, %v782_v26 }
 0x131   : > { %v788_v28 = vsel %vm787_vm2, %v783_v27, -inf }
 0x132   : > { %789 = vmax.xlane.f32.xlu0 %v788_v28 }
 0x136   : > { %v784_v29 = vpop.f32.mrf.mxu3 }
 0x137   : > { %v785_v30 = vadd.f32 %v2305_v25, %v784_v29 }
 0x139   : > { %v792_v31 = vsel %vm791_vm3, %v785_v30, -inf }
 0x13a   : > { %793 = vmax.xlane.f32.xlu0 %v792_v31 }
 0x1a5   : > { %v790_v35 = vpop.xlane.xlu0 %789 }
 0x1a6   : > { %v795_v36 = vsub.f32 %v783_v27, %v790_v35  ;;  %v941_v35 = vpop.f32.mrf.mxu3 }
 0x1a8   : > { %v797_v37 = vmul.f32 1.442695, %v795_v36  ;;  %v2068_v36 = vld [vmem:[%s2559_s7 + $0x1] ss:$0 sm:$0xff] }
 0x1aa   : > { %2084 = vpow2.f32 %v797_v37 }
 0x1ad   : > { %v794_v38 = vpop.xlane.xlu0 %793 }
 0x1ae   : > { %v796_v39 = vsub.f32 %v785_v30, %v794_v38  ;;  %v943_v37 = vpop.f32.mrf.mxu3  ;;  %v942_v38 = vadd.f32 %v2068_v36, %v941_v35 }
 0x1b0   : > { %v2085_v40 = vpop.eup %2084  ;;  %v799_v41 = vmul.f32 1.442695, %v796_v39  ;;  %v944_v39 = vadd.f32 %v2068_v36, %v943_v37 }
 0x1b1   : > { %v801_v42 = vsel %vm787_vm2, %v2085_v40, 0.0 }
 0x1b2   : > { %2086 = vpow2.f32 %v799_v41  ;;  %802 = vadd.xlane.f32.xlu1 %v801_v42  ;;  %v2038_v42 = vld [vmem:[%s2582_s26 + $0x28] sm:$0xff] }
 0x1b8   : > { %v2087_v43 = vpop.eup %2086 }
 0x1b9   : > { %v804_v44 = vsel %vm791_vm3, %v2087_v43, 0.0 }
 0x1ba   : > { %805 = vadd.xlane.f32.xlu1 %v804_v44  ;;  %v2037_v44 = vld [vmem:[%s2582_s26 + $0x20] sm:$0xff] }
 0x225   : > { %v803_v59 = vpop.xlane.xlu1 %802 }
 0x226   : > { %2088 = vrcp.f32 %v803_v59 }
 0x22c   : > { %v2089_v63 = vpop.eup %2088 }
 0x22d   : > { %v806_v62 = vpop.xlane.xlu1 %805  ;;  %v809_v2 = vmul.f32 %v2089_v63, %v2085_v40  ;;  %v991_v40 = vpack.c.bf16 %v944_v39, %v942_v38  ;;  %v2044_v38 = vld [vmem:[%s2582_s26 + $0x38] sm:$0xff] }
 0x22e   : > { %2090 = vrcp.f32 %v806_v62 }
 0x22f   : > { %v996_v41 = vsel %vm816_vm4, %v991_v40, 0  ;;  %v2043_v40 = vld [vmem:[%s2582_s26 + $0x30] sm:$0xff] }
 0x230   : > { %1005 = vmatpush.bf16.msra.mxu1 %v996_v41 }
 0x234   : > { %v2091_v1 = vpop.eup %2090  ;;  %1122 = vmatpush.bf16.msrb.mxu1 %v2038_v42  ;;  %v2042_v42 = vld [vmem:[%s2581_s2 + $0x38] sm:$0xff] }
 0x235   : > { %v810_v3 = vmul.f32 %v2091_v1, %v2087_v43  ;;  %v2036_v43 = vld [vmem:[%s2581_s2 + $0x28] sm:$0xff] }
 0x237   : > { %v811_v4 = vpack.c.bf16 %v810_v3, %v809_v2 }
 0x238   : > { %1123 = vmatpush.bf16.msrb.mxu1 %v2037_v44 }
 0x239   : > { %1852 = vmatmul.msk.bf16.vlgmr.msrb.gmra.mxu0 %vm787_vm2, %v811_v4 }
 0x23a   : > { %1084 = vmatpush.bf16.msrb.mxu0 %v2036_v43  ;;  %v2041_v43 = vld [vmem:[%s2581_s2 + $0x30] sm:$0xff] }
 0x23e   : > { %1085 = vmatpush.bf16.msrb.mxu0 %v2035_v45 }
 0x249   : > { %1895 = vmatmul.msk.bf16.vlgmr.msra.gmra.mxu0 %vm766_vm1, %v946_v12  ;;  %v2039_v12 = vld [vmem:[%s2558_s6 + $0x20] sm:$0xff] }
 0x24a   : > { %1159 = vmatpush.bf16.msrb.mxu2 %v2039_v12 }
 0x259   : > { %1913 = vmatmul.msk.bf16.vlgmr.msrb.gmra.mxu0 %vm673_vm0, %v2276_v6 }
 0x2b6   : > { %v829_v15 = vpop.f32.mrf.mxu0 }
 0x2be   : > { %v831_v16 = vpop.f32.mrf.mxu0 }
 0x2bf   : > { %v834_v17 = vpack.c.bf16 %v831_v16, %v829_v15 }
 0x2c1   : > { %1899 = vmatmul.msk.bf16.vlgmr.msra.gmra.mxu3 %vm766_vm1, %v834_v17 }
 0x2c6   : > { %v963_v18 = vpop.f32.mrf.mxu0 }
 0x2c7   : > { %v964_v19 = vadd.f32 %v2305_v25, %v963_v18 }
 0x2c9   : > { %v968_v20 = vsel %vm787_vm2, %v964_v19, -inf }
 0x2ca   : > { %969 = vmax.xlane.f32.xlu2 %v968_v20 }
 0x2ce   : > { %v965_v21 = vpop.f32.mrf.mxu0 }
 0x2cf   : > { %v966_v22 = vadd.f32 %v2305_v25, %v965_v21 }
 0x2d1   : > { %v971_v23 = vsel %vm791_vm3, %v966_v22, -inf }
 0x2d2   : > { %972 = vmax.xlane.f32.xlu2 %v971_v23 }
 0x2d6   : > { %v1087_v58 = vpop.f32.mrf.mxu0 }
 0x2d7   : > { %v1088_v2 = vadd.f32 %v2070_v61, %v1087_v58 }
 0x2d9   : > { %v1092_v7 = vmul.f32 0.35355338, %v1088_v2 }
 0x2de   : > { %v1089_v63 = vpop.f32.mrf.mxu0 }
 0x2df   : > { %v1090_v4 = vadd.f32 %v2070_v61, %v1089_v63 }
 0x2e1   : > { %v1093_v8 = vmul.f32 0.35355338, %v1090_v4 }
 0x2e3   : > { %v1166_v9 = vpack.c.bf16 %v1093_v8, %v1092_v7  ;;  %v2046_v8 = vld [vmem:[%s2558_s6 + $0x38] sm:$0xff] }
 0x33d   : > { %v970_v24 = vpop.xlane.xlu2 %969 }
 0x33e   : > { %v974_v26 = vsub.f32 %v964_v19, %v970_v24 }
 0x340   : > { %v976_v27 = vmul.f32 1.442695, %v974_v26 }
 0x342   : > { %2092 = vpow2.f32 %v976_v27 }
 0x344   : > { %v2395_v11 = vpop.f32.mrf.mxu3 }
 0x345   : > { %v973_v28 = vpop.xlane.xlu2 %972 }
 0x346   : > { %v975_v29 = vsub.f32 %v966_v22, %v973_v28 }
 0x348   : > { %v2093_v30 = vpop.eup %2092  ;;  %v978_v31 = vmul.f32 1.442695, %v975_v29 }
 0x349   : > { %v980_v32 = vsel %vm787_vm2, %v2093_v30, 0.0 }
 0x34a   : > { %2094 = vpow2.f32 %v978_v31  ;;  %981 = vadd.xlane.f32.xlu0 %v980_v32 }
 0x34c   : > { %v2402_v13 = vpop.f32.mrf.mxu3 }
 0x350   : > { %v2095_v33 = vpop.eup %2094 }
 0x351   : > { %v983_v34 = vsel %vm791_vm3, %v2095_v33, 0.0 }
 0x352   : > { %984 = vadd.xlane.f32.xlu1 %v983_v34  ;;  %v2071_v34 = vld [vmem:[%s2559_s7 + $0x2] ss:$0 sm:$0xff] }
 0x3bd   : > { %v982_v46 = vpop.xlane.xlu0 %981 }
 0x3be   : > { %2096 = vrcp.f32 %v982_v46 }
 0x3c4   : > { %v2097_v48 = vpop.eup %2096 }
 0x3c5   : > { %v985_v47 = vpop.xlane.xlu1 %984  ;;  %v988_v50 = vmul.f32 %v2097_v48, %v2093_v30 }
 0x3c6   : > { %2098 = vrcp.f32 %v985_v47 }
 0x3cc   : > { %v2099_v49 = vpop.eup %2098 }
 0x3cd   : > { %v989_v51 = vmul.f32 %v2099_v49, %v2095_v33 }
 0x3cf   : > { %v990_v52 = vpack.c.bf16 %v989_v51, %v988_v50 }
 0x3d1   : > { %1896 = vmatmul.msk.bf16.vlgmr.msra.gmra.mxu1 %vm787_vm2, %v990_v52  ;;  %v1944_v52 = vld [vmem:[%s2560_s8 + $0x8] sm:$0xf] }
 0x3d2   : > { %v1239_v54 = vsel %vm1018_vm5, %v1944_v52, 0 }
 0x3d3   : > { %1248 = vmatpush.bf16.msra.mxu1 %v1239_v54 }
 0x3e1   : > { %1927 = vmatmul.msk.bf16.vlgmr.msrb.gmra.mxu1 %vm673_vm0, %v2276_v6 }
 0x44e   : > { %v1007_v55 = vpop.f32.mrf.mxu1 }
 0x456   : > { %v1009_v56 = vpop.f32.mrf.mxu1 }
 0x457   : > { %v1012_v57 = vpack.c.bf16 %v1009_v56, %v1007_v55 }
 0x459   : > { %1898 = vmatmul.msk.bf16.vlgmr.msra.gmra.mxu2 %vm766_vm1, %v1012_v57 }
 0x45a   : > { %1285 = vmatpush.bf16.msra.mxu2 %v2042_v42 }
 0x45e   : > { %v1125_v59 = vpop.f32.mrf.mxu1  ;;  %1286 = vmatpush.bf16.msra.mxu2 %v2041_v43 }
 0x45f   : > { %v1126_v0 = vadd.f32 %v2069_v60, %v1125_v59 }
 0x466   : > { %v1127_v62 = vpop.f32.mrf.mxu1 }
 0x467   : > { %v1128_v1 = vadd.f32 %v2069_v60, %v1127_v62 }
 0x469   : > { %v1167_v3 = vpack.c.bf16 %v1128_v1, %v1126_v0  ;;  %1941 = vmatmul.msk.bf16.vlgmr.msrb.gmra.mxu2 %vm673_vm0, %v2276_v6  ;;  %v2073_v0 = vld [vmem:[%s2585_s23 + $0x3] ss:$0 sm:$0xff] }
 0x46b   : > { %v1172_v5 = vsel %vm766_vm1, %v1167_v3, 0 }
 0x46c   : > { %1181 = vmatpush.bf16.xpose.msrb.mxu3 %v1172_v5 }
 0x473   : > { %1942 = vmatmul.msk.bf16.vlgmr.msrb.gmra.mxu3 %vm766_vm1, %v1166_v9  ;;  %v2045_v9 = vld [vmem:[%s2558_s6 + $0x30] sm:$0xff] }
 0x474   : > { %1323 = vmatpush.bf16.msra.mxu3 %v2044_v38 }
 0x478   : > { %1324 = vmatpush.bf16.msra.mxu3 %v2043_v40 }
 0x479   : > { %1959 = vmatmul.msk.bf16.vlgmr.msra.gmra.mxu2 %vm673_vm0, %v2276_v6 }
 0x483   : > { %1973 = vmatmul.msk.bf16.vlgmr.msra.gmra.mxu3 %vm673_vm0, %v2276_v6 }
 0x4dc   : > { %v1031_v31 = vpop.f32.mrf.mxu2 }
 0x4dd   : > { %v1052_v10 = vadd.f32 %v2395_v11, %v1031_v31 }
 0x4e4   : > { %v1033_v32 = vpop.f32.mrf.mxu2 }
 0x4ec   : > { %v1161_v33 = vpop.f32.mrf.mxu2 }
 0x4ed   : > { %v1162_v36 = vadd.f32 %v2071_v34, %v1161_v33 }
 0x4f4   : > { %v1163_v35 = vpop.f32.mrf.mxu2 }
 0x4f5   : > { %v1164_v37 = vadd.f32 %v2071_v34, %v1163_v35 }
 0x4f6   : > { %v1183_v14 = vpop.f32.mrf.mxu3 }
 0x4f7   : > { %v1184_v15 = vadd.f32 %v2305_v25, %v1183_v14  ;;  %v1211_v39 = vpack.c.bf16 %v1164_v37, %v1162_v36 }
 0x4f9   : > { %v1188_v16 = vsel %vm787_vm2, %v1184_v15, -inf  ;;  %v1216_v41 = vsel %vm816_vm4, %v1211_v39, 0 }
 0x4fa   : > { %1189 = vmax.xlane.f32.xlu2 %v1188_v16  ;;  %1225 = vmatpush.bf16.msra.mxu0 %v1216_v41 }
 0x4fc   : > { %v1288_v61 = vpop.f32.mrf.mxu2 }
 0x4fd   : > { %v1289_v2 = vadd.f32 %v2073_v0, %v1288_v61 }
 0x4fe   : > { %v1185_v17 = vpop.f32.mrf.mxu3  ;;  %1359 = vmatpush.bf16.msrb.mxu0 %v2046_v8 }
 0x4ff   : > { %v1186_v18 = vadd.f32 %v2305_v25, %v1185_v17  ;;  %v1293_v4 = vmul.f32 0.35355338, %v1289_v2 }
 0x501   : > { %v1191_v19 = vsel %vm791_vm3, %v1186_v18, -inf }
 0x502   : > { %1192 = vmax.xlane.f32.xlu0 %v1191_v19  ;;  %1360 = vmatpush.bf16.msrb.mxu0 %v2045_v9 }
 0x504   : > { %v1290_v1 = vpop.f32.mrf.mxu2 }
 0x505   : > { %v1291_v3 = vadd.f32 %v2073_v0, %v1290_v1  ;;  %v2138_v1 = vmov 32.0  }
 0x506   : > { %v1326_v51 = vpop.f32.mrf.mxu3 }
 0x507   : > { %v1327_v55 = vadd.f32 %v2072_v53, %v1326_v51  ;;  %v1294_v5 = vmul.f32 0.35355338, %v1291_v3  ;;  %v2075_v51 = vld [vmem:[%s2561_s9] ss:$0 sm:$0xff] }
 0x509   : > { %v1367_v7 = vpack.c.bf16 %v1294_v5, %v1293_v4 }
 0x50e   : > { %v1328_v56 = vpop.f32.mrf.mxu3 }
 0x50f   : > { %v1329_v57 = vadd.f32 %v2072_v53, %v1328_v56 }
 0x511   : > { %v1368_v58 = vpack.c.bf16 %v1329_v57, %v1327_v55  ;;  %v646_v57 = vld [vmem:[%s2272_s24 + $0x4] sm:$0x1] }
 0x512   : > { %v1465_v61 = vunpack.c.l.bf16 %v646_v57 }
 0x513   : > { %v1373_v59 = vsel %vm766_vm1, %v1368_v58, 0 }
 0x514   : > { %1382 = vmatpush.bf16.xpose.msrb.mxu1 %v1373_v59 }
 0x56d   : > { %v1190_v20 = vpop.xlane.xlu2 %1189 }
 0x56e   : > { %v1194_v21 = vsub.f32 %v1184_v15, %v1190_v20  ;;  %v1054_v15 = vadd.f32 %v2402_v13, %v1033_v32  ;;  %v2074_v32 = vld [vmem:[%s2559_s7 + $0x3] ss:$0 sm:$0xff] }
 0x570   : > { %v1196_v22 = vmul.f32 1.442695, %v1194_v21 }
 0x572   : > { %2100 = vpow2.f32 %v1196_v22 }
 0x575   : > { %v1193_v23 = vpop.xlane.xlu0 %1192 }
 0x576   : > { %v1195_v24 = vsub.f32 %v1186_v18, %v1193_v23 }
 0x578   : > { %v2101_v26 = vpop.eup %2100  ;;  %v1198_v27 = vmul.f32 1.442695, %v1195_v24 }
 0x579   : > { %v1200_v28 = vsel %vm787_vm2, %v2101_v26, 0.0 }
 0x57a   : > { %2102 = vpow2.f32 %v1198_v27  ;;  %1201 = vadd.xlane.f32.xlu1 %v1200_v28 }
 0x580   : > { %v2103_v29 = vpop.eup %2102 }
 0x581   : > { %v1203_v30 = vsel %vm791_vm3, %v2103_v29, 0.0 }
 0x582   : > { %1204 = vadd.xlane.f32.xlu2 %v1203_v30 }
 0x5ed   : > { %v1202_v44 = vpop.xlane.xlu1 %1201 }
 0x5ee   : > { %2104 = vrcp.f32 %v1202_v44 }
 0x5f4   : > { %v2105_v46 = vpop.eup %2104 }
 0x5f5   : > { %v1205_v45 = vpop.xlane.xlu2 %1204  ;;  %v1208_v48 = vmul.f32 %v2105_v46, %v2101_v26 }
 0x5f6   : > { %2106 = vrcp.f32 %v1205_v45  ;;  %v1990_v45 = vld [vmem:[%s2560_s8 + $0xc] sm:$0xf] }
 0x5f7   : > { %v1440_v46 = vsel %vm1018_vm5, %v1990_v45, 0 }
 0x5f8   : > { %1449 = vmatpush.bf16.msrb.mxu3 %v1440_v46 }
 0x5fc   : > { %v2107_v47 = vpop.eup %2106 }
 0x5fd   : > { %v1209_v49 = vmul.f32 %v2107_v47, %v2103_v29 }
 0x5ff   : > { %v1210_v50 = vpack.c.bf16 %v1209_v49, %v1208_v48 }
 0x601   : > { %1943 = vmatmul.msk.bf16.vlgmr.msra.gmra.mxu0 %vm787_vm2, %v1210_v50  ;;  %v645_v50 = vld [vmem:[%s2272_s24] sm:$0xf] }
 0x602   : > { %v1464_v54 = vunpack.c.l.bf16 %v645_v50  ;;  %v2051_v50 = vld [vmem:[%s2566_s14 + $0x10] sm:$0xff] }
 0x611   : > { %1987 = vmatmul.msk.bf16.vlgmr.msrb.gmra.mxu0 %vm673_vm0, %v2276_v6 }
 0x67e   : > { %v1227_v60 = vpop.f32.mrf.mxu0 }
 0x686   : > { %v1229_v62 = vpop.f32.mrf.mxu0 }
 0x687   : > { %v1232_v63 = vpack.c.bf16 %v1229_v62, %v1227_v60 }
 0x689   : > { %1945 = vmatmul.msk.bf16.vlgmr.msra.gmra.mxu1 %vm766_vm1, %v1232_v63 }
 0x699   : > { %1988 = vmatmul.msk.bf16.vlgmr.msrb.gmra.mxu1 %vm766_vm1, %v1367_v7 }
 0x706   : > { %v1250_v12 = vpop.f32.mrf.mxu1 }
 0x707   : > { %v1255_v14 = vadd.f32 %v1250_v12, %v1052_v10 }
 0x70e   : > { %v1252_v16 = vpop.f32.mrf.mxu1 }
 0x70f   : > { %v1256_v17 = vadd.f32 %v1252_v16, %v1054_v15 }
 0x716   : > { %v1384_v18 = vpop.f32.mrf.mxu1 }
 0x717   : > { %v1385_v19 = vadd.f32 %v2305_v25, %v1384_v18 }
 0x719   : > { %v1389_v20 = vsel %vm787_vm2, %v1385_v19, -inf }
 0x71a   : > { %1390 = vmax.xlane.f32.xlu0 %v1389_v20 }
 0x71e   : > { %v1386_v21 = vpop.f32.mrf.mxu1 }
 0x71f   : > { %v1387_v22 = vadd.f32 %v2305_v25, %v1386_v21  ;;  %v1362_v25 = vpop.f32.mrf.mxu0  ;;  %v2048_v21 = vld [vmem:[%s2564_s12 + $0x8] sm:$0xff] }
 0x720   : > { %v1363_v34 = vadd.f32 %v2074_v32, %v1362_v25  ;;  %1562 = vmatpush.bf16.msra.mxu0 %v2048_v21 }
 0x721   : > { %v1392_v11 = vsel %vm791_vm3, %v1387_v22, -inf }
 0x722   : > { %1393 = vmax.xlane.f32.xlu1 %v1392_v11 }
 0x727   : > { %v1364_v33 = vpop.f32.mrf.mxu0 }
 0x728   : > { %v1365_v35 = vadd.f32 %v2074_v32, %v1364_v33 }
 0x72a   : > { %v1412_v36 = vpack.c.bf16 %v1365_v35, %v1363_v34 }
 0x72c   : > { %v1417_v37 = vsel %vm816_vm4, %v1412_v36, 0 }
 0x72d   : > { %1426 = vmatpush.bf16.msrb.mxu2 %v1417_v37 }
 0x78d   : > { %v1391_v23 = vpop.xlane.xlu0 %1390 }
 0x78e   : > { %v1395_v24 = vsub.f32 %v1385_v19, %v1391_v23  ;;  %v2047_v23 = vld [vmem:[%s2564_s12] sm:$0xff] }
 0x78f   : > { %1563 = vmatpush.bf16.msra.mxu0 %v2047_v23 }
 0x790   : > { %v1397_v26 = vmul.f32 1.442695, %v1395_v24 }
 0x792   : > { %2108 = vpow2.f32 %v1397_v26 }
 0x795   : > { %v1394_v6 = vpop.xlane.xlu1 %1393 }
 0x796   : > { %v1396_v13 = vsub.f32 %v1387_v22, %v1394_v6 }
 0x798   : > { %v2109_v27 = vpop.eup %2108  ;;  %v1399_v28 = vmul.f32 1.442695, %v1396_v13 }
 0x799   : > { %v1401_v29 = vsel %vm787_vm2, %v2109_v27, 0.0 }
 0x79a   : > { %2110 = vpow2.f32 %v1399_v28  ;;  %1402 = vadd.xlane.f32.xlu2 %v1401_v29 }
 0x7a0   : > { %v2111_v30 = vpop.eup %2110 }
 0x7a1   : > { %v1404_v31 = vsel %vm791_vm3, %v2111_v30, 0.0 }
 0x7a2   : > { %1405 = vadd.xlane.f32.xlu0 %v1404_v31 }
 0x80d   : > { %v1403_v38 = vpop.xlane.xlu2 %1402 }
 0x80e   : > { %2112 = vrcp.f32 %v1403_v38  ;;  %v2076_v38 = vld [vmem:[%s2562_s10] ss:$0 sm:$0xff] }
 0x814   : > { %v2113_v40 = vpop.eup %2112 }
 0x815   : > { %v1406_v39 = vpop.xlane.xlu0 %1405  ;;  %v1409_v42 = vmul.f32 %v2113_v40, %v2109_v27 }
 0x816   : > { %2114 = vrcp.f32 %v1406_v39 }
 0x817   : > { %2116 = vrcp.f32 %v2138_v1 }
 0x81c   : > { %v2115_v41 = vpop.eup %2114 }
 0x81d   : > { %v1410_v43 = vmul.f32 %v2115_v41, %v2111_v30  ;;  %v2117_v2 = vpop.eup %2116 }
 0x81e   : > { %v1478_v3 = vmul.f32 32.0, %v2117_v2  ;;  %vm1482_vm7 = vweird.f32 %v2117_v2 }
 0x81f   : > { %v1411_v44 = vpack.c.bf16 %v1410_v43, %v1409_v42  ;;  %v2077_v42 = vld [vmem:[%s2563_s11] ss:$0 sm:$0xff] }
 0x820   : > { %v1479_v4 = vsub.f32 1.0, %v1478_v3 }
 0x821   : > { %1989 = vmatmul.msk.bf16.vlgmr.msrb.gmra.mxu2 %vm787_vm2, %v1411_v44 }
 0x822   : > { %v1480_v5 = vmul.f32 %v2117_v2, %v1479_v4 }
 0x824   : > { %v1481_v7 = vadd.f32 %v2117_v2, %v1480_v5 }
 0x826   : > { %v2477_v8 = vsel %vm1482_vm7, %v2117_v2, %v1481_v7 }
 0x8a4   : > { %v1428_v47 = vpop.f32.mrf.mxu2 }
 0x8ac   : > { %v1430_v48 = vpop.f32.mrf.mxu2 }
 0x8ad   : > { %v1433_v49 = vpack.c.bf16 %v1430_v48, %v1428_v47 }
 0x8af   : > { %1991 = vmatmul.msk.bf16.vlgmr.msrb.gmra.mxu3 %vm766_vm1, %v1433_v49  ;;  %v2052_v49 = vld [vmem:[%s2566_s14 + $0x18] sm:$0xff] }
 0x8b0   : > { %1617 = vmatpush.bf16.msra.mxu1 %v2052_v49 }
 0x8b4   : > { %1618 = vmatpush.bf16.msra.mxu1 %v2051_v50 }
 0x932   : > { %v1451_v52 = vpop.f32.mrf.mxu3 }
 0x933   : > { %v1456_v53 = vadd.f32 %v1451_v52, %v1255_v14  ;;  %v2049_v52 = vld [vmem:[%s2566_s14] sm:$0xff] }
 0x935   : > { %v1462_v55 = vadd.f32 %v2075_v51, %v1456_v53 }
 0x937   : > { %v1466_v56 = vadd.f32 %v1464_v54, %v1462_v55  ;;  %v2078_v54 = vld [vmem:[%s2565_s13] ss:$0 sm:$0xff] }
 0x939   : > { %v1470_v58 = vsel %vm673_vm0, %v1466_v56, 0.0 }
 0x93a   : > { %v1453_v59 = vpop.f32.mrf.mxu3  ;;  %1471 = vadd.xlane.f32.xlu1 %v1470_v58 }
 0x93b   : > { %v1457_v60 = vadd.f32 %v1453_v59, %v1256_v17 }
 0x93d   : > { %v1463_v62 = vadd.f32 %v2075_v51, %v1457_v60  ;;  %v2050_v51 = vld [vmem:[%s2566_s14 + $0x8] sm:$0xff] }
 0x93e   : > { %1619 = vmatpush.bf16.msra.mxu1 %v2050_v51 }
 0x93f   : > { %v1467_v63 = vadd.f32 %v1465_v61, %v1463_v62  ;;  %v2079_v61 = vld [vmem:[%s2567_s15] ss:$0 sm:$0xff] }
 0x941   : > { %v1474_v0 = vsel %vm1473_vm6, %v1467_v63, 0.0 }
 0x942   : > { %1475 = vadd.xlane.f32.xlu2 %v1474_v0  ;;  %1620 = vmatpush.bf16.msra.mxu1 %v2049_v52 }
 0x9ad   : > { %v1472_v9 = vpop.xlane.xlu1 %1471 }
 0x9ae   : > { %v1484_v10 = vmul.f32 %v2477_v8, %v1472_v9 }
 0x9b0   : > { %v1486_v12 = vsub.f32 %v1466_v56, %v1484_v10 }
 0x9b2   : > { %v1488_v14 = vmul.f32 %v1486_v12, %v1486_v12 }
 0x9b4   : > { %v1490_v15 = vsel %vm673_vm0, %v1488_v14, 0.0 }
 0x9b5   : > { %v1476_v16 = vpop.xlane.xlu2 %1475  ;;  %1491 = vadd.xlane.f32.xlu0 %v1490_v15 }
 0x9b6   : > { %v1485_v17 = vmul.f32 %v2477_v8, %v1476_v16 }
 0x9b8   : > { %v1487_v18 = vsub.f32 %v1467_v63, %v1485_v17 }
 0x9ba   : > { %v1489_v19 = vmul.f32 %v1487_v18, %v1487_v18 }
 0x9bc   : > { %v1493_v20 = vsel %vm1473_vm6, %v1489_v19, 0.0 }
 0x9bd   : > { %1494 = vadd.xlane.f32.xlu1 %v1493_v20 }
 0xa28   : > { %v1492_v22 = vpop.xlane.xlu0 %1491 }
 0xa29   : > { %v1496_v11 = vmul.f32 %v1492_v22, %v2477_v8 }
 0xa2b   : > { %v1498_v24 = vadd.f32 1e-05, %v1496_v11 }
 0xa2d   : > { %2118 = vrsqrt.f32 %v1498_v24  ;;  %vm1506_vm9 = vweird.f32 %v1498_v24 }
 0xa30   : > { %v1495_v26 = vpop.xlane.xlu1 %1494 }
 0xa31   : > { %v1497_v6 = vmul.f32 %v1495_v26, %v2477_v8 }
 0xa33   : > { %v2119_v13 = vpop.eup %2118  ;;  %v1499_v27 = vadd.f32 1e-05, %v1497_v6 }
 0xa34   : > { %v1501_v28 = vmul.f32 %v2119_v13, %v1498_v24  ;;  %vm1507_vm8 = vweird.f32 %v2119_v13 }
 0xa35   : > { %2120 = vrsqrt.f32 %v1499_v27  ;;  %vm1508_vm10 = vmor %vm1506_vm9, %vm1507_vm8  ;;  %vm1516_vm12 = vweird.f32 %v1499_v27  ;;  %vm1743_vm9 = vcmask 257024  }
 0xa36   : > { %v1502_v29 = vmul.f32 %v2119_v13, %v1501_v28 }
 0xa38   : > { %v1503_v30 = vmul.f32 0.5, %v1502_v29 }
 0xa3a   : > { %v1504_v31 = vsub.f32 1.5, %v1503_v30 }
 0xa3b   : > { %v2121_v25 = vpop.eup %2120 }
 0xa3c   : > { %v1505_v32 = vmul.f32 %v2119_v13, %v1504_v31  ;;  %v1511_v33 = vmul.f32 %v2121_v25, %v1499_v27  ;;  %vm1517_vm11 = vweird.f32 %v2121_v25 }
 0xa3d   : > { %vm1518_vm13 = vmor %vm1516_vm12, %vm1517_vm11  ;;  %vm1745_vm12 = vcmask 253952  }
 0xa3e   : > { %v1512_v34 = vmul.f32 %v2121_v25, %v1511_v33  ;;  %v1509_v35 = vsel %vm1508_vm10, %v2119_v13, %v1505_v32 }
 0xa3f   : > { %v1520_v39 = vmul.f32 %v1509_v35, %v1486_v12  ;;  %v2081_v35 = vld [vmem:[%s2569_s17] ss:$0 sm:$0xff] }
 0xa40   : > { %v1513_v36 = vmul.f32 0.5, %v1512_v34 }
 0xa41   : > { %v1525_v43 = vmul.f32 %v2076_v38, %v1520_v39 }
 0xa42   : > { %v1514_v37 = vsub.f32 1.5, %v1513_v36 }
 0xa43   : > { %v1530_v46 = vadd.f32 %v2077_v42, %v1525_v43 }
 0xa44   : > { %v1515_v40 = vmul.f32 %v2121_v25, %v1514_v37 }
 0xa46   : > { %v1519_v41 = vsel %vm1518_vm13, %v2121_v25, %v1515_v40  ;;  %v2080_v25 = vld [vmem:[%s2568_s16] ss:$0 sm:$0xff] }
 0xa47   : > { %v1521_v44 = vmul.f32 %v1519_v41, %v1487_v18 }
 0xa49   : > { %v1526_v45 = vmul.f32 %v2076_v38, %v1521_v44 }
 0xa4b   : > { %v1531_v47 = vadd.f32 %v2077_v42, %v1526_v45 }
 0xa4d   : > { %v1532_v48 = vpack.c.bf16 %v1531_v47, %v1530_v46 }
 0xa4f   : > { %2000 = vmatmul.msk.bf16.vlgmr.msra.gmra.mxu0 %vm673_vm0, %v1532_v48 }
 0xacc   : > { %v1565_v53 = vpop.f32.mrf.mxu0 }
 0xacd   : > { %v1566_v55 = vadd.f32 %v2078_v54, %v1565_v53 }
 0xacf   : > { %v1570_v58 = vmax.f32 %v1566_v55, 0.0 }
 0xad4   : > { %v1567_v56 = vpop.f32.mrf.mxu0 }
 0xad5   : > { %v1568_v57 = vadd.f32 %v2078_v54, %v1567_v56 }
 0xad7   : > { %v1571_v59 = vmax.f32 %v1568_v57, 0.0 }
 0xad9   : > { %v1572_v60 = vpack.c.bf16 %v1571_v59, %v1570_v58 }
 0xadb   : > { %2017 = vmatmul.msk.bf16.vlgmr.msra.gmra.mxu1 %vm1609_vm14, %v1572_v60 }
 0xb58   : > { %v1622_v62 = vpop.f32.mrf.mxu1 }
 0xb59   : > { %v1623_v63 = vadd.f32 %v2079_v61, %v1622_v62 }
 0xb5b   : > { %v1627_v0 = vadd.f32 %v1623_v63, %v1530_v46 }
 0xb5d   : > { %v1631_v1 = vsel %vm673_vm0, %v1627_v0, 0.0 }
 0xb5e   : > { %1632 = vadd.xlane.f32.xlu2 %v1631_v1 }
 0xb60   : > { %v1624_v2 = vpop.f32.mrf.mxu1 }
 0xb61   : > { %v1625_v3 = vadd.f32 %v2079_v61, %v1624_v2 }
 0xb63   : > { %v1628_v4 = vadd.f32 %v1625_v3, %v1531_v47 }
 0xb65   : > { %v1634_v5 = vsel %vm1473_vm6, %v1628_v4, 0.0 }
 0xb66   : > { %1635 = vadd.xlane.f32.xlu0 %v1634_v5 }
 0xbd1   : > { %v1633_v7 = vpop.xlane.xlu2 %1632 }
 0xbd2   : > { %v1637_v9 = vmul.f32 %v1633_v7, %v2477_v8 }
 0xbd4   : > { %v1639_v10 = vsub.f32 %v1627_v0, %v1637_v9  ;;  %v2082_v9 = vld [vmem:[%s2570_s18] ss:$0 sm:$0xff] }
 0xbd6   : > { %v1641_v12 = vmul.f32 %v1639_v10, %v1639_v10 }
 0xbd8   : > { %v1643_v14 = vsel %vm673_vm0, %v1641_v12, 0.0  ;;  %v2083_v12 = vld [vmem:[%s2571_s19] ss:$0 sm:$0xff] }
 0xbd9   : > { %v1636_v15 = vpop.xlane.xlu0 %1635  ;;  %1644 = vadd.xlane.f32.xlu1 %v1643_v14 }
 0xbda   : > { %v1638_v16 = vmul.f32 %v1636_v15, %v2477_v8 }
 0xbdc   : > { %v1640_v17 = vsub.f32 %v1628_v4, %v1638_v16 }
 0xbde   : > { %v1642_v18 = vmul.f32 %v1640_v17, %v1640_v17 }
 0xbe0   : > { %v1646_v19 = vsel %vm1473_vm6, %v1642_v18, 0.0 }
 0xbe1   : > { %1647 = vadd.xlane.f32.xlu2 %v1646_v19 }
 0xc4c   : > { %v1645_v20 = vpop.xlane.xlu1 %1644 }
 0xc4d   : > { %v1649_v21 = vmul.f32 %v1645_v20, %v2477_v8 }
 0xc4f   : > { %v1651_v22 = vadd.f32 1e-05, %v1649_v21 }
 0xc51   : > { %2122 = vrsqrt.f32 %v1651_v22  ;;  %vm1659_vm1 = vweird.f32 %v1651_v22 }
 0xc54   : > { %v1648_v11 = vpop.xlane.xlu2 %1647 }
 0xc55   : > { %v1650_v23 = vmul.f32 %v1648_v11, %v2477_v8 }
 0xc57   : > { %v2123_v24 = vpop.eup %2122  ;;  %v1652_v26 = vadd.f32 1e-05, %v1650_v23 }
 0xc58   : > { %v1654_v6 = vmul.f32 %v2123_v24, %v1651_v22  ;;  %vm1660_vm15 = vweird.f32 %v2123_v24 }
 0xc59   : > { %2124 = vrsqrt.f32 %v1652_v26  ;;  %vm1661_vm2 = vmor %vm1659_vm1, %vm1660_vm15  ;;  %vm1669_vm4 = vweird.f32 %v1652_v26 }
 0xc5a   : > { %v1655_v13 = vmul.f32 %v2123_v24, %v1654_v6 }
 0xc5c   : > { %v1656_v27 = vmul.f32 0.5, %v1655_v13 }
 0xc5e   : > { %v1657_v28 = vsub.f32 1.5, %v1656_v27 }
 0xc5f   : > { %v2125_v29 = vpop.eup %2124 }
 0xc60   : > { %v1658_v30 = vmul.f32 %v2123_v24, %v1657_v28  ;;  %v1664_v31 = vmul.f32 %v2125_v29, %v1652_v26  ;;  %vm1670_vm3 = vweird.f32 %v2125_v29 }
 0xc61   : > { %vm1671_vm5 = vmor %vm1669_vm4, %vm1670_vm3 }
 0xc62   : > { %v1665_v32 = vmul.f32 %v2125_v29, %v1664_v31  ;;  %v1662_v33 = vsel %vm1661_vm2, %v2123_v24, %v1658_v30 }
 0xc63   : > { %v1673_v34 = vmul.f32 %v1662_v33, %v1639_v10 }
 0xc64   : > { %v1666_v36 = vmul.f32 0.5, %v1665_v32 }
 0xc65   : > { %v1678_v37 = vmul.f32 %v2080_v25, %v1673_v34 }
 0xc66   : > { %v1667_v38 = vsub.f32 1.5, %v1666_v36 }
 0xc67   : > { %v1683_v39 = vadd.f32 %v2081_v35, %v1678_v37 }
 0xc68   : > { %v1668_v40 = vmul.f32 %v2125_v29, %v1667_v38 }
 0xc69   : > { %v1687_v41 = vsel %vm673_vm0, %v1683_v39, 0.0 }
 0xc6a   : > { %1688 = vadd.xlane.f32.xlu0 %v1687_v41  ;;  %v1672_v42 = vsel %vm1671_vm5, %v2125_v29, %v1668_v40 }
 0xc6b   : > { %v1674_v43 = vmul.f32 %v1672_v42, %v1640_v17 }
 0xc6d   : > { %v1679_v44 = vmul.f32 %v2080_v25, %v1674_v43 }
 0xc6f   : > { %v1684_v45 = vadd.f32 %v2081_v35, %v1679_v44 }
 0xc71   : > { %v1690_v46 = vsel %vm1473_vm6, %v1684_v45, 0.0 }
 0xc72   : > { %1691 = vadd.xlane.f32.xlu1 %v1690_v46 }
 0xcdd   : > { %v1689_v47 = vpop.xlane.xlu0 %1688 }
 0xcde   : > { %v1693_v48 = vmul.f32 %v1689_v47, %v2477_v8 }
 0xce0   : > { %v1695_v49 = vsub.f32 %v1683_v39, %v1693_v48 }
 0xce2   : > { %v1697_v50 = vmul.f32 %v1695_v49, %v1695_v49 }
 0xce4   : > { %v1699_v51 = vsel %vm673_vm0, %v1697_v50, 0.0 }
 0xce5   : > { %1700 = vadd.xlane.f32.xlu2 %v1699_v51  ;;  %v1692_v52 = vpop.xlane.xlu1 %1691 }
 0xce6   : > { %v1694_v53 = vmul.f32 %v1692_v52, %v2477_v8 }
 0xce8   : > { %v1696_v54 = vsub.f32 %v1684_v45, %v1694_v53 }
 0xcea   : > { %v1698_v55 = vmul.f32 %v1696_v54, %v1696_v54 }
 0xcec   : > { %v1702_v56 = vsel %vm1473_vm6, %v1698_v55, 0.0 }
 0xced   : > { %1703 = vadd.xlane.f32.xlu0 %v1702_v56 }
 0xd58   : > { %v1701_v57 = vpop.xlane.xlu2 %1700 }
 0xd59   : > { %v1705_v58 = vmul.f32 %v1701_v57, %v2477_v8 }
 0xd5b   : > { %v1707_v59 = vadd.f32 1e-05, %v1705_v58 }
 0xd5d   : > { %2126 = vrsqrt.f32 %v1707_v59  ;;  %vm1715_vm6 = vweird.f32 %v1707_v59 }
 0xd60   : > { %v1704_v60 = vpop.xlane.xlu0 %1703 }
 0xd61   : > { %v1706_v61 = vmul.f32 %v1704_v60, %v2477_v8 }
 0xd63   : > { %v2127_v62 = vpop.eup %2126  ;;  %v1708_v63 = vadd.f32 1e-05, %v1706_v61 }
 0xd64   : > { %v1710_v0 = vmul.f32 %v2127_v62, %v1707_v59  ;;  %vm1716_vm0 = vweird.f32 %v2127_v62 }
 0xd65   : > { %2128 = vrsqrt.f32 %v1708_v63  ;;  %vm1717_vm7 = vmor %vm1715_vm6, %vm1716_vm0  ;;  %vm1725_vm10 = vweird.f32 %v1708_v63 }
 0xd66   : > { %v1711_v1 = vmul.f32 %v2127_v62, %v1710_v0 }
 0xd68   : > { %v1712_v2 = vmul.f32 0.5, %v1711_v1 }
 0xd6a   : > { %v1713_v3 = vsub.f32 1.5, %v1712_v2 }
 0xd6b   : > { %v2129_v4 = vpop.eup %2128 }
 0xd6c   : > { %v1714_v5 = vmul.f32 %v2127_v62, %v1713_v3  ;;  %v1720_v7 = vmul.f32 %v2129_v4, %v1708_v63  ;;  %vm1726_vm8 = vweird.f32 %v2129_v4 }
 0xd6d   : > { %vm1727_vm11 = vmor %vm1725_vm10, %vm1726_vm8 }
 0xd6e   : > { %v1718_v10 = vsel %vm1717_vm7, %v2127_v62, %v1714_v5  ;;  %v1721_v8 = vmul.f32 %v2129_v4, %v1720_v7 }
 0xd6f   : > { %v1729_v14 = vmul.f32 %v1718_v10, %v1695_v49 }
 0xd70   : > { %v1722_v15 = vmul.f32 0.5, %v1721_v8 }
 0xd71   : > { %v1734_v16 = vmul.f32 %v2082_v9, %v1729_v14 }
 0xd72   : > { %v1723_v17 = vsub.f32 1.5, %v1722_v15 }
 0xd73   : > { %v1739_v18 = vadd.f32 %v2083_v12, %v1734_v16 }
 0xd74   : > { %v1724_v19 = vmul.f32 %v2129_v4, %v1723_v17 }
 0xd75   : > { %v1741_v20 = vpack.c.bf16 %v1739_v18, %v1739_v18 }
 0xd76   : > { %v1728_v21 = vsel %vm1727_vm11, %v2129_v4, %v1724_v19 }
 0xd77   : > { %1744 = vst.msk [vmem:[%s643_s28] sm:$0xf] %vm1743_vm9, %v1741_v20  ;;  %v1730_v22 = vmul.f32 %v1728_v21, %v1696_v54 }
 0xd79   : > { %v1735_v11 = vmul.f32 %v2082_v9, %v1730_v22 }
 0xd7b   : > { %v1740_v23 = vadd.f32 %v2083_v12, %v1735_v11 }
 0xd7d   : > { %v1742_v24 = vpack.c.bf16 %v1740_v23, %v1740_v23 }
 0xd7f   : > { %1746 = vst.msk [vmem:[%s643_s28 + $0x4] sm:$0x1] %vm1745_vm12, %v1742_v24 }
 0xd80 PF: > { %s30_s1 = sadd.s32 1, %s2136_s1  }
 0xd81   : > { %p27_p4 = scmp.ge.s32.totalorder %s30_s1, 4  }
 0xd83   :  { %29 = sbr.rel (!%p27_p4) target bundleno = 6 (0x6), region = 154 }

// kernel: mft_forward.7
= control target key start
LH: loop header
LB: loop body
LE: loop exit
PB: predicated region body
PF: predicated region fallthrough
CT: control target
= control target key end

     0   :  { %s3365_s6 = smov 1   ;;  %s3366_s10 = smov 2   ;;  %s3845_s0 = inlined_call_operand.smem [shape: u32[32], index: -1, kind: input, shape index: {}] }
   0x1   :  { %s3405_s5 = sld [smem:[%s3845_s0]]   ;;  %s3367_s14 = smov 3  }
   0x2   :  { %s3410_s9 = sld [smem:[%s3845_s0 + %s3365_s6]]   ;;  %s3368_s18 = smov 4  }
   0x3   :  { %s3415_s13 = sld [smem:[%s3845_s0 + %s3366_s10]]   ;;  %s3369_s22 = smov 5  }
   0x4   :  { %s3420_s17 = sld [smem:[%s3845_s0 + %s3367_s14]]   ;;  %s3370_s26 = smov 6  }
   0x5   :  { %s3425_s21 = sld [smem:[%s3845_s0 + %s3368_s18]]   ;;  %s3371_s30 = smov 7  }
   0x6   :  { %s3430_s25 = sld [smem:[%s3845_s0 + %s3369_s22]]   ;;  %s3372_s4 = smov 8  }
   0x7   :  { %s3435_s29 = sld [smem:[%s3845_s0 + %s3370_s26]]   ;;  %s3373_s10 = smov 9  }
   0x8   :  { %s3440_s3 = sld [smem:[%s3845_s0 + %s3371_s30]]   ;;  %s3374_s15 = smov 10  }
   0x9   :  { %s3445_s8 = sld [smem:[%s3845_s0 + %s3372_s4]]   ;;  %s3375_s20 = smov 11  }
   0xa   :  { %s3450_s14 = sld [smem:[%s3845_s0 + %s3373_s10]]   ;;  %s3376_s26 = smov 12  }
   0xb   :  { %3853 = sst [smem:[#allocation2_spill]] %s3425_s21  ;;  %s3377_s1 = smov 13  }
   0xc   :  { %s3455_s19 = sld [smem:[%s3845_s0 + %s3374_s15]]   ;;  %s3378_s7 = smov 14  }
   0xd   :  { %s3460_s24 = sld [smem:[%s3845_s0 + %s3375_s20]]   ;;  %s3379_s15 = smov 15  }
   0xe   :  { %s3465_s30 = sld [smem:[%s3845_s0 + %s3376_s26]]   ;;  %s3380_s22 = smov 16  }
   0xf   :  { %s3470_s6 = sld [smem:[%s3845_s0 + %s3377_s1]]   ;;  %s3381_s28 = smov 17  }
  0x10   :  { %s3475_s12 = sld [smem:[%s3845_s0 + %s3378_s7]]   ;;  %s3382_s7 = smov 18  }
  0x11   :  { %s3480_s20 = sld [smem:[%s3845_s0 + %s3379_s15]]   ;;  %s3383_s15 = smov 19  }
  0x12   :  { %s3485_s27 = sld [smem:[%s3845_s0 + %s3380_s22]]   ;;  %s3384_s22 = smov 20  }
  0x13   :  { %s3490_s4 = sld [smem:[%s3845_s0 + %s3381_s28]]   ;;  %s3385_s28 = smov 21  }
  0x14   :  { %s3495_s21 = sld [smem:[%s3845_s0 + %s3382_s7]]   ;;  %s3386_s7 = smov 22  }
  0x15   :  { %3854 = sst [smem:[#allocation3_spill]] %s3470_s6 }
  0x16   :  { %3855 = sst [smem:[#allocation4_spill]] %s3475_s12 }
  0x17   :  { %s3500_s12 = sld [smem:[%s3845_s0 + %s3383_s15]]   ;;  %s3387_s15 = smov 23  }
  0x18   :  { %3856 = sst [smem:[#allocation5_spill]] %s3485_s27 }
  0x19   :  { %s3505_s27 = sld [smem:[%s3845_s0 + %s3384_s22]]   ;;  %s3388_s22 = smov 24  }
  0x1a   :  { %3857 = sst [smem:[#allocation6_spill]] %s3495_s21 }
  0x1b   :  { %s3510_s6 = sld [smem:[%s3845_s0 + %s3385_s28]]   ;;  %s3389_s28 = smov 25  }
  0x1c   :  { %s3515_s21 = sld [smem:[%s3845_s0 + %s3386_s7]]   ;;  %s3390_s7 = smov 26  }
  0x1d   :  { %3858 = sst [smem:[#allocation7_spill]] %s3500_s12 }
  0x1e   :  { %s3520_s12 = sld [smem:[%s3845_s0 + %s3387_s15]]   ;;  %s3391_s15 = smov 27  }
  0x1f   :  { %3859 = sst [smem:[#allocation8_spill]] %s3505_s27 }
  0x20   :  { %s3525_s27 = sld [smem:[%s3845_s0 + %s3388_s22]]   ;;  %s3392_s22 = smov 28  }
  0x21   :  { %3860 = sst [smem:[#allocation9_spill]] %s3510_s6 }
  0x22   :  { %3861 = sst [smem:[#allocation10_spill]] %s3515_s21 }
  0x23   :  { %s3530_s6 = sld [smem:[%s3845_s0 + %s3389_s28]]   ;;  %s3393_s28 = smov 29  }
  0x24   :  { %3862 = sst [smem:[#allocation11_spill]] %s3520_s12 }
  0x25   :  { %s3535_s21 = sld [smem:[%s3845_s0 + %s3390_s7]]   ;;  %s3394_s7 = smov 30  }
  0x26   :  { %3863 = sst [smem:[#allocation12_spill]] %s3525_s27 }
  0x27   :  { %s3540_s12 = sld [smem:[%s3845_s0 + %s3391_s15]]   ;;  %s3395_s15 = smov 31  }
  0x28   :  { %s3545_s27 = sld [smem:[%s3845_s0 + %s3392_s22]]   ;;  %s3562_s22 = smov 0  }
  0x29   :  { %3864 = sst [smem:[#allocation13_spill]] %s3530_s6 }
  0x2a   :  { %s3550_s6 = sld [smem:[%s3845_s0 + %s3393_s28]]  }
  0x2b   :  { %3865 = sst [smem:[#allocation14_spill]] %s3535_s21 }
  0x2c   :  { %s3555_s21 = sld [smem:[%s3845_s0 + %s3394_s7]]  }
  0x2d   :  { %3866 = sst [smem:[#allocation15_spill]] %s3540_s12 }
  0x2e   :  { %s3560_s12 = sld [smem:[%s3845_s0 + %s3395_s15]]  }
  0x2f LB: > { %s2808_s23 = sadd.s32 4294967295, %s3363_s22   ;;  %p2812_p0 = scmp.ge.s32.totalorder %s3363_s22, 1  ;;  %s3363_s22 = sphi %s3562_s22, %s73_s22  }
  0x30   : > { %p894_p1 = scmp.lt.s32.totalorder %s3363_s22, 3 }
  0x32   : > { %p895_p2 = pnand %p2812_p0, %p894_p1 }
  0x33   : > { %p983_p3 = scmp.lt.s32.totalorder (!%p895_p2), %s2808_s23, 1  ;;  %s3867_s7 = sld [smem:[#allocation3_spill]] (!%p895_p2) }
  0x34   : > { %898 = sbr.rel (%p895_p2) target bundleno = 5685 (0x1635), region = 144  ;;  %s3868_s10 = sld [smem:[#allocation4_spill]] (!%p895_p2) }
  0x35   : > { %s3869_s11 = sld [smem:[#allocation2_spill]] (!%p895_p2) }
  0x36   : > { %s3870_s15 = sld [smem:[#allocation6_spill]] (!%p895_p2) }
  0x37   : > { %s3871_s16 = sld [smem:[#allocation5_spill]] (!%p895_p2) }
  0x39   : > { %v3188_v0 = vld [vmem:[%s3430_s25 + $0x8] sm:$0xff]  ;;  %v3187_v2 = vld [vmem:[%s3430_s25] sm:$0xff]  ;;  %s3882_s23 = smov (!%p983_p3, %s2808_s23), 1  ;;  %vm1033_vm0 = vcmask 261120   ;;  %vm1119_vm1 = vcmask 64512   ;;  %v3196_v19 = vld [vmem:[%s3440_s3 + $0x18] sm:$0xff] }
  0x3a   : > { %v3190_v1 = vld [vmem:[%s3440_s3 + $0x8] sm:$0xff]  ;;  %1043 = vmatpush.bf16.msra.mxu0 %v3188_v0  ;;  %v3189_v3 = vld [vmem:[%s3440_s3] sm:$0xff]  ;;  %s2813_s0 = sshll.u32 %s3882_s23, 2  ;;  %s994_s28 = scalar_lea.vmem %s3420_s17, %s3882_s23  ;;  %v3195_v27 = vld [vmem:[%s3440_s3 + $0x10] sm:$0xff]  ;;  %vm1155_vm2 = vcmask 1043456   ;;  %vm1922_vm7 = vcmask 80896  }
  0x3b   : > { %1077 = vmatpush.bf16.msra.mxu1 %v3190_v1  ;;  %s986_s26 = scalar_lea.vmem %s3405_s5, %s2813_s0  ;;  %v3281_v5 = vld [vmem:[%s3435_s29] ss:$0 sm:$0xff]  ;;  %v3192_v17 = vld [vmem:[%s3450_s14 + $0x8] sm:$0xff]  ;;  %v3194_v28 = vld [vmem:[%s3430_s25 + $0x18] sm:$0xff]  ;;  %s3185_s1 = sshll.u32 %s3882_s23, 3  ;;  %vm1939_vm8 = vcmask 1044480  }
  0x3c   : > { %v3580_v4 = vld [vmem:[%s986_s26] sm:$0xf]  ;;  %1110 = vmatpush.bf16.msra.mxu2 %v3192_v17  ;;  %v3193_v29 = vld [vmem:[%s3430_s25 + $0x10] sm:$0xff]  ;;  %v3198_v49 = vld [vmem:[%s3450_s14 + $0x18] sm:$0xff]  ;;  %s991_s2 = scalar_lea.vmem %s3410_s9, %s3185_s1  ;;  %s997_s18 = scalar_lea.vmem %s3869_s11, %s3882_s23  ;;  %vm2641_vm12 = vcmask 523264  }
  0x3d   : > { %v3282_v6 = vld [vmem:[%s3445_s8] ss:$0 sm:$0xff]  ;;  %v3285_v42 = vld [vmem:[%s3445_s8 + $0x1] ss:$0 sm:$0xff]  ;;  %v3197_v50 = vld [vmem:[%s3450_s14 + $0x10] sm:$0xff]  ;;  %s3872_s26 = sld [smem:[#allocation7_spill]] }
  0x3e   : > { %1044 = vmatpush.bf16.msra.mxu0 %v3187_v2  ;;  %v3191_v18 = vld [vmem:[%s3450_s14] sm:$0xff]  ;;  %s3874_s1 = sld [smem:[#allocation9_spill]] }
  0x3f   : > { %1078 = vmatpush.bf16.msra.mxu1 %v3189_v3  ;;  %v3283_v20 = vld [vmem:[%s994_s28] ss:$0 sm:$0xff]  ;;  %v3286_v55 = vld [vmem:[%s3435_s29 + $0x1] ss:$0 sm:$0xff]  ;;  %s3873_s28 = sld [smem:[#allocation8_spill]] }
  0x40   : > { %1111 = vmatpush.bf16.msra.mxu2 %v3191_v18  ;;  %v1006_v21 = vld [vmem:[%s3415_s13] sm:$0xff]  ;;  %v3200_v18 = vld [vmem:[%s3430_s25 + $0x28] sm:$0xff]  ;;  %s3878_s11 = sld [smem:[#allocation11_spill]] }
  0x41   : > { %2825 = vmatmul.msk.bf16.vlgmr.msra.gmra.mxu0 %vm1033_vm0, %v3580_v4  ;;  %v3598_v22 = vadd.f32 %v3283_v20, %v1006_v21  ;;  %v3284_v37 = vld [vmem:[%s3455_s19] ss:$0 sm:$0xff]  ;;  %v3287_v61 = vld [vmem:[%s3455_s19 + $0x1] ss:$0 sm:$0xff] }
  0x42   : > { %2834 = vmatmul.msk.bf16.vlgmr.msra.gmra.mxu1 %vm1033_vm0, %v3580_v4  ;;  %v1173_v59 = vld [vmem:[%s3460_s24] sm:$0xf] }
  0x43   : > { %2843 = vmatmul.msk.bf16.vlgmr.msra.gmra.mxu2 %vm1033_vm0, %v3580_v4  ;;  %1202 = vmatpush.bf16.msrb.mxu1 %v3194_v28  ;;  %v1359_v60 = vsel %vm1155_vm2, %v1173_v59, 0  ;;  %v3199_v20 = vld [vmem:[%s3430_s25 + $0x20] sm:$0xff] }
  0x44   : > { %1238 = vmatpush.bf16.msrb.mxu2 %v3196_v19  ;;  %v3202_v19 = vld [vmem:[%s3440_s3 + $0x28] sm:$0xff]  ;;  %v3201_v21 = vld [vmem:[%s3440_s3 + $0x20] sm:$0xff] }
  0x47   : > { %1203 = vmatpush.bf16.msrb.mxu1 %v3193_v29 }
  0x48   : > { %1239 = vmatpush.bf16.msrb.mxu2 %v3195_v27  ;;  %v2890_v27 = vld [vmem:[%s3460_s24 + $0x4] sm:$0xf] }
  0x49   : > { %v1340_v28 = vsel %vm1155_vm2, %v2890_v27, 0  ;;  %v3210_v27 = vld [vmem:[%s3450_s14 + $0x38] sm:$0xff] }
  0x4c   : > { %1349 = vmatpush.bf16.msra.mxu2 %v1340_v28  ;;  %v3209_v28 = vld [vmem:[%s3450_s14 + $0x30] sm:$0xff] }
  0x52   : > { %2859 = vmatmul.msk.bf16.vlgmr.msrb.gmra.mxu1 %vm1033_vm0, %v3580_v4 }
  0x53   : > { %2873 = vmatmul.msk.bf16.vlgmr.msrb.gmra.mxu2 %vm1033_vm0, %v3580_v4 }
  0xbe   : > { %v1046_v7 = vpop.f32.mrf.mxu0 }
  0xbf   : > { %v1080_v8 = vpop.f32.mrf.mxu1  ;;  %v1047_v9 = vadd.f32 %v3281_v5, %v1046_v7 }
  0xc0   : > { %v1081_v10 = vadd.f32 %v3282_v6, %v1080_v8 }
  0xc1   : > { %v1050_v12 = vmul.f32 0.35355338, %v1047_v9 }
  0xc2   : > { %v1118_v11 = vpack.c.bf16 %v1081_v10, %v1081_v10 }
  0xc3   : > { %v1117_v16 = vpack.c.bf16 %v1050_v12, %v1050_v12 }
  0xc4   : > { %v1124_v13 = vsel %vm1119_vm1, %v1118_v11, 0 }
  0xc5   : > { %1133 = vmatpush.bf16.xpose.msra.mxu3 %v1124_v13 }
  0xc6   : > { %v1048_v14 = vpop.f32.mrf.mxu0  ;;  %v1113_v30 = vpop.f32.mrf.mxu2 }
  0xc7   : > { %v1082_v15 = vpop.f32.mrf.mxu1  ;;  %v1114_v38 = vadd.f32 %v3284_v37, %v1113_v30 }
  0xc9   : > { %v1151_v39 = vpack.c.bf16 %v1114_v38, %v1114_v38 }
  0xcb   : > { %v1157_v40 = vsel %vm1155_vm2, %v1151_v39, 0 }
  0xcc   : > { %2844 = vmatmul.msk.bf16.vlgmr.msra.gmra.mxu3 %vm1119_vm1, %v1117_v16  ;;  %1166 = vmatpush.bf16.msrb.mxu0 %v1157_v40 }
  0xcd   : > { %1273 = vmatpush.bf16.msrb.mxu3 %v3198_v49 }
  0xce   : > { %v1115_v34 = vpop.f32.mrf.mxu2 }
  0xcf   : > { %v1205_v45 = vpop.f32.mrf.mxu1  ;;  %v3288_v34 = vld [vmem:[%s3435_s29 + $0x2] ss:$0 sm:$0xff] }
  0xd0   : > { %v1206_v56 = vadd.f32 %v3286_v55, %v1205_v45  ;;  %v3204_v45 = vld [vmem:[%s3450_s14 + $0x28] sm:$0xff] }
  0xd1   : > { %1274 = vmatpush.bf16.msrb.mxu3 %v3197_v50  ;;  %1473 = vmatpush.bf16.msrb.mxu2 %v3204_v45 }
  0xd2   : > { %v1209_v57 = vmul.f32 0.35355338, %v1206_v56 }
  0xd4   : > { %v1280_v58 = vpack.c.bf16 %v1209_v57, %v1209_v57 }
  0xd5   : > { %1368 = vmatpush.bf16.msra.mxu3 %v1359_v60 }
  0xd6   : > { %v1241_v41 = vpop.f32.mrf.mxu2 }
  0xd7   : > { %v1242_v43 = vadd.f32 %v3285_v42, %v1241_v41  ;;  %v1207_v48 = vpop.f32.mrf.mxu1 }
  0xd9   : > { %v1281_v44 = vpack.c.bf16 %v1242_v43, %v1242_v43 }
  0xdb   : > { %v1286_v46 = vsel %vm1119_vm1, %v1281_v44, 0 }
  0xdc   : > { %1295 = vmatpush.bf16.xpose.msra.mxu0 %v1286_v46  ;;  %2887 = vmatmul.msk.bf16.vlgmr.msrb.gmra.mxu3 %vm1033_vm0, %v3580_v4  ;;  %v3203_v46 = vld [vmem:[%s3450_s14 + $0x20] sm:$0xff] }
  0xdd   : > { %1474 = vmatpush.bf16.msrb.mxu2 %v3203_v46  ;;  %v2983_v46 = vld [vmem:[%s3460_s24 + $0xc] sm:$0xf] }
  0xde   : > { %v1243_v47 = vpop.f32.mrf.mxu2 }
 0x14f   : > { %v1135_v23 = vpop.f32.mrf.mxu3 }
 0x150   : > { %v1136_v24 = vadd.f32 %v1135_v23, %v3598_v22 }
 0x152   : > { %v1139_v25 = vsel %vm1119_vm1, %v1136_v24, -inf }
 0x153   : > { %1140 = vmax.xlane.f32.xlu0 %v1139_v25 }
 0x157   : > { %v1137_v26 = vpop.f32.mrf.mxu3 }
 0x15f   : > { %v1276_v62 = vpop.f32.mrf.mxu3 }
 0x160   : > { %v1277_v0 = vadd.f32 %v3287_v61, %v1276_v62 }
 0x162   : > { %v1313_v2 = vpack.c.bf16 %v1277_v0, %v1277_v0  ;;  %v3207_v0 = vld [vmem:[%s3440_s3 + $0x30] sm:$0xff] }
 0x164   : > { %v1318_v3 = vsel %vm1155_vm2, %v1313_v2, 0  ;;  %v3205_v2 = vld [vmem:[%s3430_s25 + $0x30] sm:$0xff] }
 0x165   : > { %1327 = vmatpush.bf16.msra.mxu1 %v1318_v3  ;;  %v2937_v3 = vld [vmem:[%s3460_s24 + $0x8] sm:$0xf] }
 0x167   : > { %v1278_v5 = vpop.f32.mrf.mxu3 }
 0x168   : > { %v1540_v5 = vsel %vm1155_vm2, %v2937_v3, 0 }
 0x169   : > { %1438 = vmatpush.bf16.msrb.mxu1 %v3202_v19 }
 0x16d   : > { %1439 = vmatpush.bf16.msrb.mxu1 %v3201_v21  ;;  %v3292_v21 = vld [vmem:[%s3435_s29 + $0x3] ss:$0 sm:$0xff] }
 0x1c6   : > { %v1141_v31 = vpop.xlane.xlu0 %1140 }
 0x1c7   : > { %v1142_v32 = vsub.f32 %v1136_v24, %v1141_v31 }
 0x1c9   : > { %v1143_v33 = vmul.f32 1.442695, %v1142_v32 }
 0x1cb   : > { %3317 = vpow2.f32 %v1143_v33 }
 0x1d1   : > { %v3318_v35 = vpop.eup %3317 }
 0x1d2   : > { %v1145_v36 = vsel %vm1119_vm1, %v3318_v35, 0.0 }
 0x1d3   : > { %1146 = vadd.xlane.f32.xlu0 %v1145_v36 }
 0x246   : > { %v1147_v51 = vpop.xlane.xlu0 %1146 }
 0x247   : > { %3319 = vrcp.f32 %v1147_v51 }
 0x24d   : > { %v3320_v52 = vpop.eup %3319 }
 0x24e   : > { %v1149_v53 = vmul.f32 %v3320_v52, %v3318_v35  ;;  %v3289_v35 = vld [vmem:[%s3445_s8 + $0x2] ss:$0 sm:$0xff]  ;;  %v3208_v52 = vld [vmem:[%s3440_s3 + $0x38] sm:$0xff] }
 0x250   : > { %v1150_v54 = vpack.c.bf16 %v1149_v53, %v1149_v53  ;;  %v3290_v53 = vld [vmem:[%s3455_s19 + $0x2] ss:$0 sm:$0xff] }
 0x252   : > { %2845 = vmatmul.msk.bf16.vlgmr.msrb.gmra.mxu0 %vm1119_vm1, %v1150_v54 }
 0x253   : > { %1402 = vmatpush.bf16.msrb.mxu0 %v3200_v18 }
 0x257   : > { %1403 = vmatpush.bf16.msrb.mxu0 %v3199_v20 }
 0x262   : > { %2888 = vmatmul.msk.bf16.vlgmr.msra.gmra.mxu0 %vm1119_vm1, %v1280_v58 }
 0x272   : > { %2906 = vmatmul.msk.bf16.vlgmr.msrb.gmra.mxu0 %vm1033_vm0, %v3580_v4 }
 0x2cf   : > { %v1168_v63 = vpop.f32.mrf.mxu0 }
 0x2d0   : > { %v1172_v1 = vpack.c.bf16 %v1168_v63, %v1168_v63 }
 0x2d2   : > { %2892 = vmatmul.msk.bf16.vlgmr.msra.gmra.mxu3 %vm1119_vm1, %v1172_v1  ;;  %v3206_v1 = vld [vmem:[%s3430_s25 + $0x38] sm:$0xff] }
 0x2d7   : > { %v1170_v6 = vpop.f32.mrf.mxu0 }
 0x2df   : > { %v1297_v7 = vpop.f32.mrf.mxu0 }
 0x2e0   : > { %v1298_v8 = vadd.f32 %v1297_v7, %v3598_v22 }
 0x2e2   : > { %v1301_v9 = vsel %vm1119_vm1, %v1298_v8, -inf }
 0x2e3   : > { %1302 = vmax.xlane.f32.xlu1 %v1301_v9 }
 0x2e7   : > { %v1299_v10 = vpop.f32.mrf.mxu0 }
 0x2e8   : > { %v3291_v10 = vld [vmem:[%s3445_s8 + $0x3] ss:$0 sm:$0xff] }
 0x2ef   : > { %v1405_v29 = vpop.f32.mrf.mxu0 }
 0x2f0   : > { %v1406_v37 = vadd.f32 %v3288_v34, %v1405_v29 }
 0x2f2   : > { %v1409_v40 = vmul.f32 0.35355338, %v1406_v37  ;;  %v3293_v37 = vld [vmem:[%s3455_s19 + $0x3] ss:$0 sm:$0xff] }
 0x2f4   : > { %v1480_v43 = vpack.c.bf16 %v1409_v40, %v1409_v40 }
 0x2f7   : > { %v1407_v30 = vpop.f32.mrf.mxu0 }
 0x355   : > { %v3628_v11 = vpop.f32.mrf.mxu3 }
 0x356   : > { %v1303_v12 = vpop.xlane.xlu1 %1302 }
 0x357   : > { %v1304_v13 = vsub.f32 %v1298_v8, %v1303_v12 }
 0x359   : > { %v1305_v14 = vmul.f32 1.442695, %v1304_v13 }
 0x35b   : > { %3321 = vpow2.f32 %v1305_v14 }
 0x35d   : > { %v1372_v15 = vpop.f32.mrf.mxu3 }
 0x361   : > { %v3322_v16 = vpop.eup %3321 }
 0x362   : > { %v1307_v17 = vsel %vm1119_vm1, %v3322_v16, 0.0 }
 0x363   : > { %1308 = vadd.xlane.f32.xlu1 %v1307_v17 }
 0x3d6   : > { %v1309_v23 = vpop.xlane.xlu1 %1308 }
 0x3d7   : > { %3323 = vrcp.f32 %v1309_v23 }
 0x3dd   : > { %v3324_v24 = vpop.eup %3323 }
 0x3de   : > { %v1311_v25 = vmul.f32 %v3324_v24, %v3322_v16 }
 0x3e0   : > { %v1312_v26 = vpack.c.bf16 %v1311_v25, %v1311_v25 }
 0x3e2   : > { %2889 = vmatmul.msk.bf16.vlgmr.msra.gmra.mxu1 %vm1119_vm1, %v1312_v26 }
 0x3e3   : > { %1549 = vmatpush.bf16.msra.mxu1 %v1540_v5 }
 0x3f2   : > { %2920 = vmatmul.msk.bf16.vlgmr.msrb.gmra.mxu1 %vm1033_vm0, %v3580_v4 }
 0x45f   : > { %v1329_v31 = vpop.f32.mrf.mxu1 }
 0x460   : > { %v1333_v32 = vpack.c.bf16 %v1329_v31, %v1329_v31 }
 0x462   : > { %2891 = vmatmul.msk.bf16.vlgmr.msra.gmra.mxu2 %vm1119_vm1, %v1333_v32 }
 0x463   : > { %1584 = vmatpush.bf16.msra.mxu2 %v3206_v1 }
 0x467   : > { %v1331_v33 = vpop.f32.mrf.mxu1  ;;  %1585 = vmatpush.bf16.msra.mxu2 %v3205_v2 }
 0x46f   : > { %v1441_v36 = vpop.f32.mrf.mxu1 }
 0x470   : > { %v1442_v38 = vadd.f32 %v3289_v35, %v1441_v36 }
 0x472   : > { %v1481_v39 = vpack.c.bf16 %v1442_v38, %v1442_v38  ;;  %2934 = vmatmul.msk.bf16.vlgmr.msrb.gmra.mxu2 %vm1033_vm0, %v3580_v4 }
 0x474   : > { %v1486_v41 = vsel %vm1119_vm1, %v1481_v39, 0 }
 0x475   : > { %1495 = vmatpush.bf16.xpose.msrb.mxu3 %v1486_v41 }
 0x477   : > { %v1443_v42 = vpop.f32.mrf.mxu1 }
 0x47c   : > { %2935 = vmatmul.msk.bf16.vlgmr.msrb.gmra.mxu3 %vm1119_vm1, %v1480_v43 }
 0x47d   : > { %1620 = vmatpush.bf16.msra.mxu3 %v3208_v52 }
 0x481   : > { %1621 = vmatpush.bf16.msra.mxu3 %v3207_v0 }
 0x482   : > { %2952 = vmatmul.msk.bf16.vlgmr.msra.gmra.mxu2 %vm1033_vm0, %v3580_v4 }
 0x48c   : > { %2966 = vmatmul.msk.bf16.vlgmr.msra.gmra.mxu3 %vm1033_vm0, %v3580_v4 }
 0x4e5   : > { %v3647_v44 = vpop.f32.mrf.mxu2 }
 0x4e6   : > { %v1371_v29 = vadd.f32 %v3628_v11, %v3647_v44 }
 0x4ed   : > { %v1353_v47 = vpop.f32.mrf.mxu2 }
 0x4ee   : > { %v1722_v47 = vsel %vm1155_vm2, %v2983_v46, 0 }
 0x4ef   : > { %1731 = vmatpush.bf16.msrb.mxu3 %v1722_v47 }
 0x4f5   : > { %v1476_v54 = vpop.f32.mrf.mxu2 }
 0x4f6   : > { %v1477_v55 = vadd.f32 %v3290_v53, %v1476_v54 }
 0x4f8   : > { %v1513_v57 = vpack.c.bf16 %v1477_v55, %v1477_v55  ;;  %v3294_v55 = vld [vmem:[%s3465_s30] ss:$0 sm:$0xff] }
 0x4fa   : > { %v1518_v59 = vsel %vm1155_vm2, %v1513_v57, 0 }
 0x4fb   : > { %1527 = vmatpush.bf16.msra.mxu0 %v1518_v59 }
 0x4fd   : > { %v1478_v61 = vpop.f32.mrf.mxu2 }
 0x4ff   : > { %v1497_v48 = vpop.f32.mrf.mxu3  ;;  %1655 = vmatpush.bf16.msrb.mxu0 %v3210_v27 }
 0x500   : > { %v1498_v49 = vadd.f32 %v1497_v48, %v3598_v22 }
 0x502   : > { %v1501_v50 = vsel %vm1119_vm1, %v1498_v49, -inf }
 0x503   : > { %1502 = vmax.xlane.f32.xlu2 %v1501_v50  ;;  %1656 = vmatpush.bf16.msrb.mxu0 %v3209_v28 }
 0x505   : > { %v1587_v16 = vpop.f32.mrf.mxu2 }
 0x506   : > { %v1588_v23 = vadd.f32 %v3292_v21, %v1587_v16 }
 0x507   : > { %v1499_v51 = vpop.f32.mrf.mxu3 }
 0x508   : > { %v1591_v25 = vmul.f32 0.35355338, %v1588_v23 }
 0x50a   : > { %v1662_v26 = vpack.c.bf16 %v1591_v25, %v1591_v25 }
 0x50d   : > { %v1589_v18 = vpop.f32.mrf.mxu2 }
 0x50e   : > { %v3218_v18 = vld [vmem:[%s3480_s20 + $0x18] sm:$0xff] }
 0x50f   : > { %v1623_v12 = vpop.f32.mrf.mxu3 }
 0x510   : > { %v1624_v13 = vadd.f32 %v3291_v10, %v1623_v12  ;;  %v3214_v12 = vld [vmem:[%s3490_s4 + $0x8] sm:$0xff] }
 0x512   : > { %v1663_v14 = vpack.c.bf16 %v1624_v13, %v1624_v13  ;;  %v3213_v13 = vld [vmem:[%s3490_s4] sm:$0xff] }
 0x514   : > { %v1668_v15 = vsel %vm1119_vm1, %v1663_v14, 0  ;;  %v2996_v14 = vld [vmem:[%s991_s2] sm:$0xf] }
 0x515   : > { %1677 = vmatpush.bf16.xpose.msrb.mxu1 %v1668_v15  ;;  %v3186_v15 = vld [vmem:[%s991_s2] sm:$0x10]  ;;  %s3875_s2 = sld [smem:[#allocation10_spill]] }
 0x516   : > { %v3700_v16 = vor.u32 %v3186_v15, %v2996_v14 }
 0x517   : > { %v1625_v17 = vpop.f32.mrf.mxu3 }
 0x518   : > { %v3212_v17 = vld [vmem:[%s3480_s20 + $0x8] sm:$0xff] }
 0x576   : > { %v1503_v56 = vpop.xlane.xlu2 %1502 }
 0x577   : > { %v1504_v58 = vsub.f32 %v1498_v49, %v1503_v56 }
 0x579   : > { %v1505_v60 = vmul.f32 1.442695, %v1504_v58  ;;  %v1743_v58 = vunpack.c.l.bf16 %v3580_v4 }
 0x57b   : > { %3325 = vpow2.f32 %v1505_v60 }
 0x581   : > { %v3326_v62 = vpop.eup %3325 }
 0x582   : > { %v1507_v63 = vsel %vm1119_vm1, %v3326_v62, 0.0 }
 0x583   : > { %1508 = vadd.xlane.f32.xlu2 %v1507_v63  ;;  %v3396_v63 = vmov 32.0  }
 0x5f6   : > { %v1509_v6 = vpop.xlane.xlu2 %1508 }
 0x5f7   : > { %3327 = vrcp.f32 %v1509_v6 }
 0x5fd   : > { %v3328_v7 = vpop.eup %3327 }
 0x5fe   : > { %v1511_v8 = vmul.f32 %v3328_v7, %v3326_v62 }
 0x600   : > { %v1512_v9 = vpack.c.bf16 %v1511_v8, %v1511_v8 }
 0x602   : > { %2936 = vmatmul.msk.bf16.vlgmr.msra.gmra.mxu0 %vm1119_vm1, %v1512_v9 }
 0x603   : > { %1814 = vmatpush.bf16.msra.mxu0 %v3212_v17 }
 0x612   : > { %2980 = vmatmul.msk.bf16.vlgmr.msrb.gmra.mxu0 %vm1033_vm0, %v3580_v4 }
 0x67f   : > { %v1529_v19 = vpop.f32.mrf.mxu0 }
 0x680   : > { %v1533_v20 = vpack.c.bf16 %v1529_v19, %v1529_v19  ;;  %v3211_v19 = vld [vmem:[%s3480_s20] sm:$0xff] }
 0x681   : > { %1815 = vmatpush.bf16.msra.mxu0 %v3211_v19 }
 0x682   : > { %2938 = vmatmul.msk.bf16.vlgmr.msra.gmra.mxu1 %vm1119_vm1, %v1533_v20  ;;  %v3217_v20 = vld [vmem:[%s3480_s20 + $0x10] sm:$0xff] }
 0x683   : > { %1856 = vmatpush.bf16.msra.mxu1 %v3214_v12 }
 0x687   : > { %v1531_v24 = vpop.f32.mrf.mxu0  ;;  %1857 = vmatpush.bf16.msra.mxu1 %v3213_v13 }
 0x68f   : > { %v1658_v38 = vpop.f32.mrf.mxu0 }
 0x690   : > { %v1659_v39 = vadd.f32 %v3293_v37, %v1658_v38 }
 0x692   : > { %2981 = vmatmul.msk.bf16.vlgmr.msrb.gmra.mxu1 %vm1119_vm1, %v1662_v26  ;;  %v1695_v40 = vpack.c.bf16 %v1659_v39, %v1659_v39  ;;  %v3297_v39 = vld [vmem:[%s3870_s15] ss:$0 sm:$0xff] }
 0x693   : > { %1986 = vmatpush.bf16.msrb.mxu1 %v3218_v18 }
 0x694   : > { %v1700_v11 = vsel %vm1155_vm2, %v1695_v40, 0 }
 0x695   : > { %1709 = vmatpush.bf16.msrb.mxu2 %v1700_v11 }
 0x697   : > { %v1660_v41 = vpop.f32.mrf.mxu0  ;;  %1987 = vmatpush.bf16.msrb.mxu1 %v3217_v20 }
 0x6a2   : > { %3006 = vmatmul.msk.bf16.vlgmr.msra.gmra.mxu1 %vm1033_vm0, %v3700_v16 }
 0x6ff   : > { %v1551_v30 = vpop.f32.mrf.mxu1 }
 0x700   : > { %v1555_v31 = vadd.f32 %v1551_v30, %v1371_v29 }
 0x707   : > { %v1553_v32 = vpop.f32.mrf.mxu1 }
 0x70f   : > { %v1679_v33 = vpop.f32.mrf.mxu1 }
 0x710   : > { %v1680_v34 = vadd.f32 %v1679_v33, %v3598_v22  ;;  %v3296_v33 = vld [vmem:[%s3868_s10] ss:$0 sm:$0xff]  ;;  %s3877_s10 = sld [smem:[#allocation15_spill]] }
 0x712   : > { %v1683_v35 = vsel %vm1119_vm1, %v1680_v34, -inf }
 0x713   : > { %1684 = vmax.xlane.f32.xlu0 %v1683_v35 }
 0x717   : > { %v1681_v36 = vpop.f32.mrf.mxu1 }
 0x71f   : > { %v1859_v38 = vpop.f32.mrf.mxu1 }
 0x720   : > { %v1860_v40 = vadd.f32 %v3297_v39, %v1859_v38 }
 0x727   : > { %v1861_v11 = vpop.f32.mrf.mxu1 }
 0x728   : > { %v1862_v41 = vadd.f32 %v3297_v39, %v1861_v11 }
 0x786   : > { %v1685_v42 = vpop.xlane.xlu0 %1684 }
 0x787   : > { %v1686_v43 = vsub.f32 %v1680_v34, %v1685_v42  ;;  %v1899_v42 = vpack.c.bf16 %v1862_v41, %v1860_v40 }
 0x789   : > { %v1687_v44 = vmul.f32 1.442695, %v1686_v43  ;;  %v1907_v43 = vsel %vm1119_vm1, %v1899_v42, 0 }
 0x78a   : > { %1916 = vmatpush.bf16.xpose.msra.mxu3 %v1907_v43 }
 0x78b   : > { %3329 = vpow2.f32 %v1687_v44  ;;  %v3298_v44 = vld [vmem:[%s3871_s16] ss:$0 sm:$0xff] }
 0x791   : > { %v3330_v45 = vpop.eup %3329 }
 0x792   : > { %v1689_v22 = vsel %vm1119_vm1, %v3330_v45, 0.0 }
 0x793   : > { %1690 = vadd.xlane.f32.xlu1 %v1689_v22 }
 0x806   : > { %v1691_v48 = vpop.xlane.xlu1 %1690 }
 0x807   : > { %3331 = vrcp.f32 %v1691_v48 }
 0x808   : > { %3333 = vrcp.f32 %v3396_v63 }
 0x80d   : > { %v3332_v49 = vpop.eup %3331 }
 0x80e   : > { %v1693_v50 = vmul.f32 %v3332_v49, %v3330_v45  ;;  %v3334_v0 = vpop.eup %3333 }
 0x80f   : > { %v1751_v1 = vmul.f32 32.0, %v3334_v0  ;;  %vm1755_vm3 = vweird.f32 %v3334_v0 }
 0x810   : > { %v1694_v51 = vpack.c.bf16 %v1693_v50, %v1693_v50 }
 0x811   : > { %v1752_v2 = vsub.f32 1.0, %v1751_v1 }
 0x812   : > { %2982 = vmatmul.msk.bf16.vlgmr.msrb.gmra.mxu2 %vm1119_vm1, %v1694_v51  ;;  %v3216_v51 = vld [vmem:[%s3872_s26 + $0x8] sm:$0xff] }
 0x813   : > { %v1753_v3 = vmul.f32 %v3334_v0, %v1752_v2  ;;  %1890 = vmatpush.bf16.msra.mxu2 %v3216_v51 }
 0x815   : > { %v1754_v5 = vadd.f32 %v3334_v0, %v1753_v3 }
 0x817   : > { %v3692_v6 = vsel %vm1755_vm3, %v3334_v0, %v1754_v5 }
 0x895   : > { %v1711_v52 = vpop.f32.mrf.mxu2 }
 0x896   : > { %v1715_v53 = vpack.c.bf16 %v1711_v52, %v1711_v52  ;;  %v3215_v52 = vld [vmem:[%s3872_s26] sm:$0xff] }
 0x897   : > { %1891 = vmatpush.bf16.msra.mxu2 %v3215_v52 }
 0x898   : > { %2984 = vmatmul.msk.bf16.vlgmr.msrb.gmra.mxu3 %vm1119_vm1, %v1715_v53  ;;  %v3220_v53 = vld [vmem:[%s3490_s4 + $0x18] sm:$0xff] }
 0x89a   : > { %3015 = vmatmul.msk.bf16.vlgmr.msra.gmra.mxu2 %vm1033_vm0, %v3700_v16 }
 0x89b   : > { %2022 = vmatpush.bf16.msrb.mxu2 %v3220_v53 }
 0x89d   : > { %v1713_v54 = vpop.f32.mrf.mxu2 }
 0x89e   : > { %v3219_v54 = vld [vmem:[%s3490_s4 + $0x10] sm:$0xff] }
 0x89f   : > { %2023 = vmatpush.bf16.msrb.mxu2 %v3219_v54 }
 0x8aa   : > { %3045 = vmatmul.msk.bf16.vlgmr.msrb.gmra.mxu2 %vm1033_vm0, %v3700_v16 }
 0x91b   : > { %v1733_v56 = vpop.f32.mrf.mxu3 }
 0x91c   : > { %v1737_v57 = vadd.f32 %v1733_v56, %v1555_v31  ;;  %v3295_v31 = vld [vmem:[%s3867_s7] ss:$0 sm:$0xff]  ;;  %s3876_s7 = sld [smem:[#allocation13_spill]] }
 0x91e   : > { %v1742_v59 = vadd.f32 %v3294_v55, %v1737_v57  ;;  %v3733_v55 = vld [vmem:[%s997_s18] ss:$0 sm:$0xff]  ;;  %s3879_s18 = sld [smem:[#allocation12_spill]] }
 0x920   : > { %v1744_v60 = vadd.f32 %v1743_v58, %v1742_v59 }
 0x922   : > { %v1747_v61 = vsel %vm1033_vm0, %v1744_v60, 0.0 }
 0x923   : > { %1748 = vadd.xlane.f32.xlu2 %v1747_v61  ;;  %v1735_v62 = vpop.f32.mrf.mxu3 }
 0x924   : > { %v3301_v62 = vld [vmem:[%s3873_s28] ss:$0 sm:$0xff] }
 0x996   : > { %v1749_v4 = vpop.xlane.xlu2 %1748 }
 0x997   : > { %v1757_v7 = vmul.f32 %v3692_v6, %v1749_v4 }
 0x999   : > { %v1758_v8 = vsub.f32 %v1744_v60, %v1757_v7  ;;  %v1893_v60 = vpop.f32.mrf.mxu2 }
 0x99a   : > { %v1894_v1 = vadd.f32 %v3301_v62, %v1893_v60 }
 0x99b   : > { %v1759_v9 = vmul.f32 %v1758_v8, %v1758_v8 }
 0x99d   : > { %v1760_v10 = vsel %vm1033_vm0, %v1759_v9, 0.0 }
 0x99e   : > { %1761 = vadd.xlane.f32.xlu0 %v1760_v10  ;;  %v3302_v10 = vld [vmem:[%s3870_s15 + $0x1] ss:$0 sm:$0xff] }
 0x9a1   : > { %v1895_v2 = vpop.f32.mrf.mxu2 }
 0x9a2   : > { %v1896_v3 = vadd.f32 %v3301_v62, %v1895_v2  ;;  %v3227_v2 = vld [vmem:[%s3872_s26 + $0x20] sm:$0xff] }
 0x9a4   : > { %v1935_v5 = vpack.c.bf16 %v1896_v3, %v1894_v1  ;;  %v3228_v1 = vld [vmem:[%s3872_s26 + $0x28] sm:$0xff] }
 0x9a6   : > { %v1941_v4 = vsel %vm1939_vm8, %v1935_v5, 0  ;;  %v3230_v5 = vld [vmem:[%s3480_s20 + $0x38] sm:$0xff] }
 0x9a7   : > { %1950 = vmatpush.bf16.msrb.mxu0 %v1941_v4 }
 0x9a9   : > { %v2025_v9 = vpop.f32.mrf.mxu2 }
 0x9aa   : > { %v2026_v12 = vadd.f32 %v3302_v10, %v2025_v9 }
 0x9b1   : > { %v2027_v13 = vpop.f32.mrf.mxu2 }
 0x9b2   : > { %v2028_v14 = vadd.f32 %v3302_v10, %v2027_v13  ;;  %v3305_v10 = vld [vmem:[%s3870_s15 + $0x2] ss:$0 sm:$0xff] }
 0x9b4   : > { %v2067_v15 = vpack.c.bf16 %v2028_v14, %v2026_v12  ;;  %v3303_v12 = vld [vmem:[%s3871_s16 + $0x2] ss:$0 sm:$0xff] }
 0x9b6   : > { %v2072_v17 = vsel %vm1119_vm1, %v2067_v15, 0 }
 0xa11   : > { %v1762_v21 = vpop.xlane.xlu0 %1761 }
 0xa12   : > { %v1763_v23 = vmul.f32 %v1762_v21, %v3692_v6  ;;  %v3224_v21 = vld [vmem:[%s3480_s20 + $0x28] sm:$0xff] }
 0xa14   : > { %v1764_v24 = vadd.f32 1e-05, %v1763_v23 }
 0xa16   : > { %3335 = vrsqrt.f32 %v1764_v24  ;;  %vm1771_vm5 = vweird.f32 %v1764_v24 }
 0xa1c   : > { %v3336_v25 = vpop.eup %3335 }
 0xa1d   : > { %v1766_v26 = vmul.f32 %v3336_v25, %v1764_v24  ;;  %vm1772_vm4 = vweird.f32 %v3336_v25  ;;  %v3222_v24 = vld [vmem:[%s3872_s26 + $0x18] sm:$0xff] }
 0xa1e   : > { %vm1773_vm6 = vmor %vm1771_vm5, %vm1772_vm4  ;;  %2058 = vmatpush.bf16.msrb.mxu3 %v3222_v24 }
 0xa1f   : > { %v1767_v27 = vmul.f32 %v3336_v25, %v1766_v26  ;;  %v3299_v26 = vld [vmem:[%s3871_s16 + $0x1] ss:$0 sm:$0xff] }
 0xa21   : > { %v1768_v28 = vmul.f32 0.5, %v1767_v27  ;;  %v3221_v27 = vld [vmem:[%s3872_s26 + $0x10] sm:$0xff] }
 0xa22   : > { %2059 = vmatpush.bf16.msrb.mxu3 %v3221_v27 }
 0xa23   : > { %v1769_v29 = vsub.f32 1.5, %v1768_v28 }
 0xa25   : > { %v1770_v30 = vmul.f32 %v3336_v25, %v1769_v29 }
 0xa27   : > { %v1774_v32 = vsel %vm1773_vm6, %v3336_v25, %v1770_v30  ;;  %v3223_v25 = vld [vmem:[%s3480_s20 + $0x20] sm:$0xff] }
 0xa28   : > { %v1775_v34 = vmul.f32 %v1774_v32, %v1758_v8 }
 0xa2a   : > { %v1779_v35 = vmul.f32 %v3295_v31, %v1775_v34  ;;  %v1957_v31 = vld [vmem:[%s3874_s1] sm:$0xf] }
 0xa2b   : > { %v2145_v32 = vsel %vm1155_vm2, %v1957_v31, 0 }
 0xa2c   : > { %v3711_v36 = vadd.f32 %v3296_v33, %v1779_v35 }
 0xa2e   : > { %v3715_v37 = vpack.c.bf16 %v3711_v36, %v3711_v36 }
 0xa30   : > { %2993 = vmatmul.msk.bf16.vlgmr.msra.gmra.mxu0 %vm1033_vm0, %v3715_v37  ;;  %3031 = vmatmul.msk.bf16.vlgmr.msrb.gmra.mxu1 %vm1033_vm0, %v3715_v37 }
 0xa31   : > { %2081 = vmatpush.bf16.xpose.msra.mxu0 %v2072_v17 }
 0xaad   : > { %v1817_v45 = vpop.f32.mrf.mxu0  ;;  %v1989_v22 = vpop.f32.mrf.mxu1 }
 0xaae   : > { %v1818_v46 = vadd.f32 %v3298_v44, %v1817_v45  ;;  %v1990_v28 = vadd.f32 %v3299_v26, %v1989_v22  ;;  %v3304_v44 = vld [vmem:[%s3873_s28 + $0x1] ss:$0 sm:$0xff]  ;;  %v3306_v26 = vld [vmem:[%s3873_s28 + $0x2] ss:$0 sm:$0xff] }
 0xab0   : > { %v1821_v47 = vmul.f32 0.35355338, %v1818_v46  ;;  %v1993_v29 = vmul.f32 0.35355338, %v1990_v28 }
 0xab2   : > { %v1898_v48 = vpack.c.bf16 %v1821_v47, %v1821_v47  ;;  %v2066_v30 = vpack.c.bf16 %v1993_v29, %v1993_v29 }
 0xab4   : > { %3016 = vmatmul.msk.bf16.vlgmr.msra.gmra.mxu3 %vm1119_vm1, %v1898_v48 }
 0xab5   : > { %v1819_v49 = vpop.f32.mrf.mxu0  ;;  %v1991_v50 = vpop.f32.mrf.mxu1  ;;  %2154 = vmatpush.bf16.msra.mxu3 %v2145_v32 }
 0xac4   : > { %3059 = vmatmul.msk.bf16.vlgmr.msrb.gmra.mxu3 %vm1033_vm0, %v3700_v16 }
 0xb37   : > { %v1918_v56 = vpop.f32.mrf.mxu3 }
 0xb38   : > { %v1919_v57 = vadd.f32 %v3733_v55, %v1918_v56 }
 0xb3a   : > { %v1923_v58 = vsel %vm1922_vm7, %v1919_v57, -inf }
 0xb3b   : > { %1924 = vmax.xlane.f32.xlu1 %v1923_v58  ;;  %v3225_v58 = vld [vmem:[%s3490_s4 + $0x20] sm:$0xff] }
 0xb3f   : > { %v1920_v59 = vpop.f32.mrf.mxu3 }
 0xb47   : > { %v2061_v43 = vpop.f32.mrf.mxu3 }
 0xb48   : > { %v2062_v22 = vadd.f32 %v3304_v44, %v2061_v43 }
 0xb4f   : > { %v2063_v45 = vpop.f32.mrf.mxu3 }
 0xb50   : > { %v2064_v46 = vadd.f32 %v3304_v44, %v2063_v45  ;;  %v3109_v45 = vld [vmem:[%s3874_s1 + $0x8] sm:$0xf] }
 0xb52   : > { %v2099_v47 = vpack.c.bf16 %v2064_v46, %v2062_v22  ;;  %v2328_v22 = vsel %vm1155_vm2, %v3109_v45, 0 }
 0xb54   : > { %v2104_v48 = vsel %vm1939_vm8, %v2099_v47, 0 }
 0xb55   : > { %2113 = vmatpush.bf16.msra.mxu1 %v2104_v48 }
 0xbae   : > { %v1925_v61 = vpop.xlane.xlu1 %1924 }
 0xbaf   : > { %v1926_v63 = vsub.f32 %v1919_v57, %v1925_v61  ;;  %v3226_v57 = vld [vmem:[%s3490_s4 + $0x28] sm:$0xff] }
 0xbb0   : > { %2224 = vmatpush.bf16.msrb.mxu1 %v3226_v57 }
 0xbb1   : > { %v1927_v0 = vmul.f32 1.442695, %v1926_v63  ;;  %v3062_v63 = vld [vmem:[%s3874_s1 + $0x4] sm:$0xf] }
 0xbb3   : > { %3337 = vpow2.f32 %v1927_v0  ;;  %v2126_v0 = vsel %vm1155_vm2, %v3062_v63, 0 }
 0xbb4   : > { %2225 = vmatpush.bf16.msrb.mxu1 %v3225_v58  ;;  %2135 = vmatpush.bf16.msra.mxu2 %v2126_v0 }
 0xbb8   : > { %2260 = vmatpush.bf16.msrb.mxu2 %v3228_v1 }
 0xbb9   : > { %v3338_v7 = vpop.eup %3337 }
 0xbba   : > { %v1929_v8 = vsel %vm1922_vm7, %v3338_v7, 0.0 }
 0xbbb   : > { %1930 = vadd.xlane.f32.xlu2 %v1929_v8 }
 0xbbc   : > { %2261 = vmatpush.bf16.msrb.mxu2 %v3227_v2  ;;  %v3234_v2 = vld [vmem:[%s3872_s26 + $0x38] sm:$0xff] }
 0xc2e   : > { %v1931_v18 = vpop.xlane.xlu2 %1930 }
 0xc2f   : > { %3339 = vrcp.f32 %v1931_v18 }
 0xc35   : > { %v3340_v19 = vpop.eup %3339 }
 0xc36   : > { %v1933_v20 = vmul.f32 %v3340_v19, %v3338_v7  ;;  %v3229_v7 = vld [vmem:[%s3480_s20 + $0x30] sm:$0xff] }
 0xc38   : > { %v1934_v23 = vpack.c.bf16 %v1933_v20, %v1933_v20 }
 0xc3a   : > { %3017 = vmatmul.msk.bf16.vlgmr.msrb.gmra.mxu0 %vm1922_vm7, %v1934_v23 }
 0xc3b   : > { %2188 = vmatpush.bf16.msrb.mxu0 %v3224_v21 }
 0xc3f   : > { %2189 = vmatpush.bf16.msrb.mxu0 %v3223_v25 }
 0xc4a   : > { %3060 = vmatmul.msk.bf16.vlgmr.msra.gmra.mxu0 %vm1119_vm1, %v2066_v30 }
 0xc5a   : > { %3078 = vmatmul.msk.bf16.vlgmr.msrb.gmra.mxu0 %vm1033_vm0, %v3715_v37 }
 0xcb7   : > { %v1952_v33 = vpop.f32.mrf.mxu0 }
 0xcb8   : > { %v1956_v34 = vpack.c.bf16 %v1952_v33, %v1952_v33 }
 0xcba   : > { %3064 = vmatmul.msk.bf16.vlgmr.msra.gmra.mxu3 %vm1119_vm1, %v1956_v34 }
 0xcbf   : > { %v1954_v35 = vpop.f32.mrf.mxu0 }
 0xcc7   : > { %v2083_v38 = vpop.f32.mrf.mxu0 }
 0xcc8   : > { %v2084_v39 = vadd.f32 %v3733_v55, %v2083_v38  ;;  %v3232_v38 = vld [vmem:[%s3490_s4 + $0x38] sm:$0xff] }
 0xcca   : > { %v2087_v40 = vsel %vm1922_vm7, %v2084_v39, -inf }
 0xccb   : > { %2088 = vmax.xlane.f32.xlu0 %v2087_v40  ;;  %v3231_v40 = vld [vmem:[%s3490_s4 + $0x30] sm:$0xff] }
 0xccf   : > { %v2085_v11 = vpop.f32.mrf.mxu0 }
 0xcd7   : > { %v2191_v41 = vpop.f32.mrf.mxu0 }
 0xcd8   : > { %v2192_v17 = vadd.f32 %v3303_v12, %v2191_v41 }
 0xcda   : > { %v2195_v20 = vmul.f32 0.35355338, %v2192_v17 }
 0xcdc   : > { %v2268_v21 = vpack.c.bf16 %v2195_v20, %v2195_v20 }
 0xcdf   : > { %v2193_v42 = vpop.f32.mrf.mxu0 }
 0xd3d   : > { %v3762_v49 = vpop.f32.mrf.mxu3 }
 0xd3e   : > { %v2089_v50 = vpop.xlane.xlu0 %2088 }
 0xd3f   : > { %v2090_v51 = vsub.f32 %v2084_v39, %v2089_v50 }
 0xd41   : > { %v2091_v52 = vmul.f32 1.442695, %v2090_v51 }
 0xd43   : > { %3341 = vpow2.f32 %v2091_v52  ;;  %v3308_v52 = vld [vmem:[%s3870_s15 + $0x3] ss:$0 sm:$0xff] }
 0xd45   : > { %v2158_v53 = vpop.f32.mrf.mxu3 }
 0xd49   : > { %v3342_v54 = vpop.eup %3341 }
 0xd4a   : > { %v2093_v56 = vsel %vm1922_vm7, %v3342_v54, 0.0 }
 0xd4b   : > { %2094 = vadd.xlane.f32.xlu1 %v2093_v56 }
 0xdbe   : > { %v2095_v59 = vpop.xlane.xlu1 %2094 }
 0xdbf   : > { %3343 = vrcp.f32 %v2095_v59 }
 0xdc5   : > { %v3344_v60 = vpop.eup %3343 }
 0xdc6   : > { %v2097_v61 = vmul.f32 %v3344_v60, %v3342_v54 }
 0xdc8   : > { %v2098_v62 = vpack.c.bf16 %v2097_v61, %v2097_v61  ;;  %v3307_v61 = vld [vmem:[%s3871_s16 + $0x3] ss:$0 sm:$0xff] }
 0xdca   : > { %3061 = vmatmul.msk.bf16.vlgmr.msra.gmra.mxu1 %vm1922_vm7, %v2098_v62 }
 0xdcb   : > { %2337 = vmatpush.bf16.msra.mxu1 %v2328_v22  ;;  %v3236_v22 = vld [vmem:[%s3876_s7 + $0x8] sm:$0xff] }
 0xdda   : > { %3092 = vmatmul.msk.bf16.vlgmr.msrb.gmra.mxu1 %vm1033_vm0, %v3700_v16 }
 0xe47   : > { %v2115_v3 = vpop.f32.mrf.mxu1 }
 0xe48   : > { %v2119_v4 = vpack.c.bf16 %v2115_v3, %v2115_v3  ;;  %v3233_v3 = vld [vmem:[%s3872_s26 + $0x30] sm:$0xff] }
 0xe4a   : > { %3063 = vmatmul.msk.bf16.vlgmr.msra.gmra.mxu2 %vm1119_vm1, %v2119_v4 }
 0xe4b   : > { %2372 = vmatpush.bf16.msra.mxu2 %v3230_v5 }
 0xe4f   : > { %v2117_v8 = vpop.f32.mrf.mxu1  ;;  %2373 = vmatpush.bf16.msra.mxu2 %v3229_v7 }
 0xe57   : > { %v2227_v9 = vpop.f32.mrf.mxu1 }
 0xe58   : > { %v2228_v14 = vadd.f32 %v3305_v10, %v2227_v9 }
 0xe5a   : > { %3106 = vmatmul.msk.bf16.vlgmr.msrb.gmra.mxu2 %vm1033_vm0, %v3700_v16 }
 0xe5f   : > { %v2229_v13 = vpop.f32.mrf.mxu1 }
 0xe60   : > { %v2230_v15 = vadd.f32 %v3305_v10, %v2229_v13 }
 0xe62   : > { %v2269_v18 = vpack.c.bf16 %v2230_v15, %v2228_v14  ;;  %v3309_v15 = vld [vmem:[%s3873_s28 + $0x3] ss:$0 sm:$0xff] }
 0xe64   : > { %v2274_v19 = vsel %vm1119_vm1, %v2269_v18, 0 }
 0xe65   : > { %2283 = vmatpush.bf16.xpose.msrb.mxu3 %v2274_v19 }
 0xe6a   : > { %3124 = vmatmul.msk.bf16.vlgmr.msra.gmra.mxu2 %vm1033_vm0, %v3715_v37 }
 0xe6c   : > { %3107 = vmatmul.msk.bf16.vlgmr.msrb.gmra.mxu3 %vm1119_vm1, %v2268_v21 }
 0xe6d   : > { %2408 = vmatpush.bf16.msra.mxu3 %v3232_v38 }
 0xe71   : > { %2409 = vmatpush.bf16.msra.mxu3 %v3231_v40 }
 0xe7c   : > { %3138 = vmatmul.msk.bf16.vlgmr.msra.gmra.mxu3 %vm1033_vm0, %v3700_v16 }
 0xecd   : > { %v2137_v23 = vpop.f32.mrf.mxu2 }
 0xece   : > { %v2157_v5 = vadd.f32 %v3762_v49, %v2137_v23 }
 0xed5   : > { %v2139_v24 = vpop.f32.mrf.mxu2 }
 0xedd   : > { %v2263_v25 = vpop.f32.mrf.mxu2 }
 0xede   : > { %v2264_v27 = vadd.f32 %v3306_v26, %v2263_v25  ;;  %v3155_v25 = vld [vmem:[%s3874_s1 + $0xc] sm:$0xf] }
 0xee5   : > { %v2265_v28 = vpop.f32.mrf.mxu2 }
 0xee6   : > { %v2266_v29 = vadd.f32 %v3306_v26, %v2265_v28  ;;  %v2512_v26 = vsel %vm1155_vm2, %v3155_v25, 0 }
 0xee7   : > { %2521 = vmatpush.bf16.msrb.mxu3 %v2512_v26 }
 0xee8   : > { %v2301_v30 = vpack.c.bf16 %v2266_v29, %v2264_v27 }
 0xeea   : > { %v2306_v39 = vsel %vm1939_vm8, %v2301_v30, 0 }
 0xeeb   : > { %2315 = vmatpush.bf16.msra.mxu0 %v2306_v39 }
 0xeed   : > { %v2375_v31 = vpop.f32.mrf.mxu2 }
 0xeee   : > { %v2376_v63 = vadd.f32 %v3307_v61, %v2375_v31  ;;  %v3312_v61 = vld [vmem:[%s3879_s18] ss:$0 sm:$0xff] }
 0xeef   : > { %v2285_v32 = vpop.f32.mrf.mxu3  ;;  %2444 = vmatpush.bf16.msrb.mxu0 %v3234_v2  ;;  %v3238_v2 = vld [vmem:[%s3877_s10 + $0x8] sm:$0xff] }
 0xef0   : > { %v2286_v33 = vadd.f32 %v3733_v55, %v2285_v32  ;;  %v2379_v0 = vmul.f32 0.35355338, %v2376_v63 }
 0xef2   : > { %v2289_v34 = vsel %vm1922_vm7, %v2286_v33, -inf  ;;  %v2452_v1 = vpack.c.bf16 %v2379_v0, %v2379_v0 }
 0xef3   : > { %2290 = vmax.xlane.f32.xlu2 %v2289_v34  ;;  %2445 = vmatpush.bf16.msrb.mxu0 %v3233_v3  ;;  %v3310_v34 = vld [vmem:[%s3875_s2] ss:$0 sm:$0xff]  ;;  %s3880_s2 = sld [smem:[#allocation14_spill]] }
 0xef4   : > { %v3237_v3 = vld [vmem:[%s3877_s10] sm:$0xff] }
 0xef5   : > { %v2377_v37 = vpop.f32.mrf.mxu2 }
 0xef7   : > { %v2287_v35 = vpop.f32.mrf.mxu3 }
 0xeff   : > { %v2411_v51 = vpop.f32.mrf.mxu3 }
 0xf00   : > { %v2412_v54 = vadd.f32 %v3308_v52, %v2411_v51 }
 0xf07   : > { %v2413_v53 = vpop.f32.mrf.mxu3 }
 0xf08   : > { %v2414_v56 = vadd.f32 %v3308_v52, %v2413_v53 }
 0xf0a   : > { %v2453_v57 = vpack.c.bf16 %v2414_v56, %v2412_v54 }
 0xf0c   : > { %v2458_v58 = vsel %vm1119_vm1, %v2453_v57, 0 }
 0xf0d   : > { %2467 = vmatpush.bf16.xpose.msrb.mxu1 %v2458_v58 }
 0xf66   : > { %v2291_v11 = vpop.xlane.xlu2 %2290 }
 0xf67   : > { %v2292_v41 = vsub.f32 %v2286_v33, %v2291_v11 }
 0xf69   : > { %v2293_v42 = vmul.f32 1.442695, %v2292_v41 }
 0xf6b   : > { %3345 = vpow2.f32 %v2293_v42 }
 0xf71   : > { %v3346_v43 = vpop.eup %3345 }
 0xf72   : > { %v2295_v44 = vsel %vm1922_vm7, %v3346_v43, 0.0 }
 0xf73   : > { %2296 = vadd.xlane.f32.xlu0 %v2295_v44 }
 0xfe6   : > { %v2297_v46 = vpop.xlane.xlu0 %2296 }
 0xfe7   : > { %3347 = vrcp.f32 %v2297_v46  ;;  %v3235_v46 = vld [vmem:[%s3876_s7] sm:$0xff] }
 0xfed   : > { %v3348_v47 = vpop.eup %3347 }
 0xfee   : > { %v2299_v48 = vmul.f32 %v3348_v47, %v3346_v43  ;;  %v3240_v47 = vld [vmem:[%s3877_s10 + $0x18] sm:$0xff] }
 0xff0   : > { %v2300_v50 = vpack.c.bf16 %v2299_v48, %v2299_v48 }
 0xff2   : > { %3108 = vmatmul.msk.bf16.vlgmr.msra.gmra.mxu0 %vm1922_vm7, %v2300_v50  ;;  %v3239_v50 = vld [vmem:[%s3877_s10 + $0x10] sm:$0xff] }
 0xff3   : > { %2596 = vmatpush.bf16.msra.mxu0 %v3236_v22 }
 0xff7   : > { %2597 = vmatpush.bf16.msra.mxu0 %v3235_v46 }
0x1002   : > { %3152 = vmatmul.msk.bf16.vlgmr.msrb.gmra.mxu0 %vm1033_vm0, %v3700_v16 }
0x106f   : > { %v2317_v59 = vpop.f32.mrf.mxu0 }
0x1070   : > { %v2321_v60 = vpack.c.bf16 %v2317_v59, %v2317_v59  ;;  %v3311_v59 = vld [vmem:[%s3878_s11] ss:$0 sm:$0xff]  ;;  %s1001_s11 = scalar_lea.vmem %s3560_s12, %s2813_s0 }
0x1072   : > { %3110 = vmatmul.msk.bf16.vlgmr.msra.gmra.mxu1 %vm1119_vm1, %v2321_v60 }
0x1073   : > { %2649 = vmatpush.bf16.msra.mxu1 %v3240_v47 }
0x1077   : > { %v2319_v62 = vpop.f32.mrf.mxu0  ;;  %2650 = vmatpush.bf16.msra.mxu1 %v3239_v50 }
0x107b   : > { %2651 = vmatpush.bf16.msra.mxu1 %v3238_v2 }
0x107f   : > { %v2447_v14 = vpop.f32.mrf.mxu0  ;;  %2652 = vmatpush.bf16.msra.mxu1 %v3237_v3 }
0x1080   : > { %v2448_v17 = vadd.f32 %v3309_v15, %v2447_v14 }
0x1082   : > { %3153 = vmatmul.msk.bf16.vlgmr.msrb.gmra.mxu1 %vm1119_vm1, %v2452_v1 }
0x1087   : > { %v2449_v18 = vpop.f32.mrf.mxu0 }
0x1088   : > { %v2450_v49 = vadd.f32 %v3309_v15, %v2449_v18 }
0x108a   : > { %v2485_v21 = vpack.c.bf16 %v2450_v49, %v2448_v17 }
0x108c   : > { %v2490_v16 = vsel %vm1939_vm8, %v2485_v21, 0 }
0x108d   : > { %2499 = vmatpush.bf16.msrb.mxu2 %v2490_v16 }
0x10ef   : > { %v2339_v4 = vpop.f32.mrf.mxu1 }
0x10f0   : > { %v2343_v7 = vadd.f32 %v2339_v4, %v2157_v5  ;;  %v3313_v5 = vld [vmem:[%s3880_s2] ss:$0 sm:$0xff] }
0x10f7   : > { %v2341_v8 = vpop.f32.mrf.mxu1 }
0x10ff   : > { %v2469_v9 = vpop.f32.mrf.mxu1 }
0x1100   : > { %v2470_v10 = vadd.f32 %v3733_v55, %v2469_v9 }
0x1102   : > { %v2473_v12 = vsel %vm1922_vm7, %v2470_v10, -inf }
0x1103   : > { %2474 = vmax.xlane.f32.xlu1 %v2473_v12  ;;  %v3314_v12 = vld [vmem:[%s3545_s27] ss:$0 sm:$0xff] }
0x1107   : > { %v2471_v13 = vpop.f32.mrf.mxu1 }
0x1176   : > { %v2475_v19 = vpop.xlane.xlu1 %2474 }
0x1177   : > { %v2476_v20 = vsub.f32 %v2470_v10, %v2475_v19 }
0x1179   : > { %v2477_v23 = vmul.f32 1.442695, %v2476_v20 }
0x117b   : > { %3349 = vpow2.f32 %v2477_v23 }
0x1181   : > { %v3350_v24 = vpop.eup %3349 }
0x1182   : > { %v2479_v55 = vsel %vm1922_vm7, %v3350_v24, 0.0 }
0x1183   : > { %2480 = vadd.xlane.f32.xlu2 %v2479_v55 }
0x11f6   : > { %v2481_v27 = vpop.xlane.xlu2 %2480 }
0x11f7   : > { %3351 = vrcp.f32 %v2481_v27 }
0x11fd   : > { %v3352_v28 = vpop.eup %3351 }
0x11fe   : > { %v2483_v29 = vmul.f32 %v3352_v28, %v3350_v24 }
0x1200   : > { %v2484_v30 = vpack.c.bf16 %v2483_v29, %v2483_v29 }
0x1202   : > { %3154 = vmatmul.msk.bf16.vlgmr.msrb.gmra.mxu2 %vm1922_vm7, %v2484_v30 }
0x1285   : > { %v2501_v31 = vpop.f32.mrf.mxu2 }
0x1286   : > { %v2505_v32 = vpack.c.bf16 %v2501_v31, %v2501_v31  ;;  %v3315_v31 = vld [vmem:[%s3550_s6] ss:$0 sm:$0xff] }
0x1288   : > { %3156 = vmatmul.msk.bf16.vlgmr.msrb.gmra.mxu3 %vm1119_vm1, %v2505_v32 }
0x128d   : > { %v2503_v33 = vpop.f32.mrf.mxu2 }
0x128e   : > { %v3316_v33 = vld [vmem:[%s3555_s21] ss:$0 sm:$0xff] }
0x130b   : > { %v2523_v37 = vpop.f32.mrf.mxu3 }
0x130c   : > { %v2527_v35 = vadd.f32 %v2523_v37, %v2343_v7 }
0x130e   : > { %v2532_v38 = vadd.f32 %v3310_v34, %v2527_v35 }
0x1310   : > { %v2533_v39 = vadd.f32 %v2532_v38, %v3711_v36 }
0x1312   : > { %v2536_v40 = vsel %vm1033_vm0, %v2533_v39, 0.0 }
0x1313   : > { %2537 = vadd.xlane.f32.xlu0 %v2536_v40  ;;  %v2525_v11 = vpop.f32.mrf.mxu3 }
0x1386   : > { %v2538_v41 = vpop.xlane.xlu0 %2537 }
0x1387   : > { %v2539_v42 = vmul.f32 %v2538_v41, %v3692_v6 }
0x1389   : > { %v2540_v43 = vsub.f32 %v2533_v39, %v2539_v42 }
0x138b   : > { %v2541_v44 = vmul.f32 %v2540_v43, %v2540_v43 }
0x138d   : > { %v2542_v45 = vsel %vm1033_vm0, %v2541_v44, 0.0 }
0x138e   : > { %2543 = vadd.xlane.f32.xlu1 %v2542_v45 }
0x1401   : > { %v2544_v36 = vpop.xlane.xlu1 %2543 }
0x1402   : > { %v2545_v48 = vmul.f32 %v2544_v36, %v3692_v6 }
0x1404   : > { %v2546_v51 = vadd.f32 1e-05, %v2545_v48 }
0x1406   : > { %3353 = vrsqrt.f32 %v2546_v51  ;;  %vm2553_vm10 = vweird.f32 %v2546_v51 }
0x140c   : > { %v3354_v52 = vpop.eup %3353 }
0x140d   : > { %v2548_v53 = vmul.f32 %v3354_v52, %v2546_v51  ;;  %vm2554_vm9 = vweird.f32 %v3354_v52 }
0x140e   : > { %vm2555_vm11 = vmor %vm2553_vm10, %vm2554_vm9 }
0x140f   : > { %v2549_v54 = vmul.f32 %v3354_v52, %v2548_v53 }
0x1411   : > { %v2550_v56 = vmul.f32 0.5, %v2549_v54 }
0x1413   : > { %v2551_v57 = vsub.f32 1.5, %v2550_v56 }
0x1415   : > { %v2552_v58 = vmul.f32 %v3354_v52, %v2551_v57 }
0x1417   : > { %v2556_v60 = vsel %vm2555_vm11, %v3354_v52, %v2552_v58 }
0x1418   : > { %v2557_v62 = vmul.f32 %v2556_v60, %v2540_v43 }
0x141a   : > { %v2561_v63 = vmul.f32 %v3311_v59, %v2557_v62 }
0x141c   : > { %v2565_v0 = vadd.f32 %v3312_v61, %v2561_v63 }
0x141e   : > { %v2566_v1 = vpack.c.bf16 %v2565_v0, %v2565_v0 }
0x1420   : > { %3165 = vmatmul.msk.bf16.vlgmr.msra.gmra.mxu0 %vm1033_vm0, %v2566_v1 }
0x149d   : > { %v2599_v4 = vpop.f32.mrf.mxu0 }
0x149e   : > { %v2600_v7 = vadd.f32 %v3313_v5, %v2599_v4 }
0x14a0   : > { %v2603_v8 = vmax.f32 %v2600_v7, 0.0 }
0x14a2   : > { %v2604_v9 = vpack.c.bf16 %v2603_v8, %v2603_v8 }
0x14a4   : > { %3182 = vmatmul.msk.bf16.vlgmr.msra.gmra.mxu1 %vm2641_vm12, %v2604_v9 }
0x14a5   : > { %v2601_v10 = vpop.f32.mrf.mxu0 }
0x1521   : > { %v2654_v13 = vpop.f32.mrf.mxu1 }
0x1522   : > { %v2655_v14 = vadd.f32 %v3314_v12, %v2654_v13 }
0x1524   : > { %v2658_v15 = vadd.f32 %v2655_v14, %v2565_v0 }
0x1526   : > { %v2661_v17 = vsel %vm1033_vm0, %v2658_v15, 0.0 }
0x1527   : > { %2662 = vadd.xlane.f32.xlu2 %v2661_v17 }
0x1529   : > { %v2656_v18 = vpop.f32.mrf.mxu1 }
0x159a   : > { %v2663_v19 = vpop.xlane.xlu2 %2662 }
0x159b   : > { %v2664_v49 = vmul.f32 %v2663_v19, %v3692_v6 }
0x159d   : > { %v2665_v20 = vsub.f32 %v2658_v15, %v2664_v49 }
0x159f   : > { %v2666_v21 = vmul.f32 %v2665_v20, %v2665_v20 }
0x15a1   : > { %v2667_v23 = vsel %vm1033_vm0, %v2666_v21, 0.0  ;;  %vm2692_vm0 = vcmask 257024  }
0x15a2   : > { %2668 = vadd.xlane.f32.xlu0 %v2667_v23 }
0x1615   : > { %v2669_v16 = vpop.xlane.xlu0 %2668 }
0x1616   : > { %v2670_v24 = vmul.f32 %v2669_v16, %v3692_v6 }
0x1618   : > { %v2671_v55 = vadd.f32 1e-05, %v2670_v24 }
0x161a   : > { %3355 = vrsqrt.f32 %v2671_v55  ;;  %vm2678_vm14 = vweird.f32 %v2671_v55 }
0x1620   : > { %v3356_v25 = vpop.eup %3355 }
0x1621   : > { %v2673_v26 = vmul.f32 %v3356_v25, %v2671_v55  ;;  %vm2679_vm13 = vweird.f32 %v3356_v25 }
0x1622   : > { %vm2680_vm15 = vmor %vm2678_vm14, %vm2679_vm13 }
0x1623   : > { %v2674_v27 = vmul.f32 %v3356_v25, %v2673_v26 }
0x1625   : > { %v2675_v28 = vmul.f32 0.5, %v2674_v27 }
0x1627   : > { %v2676_v29 = vsub.f32 1.5, %v2675_v28 }
0x1629   : > { %v2677_v30 = vmul.f32 %v3356_v25, %v2676_v29 }
0x162b   : > { %v2681_v32 = vsel %vm2680_vm15, %v3356_v25, %v2677_v30 }
0x162c   : > { %v2682_v34 = vmul.f32 %v2681_v32, %v2665_v20 }
0x162e   : > { %v2686_v37 = vmul.f32 %v3315_v31, %v2682_v34 }
0x1630   : > { %v2690_v35 = vadd.f32 %v3316_v33, %v2686_v37 }
0x1632   : > { %v2691_v6 = vpack.c.bf16 %v2690_v35, %v2690_v35 }
0x1634   : > { %2693 = vst.msk [vmem:[%s1001_s11] sm:$0xf] %vm2692_vm0, %v2691_v6 }
0x1635 PF: > { %s73_s22 = sadd.s32 1, %s3363_s22  }
0x1636   : > { %p70_p4 = scmp.ge.s32.totalorder %s73_s22, 4  }
0x1638   :  { %72 = sbr.rel (!%p70_p4) target bundleno = 47 (0x2f), region = 256 }

</bundles_post_ra>
